<compile_context>
chip_gen: v7x
topology: tpu7x:2x2x1
jax: 0.10.0
libtpu: 0.0.40
codegen_flags: <defaults>
</compile_context>

<pallas_src>
import functools

import jax
import jax.numpy as jnp
from jax.experimental import pallas as pl
from jax.experimental.pallas import tpu as pltpu

TN_MAX = 1024     # max token-tile rows (sweepable; 512-2048 all fit VMEM at C=32)
EPS = 1e-5        # norm epsilon (PyTorch default)
SPARSITY = 0.01   # softshrink lambda (AFNO default sparsity_threshold)


# ---------------------------------------------------------------------------
# Pallas kernels
# ---------------------------------------------------------------------------
def _ln_kernel(x_ref, g_ref, b_ref, o_ref):
    # per-token normalization over the channel dim
    # TODO(synk): geosatcast norm='group' may be nn.GroupNorm over grouped
    # channels+spatial; per-token channel norm (GroupNorm(1)/LayerNorm style)
    # is used here.
    x = x_ref[...]
    mean = jnp.mean(x, axis=-1, keepdims=True)
    var = jnp.mean((x - mean) ** 2, axis=-1, keepdims=True)
    o_ref[...] = (x - mean) * jax.lax.rsqrt(var + EPS) * g_ref[...] + b_ref[...]


def _spectral_kernel(xr_ref, xi_ref,
                     w1r_ref, w1s_ref, w1d_ref, b1r_ref, b1i_ref,
                     w2r_ref, w2s_ref, w2d_ref, b2r_ref, b2i_ref,
                     or_ref, oi_ref):
    # complex block-diagonal 2-layer MLP in Fourier space. Block structure is
    # baked into block-diagonal dense weights (exact at this dim).
    # TODO(synk): at production dims (dim>=256, num_blocks=8) the dense
    # block-diagonal form inflates MXU FLOPs num_blocks-x; switch to a
    # per-block einsum formulation there.
    #
    # Karatsuba 3-mult complex product per layer:
    #   m1=(xr+xi)·Wr, m2=xi·(Wr+Wi), m3=xr·(Wi-Wr);  re=m1-m2, im=m1+m3
    dot = functools.partial(jnp.dot, preferred_element_type=jnp.float32)
    xr = xr_ref[...]
    xi = xi_ref[...]

    m1 = dot(xr + xi, w1r_ref[...])
    m2 = dot(xi, w1s_ref[...])
    m3 = dot(xr, w1d_ref[...])
    hr = jnp.maximum(m1 - m2 + b1r_ref[...], 0.0)
    hi = jnp.maximum(m1 + m3 + b1i_ref[...], 0.0)

    n1 = dot(hr + hi, w2r_ref[...])
    n2 = dot(hi, w2s_ref[...])
    n3 = dot(hr, w2d_ref[...])
    yr = n1 - n2 + b2r_ref[...]
    yi = n1 + n3 + b2i_ref[...]

    # softshrink: y - clip(y, -lambda, lambda)
    or_ref[...] = yr - jnp.clip(yr, -SPARSITY, SPARSITY)
    oi_ref[...] = yi - jnp.clip(yi, -SPARSITY, SPARSITY)


def _make_mlp_kernel(layer_scale):
    ls = 1.0 if layer_scale is None else float(layer_scale)

    def _mlp_kernel(res_ref, filt_ref, g_ref, b_ref,
                    w1_ref, b1_ref, w2_ref, b2_ref, o_ref):
        # fused: (residual + ls*filt) -> norm2 -> fc1 -> GELU -> fc2
        #        -> layer-scaled residual
        x = res_ref[...] + ls * filt_ref[...]
        mean = jnp.mean(x, axis=-1, keepdims=True)
        var = jnp.mean((x - mean) ** 2, axis=-1, keepdims=True)
        xn = (x - mean) * jax.lax.rsqrt(var + EPS) * g_ref[...] + b_ref[...]

        dot = functools.partial(jnp.dot, preferred_element_type=jnp.float32)
        h = dot(xn, w1_ref[...]) + b1_ref[...]
        # TODO(synk): PyTorch nn.GELU default is the exact erf form; tanh
        # approximation used here for TPU-safe lowering.
        h = jax.nn.gelu(h, approximate=True)
        y = dot(h, w2_ref[...]) + b2_ref[...]
        o_ref[...] = x + ls * y

    return _mlp_kernel


# ---------------------------------------------------------------------------
# pallas_call wrappers (tile selection, optional padding, BlockSpecs, grid)
# ---------------------------------------------------------------------------
def _round_up(x, m):
    return ((x + m - 1) // m) * m


def _pick_tile(n):
    # Largest tile up to TN_MAX, multiple of 8 (sublane), while keeping the
    # grid length >= 2 so ("parallel",) can still shard across v7x's 2 TCs.
    tn = min(TN_MAX, _round_up(pl.cdiv(n, 2), 8))
    return max(tn, 8)


def _pad_rows(a, tn):
    # pad only when needed (no extra HBM pass when tn divides N)
    n = a.shape[0]
    pad = (-n) % tn
    if pad:
        a = jnp.pad(a, ((0, pad), (0, 0)))
    return a, n


_ROW = lambda i: (i, 0)    # tiled over tokens
_FULL = lambda i: (0, 0)   # whole (small) parameter tensor every step

# TODO(synk): at production dims (dim>=1024) set
# pltpu.CompilerParams(vmem_limit_bytes=...) and tile the MLP hidden dim with
# an accumulator so the whole-weight _FULL blocks fit v7x's 64 MiB VMEM.
_CPARAMS = pltpu.CompilerParams(dimension_semantics=("parallel",))


def layernorm_pallas(x2d, gamma, beta):
    tn = _pick_tile(x2d.shape[0])
    xp, n0 = _pad_rows(x2d, tn)
    n, c = xp.shape
    out = pl.pallas_call(
        _ln_kernel,
        out_shape=jax.ShapeDtypeStruct((n, c), jnp.float32),
        grid=(n // tn,),
        in_specs=[pl.BlockSpec((tn, c), _ROW),
                  pl.BlockSpec((1, c), _FULL),
                  pl.BlockSpec((1, c), _FULL)],
        out_specs=pl.BlockSpec((tn, c), _ROW),
        compiler_params=_CPARAMS,
    )(xp, gamma, beta)
    return out[:n0]


def spectral_mlp_pallas(xr2d, xi2d, p):
    tn = _pick_tile(xr2d.shape[0])
    xrp, n0 = _pad_rows(xr2d, tn)
    xip, _ = _pad_rows(xi2d, tn)
    n, c = xrp.shape

    # host-side precombined weights for the 3-mult complex trick (tiny arrays)
    w1r = p["sw1r"]
    w1s = p["sw1r"] + p["sw1i"]
    w1d = p["sw1i"] - p["sw1r"]
    w2r = p["sw2r"]
    w2s = p["sw2r"] + p["sw2i"]
    w2d = p["sw2i"] - p["sw2r"]

    ch = w1r.shape[1]
    out_r, out_i = pl.pallas_call(
        _spectral_kernel,
        out_shape=(jax.ShapeDtypeStruct((n, c), jnp.float32),
                   jax.ShapeDtypeStruct((n, c), jnp.float32)),
        grid=(n // tn,),
        in_specs=[pl.BlockSpec((tn, c), _ROW),
                  pl.BlockSpec((tn, c), _ROW),
                  pl.BlockSpec((c, ch), _FULL),
                  pl.BlockSpec((c, ch), _FULL),
                  pl.BlockSpec((c, ch), _FULL),
                  pl.BlockSpec((1, ch), _FULL),
                  pl.BlockSpec((1, ch), _FULL),
                  pl.BlockSpec((ch, c), _FULL),
                  pl.BlockSpec((ch, c), _FULL),
                  pl.BlockSpec((ch, c), _FULL),
                  pl.BlockSpec((1, c), _FULL),
                  pl.BlockSpec((1, c), _FULL)],
        out_specs=(pl.BlockSpec((tn, c), _ROW),
                   pl.BlockSpec((tn, c), _ROW)),
        compiler_params=_CPARAMS,
    )(xrp, xip, w1r, w1s, w1d, p["sb1r"], p["sb1i"],
      w2r, w2s, w2d, p["sb2r"], p["sb2i"])
    return out_r[:n0], out_i[:n0]


def mlp_pallas(res2d, filt2d, p, layer_scale):
    tn = _pick_tile(res2d.shape[0])
    rp, n0 = _pad_rows(res2d, tn)
    fp, _ = _pad_rows(filt2d, tn)
    n, c = rp.shape
    ch = p["mw1"].shape[1]
    out = pl.pallas_call(
        _make_mlp_kernel(layer_scale),
        out_shape=jax.ShapeDtypeStruct((n, c), jnp.float32),
        grid=(n // tn,),
        in_specs=[pl.BlockSpec((tn, c), _ROW),
                  pl.BlockSpec((tn, c), _ROW),
                  pl.BlockSpec((1, c), _FULL),
                  pl.BlockSpec((1, c), _FULL),
                  pl.BlockSpec((c, ch), _FULL),
                  pl.BlockSpec((1, ch), _FULL),
                  pl.BlockSpec((ch, c), _FULL),
                  pl.BlockSpec((1, c), _FULL)],
        out_specs=pl.BlockSpec((tn, c), _ROW),
        compiler_params=_CPARAMS,
    )(rp, fp, p["g2"], p["be2"], p["mw1"], p["mb1"], p["mw2"], p["mb2"])
    return out[:n0]


# ---------------------------------------------------------------------------
# AFNO block & AFNOCastLatent forward
# ---------------------------------------------------------------------------
def afno_block_2d(x, params, layer_scale, modes_range=None):
    """x: (B, H, W, C) channels-last."""
    B, H, W, C = x.shape

    # --- spectral token-mixing branch ---
    xn = layernorm_pallas(x.reshape(-1, C), params["g1"], params["be1"])
    xn = xn.reshape(B, H, W, C)

    # TODO(synk): FFT has no Pallas primitive on TPU; rfft2/irfft2 (and the
    # real/imag split) stay in plain JAX.
    xf = jnp.fft.rfft2(xn, axes=(1, 2), norm="ortho")
    Wf = W // 2 + 1
    xr = jnp.real(xf).astype(jnp.float32).reshape(-1, C)
    xi = jnp.imag(xf).astype(jnp.float32).reshape(-1, C)

    yr, yi = spectral_mlp_pallas(xr, xi, params)
    of = (yr + 1j * yi).reshape(B, H, Wf, C)

    if modes_range is not None:
        # TODO(synk): exact modes_range semantics depend on geosatcast's AFNO2D;
        # here low-frequency modes within `modes_range` are kept, rest zeroed.
        # (At production sizes, gather the kept modes BEFORE the spectral MLP.)
        m = int(modes_range)
        kh = jnp.abs(jnp.fft.fftfreq(H) * H) < m
        kw = jnp.arange(Wf) < m
        of = of * (kh[:, None] & kw[None, :])[None, :, :, None]

    filt = jnp.fft.irfft2(of, s=(H, W), axes=(1, 2), norm="ortho").astype(jnp.float32)

    # --- fused: residual combine + norm2 + channel MLP + scaled residual ---
    x = mlp_pallas(x.reshape(-1, C), filt.reshape(-1, C), params,
                   layer_scale).reshape(B, H, W, C)
    return x


def afno_cast_latent_forward(x, blocks_params, layer_scale, modes_range=None):
    """x: (B, C, 1, H, W)  ->  (B, C, 1, H, W)  (matches the PyTorch module)."""
    x = jnp.transpose(x[:, :, 0], (0, 2, 3, 1))            # squeeze(2).permute(0,2,3,1)
    for p in blocks_params:
        # (torch.utils.checkpoint is a training-memory optimization; forward
        #  semantics are identical, so blocks are applied directly.)
        x = afno_block_2d(x, p, layer_scale, modes_range)
    x = jnp.transpose(x, (0, 3, 1, 2))[:, :, None]          # permute(0,3,1,2).unsqueeze(2)
    return x


# ---------------------------------------------------------------------------
# deterministic parameter init
# ---------------------------------------------------------------------------
def init_block_params(key, dim, num_blocks, mlp_ratio):
    bs = dim // num_blocks
    ch = dim * mlp_ratio
    ks = jax.random.split(key, 10)
    scale = 0.02

    def blkdiag(w):  # (nb, bs, bs) -> (dim, dim) block-diagonal
        return jax.scipy.linalg.block_diag(
            *[w[i] for i in range(num_blocks)]).astype(jnp.float32)

    p = {
        # norm1 / norm2 affine
        "g1": jnp.ones((1, dim), jnp.float32),
        "be1": jnp.zeros((1, dim), jnp.float32),
        "g2": jnp.ones((1, dim), jnp.float32),
        "be2": jnp.zeros((1, dim), jnp.float32),
        # spectral (complex, block-diagonal) weights, hidden_size_factor=1
        "sw1r": blkdiag(scale * jax.random.normal(ks[0], (num_blocks, bs, bs))),
        "sw1i": blkdiag(scale * jax.random.normal(ks[1], (num_blocks, bs, bs))),
        "sb1r": (scale * jax.random.normal(ks[2], (1, dim))).astype(jnp.float32),
        "sb1i": (scale * jax.random.normal(ks[3], (1, dim))).astype(jnp.float32),
        "sw2r": blkdiag(scale * jax.random.normal(ks[4], (num_blocks, bs, bs))),
        "sw2i": blkdiag(scale * jax.random.normal(ks[5], (num_blocks, bs, bs))),
        "sb2r": (scale * jax.random.normal(ks[6], (1, dim))).astype(jnp.float32),
        "sb2i": (scale * jax.random.normal(ks[7], (1, dim))).astype(jnp.float32),
        # channel MLP
        "mw1": (scale * jax.random.normal(ks[8], (dim, ch))).astype(jnp.float32),
        "mb1": jnp.zeros((1, ch), jnp.float32),
        "mw2": (scale * jax.random.normal(ks[9], (ch, dim))).astype(jnp.float32),
        "mb2": jnp.zeros((1, dim), jnp.float32),
    }
    return p


# ---------------------------------------------------------------------------
if __name__ == "__main__":
    # small, forward-consistent shapes
    B, EMBED, H, W = 2, 32, 16, 16
    NUM_BLOCKS, MLP_RATIO, FORECAST_DEPTH = 8, 4, 2
    LAYER_SCALE = 0.5 / FORECAST_DEPTH          # layer_scale='auto'

    key = jax.random.PRNGKey(0)
    kx, kp = jax.random.split(key)

    x = jax.random.normal(kx, (B, EMBED, 1, H, W), dtype=jnp.float32)

    block_keys = jax.random.split(kp, FORECAST_DEPTH)
    blocks_params = [init_block_params(k, EMBED, NUM_BLOCKS, MLP_RATIO)
                     for k in block_keys]

    fwd = jax.jit(functools.partial(afno_cast_latent_forward,
                                    layer_scale=LAYER_SCALE, modes_range=None))
    out = fwd(x, blocks_params)
    out = jax.block_until_ready(out)

    assert out.shape == (B, EMBED, 1, H, W), out.shape
    assert out.dtype == jnp.float32
    assert bool(jnp.all(jnp.isfinite(out)))
    print("KERNEL_OK")
</pallas_src>

<mosaic_0001>
module attributes {stable_mosaic.version = 11 : i64} {
  func.func @_ln_kernel(%arg0: i32, %arg1: memref<256x32xf32, #tpu.memory_space<vmem>>, %arg2: memref<1x32xf32, #tpu.memory_space<vmem>>, %arg3: memref<1x32xf32, #tpu.memory_space<vmem>>, %arg4: memref<256x32xf32, #tpu.memory_space<vmem>>) attributes {dimension_semantics = [#tpu.dimension_semantics<parallel>], iteration_bounds = array<i64: 2>, scalar_prefetch = 0 : i64, scratch_operands = 0 : i64, tpu.core_type = #tpu.core_type<tc>, window_params = [{transform_indices = @transform_0, window_bounds = array<i64: 256, 32>}, {pipeline_mode = #tpu.pipeline_mode<synchronous>, transform_indices = @transform_1, window_bounds = array<i64: 1, 32>}, {pipeline_mode = #tpu.pipeline_mode<synchronous>, transform_indices = @transform_2, window_bounds = array<i64: 1, 32>}, {transform_indices = @transform_3, window_bounds = array<i64: 256, 32>}]} {
    %c0 = arith.constant 0 : index
    %c0_0 = arith.constant 0 : index
    %0 = vector.load %arg1[%c0, %c0_0] : memref<256x32xf32, #tpu.memory_space<vmem>>, vector<256x32xf32>
    %cst = arith.constant dense<0.000000e+00> : vector<256xf32>
    %1 = vector.multi_reduction <add>, %0, %cst [1] : vector<256x32xf32> to vector<256xf32>
    %2 = vector.shape_cast %1 : vector<256xf32> to vector<256x1xf32>
    %cst_1 = arith.constant 3.200000e+01 : f32
    %3 = vector.broadcast %cst_1 : f32 to vector<256x1xf32>
    %4 = arith.divf %2, %3 : vector<256x1xf32>
    %5 = vector.broadcast %4 : vector<256x1xf32> to vector<256x32xf32>
    %6 = arith.subf %0, %5 : vector<256x32xf32>
    %7 = arith.mulf %6, %6 : vector<256x32xf32>
    %cst_2 = arith.constant dense<0.000000e+00> : vector<256xf32>
    %8 = vector.multi_reduction <add>, %7, %cst_2 [1] : vector<256x32xf32> to vector<256xf32>
    %9 = vector.shape_cast %8 : vector<256xf32> to vector<256x1xf32>
    %cst_3 = arith.constant 3.200000e+01 : f32
    %10 = vector.broadcast %cst_3 : f32 to vector<256x1xf32>
    %11 = arith.divf %9, %10 : vector<256x1xf32>
    %12 = vector.broadcast %4 : vector<256x1xf32> to vector<256x32xf32>
    %13 = arith.subf %0, %12 : vector<256x32xf32>
    %cst_4 = arith.constant 9.99999974E-6 : f32
    %14 = vector.broadcast %cst_4 : f32 to vector<256x1xf32>
    %15 = arith.addf %11, %14 : vector<256x1xf32>
    %16 = math.rsqrt %15 : vector<256x1xf32>
    %17 = vector.broadcast %16 : vector<256x1xf32> to vector<256x32xf32>
    %18 = arith.mulf %13, %17 : vector<256x32xf32>
    %c0_5 = arith.constant 0 : index
    %c0_6 = arith.constant 0 : index
    %19 = vector.load %arg2[%c0_5, %c0_6] : memref<1x32xf32, #tpu.memory_space<vmem>>, vector<1x32xf32>
    %20 = vector.broadcast %19 : vector<1x32xf32> to vector<256x32xf32>
    %21 = arith.mulf %18, %20 : vector<256x32xf32>
    %c0_7 = arith.constant 0 : index
    %c0_8 = arith.constant 0 : index
    %22 = vector.load %arg3[%c0_7, %c0_8] : memref<1x32xf32, #tpu.memory_space<vmem>>, vector<1x32xf32>
    %23 = vector.broadcast %22 : vector<1x32xf32> to vector<256x32xf32>
    %24 = arith.addf %21, %23 : vector<256x32xf32>
    %c0_9 = arith.constant 0 : index
    %c0_10 = arith.constant 0 : index
    %25 = vector.load %arg4[%c0_9, %c0_10] : memref<256x32xf32, #tpu.memory_space<vmem>>, vector<256x32xf32>
    tpu.vector_store %arg4[%c0_9, %c0_10], %24 {strides = array<i32>} : memref<256x32xf32, #tpu.memory_space<vmem>>, vector<256x32xf32>,
    return
  }
  func.func @transform_0(%arg0: i32) -> (i32, i32) {
    %c0_i32 = arith.constant 0 : i32
    %c0_i32_0 = arith.constant 0 : i32
    return %arg0, %c0_i32 : i32, i32
  }
  func.func @transform_1(%arg0: i32) -> (i32, i32) {
    %c0_i32 = arith.constant 0 : i32
    %c0_i32_0 = arith.constant 0 : i32
    %c0_i32_1 = arith.constant 0 : i32
    return %c0_i32, %c0_i32_0 : i32, i32
  }
  func.func @transform_2(%arg0: i32) -> (i32, i32) {
    %c0_i32 = arith.constant 0 : i32
    %c0_i32_0 = arith.constant 0 : i32
    %c0_i32_1 = arith.constant 0 : i32
    return %c0_i32, %c0_i32_0 : i32, i32
  }
  func.func @transform_3(%arg0: i32) -> (i32, i32) {
    %c0_i32 = arith.constant 0 : i32
    %c0_i32_0 = arith.constant 0 : i32
    return %arg0, %c0_i32 : i32, i32
  }
}

module attributes {stable_mosaic.version = 11 : i64} {
  func.func @_spectral_kernel(%arg0: i32, %arg1: memref<144x32xf32, #tpu.memory_space<vmem>>, %arg2: memref<144x32xf32, #tpu.memory_space<vmem>>, %arg3: memref<32x32xf32, #tpu.memory_space<vmem>>, %arg4: memref<32x32xf32, #tpu.memory_space<vmem>>, %arg5: memref<32x32xf32, #tpu.memory_space<vmem>>, %arg6: memref<1x32xf32, #tpu.memory_space<vmem>>, %arg7: memref<1x32xf32, #tpu.memory_space<vmem>>, %arg8: memref<32x32xf32, #tpu.memory_space<vmem>>, %arg9: memref<32x32xf32, #tpu.memory_space<vmem>>, %arg10: memref<32x32xf32, #tpu.memory_space<vmem>>, %arg11: memref<1x32xf32, #tpu.memory_space<vmem>>, %arg12: memref<1x32xf32, #tpu.memory_space<vmem>>, %arg13: memref<144x32xf32, #tpu.memory_space<vmem>>, %arg14: memref<144x32xf32, #tpu.memory_space<vmem>>) attributes {dimension_semantics = [#tpu.dimension_semantics<parallel>], iteration_bounds = array<i64: 2>, scalar_prefetch = 0 : i64, scratch_operands = 0 : i64, tpu.core_type = #tpu.core_type<tc>, window_params = [{transform_indices = @transform_0, window_bounds = array<i64: 144, 32>}, {transform_indices = @transform_1, window_bounds = array<i64: 144, 32>}, {pipeline_mode = #tpu.pipeline_mode<synchronous>, transform_indices = @transform_2, window_bounds = array<i64: 32, 32>}, {pipeline_mode = #tpu.pipeline_mode<synchronous>, transform_indices = @transform_3, window_bounds = array<i64: 32, 32>}, {pipeline_mode = #tpu.pipeline_mode<synchronous>, transform_indices = @transform_4, window_bounds = array<i64: 32, 32>}, {pipeline_mode = #tpu.pipeline_mode<synchronous>, transform_indices = @transform_5, window_bounds = array<i64: 1, 32>}, {pipeline_mode = #tpu.pipeline_mode<synchronous>, transform_indices = @transform_6, window_bounds = array<i64: 1, 32>}, {pipeline_mode = #tpu.pipeline_mode<synchronous>, transform_indices = @transform_7, window_bounds = array<i64: 32, 32>}, {pipeline_mode = #tpu.pipeline_mode<synchronous>, transform_indices = @transform_8, window_bounds = array<i64: 32, 32>}, {pipeline_mode = #tpu.pipeline_mode<synchronous>, transform_indices = @transform_9, window_bounds = array<i64: 32, 32>}, {pipeline_mode = #tpu.pipeline_mode<synchronous>, transform_indices = @transform_10, window_bounds = array<i64: 1, 32>}, {pipeline_mode = #tpu.pipeline_mode<synchronous>, transform_indices = @transform_11, window_bounds = array<i64: 1, 32>}, {transform_indices = @transform_12, window_bounds = array<i64: 144, 32>}, {transform_indices = @transform_13, window_bounds = array<i64: 144, 32>}]} {
    %c0 = arith.constant 0 : index
    %c0_0 = arith.constant 0 : index
    %0 = vector.load %arg1[%c0, %c0_0] : memref<144x32xf32, #tpu.memory_space<vmem>>, vector<144x32xf32>
    %c0_1 = arith.constant 0 : index
    %c0_2 = arith.constant 0 : index
    %1 = vector.load %arg2[%c0_1, %c0_2] : memref<144x32xf32, #tpu.memory_space<vmem>>, vector<144x32xf32>
    %2 = arith.addf %0, %1 : vector<144x32xf32>
    %c0_3 = arith.constant 0 : index
    %c0_4 = arith.constant 0 : index
    %3 = vector.load %arg3[%c0_3, %c0_4] : memref<32x32xf32, #tpu.memory_space<vmem>>, vector<32x32xf32>
    %cst = arith.constant dense<0.000000e+00> : vector<144x32xf32>
    %4 = tpu.matmul %2, %3, %cst {dimension_numbers = #tpu.dot_dimension_numbers<[1], [0], [0], [1], [0, 0, 1, 1], [], []>} : vector<144x32xf32>, vector<32x32xf32>, vector<144x32xf32> -> vector<144x32xf32>
    %c0_5 = arith.constant 0 : index
    %c0_6 = arith.constant 0 : index
    %5 = vector.load %arg4[%c0_5, %c0_6] : memref<32x32xf32, #tpu.memory_space<vmem>>, vector<32x32xf32>
    %cst_7 = arith.constant dense<0.000000e+00> : vector<144x32xf32>
    %6 = tpu.matmul %1, %5, %cst_7 {dimension_numbers = #tpu.dot_dimension_numbers<[1], [0], [0], [1], [0, 0, 1, 1], [], []>} : vector<144x32xf32>, vector<32x32xf32>, vector<144x32xf32> -> vector<144x32xf32>
    %c0_8 = arith.constant 0 : index
    %c0_9 = arith.constant 0 : index
    %7 = vector.load %arg5[%c0_8, %c0_9] : memref<32x32xf32, #tpu.memory_space<vmem>>, vector<32x32xf32>
    %cst_10 = arith.constant dense<0.000000e+00> : vector<144x32xf32>
    %8 = tpu.matmul %0, %7, %cst_10 {dimension_numbers = #tpu.dot_dimension_numbers<[1], [0], [0], [1], [0, 0, 1, 1], [], []>} : vector<144x32xf32>, vector<32x32xf32>, vector<144x32xf32> -> vector<144x32xf32>
    %9 = arith.subf %4, %6 : vector<144x32xf32>
    %c0_11 = arith.constant 0 : index
    %c0_12 = arith.constant 0 : index
    %10 = vector.load %arg6[%c0_11, %c0_12] : memref<1x32xf32, #tpu.memory_space<vmem>>, vector<1x32xf32>
    %11 = vector.broadcast %10 : vector<1x32xf32> to vector<144x32xf32>
    %12 = arith.addf %9, %11 : vector<144x32xf32>
    %cst_13 = arith.constant 0.000000e+00 : f32
    %13 = vector.broadcast %cst_13 : f32 to vector<144x32xf32>
    %14 = arith.maximumf %12, %13 : vector<144x32xf32>
    %15 = arith.addf %4, %8 : vector<144x32xf32>
    %c0_14 = arith.constant 0 : index
    %c0_15 = arith.constant 0 : index
    %16 = vector.load %arg7[%c0_14, %c0_15] : memref<1x32xf32, #tpu.memory_space<vmem>>, vector<1x32xf32>
    %17 = vector.broadcast %16 : vector<1x32xf32> to vector<144x32xf32>
    %18 = arith.addf %15, %17 : vector<144x32xf32>
    %cst_16 = arith.constant 0.000000e+00 : f32
    %19 = vector.broadcast %cst_16 : f32 to vector<144x32xf32>
    %20 = arith.maximumf %18, %19 : vector<144x32xf32>
    %21 = arith.addf %14, %20 : vector<144x32xf32>
    %c0_17 = arith.constant 0 : index
    %c0_18 = arith.constant 0 : index
    %22 = vector.load %arg8[%c0_17, %c0_18] : memref<32x32xf32, #tpu.memory_space<vmem>>, vector<32x32xf32>
    %cst_19 = arith.constant dense<0.000000e+00> : vector<144x32xf32>
    %23 = tpu.matmul %21, %22, %cst_19 {dimension_numbers = #tpu.dot_dimension_numbers<[1], [0], [0], [1], [0, 0, 1, 1], [], []>} : vector<144x32xf32>, vector<32x32xf32>, vector<144x32xf32> -> vector<144x32xf32>
    %c0_20 = arith.constant 0 : index
    %c0_21 = arith.constant 0 : index
    %24 = vector.load %arg9[%c0_20, %c0_21] : memref<32x32xf32, #tpu.memory_space<vmem>>, vector<32x32xf32>
    %cst_22 = arith.constant dense<0.000000e+00> : vector<144x32xf32>
    %25 = tpu.matmul %20, %24, %cst_22 {dimension_numbers = #tpu.dot_dimension_numbers<[1], [0], [0], [1], [0, 0, 1, 1], [], []>} : vector<144x32xf32>, vector<32x32xf32>, vector<144x32xf32> -> vector<144x32xf32>
    %c0_23 = arith.constant 0 : index
    %c0_24 = arith.constant 0 : index
    %26 = vector.load %arg10[%c0_23, %c0_24] : memref<32x32xf32, #tpu.memory_space<vmem>>, vector<32x32xf32>
    %cst_25 = arith.constant dense<0.000000e+00> : vector<144x32xf32>
    %27 = tpu.matmul %14, %26, %cst_25 {dimension_numbers = #tpu.dot_dimension_numbers<[1], [0], [0], [1], [0, 0, 1, 1], [], []>} : vector<144x32xf32>, vector<32x32xf32>, vector<144x32xf32> -> vector<144x32xf32>
    %28 = arith.subf %23, %25 : vector<144x32xf32>
    %c0_26 = arith.constant 0 : index
    %c0_27 = arith.constant 0 : index
    %29 = vector.load %arg11[%c0_26, %c0_27] : memref<1x32xf32, #tpu.memory_space<vmem>>, vector<1x32xf32>
    %30 = vector.broadcast %29 : vector<1x32xf32> to vector<144x32xf32>
    %31 = arith.addf %28, %30 : vector<144x32xf32>
    %32 = arith.addf %23, %27 : vector<144x32xf32>
    %c0_28 = arith.constant 0 : index
    %c0_29 = arith.constant 0 : index
    %33 = vector.load %arg12[%c0_28, %c0_29] : memref<1x32xf32, #tpu.memory_space<vmem>>, vector<1x32xf32>
    %34 = vector.broadcast %33 : vector<1x32xf32> to vector<144x32xf32>
    %35 = arith.addf %32, %34 : vector<144x32xf32>
    %cst_30 = arith.constant -0.00999999977 : f32
    %cst_31 = arith.constant 0.00999999977 : f32
    %36 = vector.broadcast %cst_30 : f32 to vector<144x32xf32>
    %37 = arith.maximumf %36, %31 : vector<144x32xf32>
    %38 = vector.broadcast %cst_31 : f32 to vector<144x32xf32>
    %39 = arith.minimumf %38, %37 : vector<144x32xf32>
    %40 = arith.subf %31, %39 : vector<144x32xf32>
    %c0_32 = arith.constant 0 : index
    %c0_33 = arith.constant 0 : index
    %41 = vector.load %arg13[%c0_32, %c0_33] : memref<144x32xf32, #tpu.memory_space<vmem>>, vector<144x32xf32>
    tpu.vector_store %arg13[%c0_32, %c0_33], %40 {strides = array<i32>} : memref<144x32xf32, #tpu.memory_space<vmem>>, vector<144x32xf32>,
    %cst_34 = arith.constant -0.00999999977 : f32
    %cst_35 = arith.constant 0.00999999977 : f32
    %42 = vector.broadcast %cst_34 : f32 to vector<144x32xf32>
    %43 = arith.maximumf %42, %35 : vector<144x32xf32>
    %44 = vector.broadcast %cst_35 : f32 to vector<144x32xf32>
    %45 = arith.minimumf %44, %43 : vector<144x32xf32>
    %46 = arith.subf %35, %45 : vector<144x32xf32>
    %c0_36 = arith.constant 0 : index
    %c0_37 = arith.constant 0 : index
    %47 = vector.load %arg14[%c0_36, %c0_37] : memref<144x32xf32, #tpu.memory_space<vmem>>, vector<144x32xf32>
    tpu.vector_store %arg14[%c0_36, %c0_37], %46 {strides = array<i32>} : memref<144x32xf32, #tpu.memory_space<vmem>>, vector<144x32xf32>,
    return
  }
  func.func @transform_0(%arg0: i32) -> (i32, i32) {
    %c0_i32 = arith.constant 0 : i32
    %c0_i32_0 = arith.constant 0 : i32
    return %arg0, %c0_i32 : i32, i32
  }
  func.func @transform_1(%arg0: i32) -> (i32, i32) {
    %c0_i32 = arith.constant 0 : i32
    %c0_i32_0 = arith.constant 0 : i32
    return %arg0, %c0_i32 : i32, i32
  }
  func.func @transform_2(%arg0: i32) -> (i32, i32) {
    %c0_i32 = arith.constant 0 : i32
    %c0_i32_0 = arith.constant 0 : i32
    %c0_i32_1 = arith.constant 0 : i32
    return %c0_i32, %c0_i32_0 : i32, i32
  }
  func.func @transform_3(%arg0: i32) -> (i32, i32) {
    %c0_i32 = arith.constant 0 : i32
    %c0_i32_0 = arith.constant 0 : i32
    %c0_i32_1 = arith.constant 0 : i32
    return %c0_i32, %c0_i32_0 : i32, i32
  }
  func.func @transform_4(%arg0: i32) -> (i32, i32) {
    %c0_i32 = arith.constant 0 : i32
    %c0_i32_0 = arith.constant 0 : i32
    %c0_i32_1 = arith.constant 0 : i32
    return %c0_i32, %c0_i32_0 : i32, i32
  }
  func.func @transform_5(%arg0: i32) -> (i32, i32) {
    %c0_i32 = arith.constant 0 : i32
    %c0_i32_0 = arith.constant 0 : i32
    %c0_i32_1 = arith.constant 0 : i32
    return %c0_i32, %c0_i32_0 : i32, i32
  }
  func.func @transform_6(%arg0: i32) -> (i32, i32) {
    %c0_i32 = arith.constant 0 : i32
    %c0_i32_0 = arith.constant 0 : i32
    %c0_i32_1 = arith.constant 0 : i32
    return %c0_i32, %c0_i32_0 : i32, i32
  }
  func.func @transform_7(%arg0: i32) -> (i32, i32) {
    %c0_i32 = arith.constant 0 : i32
    %c0_i32_0 = arith.constant 0 : i32
    %c0_i32_1 = arith.constant 0 : i32
    return %c0_i32, %c0_i32_0 : i32, i32
  }
  func.func @transform_8(%arg0: i32) -> (i32, i32) {
    %c0_i32 = arith.constant 0 : i32
    %c0_i32_0 = arith.constant 0 : i32
    %c0_i32_1 = arith.constant 0 : i32
    return %c0_i32, %c0_i32_0 : i32, i32
  }
  func.func @transform_9(%arg0: i32) -> (i32, i32) {
    %c0_i32 = arith.constant 0 : i32
    %c0_i32_0 = arith.constant 0 : i32
    %c0_i32_1 = arith.constant 0 : i32
    return %c0_i32, %c0_i32_0 : i32, i32
  }
  func.func @transform_10(%arg0: i32) -> (i32, i32) {
    %c0_i32 = arith.constant 0 : i32
    %c0_i32_0 = arith.constant 0 : i32
    %c0_i32_1 = arith.constant 0 : i32
    return %c0_i32, %c0_i32_0 : i32, i32
  }
  func.func @transform_11(%arg0: i32) -> (i32, i32) {
    %c0_i32 = arith.constant 0 : i32
    %c0_i32_0 = arith.constant 0 : i32
    %c0_i32_1 = arith.constant 0 : i32
    return %c0_i32, %c0_i32_0 : i32, i32
  }
  func.func @transform_12(%arg0: i32) -> (i32, i32) {
    %c0_i32 = arith.constant 0 : i32
    %c0_i32_0 = arith.constant 0 : i32
    return %arg0, %c0_i32 : i32, i32
  }
  func.func @transform_13(%arg0: i32) -> (i32, i32) {
    %c0_i32 = arith.constant 0 : i32
    %c0_i32_0 = arith.constant 0 : i32
    return %arg0, %c0_i32 : i32, i32
  }
}

module attributes {stable_mosaic.version = 11 : i64} {
  func.func @_mlp_kernel(%arg0: i32, %arg1: memref<256x32xf32, #tpu.memory_space<vmem>>, %arg2: memref<256x32xf32, #tpu.memory_space<vmem>>, %arg3: memref<1x32xf32, #tpu.memory_space<vmem>>, %arg4: memref<1x32xf32, #tpu.memory_space<vmem>>, %arg5: memref<32x128xf32, #tpu.memory_space<vmem>>, %arg6: memref<1x128xf32, #tpu.memory_space<vmem>>, %arg7: memref<128x32xf32, #tpu.memory_space<vmem>>, %arg8: memref<1x32xf32, #tpu.memory_space<vmem>>, %arg9: memref<256x32xf32, #tpu.memory_space<vmem>>) attributes {dimension_semantics = [#tpu.dimension_semantics<parallel>], iteration_bounds = array<i64: 2>, scalar_prefetch = 0 : i64, scratch_operands = 0 : i64, tpu.core_type = #tpu.core_type<tc>, window_params = [{transform_indices = @transform_0, window_bounds = array<i64: 256, 32>}, {transform_indices = @transform_1, window_bounds = array<i64: 256, 32>}, {pipeline_mode = #tpu.pipeline_mode<synchronous>, transform_indices = @transform_2, window_bounds = array<i64: 1, 32>}, {pipeline_mode = #tpu.pipeline_mode<synchronous>, transform_indices = @transform_3, window_bounds = array<i64: 1, 32>}, {pipeline_mode = #tpu.pipeline_mode<synchronous>, transform_indices = @transform_4, window_bounds = array<i64: 32, 128>}, {pipeline_mode = #tpu.pipeline_mode<synchronous>, transform_indices = @transform_5, window_bounds = array<i64: 1, 128>}, {pipeline_mode = #tpu.pipeline_mode<synchronous>, transform_indices = @transform_6, window_bounds = array<i64: 128, 32>}, {pipeline_mode = #tpu.pipeline_mode<synchronous>, transform_indices = @transform_7, window_bounds = array<i64: 1, 32>}, {transform_indices = @transform_8, window_bounds = array<i64: 256, 32>}]} {
    %c0 = arith.constant 0 : index
    %c0_0 = arith.constant 0 : index
    %0 = vector.load %arg1[%c0, %c0_0] : memref<256x32xf32, #tpu.memory_space<vmem>>, vector<256x32xf32>
    %c0_1 = arith.constant 0 : index
    %c0_2 = arith.constant 0 : index
    %1 = vector.load %arg2[%c0_1, %c0_2] : memref<256x32xf32, #tpu.memory_space<vmem>>, vector<256x32xf32>
    %cst = arith.constant 2.500000e-01 : f32
    %2 = vector.broadcast %cst : f32 to vector<256x32xf32>
    %3 = arith.mulf %2, %1 : vector<256x32xf32>
    %4 = arith.addf %0, %3 : vector<256x32xf32>
    %cst_3 = arith.constant dense<0.000000e+00> : vector<256xf32>
    %5 = vector.multi_reduction <add>, %4, %cst_3 [1] : vector<256x32xf32> to vector<256xf32>
    %6 = vector.shape_cast %5 : vector<256xf32> to vector<256x1xf32>
    %cst_4 = arith.constant 3.200000e+01 : f32
    %7 = vector.broadcast %cst_4 : f32 to vector<256x1xf32>
    %8 = arith.divf %6, %7 : vector<256x1xf32>
    %9 = vector.broadcast %8 : vector<256x1xf32> to vector<256x32xf32>
    %10 = arith.subf %4, %9 : vector<256x32xf32>
    %11 = arith.mulf %10, %10 : vector<256x32xf32>
    %cst_5 = arith.constant dense<0.000000e+00> : vector<256xf32>
    %12 = vector.multi_reduction <add>, %11, %cst_5 [1] : vector<256x32xf32> to vector<256xf32>
    %13 = vector.shape_cast %12 : vector<256xf32> to vector<256x1xf32>
    %cst_6 = arith.constant 3.200000e+01 : f32
    %14 = vector.broadcast %cst_6 : f32 to vector<256x1xf32>
    %15 = arith.divf %13, %14 : vector<256x1xf32>
    %16 = vector.broadcast %8 : vector<256x1xf32> to vector<256x32xf32>
    %17 = arith.subf %4, %16 : vector<256x32xf32>
    %cst_7 = arith.constant 9.99999974E-6 : f32
    %18 = vector.broadcast %cst_7 : f32 to vector<256x1xf32>
    %19 = arith.addf %15, %18 : vector<256x1xf32>
    %20 = math.rsqrt %19 : vector<256x1xf32>
    %21 = vector.broadcast %20 : vector<256x1xf32> to vector<256x32xf32>
    %22 = arith.mulf %17, %21 : vector<256x32xf32>
    %c0_8 = arith.constant 0 : index
    %c0_9 = arith.constant 0 : index
    %23 = vector.load %arg3[%c0_8, %c0_9] : memref<1x32xf32, #tpu.memory_space<vmem>>, vector<1x32xf32>
    %24 = vector.broadcast %23 : vector<1x32xf32> to vector<256x32xf32>
    %25 = arith.mulf %22, %24 : vector<256x32xf32>
    %c0_10 = arith.constant 0 : index
    %c0_11 = arith.constant 0 : index
    %26 = vector.load %arg4[%c0_10, %c0_11] : memref<1x32xf32, #tpu.memory_space<vmem>>, vector<1x32xf32>
    %27 = vector.broadcast %26 : vector<1x32xf32> to vector<256x32xf32>
    %28 = arith.addf %25, %27 : vector<256x32xf32>
    %c0_12 = arith.constant 0 : index
    %c0_13 = arith.constant 0 : index
    %29 = vector.load %arg5[%c0_12, %c0_13] : memref<32x128xf32, #tpu.memory_space<vmem>>, vector<32x128xf32>
    %cst_14 = arith.constant dense<0.000000e+00> : vector<256x128xf32>
    %30 = tpu.matmul %28, %29, %cst_14 {dimension_numbers = #tpu.dot_dimension_numbers<[1], [0], [0], [1], [0, 0, 1, 1], [], []>} : vector<256x32xf32>, vector<32x128xf32>, vector<256x128xf32> -> vector<256x128xf32>
    %c0_15 = arith.constant 0 : index
    %c0_16 = arith.constant 0 : index
    %31 = vector.load %arg6[%c0_15, %c0_16] : memref<1x128xf32, #tpu.memory_space<vmem>>, vector<1x128xf32>
    %32 = vector.broadcast %31 : vector<1x128xf32> to vector<256x128xf32>
    %33 = arith.addf %30, %32 : vector<256x128xf32>
    %34 = arith.mulf %33, %33 : vector<256x128xf32>
    %35 = arith.mulf %33, %34 : vector<256x128xf32>
    %cst_17 = arith.constant 4.471500e-02 : f32
    %36 = vector.broadcast %cst_17 : f32 to vector<256x128xf32>
    %37 = arith.mulf %36, %35 : vector<256x128xf32>
    %38 = arith.addf %33, %37 : vector<256x128xf32>
    %cst_18 = arith.constant 0.797884583 : f32
    %39 = vector.broadcast %cst_18 : f32 to vector<256x128xf32>
    %40 = arith.mulf %39, %38 : vector<256x128xf32>
    %41 = math.tanh %40 : vector<256x128xf32>
    %cst_19 = arith.constant 1.000000e+00 : f32
    %42 = vector.broadcast %cst_19 : f32 to vector<256x128xf32>
    %43 = arith.addf %42, %41 : vector<256x128xf32>
    %cst_20 = arith.constant 5.000000e-01 : f32
    %44 = vector.broadcast %cst_20 : f32 to vector<256x128xf32>
    %45 = arith.mulf %44, %43 : vector<256x128xf32>
    %46 = arith.mulf %33, %45 : vector<256x128xf32>
    %c0_21 = arith.constant 0 : index
    %c0_22 = arith.constant 0 : index
    %47 = vector.load %arg7[%c0_21, %c0_22] : memref<128x32xf32, #tpu.memory_space<vmem>>, vector<128x32xf32>
    %cst_23 = arith.constant dense<0.000000e+00> : vector<256x32xf32>
    %48 = tpu.matmul %46, %47, %cst_23 {dimension_numbers = #tpu.dot_dimension_numbers<[1], [0], [0], [1], [0, 0, 1, 1], [], []>} : vector<256x128xf32>, vector<128x32xf32>, vector<256x32xf32> -> vector<256x32xf32>
    %c0_24 = arith.constant 0 : index
    %c0_25 = arith.constant 0 : index
    %49 = vector.load %arg8[%c0_24, %c0_25] : memref<1x32xf32, #tpu.memory_space<vmem>>, vector<1x32xf32>
    %50 = vector.broadcast %49 : vector<1x32xf32> to vector<256x32xf32>
    %51 = arith.addf %48, %50 : vector<256x32xf32>
    %cst_26 = arith.constant 2.500000e-01 : f32
    %52 = vector.broadcast %cst_26 : f32 to vector<256x32xf32>
    %53 = arith.mulf %52, %51 : vector<256x32xf32>
    %54 = arith.addf %4, %53 : vector<256x32xf32>
    %c0_27 = arith.constant 0 : index
    %c0_28 = arith.constant 0 : index
    %55 = vector.load %arg9[%c0_27, %c0_28] : memref<256x32xf32, #tpu.memory_space<vmem>>, vector<256x32xf32>
    tpu.vector_store %arg9[%c0_27, %c0_28], %54 {strides = array<i32>} : memref<256x32xf32, #tpu.memory_space<vmem>>, vector<256x32xf32>,
    return
  }
  func.func @transform_0(%arg0: i32) -> (i32, i32) {
    %c0_i32 = arith.constant 0 : i32
    %c0_i32_0 = arith.constant 0 : i32
    return %arg0, %c0_i32 : i32, i32
  }
  func.func @transform_1(%arg0: i32) -> (i32, i32) {
    %c0_i32 = arith.constant 0 : i32
    %c0_i32_0 = arith.constant 0 : i32
    return %arg0, %c0_i32 : i32, i32
  }
  func.func @transform_2(%arg0: i32) -> (i32, i32) {
    %c0_i32 = arith.constant 0 : i32
    %c0_i32_0 = arith.constant 0 : i32
    %c0_i32_1 = arith.constant 0 : i32
    return %c0_i32, %c0_i32_0 : i32, i32
  }
  func.func @transform_3(%arg0: i32) -> (i32, i32) {
    %c0_i32 = arith.constant 0 : i32
    %c0_i32_0 = arith.constant 0 : i32
    %c0_i32_1 = arith.constant 0 : i32
    return %c0_i32, %c0_i32_0 : i32, i32
  }
  func.func @transform_4(%arg0: i32) -> (i32, i32) {
    %c0_i32 = arith.constant 0 : i32
    %c0_i32_0 = arith.constant 0 : i32
    %c0_i32_1 = arith.constant 0 : i32
    return %c0_i32, %c0_i32_0 : i32, i32
  }
  func.func @transform_5(%arg0: i32) -> (i32, i32) {
    %c0_i32 = arith.constant 0 : i32
    %c0_i32_0 = arith.constant 0 : i32
    %c0_i32_1 = arith.constant 0 : i32
    return %c0_i32, %c0_i32_0 : i32, i32
  }
  func.func @transform_6(%arg0: i32) -> (i32, i32) {
    %c0_i32 = arith.constant 0 : i32
    %c0_i32_0 = arith.constant 0 : i32
    %c0_i32_1 = arith.constant 0 : i32
    return %c0_i32, %c0_i32_0 : i32, i32
  }
  func.func @transform_7(%arg0: i32) -> (i32, i32) {
    %c0_i32 = arith.constant 0 : i32
    %c0_i32_0 = arith.constant 0 : i32
    %c0_i32_1 = arith.constant 0 : i32
    return %c0_i32, %c0_i32_0 : i32, i32
  }
  func.func @transform_8(%arg0: i32) -> (i32, i32) {
    %c0_i32 = arith.constant 0 : i32
    %c0_i32_0 = arith.constant 0 : i32
    return %arg0, %c0_i32 : i32, i32
  }
}

module attributes {stable_mosaic.version = 11 : i64} {
  func.func @_ln_kernel(%arg0: i32, %arg1: memref<256x32xf32, #tpu.memory_space<vmem>>, %arg2: memref<1x32xf32, #tpu.memory_space<vmem>>, %arg3: memref<1x32xf32, #tpu.memory_space<vmem>>, %arg4: memref<256x32xf32, #tpu.memory_space<vmem>>) attributes {dimension_semantics = [#tpu.dimension_semantics<parallel>], iteration_bounds = array<i64: 2>, scalar_prefetch = 0 : i64, scratch_operands = 0 : i64, tpu.core_type = #tpu.core_type<tc>, window_params = [{transform_indices = @transform_0, window_bounds = array<i64: 256, 32>}, {pipeline_mode = #tpu.pipeline_mode<synchronous>, transform_indices = @transform_1, window_bounds = array<i64: 1, 32>}, {pipeline_mode = #tpu.pipeline_mode<synchronous>, transform_indices = @transform_2, window_bounds = array<i64: 1, 32>}, {transform_indices = @transform_3, window_bounds = array<i64: 256, 32>}]} {
    %c0 = arith.constant 0 : index
    %c0_0 = arith.constant 0 : index
    %0 = vector.load %arg1[%c0, %c0_0] : memref<256x32xf32, #tpu.memory_space<vmem>>, vector<256x32xf32>
    %cst = arith.constant dense<0.000000e+00> : vector<256xf32>
    %1 = vector.multi_reduction <add>, %0, %cst [1] : vector<256x32xf32> to vector<256xf32>
    %2 = vector.shape_cast %1 : vector<256xf32> to vector<256x1xf32>
    %cst_1 = arith.constant 3.200000e+01 : f32
    %3 = vector.broadcast %cst_1 : f32 to vector<256x1xf32>
    %4 = arith.divf %2, %3 : vector<256x1xf32>
    %5 = vector.broadcast %4 : vector<256x1xf32> to vector<256x32xf32>
    %6 = arith.subf %0, %5 : vector<256x32xf32>
    %7 = arith.mulf %6, %6 : vector<256x32xf32>
    %cst_2 = arith.constant dense<0.000000e+00> : vector<256xf32>
    %8 = vector.multi_reduction <add>, %7, %cst_2 [1] : vector<256x32xf32> to vector<256xf32>
    %9 = vector.shape_cast %8 : vector<256xf32> to vector<256x1xf32>
    %cst_3 = arith.constant 3.200000e+01 : f32
    %10 = vector.broadcast %cst_3 : f32 to vector<256x1xf32>
    %11 = arith.divf %9, %10 : vector<256x1xf32>
    %12 = vector.broadcast %4 : vector<256x1xf32> to vector<256x32xf32>
    %13 = arith.subf %0, %12 : vector<256x32xf32>
    %cst_4 = arith.constant 9.99999974E-6 : f32
    %14 = vector.broadcast %cst_4 : f32 to vector<256x1xf32>
    %15 = arith.addf %11, %14 : vector<256x1xf32>
    %16 = math.rsqrt %15 : vector<256x1xf32>
    %17 = vector.broadcast %16 : vector<256x1xf32> to vector<256x32xf32>
    %18 = arith.mulf %13, %17 : vector<256x32xf32>
    %c0_5 = arith.constant 0 : index
    %c0_6 = arith.constant 0 : index
    %19 = vector.load %arg2[%c0_5, %c0_6] : memref<1x32xf32, #tpu.memory_space<vmem>>, vector<1x32xf32>
    %20 = vector.broadcast %19 : vector<1x32xf32> to vector<256x32xf32>
    %21 = arith.mulf %18, %20 : vector<256x32xf32>
    %c0_7 = arith.constant 0 : index
    %c0_8 = arith.constant 0 : index
    %22 = vector.load %arg3[%c0_7, %c0_8] : memref<1x32xf32, #tpu.memory_space<vmem>>, vector<1x32xf32>
    %23 = vector.broadcast %22 : vector<1x32xf32> to vector<256x32xf32>
    %24 = arith.addf %21, %23 : vector<256x32xf32>
    %c0_9 = arith.constant 0 : index
    %c0_10 = arith.constant 0 : index
    %25 = vector.load %arg4[%c0_9, %c0_10] : memref<256x32xf32, #tpu.memory_space<vmem>>, vector<256x32xf32>
    tpu.vector_store %arg4[%c0_9, %c0_10], %24 {strides = array<i32>} : memref<256x32xf32, #tpu.memory_space<vmem>>, vector<256x32xf32>,
    return
  }
  func.func @transform_0(%arg0: i32) -> (i32, i32) {
    %c0_i32 = arith.constant 0 : i32
    %c0_i32_0 = arith.constant 0 : i32
    return %arg0, %c0_i32 : i32, i32
  }
  func.func @transform_1(%arg0: i32) -> (i32, i32) {
    %c0_i32 = arith.constant 0 : i32
    %c0_i32_0 = arith.constant 0 : i32
    %c0_i32_1 = arith.constant 0 : i32
    return %c0_i32, %c0_i32_0 : i32, i32
  }
  func.func @transform_2(%arg0: i32) -> (i32, i32) {
    %c0_i32 = arith.constant 0 : i32
    %c0_i32_0 = arith.constant 0 : i32
    %c0_i32_1 = arith.constant 0 : i32
    return %c0_i32, %c0_i32_0 : i32, i32
  }
  func.func @transform_3(%arg0: i32) -> (i32, i32) {
    %c0_i32 = arith.constant 0 : i32
    %c0_i32_0 = arith.constant 0 : i32
    return %arg0, %c0_i32 : i32, i32
  }
}

module attributes {stable_mosaic.version = 11 : i64} {
  func.func @_mlp_kernel(%arg0: i32, %arg1: memref<256x32xf32, #tpu.memory_space<vmem>>, %arg2: memref<256x32xf32, #tpu.memory_space<vmem>>, %arg3: memref<1x32xf32, #tpu.memory_space<vmem>>, %arg4: memref<1x32xf32, #tpu.memory_space<vmem>>, %arg5: memref<32x128xf32, #tpu.memory_space<vmem>>, %arg6: memref<1x128xf32, #tpu.memory_space<vmem>>, %arg7: memref<128x32xf32, #tpu.memory_space<vmem>>, %arg8: memref<1x32xf32, #tpu.memory_space<vmem>>, %arg9: memref<256x32xf32, #tpu.memory_space<vmem>>) attributes {dimension_semantics = [#tpu.dimension_semantics<parallel>], iteration_bounds = array<i64: 2>, scalar_prefetch = 0 : i64, scratch_operands = 0 : i64, tpu.core_type = #tpu.core_type<tc>, window_params = [{transform_indices = @transform_0, window_bounds = array<i64: 256, 32>}, {transform_indices = @transform_1, window_bounds = array<i64: 256, 32>}, {pipeline_mode = #tpu.pipeline_mode<synchronous>, transform_indices = @transform_2, window_bounds = array<i64: 1, 32>}, {pipeline_mode = #tpu.pipeline_mode<synchronous>, transform_indices = @transform_3, window_bounds = array<i64: 1, 32>}, {pipeline_mode = #tpu.pipeline_mode<synchronous>, transform_indices = @transform_4, window_bounds = array<i64: 32, 128>}, {pipeline_mode = #tpu.pipeline_mode<synchronous>, transform_indices = @transform_5, window_bounds = array<i64: 1, 128>}, {pipeline_mode = #tpu.pipeline_mode<synchronous>, transform_indices = @transform_6, window_bounds = array<i64: 128, 32>}, {pipeline_mode = #tpu.pipeline_mode<synchronous>, transform_indices = @transform_7, window_bounds = array<i64: 1, 32>}, {transform_indices = @transform_8, window_bounds = array<i64: 256, 32>}]} {
    %c0 = arith.constant 0 : index
    %c0_0 = arith.constant 0 : index
    %0 = vector.load %arg1[%c0, %c0_0] : memref<256x32xf32, #tpu.memory_space<vmem>>, vector<256x32xf32>
    %c0_1 = arith.constant 0 : index
    %c0_2 = arith.constant 0 : index
    %1 = vector.load %arg2[%c0_1, %c0_2] : memref<256x32xf32, #tpu.memory_space<vmem>>, vector<256x32xf32>
    %cst = arith.constant 2.500000e-01 : f32
    %2 = vector.broadcast %cst : f32 to vector<256x32xf32>
    %3 = arith.mulf %2, %1 : vector<256x32xf32>
    %4 = arith.addf %0, %3 : vector<256x32xf32>
    %cst_3 = arith.constant dense<0.000000e+00> : vector<256xf32>
    %5 = vector.multi_reduction <add>, %4, %cst_3 [1] : vector<256x32xf32> to vector<256xf32>
    %6 = vector.shape_cast %5 : vector<256xf32> to vector<256x1xf32>
    %cst_4 = arith.constant 3.200000e+01 : f32
    %7 = vector.broadcast %cst_4 : f32 to vector<256x1xf32>
    %8 = arith.divf %6, %7 : vector<256x1xf32>
    %9 = vector.broadcast %8 : vector<256x1xf32> to vector<256x32xf32>
    %10 = arith.subf %4, %9 : vector<256x32xf32>
    %11 = arith.mulf %10, %10 : vector<256x32xf32>
    %cst_5 = arith.constant dense<0.000000e+00> : vector<256xf32>
    %12 = vector.multi_reduction <add>, %11, %cst_5 [1] : vector<256x32xf32> to vector<256xf32>
    %13 = vector.shape_cast %12 : vector<256xf32> to vector<256x1xf32>
    %cst_6 = arith.constant 3.200000e+01 : f32
    %14 = vector.broadcast %cst_6 : f32 to vector<256x1xf32>
    %15 = arith.divf %13, %14 : vector<256x1xf32>
    %16 = vector.broadcast %8 : vector<256x1xf32> to vector<256x32xf32>
    %17 = arith.subf %4, %16 : vector<256x32xf32>
    %cst_7 = arith.constant 9.99999974E-6 : f32
    %18 = vector.broadcast %cst_7 : f32 to vector<256x1xf32>
    %19 = arith.addf %15, %18 : vector<256x1xf32>
    %20 = math.rsqrt %19 : vector<256x1xf32>
    %21 = vector.broadcast %20 : vector<256x1xf32> to vector<256x32xf32>
    %22 = arith.mulf %17, %21 : vector<256x32xf32>
    %c0_8 = arith.constant 0 : index
    %c0_9 = arith.constant 0 : index
    %23 = vector.load %arg3[%c0_8, %c0_9] : memref<1x32xf32, #tpu.memory_space<vmem>>, vector<1x32xf32>
    %24 = vector.broadcast %23 : vector<1x32xf32> to vector<256x32xf32>
    %25 = arith.mulf %22, %24 : vector<256x32xf32>
    %c0_10 = arith.constant 0 : index
    %c0_11 = arith.constant 0 : index
    %26 = vector.load %arg4[%c0_10, %c0_11] : memref<1x32xf32, #tpu.memory_space<vmem>>, vector<1x32xf32>
    %27 = vector.broadcast %26 : vector<1x32xf32> to vector<256x32xf32>
    %28 = arith.addf %25, %27 : vector<256x32xf32>
    %c0_12 = arith.constant 0 : index
    %c0_13 = arith.constant 0 : index
    %29 = vector.load %arg5[%c0_12, %c0_13] : memref<32x128xf32, #tpu.memory_space<vmem>>, vector<32x128xf32>
    %cst_14 = arith.constant dense<0.000000e+00> : vector<256x128xf32>
    %30 = tpu.matmul %28, %29, %cst_14 {dimension_numbers = #tpu.dot_dimension_numbers<[1], [0], [0], [1], [0, 0, 1, 1], [], []>} : vector<256x32xf32>, vector<32x128xf32>, vector<256x128xf32> -> vector<256x128xf32>
    %c0_15 = arith.constant 0 : index
    %c0_16 = arith.constant 0 : index
    %31 = vector.load %arg6[%c0_15, %c0_16] : memref<1x128xf32, #tpu.memory_space<vmem>>, vector<1x128xf32>
    %32 = vector.broadcast %31 : vector<1x128xf32> to vector<256x128xf32>
    %33 = arith.addf %30, %32 : vector<256x128xf32>
    %34 = arith.mulf %33, %33 : vector<256x128xf32>
    %35 = arith.mulf %33, %34 : vector<256x128xf32>
    %cst_17 = arith.constant 4.471500e-02 : f32
    %36 = vector.broadcast %cst_17 : f32 to vector<256x128xf32>
    %37 = arith.mulf %36, %35 : vector<256x128xf32>
    %38 = arith.addf %33, %37 : vector<256x128xf32>
    %cst_18 = arith.constant 0.797884583 : f32
    %39 = vector.broadcast %cst_18 : f32 to vector<256x128xf32>
    %40 = arith.mulf %39, %38 : vector<256x128xf32>
    %41 = math.tanh %40 : vector<256x128xf32>
    %cst_19 = arith.constant 1.000000e+00 : f32
    %42 = vector.broadcast %cst_19 : f32 to vector<256x128xf32>
    %43 = arith.addf %42, %41 : vector<256x128xf32>
    %cst_20 = arith.constant 5.000000e-01 : f32
    %44 = vector.broadcast %cst_20 : f32 to vector<256x128xf32>
    %45 = arith.mulf %44, %43 : vector<256x128xf32>
    %46 = arith.mulf %33, %45 : vector<256x128xf32>
    %c0_21 = arith.constant 0 : index
    %c0_22 = arith.constant 0 : index
    %47 = vector.load %arg7[%c0_21, %c0_22] : memref<128x32xf32, #tpu.memory_space<vmem>>, vector<128x32xf32>
    %cst_23 = arith.constant dense<0.000000e+00> : vector<256x32xf32>
    %48 = tpu.matmul %46, %47, %cst_23 {dimension_numbers = #tpu.dot_dimension_numbers<[1], [0], [0], [1], [0, 0, 1, 1], [], []>} : vector<256x128xf32>, vector<128x32xf32>, vector<256x32xf32> -> vector<256x32xf32>
    %c0_24 = arith.constant 0 : index
    %c0_25 = arith.constant 0 : index
    %49 = vector.load %arg8[%c0_24, %c0_25] : memref<1x32xf32, #tpu.memory_space<vmem>>, vector<1x32xf32>
    %50 = vector.broadcast %49 : vector<1x32xf32> to vector<256x32xf32>
    %51 = arith.addf %48, %50 : vector<256x32xf32>
    %cst_26 = arith.constant 2.500000e-01 : f32
    %52 = vector.broadcast %cst_26 : f32 to vector<256x32xf32>
    %53 = arith.mulf %52, %51 : vector<256x32xf32>
    %54 = arith.addf %4, %53 : vector<256x32xf32>
    %c0_27 = arith.constant 0 : index
    %c0_28 = arith.constant 0 : index
    %55 = vector.load %arg9[%c0_27, %c0_28] : memref<256x32xf32, #tpu.memory_space<vmem>>, vector<256x32xf32>
    tpu.vector_store %arg9[%c0_27, %c0_28], %54 {strides = array<i32>} : memref<256x32xf32, #tpu.memory_space<vmem>>, vector<256x32xf32>,
    return
  }
  func.func @transform_0(%arg0: i32) -> (i32, i32) {
    %c0_i32 = arith.constant 0 : i32
    %c0_i32_0 = arith.constant 0 : i32
    return %arg0, %c0_i32 : i32, i32
  }
  func.func @transform_1(%arg0: i32) -> (i32, i32) {
    %c0_i32 = arith.constant 0 : i32
    %c0_i32_0 = arith.constant 0 : i32
    return %arg0, %c0_i32 : i32, i32
  }
  func.func @transform_2(%arg0: i32) -> (i32, i32) {
    %c0_i32 = arith.constant 0 : i32
    %c0_i32_0 = arith.constant 0 : i32
    %c0_i32_1 = arith.constant 0 : i32
    return %c0_i32, %c0_i32_0 : i32, i32
  }
  func.func @transform_3(%arg0: i32) -> (i32, i32) {
    %c0_i32 = arith.constant 0 : i32
    %c0_i32_0 = arith.constant 0 : i32
    %c0_i32_1 = arith.constant 0 : i32
    return %c0_i32, %c0_i32_0 : i32, i32
  }
  func.func @transform_4(%arg0: i32) -> (i32, i32) {
    %c0_i32 = arith.constant 0 : i32
    %c0_i32_0 = arith.constant 0 : i32
    %c0_i32_1 = arith.constant 0 : i32
    return %c0_i32, %c0_i32_0 : i32, i32
  }
  func.func @transform_5(%arg0: i32) -> (i32, i32) {
    %c0_i32 = arith.constant 0 : i32
    %c0_i32_0 = arith.constant 0 : i32
    %c0_i32_1 = arith.constant 0 : i32
    return %c0_i32, %c0_i32_0 : i32, i32
  }
  func.func @transform_6(%arg0: i32) -> (i32, i32) {
    %c0_i32 = arith.constant 0 : i32
    %c0_i32_0 = arith.constant 0 : i32
    %c0_i32_1 = arith.constant 0 : i32
    return %c0_i32, %c0_i32_0 : i32, i32
  }
  func.func @transform_7(%arg0: i32) -> (i32, i32) {
    %c0_i32 = arith.constant 0 : i32
    %c0_i32_0 = arith.constant 0 : i32
    %c0_i32_1 = arith.constant 0 : i32
    return %c0_i32, %c0_i32_0 : i32, i32
  }
  func.func @transform_8(%arg0: i32) -> (i32, i32) {
    %c0_i32 = arith.constant 0 : i32
    %c0_i32_0 = arith.constant 0 : i32
    return %arg0, %c0_i32 : i32, i32
  }
}

</mosaic_0001>

<bundles_post_ra>
// kernel: afno_cast_latent_forward.6
= control target key start
LH: loop header
LB: loop body
LE: loop exit
PB: predicated region body
PF: predicated region fallthrough
CT: control target
= control target key end

     0   :  { %8 = vsyncpa [#allocation3], 0  ;;  %s1663_s0 = inlined_call_operand.hbm [shape: f32[512,32], index: 0, kind: input, shape index: {}]   ;;  %s1664_s1 = inlined_call_operand.vmem [shape: f32[1,32], index: 1, kind: input, shape index: {}]   ;;  %s1665_s2 = inlined_call_operand.vmem [shape: f32[1,32], index: 2, kind: input, shape index: {}]   ;;  %s1666_s3 = inlined_call_operand.vmem [shape: f32[512,32], index: 3, kind: output, shape index: {}]  }
   0x1   :  { %10 = vsyncpa [#allocation3 + $0x1], 0  ;;  %s1030_s12 = smov 0   ;;  %s1032_s13 = smov 0  }
   0x2   :  { %s1034_s14 = smov 0   ;;  %s1036_s15 = smov 0  }
   0x3 LB: > { %s820_s16 = sadd.s32 4294967295, %s1005_s15   ;;  %s1050_s17 = sadd.s32 1, %s1005_s15   ;;  %s1005_s15 = sphi %s1036_s15, %s1673_s15   ;;  %s1001_s14 = sphi %s1034_s14, %s1672_s14   ;;  %s997_s13 = sphi %s1032_s13, %s1671_s13   ;;  %s993_s12 = sphi %s1030_s12, %s1670_s12  }
   0x4   : > { %s20_s18 = ssub.s32 %s1005_s15, %s1050_s17  ;;  %s23_s19 = sadd.s32 1, %s1001_s14 }
   0x5   : > { %p21_p0 = scmp.eq.s32.totalorder %s20_s18, 0  ;;  %p30_p1 = scmp.ne.s32.totalorder %s1001_s14, %s997_s13 }
   0x6   : > { %p31_p2 = scmp.eq.s32.totalorder %s1005_s15, 0  ;;  %p36_p3 = scmp.ne.s32.totalorder %s997_s13, %s993_s12 }
   0x7   : > { %s1060_s20 = scalar_select %p21_p0, %s1001_s14, %s23_s19  }
   0x8   : > { %p32_p4 = por %p31_p2, %p30_p1  ;;  %p37_p5 = scmp.eq.s32.totalorder %s820_s16, 0 }
   0x9   : > { %p842_p6 = scmp.lt.s32.totalorder %s1005_s15, 2  ;;  %s134_s22 = sand.u32 1, %s1001_s14  }
   0xa   : > { %p1065_p7 = por %p37_p5, %p36_p3  ;;  %s824_s23 = sshll.u32 %s134_s22, 8 }
   0xb   : > { %s835_s24 = sshll.u32 %s1005_s15, 12  ;;  %s138_s28 = scalar_lea.vmem [#allocation2], %s824_s23 }
   0xc   : > { %s1074_s27 = scalar_lea.hbm %s1663_s0, %s835_s24  ;;  %s145_s29 = sshll.u32 %s138_s28, 4  ;;  %s1076_s29 = int_to_ptr.vmem [resolvable:$true] %s145_s29 }
   0xd   : > { %p1078_p8 = pnand %p842_p6, %p32_p4  ;;  %s1083_s4 = scalar_lea.sflag [#allocation3], %s134_s22 }
   0xe   : > { %s941_s5 = scalar_lea.hbm %s1074_s27, 4096  ;;  %s946_s8 = scalar_lea.hbm %s1663_s0, 8192 }
   0xf   : > { %p942_p10 = scmp.ne.s32.totalorder %s1074_s27, %s941_s5  ;;  %p943_p11 = pneg %p1078_p8 }
  0x10   : > { %p947_p0 = scmp.lt.u32.totalorder %s1074_s27, %s1663_s0  ;;  %p948_p1 = scmp.lt.u32.totalorder %s946_s8, %s941_s5 }
  0x11   : > { %p944_p12 = pnand %p943_p11, %p942_p10  ;;  %p950_p3 = scmp.lt.u32.totalorder %s941_s5, %s1074_s27 }
  0x12   : > { %p949_p2 = por %p948_p1, %p947_p0 }
  0x13   : > { %p945_p13 = pneg %p944_p12 }
  0x14   : > { %p951_p4 = por %p950_p3, %p949_p2 }
  0x16   : > { %p952_p5 = pnand %p951_p4, %p945_p13 }
  0x18   : > { %955 = shalt.err (!%p952_p5)
}
  0x19   : > { %s956_s11 = scalar_lea.vmem %s1076_s29, 4096  ;;  %s1007_s12 = smov [#allocation2]  }
  0x1a   : > { %p957_p6 = scmp.ne.s32.totalorder %s1076_s29, %s956_s11  ;;  %s961_s18 = sshll.u32 %s1007_s12, 4  ;;  %s962_s18 = int_to_ptr.vmem [resolvable:$false] %s961_s18 }
  0x1b   : > { %s963_s19 = scalar_lea.vmem %s962_s18, 8192  ;;  %p964_p9 = scmp.lt.s32.totalorder %s1076_s29, %s962_s18 }
  0x1c   : > { %p959_p10 = pnand %p957_p6, %p943_p11  ;;  %p965_p0 = scmp.lt.s32.totalorder %s963_s19, %s956_s11 }
  0x1e   : > { %p960_p12 = pneg %p959_p10  ;;  %p966_p1 = por %p965_p0, %p964_p9 }
  0x20   : > { %p967_p2 = pnand %p966_p1, %p960_p12 }
  0x22   : > { %970 = shalt.err (!%p967_p2)
}
  0x23   : > { %s1008_s22 = smov 128   ;;  %s1009_s23 = smov 8  }
  0x24   : > { %841 = dma.hbm_to_vmem [thread:$0]  (!%p1078_p8), %s1074_s27, 4096, %s1076_s29, %s1083_s4, %s1008_s22, %s1008_s22, %s1009_s23  }
  0x25   : > { %p153_p11 = scmp.lt.s32.totalorder %s1005_s15, 3  ;;  %p1669_p13 = scmp.ge.s32.totalorder %s1005_s15, 1 }
  0x27   : > { %p154_p3 = pnand %p1669_p13, %p153_p11 }
  0x28   : > { %s159_s24 = sand.u32 (!%p154_p3), 1, %s997_s13  }
  0x29   : > { %157 = sbr.rel (%p154_p3) target bundleno = 428 (0x1ac), region = 32  ;;  %s828_s25 = sshll.u32 (!%p154_p3), %s159_s24, 8 }
  0x2a   : > { %s160_s26 = scalar_lea.sflag (!%p154_p3), [#allocation3], %s159_s24  ;;  %s1115_s28 = scalar_lea.vmem (!%p154_p3), [#allocation2], %s828_s25 }
  0x30   : > { %988 = dma.done.wait (%p1065_p7), %s160_s26, 4096  }
  0x31   : > { %990 = vsyncadd (%p1065_p7), %s160_s26, 4294963200  ;;  %vm225_vm0 = vcmask 261120   ;;  %v1122_v0 = vld [vmem:[%s1115_s28] sm:$0xff]  ;;  %v1125_v1 = vld [vmem:[%s1115_s28 + $0x10] sm:$0xff]  ;;  %s829_s21 = sshll.u32 %s820_s16, 5 }
  0x32   : > { %v1128_v2 = vld [vmem:[%s1115_s28 + $0x8] sm:$0xff]  ;;  %v226_v3 = vsel %vm225_vm0, %v1122_v0, 0.0  ;;  %v232_v4 = vsel %vm225_vm0, %v1125_v1, 0.0  ;;  %v1135_v5 = vld [vmem:[%s1115_s28 + $0x18] sm:$0xff]  ;;  %v1142_v8 = vld [vmem:[%s1115_s28 + $0x20] sm:$0xff]  ;;  %p188_p7 = scmp.lt.s32.totalorder %s829_s21, 63 }
  0x33   : > { %227 = vadd.xlane.f32.xlu0 %v226_v3  ;;  %233 = vadd.xlane.f32.xlu1 %v232_v4  ;;  %v229_v6 = vsel %vm225_vm0, %v1128_v2, 0.0  ;;  %v235_v7 = vsel %vm225_vm0, %v1135_v5, 0.0  ;;  %v1145_v9 = vld [vmem:[%s1115_s28 + $0x28] sm:$0xff]  ;;  %v238_v10 = vsel %vm225_vm0, %v1142_v8, 0.0  ;;  %v1152_v12 = vld [vmem:[%s1115_s28 + $0x30] sm:$0xff]  ;;  %v1155_v13 = vld [vmem:[%s1115_s28 + $0x38] sm:$0xff] }
  0x34   : > { %v241_v11 = vsel %vm225_vm0, %v1145_v9, 0.0  ;;  %v244_v14 = vsel %vm225_vm0, %v1152_v12, 0.0  ;;  %v247_v15 = vsel %vm225_vm0, %v1155_v13, 0.0  ;;  %v1162_v16 = vld [vmem:[%s1115_s28 + $0x40] sm:$0xff]  ;;  %v1165_v17 = vld [vmem:[%s1115_s28 + $0x48] sm:$0xff]  ;;  %v1172_v20 = vld [vmem:[%s1115_s28 + $0x50] sm:$0xff] }
  0x35   : > { %v250_v18 = vsel %vm225_vm0, %v1162_v16, 0.0  ;;  %v253_v19 = vsel %vm225_vm0, %v1165_v17, 0.0  ;;  %v1175_v21 = vld [vmem:[%s1115_s28 + $0x58] sm:$0xff]  ;;  %v256_v22 = vsel %vm225_vm0, %v1172_v20, 0.0  ;;  %v1182_v24 = vld [vmem:[%s1115_s28 + $0x60] sm:$0xff]  ;;  %v1185_v25 = vld [vmem:[%s1115_s28 + $0x68] sm:$0xff] }
  0x36   : > { %v259_v23 = vsel %vm225_vm0, %v1175_v21, 0.0  ;;  %v262_v26 = vsel %vm225_vm0, %v1182_v24, 0.0  ;;  %v265_v27 = vsel %vm225_vm0, %v1185_v25, 0.0  ;;  %v1192_v28 = vld [vmem:[%s1115_s28 + $0x70] sm:$0xff]  ;;  %v1195_v29 = vld [vmem:[%s1115_s28 + $0x78] sm:$0xff]  ;;  %v1202_v32 = vld [vmem:[%s1115_s28 + $0x80] sm:$0xff] }
  0x37   : > { %230 = vadd.xlane.f32.xlu0 %v229_v6  ;;  %236 = vadd.xlane.f32.xlu1 %v235_v7  ;;  %v268_v30 = vsel %vm225_vm0, %v1192_v28, 0.0  ;;  %v271_v31 = vsel %vm225_vm0, %v1195_v29, 0.0  ;;  %v1205_v33 = vld [vmem:[%s1115_s28 + $0x88] sm:$0xff]  ;;  %v274_v34 = vsel %vm225_vm0, %v1202_v32, 0.0  ;;  %v1212_v36 = vld [vmem:[%s1115_s28 + $0x90] sm:$0xff]  ;;  %v1215_v37 = vld [vmem:[%s1115_s28 + $0x98] sm:$0xff] }
  0x38   : > { %v277_v35 = vsel %vm225_vm0, %v1205_v33, 0.0  ;;  %v280_v38 = vsel %vm225_vm0, %v1212_v36, 0.0  ;;  %v283_v39 = vsel %vm225_vm0, %v1215_v37, 0.0  ;;  %v1222_v40 = vld [vmem:[%s1115_s28 + $0xa0] sm:$0xff]  ;;  %v1225_v41 = vld [vmem:[%s1115_s28 + $0xa8] sm:$0xff]  ;;  %v1232_v44 = vld [vmem:[%s1115_s28 + $0xb0] sm:$0xff] }
  0x39   : > { %v286_v42 = vsel %vm225_vm0, %v1222_v40, 0.0  ;;  %v289_v43 = vsel %vm225_vm0, %v1225_v41, 0.0  ;;  %v1235_v45 = vld [vmem:[%s1115_s28 + $0xb8] sm:$0xff]  ;;  %v292_v46 = vsel %vm225_vm0, %v1232_v44, 0.0  ;;  %v1242_v48 = vld [vmem:[%s1115_s28 + $0xc0] sm:$0xff]  ;;  %v1245_v49 = vld [vmem:[%s1115_s28 + $0xc8] sm:$0xff] }
  0x3a   : > { %v295_v47 = vsel %vm225_vm0, %v1235_v45, 0.0  ;;  %v298_v50 = vsel %vm225_vm0, %v1242_v48, 0.0  ;;  %v301_v51 = vsel %vm225_vm0, %v1245_v49, 0.0  ;;  %v1252_v52 = vld [vmem:[%s1115_s28 + $0xd0] sm:$0xff]  ;;  %v1255_v53 = vld [vmem:[%s1115_s28 + $0xd8] sm:$0xff]  ;;  %v1262_v56 = vld [vmem:[%s1115_s28 + $0xe0] sm:$0xff] }
  0x3b   : > { %239 = vadd.xlane.f32.xlu0 %v238_v10  ;;  %242 = vadd.xlane.f32.xlu1 %v241_v11  ;;  %v304_v54 = vsel %vm225_vm0, %v1252_v52, 0.0  ;;  %v307_v55 = vsel %vm225_vm0, %v1255_v53, 0.0  ;;  %v1265_v57 = vld [vmem:[%s1115_s28 + $0xe8] sm:$0xff]  ;;  %v310_v58 = vsel %vm225_vm0, %v1262_v56, 0.0  ;;  %v1272_v60 = vld [vmem:[%s1115_s28 + $0xf0] sm:$0xff]  ;;  %v1275_v61 = vld [vmem:[%s1115_s28 + $0xf8] sm:$0xff] }
  0x3c   : > { %v313_v59 = vsel %vm225_vm0, %v1265_v57, 0.0  ;;  %v316_v62 = vsel %vm225_vm0, %v1272_v60, 0.0  ;;  %v319_v63 = vsel %vm225_vm0, %v1275_v61, 0.0  ;;  %s1675_s21 = smov (!%p188_p7, %s829_s21), 63 }
  0x3d   : > { %s830_s27 = sshll.u32 %s1675_s21, 3 }
  0x3e   : > { %s1490_s6 = scalar_lea.vmem %s1666_s3, %s830_s27 }
  0x3f   : > { %245 = vadd.xlane.f32.xlu0 %v244_v14  ;;  %248 = vadd.xlane.f32.xlu1 %v247_v15 }
  0x43   : > { %251 = vadd.xlane.f32.xlu0 %v250_v18  ;;  %254 = vadd.xlane.f32.xlu1 %v253_v19 }
  0x47   : > { %257 = vadd.xlane.f32.xlu0 %v256_v22  ;;  %260 = vadd.xlane.f32.xlu1 %v259_v23 }
  0x4b   : > { %263 = vadd.xlane.f32.xlu0 %v262_v26  ;;  %266 = vadd.xlane.f32.xlu1 %v265_v27 }
  0x4f   : > { %269 = vadd.xlane.f32.xlu0 %v268_v30  ;;  %272 = vadd.xlane.f32.xlu1 %v271_v31 }
  0x53   : > { %275 = vadd.xlane.f32.xlu0 %v274_v34  ;;  %278 = vadd.xlane.f32.xlu1 %v277_v35 }
  0x57   : > { %281 = vadd.xlane.f32.xlu0 %v280_v38  ;;  %284 = vadd.xlane.f32.xlu1 %v283_v39 }
  0x5b   : > { %287 = vadd.xlane.f32.xlu0 %v286_v42  ;;  %290 = vadd.xlane.f32.xlu1 %v289_v43 }
  0x5f   : > { %293 = vadd.xlane.f32.xlu0 %v292_v46  ;;  %296 = vadd.xlane.f32.xlu1 %v295_v47 }
  0x63   : > { %299 = vadd.xlane.f32.xlu0 %v298_v50  ;;  %302 = vadd.xlane.f32.xlu1 %v301_v51 }
  0x67   : > { %305 = vadd.xlane.f32.xlu0 %v304_v54  ;;  %308 = vadd.xlane.f32.xlu1 %v307_v55 }
  0x6b   : > { %311 = vadd.xlane.f32.xlu0 %v310_v58  ;;  %314 = vadd.xlane.f32.xlu1 %v313_v59 }
  0x6f   : > { %317 = vadd.xlane.f32.xlu0 %v316_v62  ;;  %320 = vadd.xlane.f32.xlu1 %v319_v63 }
  0xc0   : > { %v228_v3 = vpop.xlane.xlu0 %227  ;;  %v234_v4 = vpop.xlane.xlu1 %233 }
  0xc1   : > { %v323_v6 = vmul.f32 0.03125, %v228_v3  ;;  %v325_v7 = vmul.f32 0.03125, %v234_v4 }
  0xc3   : > { %v1282_v10 = vsub.f32 %v1122_v0, %v323_v6  ;;  %v1285_v11 = vsub.f32 %v1125_v1, %v325_v7 }
  0xc4   : > { %v231_v14 = vpop.xlane.xlu0 %230  ;;  %v237_v15 = vpop.xlane.xlu1 %236 }
  0xc5   : > { %v324_v18 = vmul.f32 0.03125, %v231_v14  ;;  %v326_v19 = vmul.f32 0.03125, %v237_v15  ;;  %v387_v22 = vmul.f32 %v1282_v10, %v1282_v10  ;;  %v389_v23 = vmul.f32 %v1285_v11, %v1285_v11 }
  0xc7   : > { %v1292_v26 = vsub.f32 %v1128_v2, %v324_v18  ;;  %v1295_v27 = vsub.f32 %v1135_v5, %v326_v19  ;;  %v419_v0 = vsel %vm225_vm0, %v387_v22, 0.0  ;;  %v425_v31 = vsel %vm225_vm0, %v389_v23, 0.0 }
  0xc8   : > { %420 = vadd.xlane.f32.xlu0 %v419_v0  ;;  %v240_v1 = vpop.xlane.xlu0 %239  ;;  %v243_v30 = vpop.xlane.xlu1 %242 }
  0xc9   : > { %v327_v34 = vmul.f32 0.03125, %v240_v1  ;;  %v328_v35 = vmul.f32 0.03125, %v243_v30  ;;  %v388_v38 = vmul.f32 %v1292_v26, %v1292_v26  ;;  %v390_v39 = vmul.f32 %v1295_v27, %v1295_v27 }
  0xcb   : > { %v1304_v2 = vsub.f32 %v1142_v8, %v327_v34  ;;  %v1307_v5 = vsub.f32 %v1145_v9, %v328_v35  ;;  %v422_v42 = vsel %vm225_vm0, %v388_v38, 0.0  ;;  %v428_v47 = vsel %vm225_vm0, %v390_v39, 0.0 }
  0xcc   : > { %426 = vadd.xlane.f32.xlu0 %v425_v31  ;;  %423 = vadd.xlane.f32.xlu1 %v422_v42  ;;  %v246_v43 = vpop.xlane.xlu0 %245  ;;  %v249_v46 = vpop.xlane.xlu1 %248 }
  0xcd   : > { %v329_v50 = vmul.f32 0.03125, %v246_v43  ;;  %v330_v51 = vmul.f32 0.03125, %v249_v46  ;;  %v391_v54 = vmul.f32 %v1304_v2, %v1304_v2  ;;  %v392_v8 = vmul.f32 %v1307_v5, %v1307_v5 }
  0xcf   : > { %v1316_v55 = vsub.f32 %v1152_v12, %v329_v50  ;;  %v1319_v9 = vsub.f32 %v1155_v13, %v330_v51  ;;  %v431_v58 = vsel %vm225_vm0, %v391_v54, 0.0  ;;  %v434_v63 = vsel %vm225_vm0, %v392_v8, 0.0 }
  0xd0   : > { %429 = vadd.xlane.f32.xlu1 %v428_v47  ;;  %432 = vadd.xlane.f32.xlu0 %v431_v58  ;;  %v252_v59 = vpop.xlane.xlu0 %251  ;;  %v255_v62 = vpop.xlane.xlu1 %254 }
  0xd1   : > { %v331_v3 = vmul.f32 0.03125, %v252_v59  ;;  %v332_v4 = vmul.f32 0.03125, %v255_v62  ;;  %v393_v6 = vmul.f32 %v1316_v55, %v1316_v55  ;;  %v394_v12 = vmul.f32 %v1319_v9, %v1319_v9 }
  0xd3   : > { %v1328_v7 = vsub.f32 %v1162_v16, %v331_v3  ;;  %v1331_v13 = vsub.f32 %v1165_v17, %v332_v4  ;;  %v437_v14 = vsel %vm225_vm0, %v393_v6, 0.0  ;;  %v440_v19 = vsel %vm225_vm0, %v394_v12, 0.0 }
  0xd4   : > { %435 = vadd.xlane.f32.xlu1 %v434_v63  ;;  %438 = vadd.xlane.f32.xlu0 %v437_v14  ;;  %v258_v15 = vpop.xlane.xlu0 %257  ;;  %v261_v18 = vpop.xlane.xlu1 %260 }
  0xd5   : > { %v333_v22 = vmul.f32 0.03125, %v258_v15  ;;  %v334_v23 = vmul.f32 0.03125, %v261_v18  ;;  %v395_v0 = vmul.f32 %v1328_v7, %v1328_v7  ;;  %v396_v16 = vmul.f32 %v1331_v13, %v1331_v13 }
  0xd7   : > { %v1340_v1 = vsub.f32 %v1172_v20, %v333_v22  ;;  %v1343_v17 = vsub.f32 %v1175_v21, %v334_v23  ;;  %v443_v30 = vsel %vm225_vm0, %v395_v0, 0.0  ;;  %v446_v35 = vsel %vm225_vm0, %v396_v16, 0.0 }
  0xd8   : > { %441 = vadd.xlane.f32.xlu1 %v440_v19  ;;  %444 = vadd.xlane.f32.xlu0 %v443_v30  ;;  %v264_v31 = vpop.xlane.xlu0 %263  ;;  %v267_v34 = vpop.xlane.xlu1 %266 }
  0xd9   : > { %v335_v38 = vmul.f32 0.03125, %v264_v31  ;;  %v336_v39 = vmul.f32 0.03125, %v267_v34  ;;  %v397_v42 = vmul.f32 %v1340_v1, %v1340_v1  ;;  %v398_v20 = vmul.f32 %v1343_v17, %v1343_v17 }
  0xdb   : > { %v1352_v43 = vsub.f32 %v1182_v24, %v335_v38  ;;  %v1355_v21 = vsub.f32 %v1185_v25, %v336_v39  ;;  %v449_v46 = vsel %vm225_vm0, %v397_v42, 0.0  ;;  %v452_v51 = vsel %vm225_vm0, %v398_v20, 0.0 }
  0xdc   : > { %447 = vadd.xlane.f32.xlu1 %v446_v35  ;;  %450 = vadd.xlane.f32.xlu0 %v449_v46  ;;  %v270_v47 = vpop.xlane.xlu0 %269  ;;  %v273_v50 = vpop.xlane.xlu1 %272 }
  0xdd   : > { %v337_v54 = vmul.f32 0.03125, %v270_v47  ;;  %v338_v8 = vmul.f32 0.03125, %v273_v50  ;;  %v399_v58 = vmul.f32 %v1352_v43, %v1352_v43  ;;  %v400_v24 = vmul.f32 %v1355_v21, %v1355_v21 }
  0xdf   : > { %v1364_v59 = vsub.f32 %v1192_v28, %v337_v54  ;;  %v1367_v25 = vsub.f32 %v1195_v29, %v338_v8  ;;  %v455_v62 = vsel %vm225_vm0, %v399_v58, 0.0  ;;  %v458_v4 = vsel %vm225_vm0, %v400_v24, 0.0 }
  0xe0   : > { %453 = vadd.xlane.f32.xlu1 %v452_v51  ;;  %456 = vadd.xlane.f32.xlu0 %v455_v62  ;;  %v276_v63 = vpop.xlane.xlu0 %275  ;;  %v279_v3 = vpop.xlane.xlu1 %278 }
  0xe1   : > { %v339_v6 = vmul.f32 0.03125, %v276_v63  ;;  %v340_v12 = vmul.f32 0.03125, %v279_v3  ;;  %v401_v14 = vmul.f32 %v1364_v59, %v1364_v59  ;;  %v402_v28 = vmul.f32 %v1367_v25, %v1367_v25 }
  0xe3   : > { %v1376_v15 = vsub.f32 %v1202_v32, %v339_v6  ;;  %v1379_v29 = vsub.f32 %v1205_v33, %v340_v12  ;;  %v461_v18 = vsel %vm225_vm0, %v401_v14, 0.0  ;;  %v464_v23 = vsel %vm225_vm0, %v402_v28, 0.0 }
  0xe4   : > { %459 = vadd.xlane.f32.xlu1 %v458_v4  ;;  %462 = vadd.xlane.f32.xlu0 %v461_v18  ;;  %v282_v19 = vpop.xlane.xlu0 %281  ;;  %v285_v22 = vpop.xlane.xlu1 %284 }
  0xe5   : > { %v341_v0 = vmul.f32 0.03125, %v282_v19  ;;  %v342_v16 = vmul.f32 0.03125, %v285_v22  ;;  %v403_v30 = vmul.f32 %v1376_v15, %v1376_v15  ;;  %v404_v32 = vmul.f32 %v1379_v29, %v1379_v29 }
  0xe7   : > { %v1388_v31 = vsub.f32 %v1212_v36, %v341_v0  ;;  %v1391_v33 = vsub.f32 %v1215_v37, %v342_v16  ;;  %v467_v34 = vsel %vm225_vm0, %v403_v30, 0.0  ;;  %v470_v39 = vsel %vm225_vm0, %v404_v32, 0.0 }
  0xe8   : > { %465 = vadd.xlane.f32.xlu1 %v464_v23  ;;  %468 = vadd.xlane.f32.xlu0 %v467_v34  ;;  %v288_v35 = vpop.xlane.xlu0 %287  ;;  %v291_v38 = vpop.xlane.xlu1 %290 }
  0xe9   : > { %v343_v42 = vmul.f32 0.03125, %v288_v35  ;;  %v344_v20 = vmul.f32 0.03125, %v291_v38  ;;  %v405_v46 = vmul.f32 %v1388_v31, %v1388_v31  ;;  %v406_v36 = vmul.f32 %v1391_v33, %v1391_v33 }
  0xeb   : > { %v1400_v47 = vsub.f32 %v1222_v40, %v343_v42  ;;  %v1403_v37 = vsub.f32 %v1225_v41, %v344_v20  ;;  %v473_v50 = vsel %vm225_vm0, %v405_v46, 0.0  ;;  %v476_v8 = vsel %vm225_vm0, %v406_v36, 0.0 }
  0xec   : > { %471 = vadd.xlane.f32.xlu1 %v470_v39  ;;  %474 = vadd.xlane.f32.xlu0 %v473_v50  ;;  %v294_v51 = vpop.xlane.xlu0 %293  ;;  %v297_v54 = vpop.xlane.xlu1 %296 }
  0xed   : > { %v345_v58 = vmul.f32 0.03125, %v294_v51  ;;  %v346_v24 = vmul.f32 0.03125, %v297_v54  ;;  %v407_v62 = vmul.f32 %v1400_v47, %v1400_v47  ;;  %v408_v40 = vmul.f32 %v1403_v37, %v1403_v37 }
  0xef   : > { %v1412_v63 = vsub.f32 %v1232_v44, %v345_v58  ;;  %v1415_v41 = vsub.f32 %v1235_v45, %v346_v24  ;;  %v479_v3 = vsel %vm225_vm0, %v407_v62, 0.0  ;;  %v482_v12 = vsel %vm225_vm0, %v408_v40, 0.0 }
  0xf0   : > { %477 = vadd.xlane.f32.xlu1 %v476_v8  ;;  %480 = vadd.xlane.f32.xlu0 %v479_v3  ;;  %v300_v4 = vpop.xlane.xlu0 %299  ;;  %v303_v6 = vpop.xlane.xlu1 %302 }
  0xf1   : > { %v347_v14 = vmul.f32 0.03125, %v300_v4  ;;  %v348_v28 = vmul.f32 0.03125, %v303_v6  ;;  %v409_v18 = vmul.f32 %v1412_v63, %v1412_v63  ;;  %v410_v44 = vmul.f32 %v1415_v41, %v1415_v41 }
  0xf3   : > { %v1424_v19 = vsub.f32 %v1242_v48, %v347_v14  ;;  %v1427_v45 = vsub.f32 %v1245_v49, %v348_v28  ;;  %v485_v22 = vsel %vm225_vm0, %v409_v18, 0.0  ;;  %v488_v16 = vsel %vm225_vm0, %v410_v44, 0.0 }
  0xf4   : > { %483 = vadd.xlane.f32.xlu1 %v482_v12  ;;  %486 = vadd.xlane.f32.xlu0 %v485_v22  ;;  %v306_v23 = vpop.xlane.xlu0 %305  ;;  %v309_v0 = vpop.xlane.xlu1 %308 }
  0xf5   : > { %v349_v30 = vmul.f32 0.03125, %v306_v23  ;;  %v350_v32 = vmul.f32 0.03125, %v309_v0  ;;  %v411_v34 = vmul.f32 %v1424_v19, %v1424_v19  ;;  %v412_v48 = vmul.f32 %v1427_v45, %v1427_v45 }
  0xf7   : > { %v1436_v35 = vsub.f32 %v1252_v52, %v349_v30  ;;  %v1439_v49 = vsub.f32 %v1255_v53, %v350_v32  ;;  %v491_v38 = vsel %vm225_vm0, %v411_v34, 0.0  ;;  %v494_v20 = vsel %vm225_vm0, %v412_v48, 0.0 }
  0xf8   : > { %489 = vadd.xlane.f32.xlu1 %v488_v16  ;;  %492 = vadd.xlane.f32.xlu0 %v491_v38  ;;  %v312_v39 = vpop.xlane.xlu0 %311  ;;  %v315_v42 = vpop.xlane.xlu1 %314 }
  0xf9   : > { %v351_v46 = vmul.f32 0.03125, %v312_v39  ;;  %v352_v36 = vmul.f32 0.03125, %v315_v42  ;;  %v413_v50 = vmul.f32 %v1436_v35, %v1436_v35  ;;  %v414_v52 = vmul.f32 %v1439_v49, %v1439_v49 }
  0xfb   : > { %v1448_v51 = vsub.f32 %v1262_v56, %v351_v46  ;;  %v1451_v53 = vsub.f32 %v1265_v57, %v352_v36  ;;  %v497_v54 = vsel %vm225_vm0, %v413_v50, 0.0  ;;  %v500_v24 = vsel %vm225_vm0, %v414_v52, 0.0 }
  0xfc   : > { %495 = vadd.xlane.f32.xlu1 %v494_v20  ;;  %498 = vadd.xlane.f32.xlu0 %v497_v54  ;;  %v318_v8 = vpop.xlane.xlu0 %317  ;;  %v321_v58 = vpop.xlane.xlu1 %320 }
  0xfd   : > { %v353_v62 = vmul.f32 0.03125, %v318_v8  ;;  %v354_v40 = vmul.f32 0.03125, %v321_v58  ;;  %v415_v3 = vmul.f32 %v1448_v51, %v1448_v51  ;;  %v416_v56 = vmul.f32 %v1451_v53, %v1451_v53  ;;  %v1478_v58 = vld [vmem:[%s1664_s1] ss:$0 sm:$0xff] }
  0xff   : > { %v1460_v4 = vsub.f32 %v1272_v60, %v353_v62  ;;  %v1463_v57 = vsub.f32 %v1275_v61, %v354_v40  ;;  %v503_v6 = vsel %vm225_vm0, %v415_v3, 0.0  ;;  %v506_v12 = vsel %vm225_vm0, %v416_v56, 0.0 }
 0x100   : > { %501 = vadd.xlane.f32.xlu1 %v500_v24  ;;  %504 = vadd.xlane.f32.xlu0 %v503_v6  ;;  %v1484_v6 = vld [vmem:[%s1665_s2] ss:$0 sm:$0xff] }
 0x101   : > { %v417_v14 = vmul.f32 %v1460_v4, %v1460_v4  ;;  %v418_v28 = vmul.f32 %v1463_v57, %v1463_v57 }
 0x103   : > { %v509_v18 = vsel %vm225_vm0, %v417_v14, 0.0  ;;  %v512_v60 = vsel %vm225_vm0, %v418_v28, 0.0 }
 0x104   : > { %507 = vadd.xlane.f32.xlu1 %v506_v12  ;;  %510 = vadd.xlane.f32.xlu0 %v509_v18 }
 0x108   : > { %513 = vadd.xlane.f32.xlu1 %v512_v60 }
 0x155   : > { %v421_v61 = vpop.xlane.xlu0 %420 }
 0x156   : > { %v515_v44 = vmul.f32 0.03125, %v421_v61 }
 0x158   : > { %v547_v22 = vadd.f32 1e-05, %v515_v44 }
 0x159   : > { %v424_v23 = vpop.xlane.xlu1 %423  ;;  %v427_v0 = vpop.xlane.xlu0 %426 }
 0x15a   : > { %877 = vrsqrt.f32 %v547_v22  ;;  %v516_v16 = vmul.f32 0.03125, %v424_v23  ;;  %v517_v30 = vmul.f32 0.03125, %v427_v0 }
 0x15c   : > { %v548_v32 = vadd.f32 1e-05, %v516_v16  ;;  %v549_v34 = vadd.f32 1e-05, %v517_v30 }
 0x15d   : > { %v430_v48 = vpop.xlane.xlu1 %429  ;;  %v433_v38 = vpop.xlane.xlu0 %432 }
 0x15e   : > { %879 = vrsqrt.f32 %v548_v32  ;;  %v518_v39 = vmul.f32 0.03125, %v430_v48  ;;  %v519_v42 = vmul.f32 0.03125, %v433_v38 }
 0x15f   : > { %881 = vrsqrt.f32 %v549_v34 }
 0x160   : > { %v550_v20 = vadd.f32 1e-05, %v518_v39  ;;  %v551_v46 = vadd.f32 1e-05, %v519_v42 }
 0x161   : > { %v436_v36 = vpop.xlane.xlu1 %435  ;;  %v439_v50 = vpop.xlane.xlu0 %438 }
 0x162   : > { %883 = vrsqrt.f32 %v550_v20  ;;  %v520_v52 = vmul.f32 0.03125, %v436_v36  ;;  %v521_v54 = vmul.f32 0.03125, %v439_v50 }
 0x163   : > { %885 = vrsqrt.f32 %v551_v46 }
 0x164   : > { %v878_v8 = vpop.eup %877  ;;  %v552_v24 = vadd.f32 1e-05, %v520_v52  ;;  %v553_v62 = vadd.f32 1e-05, %v521_v54 }
 0x165   : > { %v611_v40 = vmul.f32 %v878_v8, %v1282_v10  ;;  %v442_v3 = vpop.xlane.xlu1 %441  ;;  %v445_v56 = vpop.xlane.xlu0 %444 }
 0x166   : > { %887 = vrsqrt.f32 %v552_v24  ;;  %v522_v12 = vmul.f32 0.03125, %v442_v3  ;;  %v523_v14 = vmul.f32 0.03125, %v445_v56 }
 0x167   : > { %v650_v28 = vmul.f32 %v1478_v58, %v611_v40  ;;  %889 = vrsqrt.f32 %v553_v62 }
 0x168   : > { %v880_v18 = vpop.eup %879  ;;  %v554_v10 = vadd.f32 1e-05, %v522_v12  ;;  %v555_v60 = vadd.f32 1e-05, %v523_v14 }
 0x169   : > { %v882_v61 = vpop.eup %881  ;;  %v689_v44 = vadd.f32 %v1484_v6, %v650_v28  ;;  %v612_v22 = vmul.f32 %v880_v18, %v1292_v26  ;;  %v448_v23 = vpop.xlane.xlu1 %447 }
 0x16a   : > { %v451_v0 = vpop.xlane.xlu0 %450  ;;  %v613_v16 = vmul.f32 %v882_v61, %v1285_v11  ;;  %891 = vrsqrt.f32 %v554_v10  ;;  %v524_v30 = vmul.f32 0.03125, %v448_v23 }
 0x16b   : > { %v525_v32 = vmul.f32 0.03125, %v451_v0  ;;  %721 = vst.msk [vmem:[%s1490_s6] sm:$0xff] %vm225_vm0, %v689_v44  ;;  %v651_v34 = vmul.f32 %v1478_v58, %v612_v22  ;;  %893 = vrsqrt.f32 %v555_v60 }
 0x16c   : > { %v884_v48 = vpop.eup %883  ;;  %v652_v38 = vmul.f32 %v1478_v58, %v613_v16  ;;  %v556_v39 = vadd.f32 1e-05, %v524_v30 }
 0x16d   : > { %v557_v42 = vadd.f32 1e-05, %v525_v32  ;;  %v886_v26 = vpop.eup %885  ;;  %v690_v20 = vadd.f32 %v1484_v6, %v651_v34  ;;  %v614_v11 = vmul.f32 %v884_v48, %v1295_v27  ;;  %v454_v46 = vpop.xlane.xlu1 %453 }
 0x16e   : > { %v457_v36 = vpop.xlane.xlu0 %456  ;;  %v691_v50 = vadd.f32 %v1484_v6, %v652_v38  ;;  %v615_v52 = vmul.f32 %v886_v26, %v1304_v2  ;;  %895 = vrsqrt.f32 %v556_v39  ;;  %v526_v54 = vmul.f32 0.03125, %v454_v46 }
 0x16f   : > { %722 = vst.msk [vmem:[%s1490_s6 + $0x8] sm:$0xff] %vm225_vm0, %v690_v20  ;;  %v653_v8 = vmul.f32 %v1478_v58, %v614_v11  ;;  %897 = vrsqrt.f32 %v557_v42  ;;  %v527_v24 = vmul.f32 0.03125, %v457_v36 }
 0x170   : > { %v888_v62 = vpop.eup %887  ;;  %723 = vst.msk [vmem:[%s1490_s6 + $0x10] sm:$0xff] %vm225_vm0, %v691_v50  ;;  %v654_v27 = vmul.f32 %v1478_v58, %v615_v52  ;;  %v558_v40 = vadd.f32 1e-05, %v526_v54 }
 0x171   : > { %v890_v3 = vpop.eup %889  ;;  %v692_v56 = vadd.f32 %v1484_v6, %v653_v8  ;;  %v616_v2 = vmul.f32 %v888_v62, %v1307_v5  ;;  %v559_v12 = vadd.f32 1e-05, %v527_v24  ;;  %v460_v14 = vpop.xlane.xlu1 %459 }
 0x172   : > { %v463_v28 = vpop.xlane.xlu0 %462  ;;  %v693_v18 = vadd.f32 %v1484_v6, %v654_v27  ;;  %v617_v10 = vmul.f32 %v890_v3, %v1316_v55  ;;  %899 = vrsqrt.f32 %v558_v40  ;;  %v528_v60 = vmul.f32 0.03125, %v460_v14 }
 0x173   : > { %724 = vst.msk [vmem:[%s1490_s6 + $0x18] sm:$0xff] %vm225_vm0, %v692_v56  ;;  %v655_v61 = vmul.f32 %v1478_v58, %v616_v2  ;;  %901 = vrsqrt.f32 %v559_v12  ;;  %v529_v44 = vmul.f32 0.03125, %v463_v28 }
 0x174   : > { %v892_v22 = vpop.eup %891  ;;  %725 = vst.msk [vmem:[%s1490_s6 + $0x20] sm:$0xff] %vm225_vm0, %v693_v18  ;;  %v656_v5 = vmul.f32 %v1478_v58, %v617_v10  ;;  %v560_v23 = vadd.f32 1e-05, %v528_v60 }
 0x175   : > { %v894_v0 = vpop.eup %893  ;;  %v694_v16 = vadd.f32 %v1484_v6, %v655_v61  ;;  %v618_v55 = vmul.f32 %v892_v22, %v1319_v9  ;;  %v561_v30 = vadd.f32 1e-05, %v529_v44  ;;  %v466_v32 = vpop.xlane.xlu1 %465 }
 0x176   : > { %v469_v34 = vpop.xlane.xlu0 %468  ;;  %v695_v48 = vadd.f32 %v1484_v6, %v656_v5  ;;  %v619_v38 = vmul.f32 %v894_v0, %v1328_v7  ;;  %903 = vrsqrt.f32 %v560_v23  ;;  %v530_v39 = vmul.f32 0.03125, %v466_v32 }
 0x177   : > { %726 = vst.msk [vmem:[%s1490_s6 + $0x28] sm:$0xff] %vm225_vm0, %v694_v16  ;;  %v657_v42 = vmul.f32 %v1478_v58, %v618_v55  ;;  %905 = vrsqrt.f32 %v561_v30  ;;  %v531_v26 = vmul.f32 0.03125, %v469_v34 }
 0x178   : > { %v896_v20 = vpop.eup %895  ;;  %727 = vst.msk [vmem:[%s1490_s6 + $0x30] sm:$0xff] %vm225_vm0, %v695_v48  ;;  %v658_v9 = vmul.f32 %v1478_v58, %v619_v38  ;;  %v562_v11 = vadd.f32 1e-05, %v530_v39 }
 0x179   : > { %v898_v46 = vpop.eup %897  ;;  %v696_v36 = vadd.f32 %v1484_v6, %v657_v42  ;;  %v620_v7 = vmul.f32 %v896_v20, %v1331_v13  ;;  %v563_v50 = vadd.f32 1e-05, %v531_v26  ;;  %v472_v52 = vpop.xlane.xlu1 %471 }
 0x17a   : > { %v475_v54 = vpop.xlane.xlu0 %474  ;;  %v697_v8 = vadd.f32 %v1484_v6, %v658_v9  ;;  %v621_v24 = vmul.f32 %v898_v46, %v1340_v1  ;;  %907 = vrsqrt.f32 %v562_v11  ;;  %v532_v62 = vmul.f32 0.03125, %v472_v52 }
 0x17b   : > { %728 = vst.msk [vmem:[%s1490_s6 + $0x38] sm:$0xff] %vm225_vm0, %v696_v36  ;;  %v659_v27 = vmul.f32 %v1478_v58, %v620_v7  ;;  %909 = vrsqrt.f32 %v563_v50  ;;  %v533_v40 = vmul.f32 0.03125, %v475_v54 }
 0x17c   : > { %v900_v3 = vpop.eup %899  ;;  %729 = vst.msk [vmem:[%s1490_s6 + $0x40] sm:$0xff] %vm225_vm0, %v697_v8  ;;  %v660_v13 = vmul.f32 %v1478_v58, %v621_v24  ;;  %v564_v56 = vadd.f32 1e-05, %v532_v62 }
 0x17d   : > { %v902_v2 = vpop.eup %901  ;;  %v698_v12 = vadd.f32 %v1484_v6, %v659_v27  ;;  %v622_v1 = vmul.f32 %v900_v3, %v1343_v17  ;;  %v565_v14 = vadd.f32 1e-05, %v533_v40  ;;  %v478_v28 = vpop.xlane.xlu1 %477 }
 0x17e   : > { %v481_v18 = vpop.xlane.xlu0 %480  ;;  %v699_v10 = vadd.f32 %v1484_v6, %v660_v13  ;;  %v623_v60 = vmul.f32 %v902_v2, %v1352_v43  ;;  %911 = vrsqrt.f32 %v564_v56  ;;  %v534_v61 = vmul.f32 0.03125, %v478_v28 }
 0x17f   : > { %730 = vst.msk [vmem:[%s1490_s6 + $0x48] sm:$0xff] %vm225_vm0, %v698_v12  ;;  %v661_v44 = vmul.f32 %v1478_v58, %v622_v1  ;;  %913 = vrsqrt.f32 %v565_v14  ;;  %v535_v22 = vmul.f32 0.03125, %v481_v18 }
 0x180   : > { %v904_v5 = vpop.eup %903  ;;  %731 = vst.msk [vmem:[%s1490_s6 + $0x50] sm:$0xff] %vm225_vm0, %v699_v10  ;;  %v662_v17 = vmul.f32 %v1478_v58, %v623_v60  ;;  %v566_v23 = vadd.f32 1e-05, %v534_v61 }
 0x181   : > { %v906_v0 = vpop.eup %905  ;;  %v700_v16 = vadd.f32 %v1484_v6, %v661_v44  ;;  %v624_v43 = vmul.f32 %v904_v5, %v1355_v21  ;;  %v567_v55 = vadd.f32 1e-05, %v535_v22  ;;  %v484_v30 = vpop.xlane.xlu1 %483 }
 0x182   : > { %v487_v32 = vpop.xlane.xlu0 %486  ;;  %v701_v34 = vadd.f32 %v1484_v6, %v662_v17  ;;  %v625_v48 = vmul.f32 %v906_v0, %v1364_v59  ;;  %915 = vrsqrt.f32 %v566_v23  ;;  %v536_v38 = vmul.f32 0.03125, %v484_v30 }
 0x183   : > { %732 = vst.msk [vmem:[%s1490_s6 + $0x58] sm:$0xff] %vm225_vm0, %v700_v16  ;;  %v663_v39 = vmul.f32 %v1478_v58, %v624_v43  ;;  %917 = vrsqrt.f32 %v567_v55  ;;  %v537_v42 = vmul.f32 0.03125, %v487_v32 }
 0x184   : > { %v908_v26 = vpop.eup %907  ;;  %733 = vst.msk [vmem:[%s1490_s6 + $0x60] sm:$0xff] %vm225_vm0, %v701_v34  ;;  %v664_v21 = vmul.f32 %v1478_v58, %v625_v48  ;;  %v568_v20 = vadd.f32 1e-05, %v536_v38 }
 0x185   : > { %v910_v9 = vpop.eup %909  ;;  %v702_v11 = vadd.f32 %v1484_v6, %v663_v39  ;;  %v626_v59 = vmul.f32 %v908_v26, %v1367_v25  ;;  %v569_v46 = vadd.f32 1e-05, %v537_v42  ;;  %v490_v36 = vpop.xlane.xlu1 %489 }
 0x186   : > { %v493_v7 = vpop.xlane.xlu0 %492  ;;  %v703_v50 = vadd.f32 %v1484_v6, %v664_v21  ;;  %v627_v52 = vmul.f32 %v910_v9, %v1376_v15  ;;  %919 = vrsqrt.f32 %v568_v20  ;;  %v538_v54 = vmul.f32 0.03125, %v490_v36 }
 0x187   : > { %734 = vst.msk [vmem:[%s1490_s6 + $0x68] sm:$0xff] %vm225_vm0, %v702_v11  ;;  %v665_v8 = vmul.f32 %v1478_v58, %v626_v59  ;;  %921 = vrsqrt.f32 %v569_v46  ;;  %v539_v24 = vmul.f32 0.03125, %v493_v7 }
 0x188   : > { %v912_v62 = vpop.eup %911  ;;  %735 = vst.msk [vmem:[%s1490_s6 + $0x70] sm:$0xff] %vm225_vm0, %v703_v50  ;;  %v666_v25 = vmul.f32 %v1478_v58, %v627_v52  ;;  %v570_v27 = vadd.f32 1e-05, %v538_v54 }
 0x189   : > { %v914_v40 = vpop.eup %913  ;;  %v704_v3 = vadd.f32 %v1484_v6, %v665_v8  ;;  %v628_v15 = vmul.f32 %v912_v62, %v1379_v29  ;;  %v571_v13 = vadd.f32 1e-05, %v539_v24  ;;  %v496_v56 = vpop.xlane.xlu1 %495 }
 0x18a   : > { %v499_v2 = vpop.xlane.xlu0 %498  ;;  %v705_v12 = vadd.f32 %v1484_v6, %v666_v25  ;;  %v629_v1 = vmul.f32 %v914_v40, %v1388_v31  ;;  %923 = vrsqrt.f32 %v570_v27  ;;  %v540_v14 = vmul.f32 0.03125, %v496_v56 }
 0x18b   : > { %736 = vst.msk [vmem:[%s1490_s6 + $0x78] sm:$0xff] %vm225_vm0, %v704_v3  ;;  %v667_v28 = vmul.f32 %v1478_v58, %v628_v15  ;;  %925 = vrsqrt.f32 %v571_v13  ;;  %v541_v18 = vmul.f32 0.03125, %v499_v2 }
 0x18c   : > { %v916_v10 = vpop.eup %915  ;;  %737 = vst.msk [vmem:[%s1490_s6 + $0x80] sm:$0xff] %vm225_vm0, %v705_v12  ;;  %v668_v29 = vmul.f32 %v1478_v58, %v629_v1  ;;  %v572_v60 = vadd.f32 1e-05, %v540_v14 }
 0x18d   : > { %v918_v61 = vpop.eup %917  ;;  %v706_v44 = vadd.f32 %v1484_v6, %v667_v28  ;;  %v630_v31 = vmul.f32 %v916_v10, %v1391_v33  ;;  %v573_v22 = vadd.f32 1e-05, %v541_v18  ;;  %v502_v5 = vpop.xlane.xlu1 %501 }
 0x18e   : > { %v505_v17 = vpop.xlane.xlu0 %504  ;;  %v707_v23 = vadd.f32 %v1484_v6, %v668_v29  ;;  %v631_v0 = vmul.f32 %v918_v61, %v1400_v47  ;;  %927 = vrsqrt.f32 %v572_v60  ;;  %v542_v16 = vmul.f32 0.03125, %v502_v5 }
 0x18f   : > { %738 = vst.msk [vmem:[%s1490_s6 + $0x88] sm:$0xff] %vm225_vm0, %v706_v44  ;;  %v669_v43 = vmul.f32 %v1478_v58, %v630_v31  ;;  %929 = vrsqrt.f32 %v573_v22  ;;  %v543_v55 = vmul.f32 0.03125, %v505_v17 }
 0x190   : > { %v920_v30 = vpop.eup %919  ;;  %739 = vst.msk [vmem:[%s1490_s6 + $0x90] sm:$0xff] %vm225_vm0, %v707_v23  ;;  %v670_v33 = vmul.f32 %v1478_v58, %v631_v0  ;;  %v574_v32 = vadd.f32 1e-05, %v542_v16 }
 0x191   : > { %v922_v34 = vpop.eup %921  ;;  %v708_v48 = vadd.f32 %v1484_v6, %v669_v43  ;;  %v632_v47 = vmul.f32 %v920_v30, %v1403_v37  ;;  %v575_v38 = vadd.f32 1e-05, %v543_v55  ;;  %v508_v39 = vpop.xlane.xlu1 %507 }
 0x192   : > { %v511_v42 = vpop.xlane.xlu0 %510  ;;  %v709_v26 = vadd.f32 %v1484_v6, %v670_v33  ;;  %v633_v21 = vmul.f32 %v922_v34, %v1412_v63  ;;  %931 = vrsqrt.f32 %v574_v32  ;;  %v544_v20 = vmul.f32 0.03125, %v508_v39 }
 0x193   : > { %740 = vst.msk [vmem:[%s1490_s6 + $0x98] sm:$0xff] %vm225_vm0, %v708_v48  ;;  %v671_v9 = vmul.f32 %v1478_v58, %v632_v47  ;;  %933 = vrsqrt.f32 %v575_v38  ;;  %v545_v11 = vmul.f32 0.03125, %v511_v42 }
 0x194   : > { %v924_v59 = vpop.eup %923  ;;  %741 = vst.msk [vmem:[%s1490_s6 + $0xa0] sm:$0xff] %vm225_vm0, %v709_v26  ;;  %v672_v37 = vmul.f32 %v1478_v58, %v633_v21  ;;  %v576_v46 = vadd.f32 1e-05, %v544_v20 }
 0x195   : > { %v926_v36 = vpop.eup %925  ;;  %v710_v7 = vadd.f32 %v1484_v6, %v671_v9  ;;  %v634_v63 = vmul.f32 %v924_v59, %v1415_v41  ;;  %v577_v50 = vadd.f32 1e-05, %v545_v11  ;;  %v514_v52 = vpop.xlane.xlu1 %513 }
 0x196   : > { %v711_v54 = vadd.f32 %v1484_v6, %v672_v37  ;;  %v635_v8 = vmul.f32 %v926_v36, %v1424_v19  ;;  %935 = vrsqrt.f32 %v576_v46  ;;  %v546_v24 = vmul.f32 0.03125, %v514_v52 }
 0x197   : > { %742 = vst.msk [vmem:[%s1490_s6 + $0xa8] sm:$0xff] %vm225_vm0, %v710_v7  ;;  %v673_v62 = vmul.f32 %v1478_v58, %v634_v63  ;;  %937 = vrsqrt.f32 %v577_v50 }
 0x198   : > { %v928_v25 = vpop.eup %927  ;;  %743 = vst.msk [vmem:[%s1490_s6 + $0xb0] sm:$0xff] %vm225_vm0, %v711_v54  ;;  %v674_v41 = vmul.f32 %v1478_v58, %v635_v8  ;;  %v578_v27 = vadd.f32 1e-05, %v546_v24 }
 0x199   : > { %v930_v40 = vpop.eup %929  ;;  %v712_v3 = vadd.f32 %v1484_v6, %v673_v62  ;;  %v636_v19 = vmul.f32 %v928_v25, %v1427_v45 }
 0x19a   : > { %v713_v15 = vadd.f32 %v1484_v6, %v674_v41  ;;  %v637_v13 = vmul.f32 %v930_v40, %v1436_v35  ;;  %939 = vrsqrt.f32 %v578_v27 }
 0x19b   : > { %744 = vst.msk [vmem:[%s1490_s6 + $0xb8] sm:$0xff] %vm225_vm0, %v712_v3  ;;  %v675_v56 = vmul.f32 %v1478_v58, %v636_v19 }
 0x19c   : > { %v932_v2 = vpop.eup %931  ;;  %745 = vst.msk [vmem:[%s1490_s6 + $0xc0] sm:$0xff] %vm225_vm0, %v713_v15  ;;  %v676_v12 = vmul.f32 %v1478_v58, %v637_v13 }
 0x19d   : > { %v934_v1 = vpop.eup %933  ;;  %v714_v14 = vadd.f32 %v1484_v6, %v675_v56  ;;  %v638_v45 = vmul.f32 %v932_v2, %v1439_v49 }
 0x19e   : > { %v715_v28 = vadd.f32 %v1484_v6, %v676_v12  ;;  %v639_v35 = vmul.f32 %v934_v1, %v1448_v51 }
 0x19f   : > { %746 = vst.msk [vmem:[%s1490_s6 + $0xc8] sm:$0xff] %vm225_vm0, %v714_v14  ;;  %v677_v18 = vmul.f32 %v1478_v58, %v638_v45 }
 0x1a0   : > { %v936_v10 = vpop.eup %935  ;;  %747 = vst.msk [vmem:[%s1490_s6 + $0xd0] sm:$0xff] %vm225_vm0, %v715_v28  ;;  %v678_v29 = vmul.f32 %v1478_v58, %v639_v35 }
 0x1a1   : > { %v938_v60 = vpop.eup %937  ;;  %v716_v61 = vadd.f32 %v1484_v6, %v677_v18  ;;  %v640_v49 = vmul.f32 %v936_v10, %v1451_v53 }
 0x1a2   : > { %v717_v44 = vadd.f32 %v1484_v6, %v678_v29  ;;  %v641_v51 = vmul.f32 %v938_v60, %v1460_v4 }
 0x1a3   : > { %748 = vst.msk [vmem:[%s1490_s6 + $0xd8] sm:$0xff] %vm225_vm0, %v716_v61  ;;  %v679_v31 = vmul.f32 %v1478_v58, %v640_v49 }
 0x1a4   : > { %v940_v22 = vpop.eup %939  ;;  %749 = vst.msk [vmem:[%s1490_s6 + $0xe0] sm:$0xff] %vm225_vm0, %v717_v44  ;;  %v680_v5 = vmul.f32 %v1478_v58, %v641_v51 }
 0x1a5   : > { %v718_v17 = vadd.f32 %v1484_v6, %v679_v31  ;;  %v642_v23 = vmul.f32 %v940_v22, %v1463_v57 }
 0x1a6   : > { %v719_v0 = vadd.f32 %v1484_v6, %v680_v5 }
 0x1a7   : > { %750 = vst.msk [vmem:[%s1490_s6 + $0xe8] sm:$0xff] %vm225_vm0, %v718_v17  ;;  %v681_v53 = vmul.f32 %v1478_v58, %v642_v23 }
 0x1a8   : > { %751 = vst.msk [vmem:[%s1490_s6 + $0xf0] sm:$0xff] %vm225_vm0, %v719_v0 }
 0x1a9   : > { %v720_v4 = vadd.f32 %v1484_v6, %v681_v53 }
 0x1ab   : > { %752 = vst.msk [vmem:[%s1490_s6 + $0xf8] sm:$0xff] %vm225_vm0, %v720_v4 }
 0x1ac PF: > { %p13_p8 = scmp.ge.s32.totalorder %s1050_s17, 4   ;;  %s1670_s12 = smov %s997_s13 }
 0x1ad   : > { %s1671_s13 = smov %s1001_s14  ;;  %s1672_s14 = smov %s1060_s20 }
 0x1ae   : > { %s1673_s15 = smov %s1050_s17  ;;  %15 = sbr.rel (!%p13_p8) target bundleno = 3 (0x3), region = 72 }
 0x1b5   :  { %775 = vsyncpa [#allocation3], 1 }
 0x1b6   :  { %777 = vsyncpa [#allocation3 + $0x1], 1 }

// kernel: afno_cast_latent_forward.7
= control target key start
LH: loop header
LB: loop body
LE: loop exit
PB: predicated region body
PF: predicated region fallthrough
CT: control target
= control target key end

     0   :  { %s2920_s25 = smov 0   ;;  %s3689_s0 = inlined_call_operand.vmem [shape: f32[288,32], index: 0, kind: input, shape index: {}]   ;;  %s3690_s1 = inlined_call_operand.vmem [shape: f32[288,32], index: 1, kind: input, shape index: {}]   ;;  %s3691_s2 = inlined_call_operand.vmem [shape: f32[32,32], index: 2, kind: input, shape index: {}]   ;;  %s3692_s3 = inlined_call_operand.vmem [shape: f32[32,32], index: 3, kind: input, shape index: {}]   ;;  %s3693_s4 = inlined_call_operand.vmem [shape: f32[32,32], index: 4, kind: input, shape index: {}]   ;;  %s3694_s5 = inlined_call_operand.vmem [shape: f32[1,32], index: 5, kind: input, shape index: {}]   ;;  %s3695_s6 = inlined_call_operand.vmem [shape: f32[1,32], index: 6, kind: input, shape index: {}]   ;;  %s3696_s7 = inlined_call_operand.vmem [shape: f32[32,32], index: 7, kind: input, shape index: {}]   ;;  %s3697_s8 = inlined_call_operand.vmem [shape: f32[32,32], index: 8, kind: input, shape index: {}]   ;;  %s3698_s9 = inlined_call_operand.vmem [shape: f32[32,32], index: 9, kind: input, shape index: {}]   ;;  %s3699_s10 = inlined_call_operand.vmem [shape: f32[1,32], index: 10, kind: input, shape index: {}]   ;;  %s3700_s11 = inlined_call_operand.vmem [shape: f32[1,32], index: 11, kind: input, shape index: {}]   ;;  %s3701_s12 = inlined_call_operand.vmem [shape: f32[288,32], index: 12, kind: output, shape index: {0}]   ;;  %s3702_s13 = inlined_call_operand.vmem [shape: f32[288,32], index: 13, kind: output, shape index: {1}]  }
   0x1 LB: > { %s2285_s26 = sadd.s32 4294967295, %s2848_s25   ;;  %p2289_p0 = scmp.ge.s32.totalorder %s2848_s25, 1  ;;  %s2848_s25 = sphi %s2920_s25, %s24_s25  }
   0x2   : > { %p402_p1 = scmp.lt.s32.totalorder %s2848_s25, 3 }
   0x4   : > { %p403_p2 = pnand %p2289_p0, %p402_p1 }
   0x5   : > { %v534_v0 = vld [vmem:[%s3691_s2] sm:$0xff] (!%p403_p2)  ;;  %v535_v1 = vld [vmem:[%s3691_s2 + $0x8] sm:$0xff] (!%p403_p2)  ;;  %s456_s16 = smul.u32 (!%p403_p2), 18, %s2285_s26  ;;  %v536_v5 = vld [vmem:[%s3691_s2 + $0x10] sm:$0xff] (!%p403_p2)  ;;  %vm538_vm0 = vcmask (!%p403_p2), 261120  }
   0x6   : > { %406 = sbr.rel (%p403_p2) target bundleno = 569 (0x239), region = 68  ;;  %v748_v2 = vld [vmem:[%s3692_s3] sm:$0xff] (!%p403_p2)  ;;  %v2786_v3 = vpack.c.bf16 (!%p403_p2), %v535_v1, %v534_v0  ;;  %v749_v4 = vld [vmem:[%s3692_s3 + $0x8] sm:$0xff] (!%p403_p2)  ;;  %v537_v6 = vld [vmem:[%s3691_s2 + $0x18] sm:$0xff] (!%p403_p2) }
   0x7   : > { %v2794_v7 = vpack.c.bf16 (!%p403_p2), %v749_v4, %v748_v2  ;;  %v2790_v8 = vpack.c.bf16 (!%p403_p2), %v537_v6, %v536_v5  ;;  %v750_v9 = vld [vmem:[%s3692_s3 + $0x10] sm:$0xff] (!%p403_p2)  ;;  %v751_v10 = vld [vmem:[%s3692_s3 + $0x18] sm:$0xff] (!%p403_p2)  ;;  %p457_p3 = scmp.lt.s32.totalorder (!%p403_p2), %s456_s16, 35  ;;  %v961_v12 = vld [vmem:[%s3693_s4] sm:$0xff] (!%p403_p2) }
   0x8   : > { %2787 = vmatprep.subr.bf16.mxu0 (!%p403_p2), %v2786_v3  ;;  %v2798_v11 = vpack.c.bf16 (!%p403_p2), %v751_v10, %v750_v9  ;;  %v962_v13 = vld [vmem:[%s3693_s4 + $0x8] sm:$0xff] (!%p403_p2)  ;;  %v963_v15 = vld [vmem:[%s3693_s4 + $0x10] sm:$0xff] (!%p403_p2)  ;;  %v964_v16 = vld [vmem:[%s3693_s4 + $0x18] sm:$0xff] (!%p403_p2) }
   0x9   : > { %2789 = vmatpush3.bf16.msra.mxu0 (!%p403_p2), %v2786_v3  ;;  %2795 = vmatprep.subr.bf16.mxu1 (!%p403_p2), %v2794_v7  ;;  %v2802_v14 = vpack.c.bf16 (!%p403_p2), %v962_v13, %v961_v12  ;;  %v2806_v29 = vpack.c.bf16 (!%p403_p2), %v964_v16, %v963_v15  ;;  %v1315_v9 = vld [vmem:[%s3696_s7 + $0x8] sm:$0xff] (!%p403_p2)  ;;  %v1317_v12 = vld [vmem:[%s3696_s7 + $0x18] sm:$0xff] (!%p403_p2) }
   0xa   : > { %2797 = vmatpush3.bf16.msra.mxu1 (!%p403_p2), %v2794_v7  ;;  %2791 = vmatprep.subr.bf16.mxu0 (!%p403_p2), %v2790_v8  ;;  %v1528_v15 = vld [vmem:[%s3697_s8 + $0x8] sm:$0xff] (!%p403_p2) }
   0xb   : > { %2799 = vmatprep.subr.bf16.mxu1 (!%p403_p2), %v2798_v11 }
   0xd   : > { %s3707_s16 = smov (!%p457_p3, %s456_s16), 35  ;;  %2793 = vmatpush3.bf16.msra.mxu0 %v2790_v8  ;;  %v1314_v8 = vld [vmem:[%s3696_s7] sm:$0xff] }
   0xe   : > { %s2958_s15 = sshll.u32 %s3707_s16, 3  ;;  %2801 = vmatpush3.bf16.msra.mxu1 %v2798_v11  ;;  %2803 = vmatprep.subr.bf16.mxu0 %v2802_v14  ;;  %v2810_v10 = vpack.c.bf16 %v1315_v9, %v1314_v8  ;;  %v1316_v11 = vld [vmem:[%s3696_s7 + $0x10] sm:$0xff] }
   0xf   : > { %s2964_s19 = scalar_lea.vmem %s3689_s0, %s2958_s15  ;;  %s2970_s22 = scalar_lea.vmem %s3690_s1, %s2958_s15  ;;  %v2814_v13 = vpack.c.bf16 %v1317_v12, %v1316_v11  ;;  %v3228_v12 = vld [vmem:[%s3694_s5] ss:$0 sm:$0xff] }
  0x10   : > { %v2979_v17 = vld [vmem:[%s2964_s19] sm:$0xff]  ;;  %v2983_v19 = vld [vmem:[%s2964_s19 + $0x8] sm:$0xff]  ;;  %v2989_v22 = vld [vmem:[%s2964_s19 + $0x10] sm:$0xff]  ;;  %2811 = vmatprep.subr.bf16.mxu1 %v2810_v10  ;;  %s3506_s29 = scalar_lea.vmem %s3701_s12, %s2958_s15 }
  0x11   : > { %v498_v18 = vld [vmem:[%s2970_s22] sm:$0xff]  ;;  %v499_v21 = vld [vmem:[%s2970_s22 + $0x8] sm:$0xff]  ;;  %v500_v23 = vld [vmem:[%s2970_s22 + $0x10] sm:$0xff] }
  0x12   : > { %v516_v20 = vadd.f32 %v498_v18, %v2979_v17  ;;  %2619 = vmatprep.mubr.msk.f32.mxu1 %vm538_vm0, %v498_v18  ;;  %v517_v24 = vadd.f32 %v499_v21, %v2983_v19  ;;  %v518_v25 = vadd.f32 %v500_v23, %v2989_v22  ;;  %v2995_v26 = vld [vmem:[%s2964_s19 + $0x18] sm:$0xff]  ;;  %v2999_v28 = vld [vmem:[%s2964_s19 + $0x20] sm:$0xff]  ;;  %v3009_v33 = vld [vmem:[%s2964_s19 + $0x28] sm:$0xff] }
  0x13   : > { %v501_v27 = vld [vmem:[%s2970_s22 + $0x18] sm:$0xff]  ;;  %v502_v30 = vld [vmem:[%s2970_s22 + $0x20] sm:$0xff]  ;;  %2620 = vmatmul.mubr.msk.f32.vlgmr.msra.gmra.mrb[0].mxu1 %vm538_vm0, %v499_v21  ;;  %v503_v34 = vld [vmem:[%s2970_s22 + $0x28] sm:$0xff] }
  0x14   : > { %2584 = vmatprep.mubr.msk.f32.mxu0 %vm538_vm0, %v516_v20  ;;  %v519_v31 = vadd.f32 %v501_v27, %v2995_v26  ;;  %v520_v32 = vadd.f32 %v502_v30, %v2999_v28  ;;  %2622 = vmatprep.mubr.msk.f32.mxu1 %vm538_vm0, %v500_v23  ;;  %v3014_v35 = vld [vmem:[%s2964_s19 + $0x30] sm:$0xff]  ;;  %v521_v37 = vadd.f32 %v503_v34, %v3009_v33  ;;  %v3024_v39 = vld [vmem:[%s2964_s19 + $0x38] sm:$0xff]  ;;  %v3028_v41 = vld [vmem:[%s2964_s19 + $0x40] sm:$0xff] }
  0x15   : > { %2585 = vmatmul.mubr.msk.f32.vlgmr.msra.gmra.mrb[0].mxu0 %vm538_vm0, %v517_v24  ;;  %v504_v36 = vld [vmem:[%s2970_s22 + $0x30] sm:$0xff]  ;;  %v505_v40 = vld [vmem:[%s2970_s22 + $0x38] sm:$0xff]  ;;  %v506_v42 = vld [vmem:[%s2970_s22 + $0x40] sm:$0xff]  ;;  %2813 = vmatpush3.bf16.msra.mxu1 %v2810_v10 }
  0x16   : > { %2805 = vmatpush3.bf16.msra.mxu0 %v2802_v14  ;;  %2587 = vmatprep.mubr.msk.f32.mxu0 %vm538_vm0, %v518_v25  ;;  %v522_v38 = vadd.f32 %v504_v36, %v3014_v35  ;;  %v523_v43 = vadd.f32 %v505_v40, %v3024_v39  ;;  %v524_v44 = vadd.f32 %v506_v42, %v3028_v41  ;;  %v489_v45 = vld [vmem:[%s2964_s19 + $0x48] sm:$0xff]  ;;  %v490_v47 = vld [vmem:[%s2964_s19 + $0x50] sm:$0xff]  ;;  %v491_v51 = vld [vmem:[%s2964_s19 + $0x58] sm:$0xff] }
  0x17   : > { %2807 = vmatprep.subr.bf16.mxu0 %v2806_v29  ;;  %2623 = vmatmul.mubr.msk.f32.gmra.mrb[2].mxu1 %vm538_vm0, %v501_v27  ;;  %v507_v46 = vld [vmem:[%s2970_s22 + $0x48] sm:$0xff]  ;;  %v508_v48 = vld [vmem:[%s2970_s22 + $0x50] sm:$0xff]  ;;  %v509_v52 = vld [vmem:[%s2970_s22 + $0x58] sm:$0xff] }
  0x18   : > { %2625 = vmatprep.mubr.msk.f32.mxu1 %vm538_vm0, %v502_v30  ;;  %v525_v49 = vadd.f32 %v507_v46, %v489_v45  ;;  %v526_v50 = vadd.f32 %v508_v48, %v490_v47  ;;  %v492_v53 = vld [vmem:[%s2964_s19 + $0x60] sm:$0xff]  ;;  %v527_v55 = vadd.f32 %v509_v52, %v491_v51  ;;  %v493_v57 = vld [vmem:[%s2964_s19 + $0x68] sm:$0xff]  ;;  %v494_v59 = vld [vmem:[%s2964_s19 + $0x70] sm:$0xff]  ;;  %2815 = vmatprep.subr.bf16.mxu1 %v2814_v13 }
  0x19   : > { %2588 = vmatmul.mubr.msk.f32.gmra.mrb[2].mxu0 %vm538_vm0, %v519_v31  ;;  %v510_v54 = vld [vmem:[%s2970_s22 + $0x60] sm:$0xff]  ;;  %v511_v58 = vld [vmem:[%s2970_s22 + $0x68] sm:$0xff]  ;;  %v512_v60 = vld [vmem:[%s2970_s22 + $0x70] sm:$0xff]  ;;  %2817 = vmatpush3.bf16.msra.mxu1 %v2814_v13 }
  0x1a   : > { %2590 = vmatprep.mubr.msk.f32.mxu0 %vm538_vm0, %v520_v32  ;;  %2809 = vmatpush3.bf16.msra.mxu0 %v2806_v29  ;;  %v528_v56 = vadd.f32 %v510_v54, %v492_v53  ;;  %v529_v61 = vadd.f32 %v511_v58, %v493_v57  ;;  %v530_v62 = vadd.f32 %v512_v60, %v494_v59  ;;  %v495_v63 = vld [vmem:[%s2964_s19 + $0x78] sm:$0xff]  ;;  %v496_v1 = vld [vmem:[%s2964_s19 + $0x80] sm:$0xff]  ;;  %v497_v5 = vld [vmem:[%s2964_s19 + $0x88] sm:$0xff]  ;;  %s3617_s19 = scalar_lea.vmem %s3702_s13, %s2958_s15 }
  0x1b   : > { %2626 = vmatmul.mubr.msk.f32.gmra.mrb[4].mxu1 %vm538_vm0, %v503_v34  ;;  %v513_v0 = vld [vmem:[%s2970_s22 + $0x78] sm:$0xff]  ;;  %v514_v2 = vld [vmem:[%s2970_s22 + $0x80] sm:$0xff]  ;;  %v515_v6 = vld [vmem:[%s2970_s22 + $0x88] sm:$0xff] }
  0x1c   : > { %2628 = vmatprep.mubr.msk.f32.mxu1 %vm538_vm0, %v504_v36  ;;  %v531_v3 = vadd.f32 %v513_v0, %v495_v63  ;;  %v532_v4 = vadd.f32 %v514_v2, %v496_v1  ;;  %v533_v7 = vadd.f32 %v515_v6, %v497_v5  ;;  %v1527_v14 = vld [vmem:[%s3697_s8] sm:$0xff]  ;;  %v1530_v18 = vld [vmem:[%s3697_s8 + $0x18] sm:$0xff]  ;;  %v1741_v21 = vld [vmem:[%s3698_s9 + $0x8] sm:$0xff] }
  0x1d   : > { %2591 = vmatmul.mubr.msk.f32.gmra.mrb[4].mxu0 %vm538_vm0, %v521_v37  ;;  %v2818_v16 = vpack.c.bf16 %v1528_v15, %v1527_v14  ;;  %v1740_v20 = vld [vmem:[%s3698_s9] sm:$0xff] }
  0x1e   : > { %2593 = vmatprep.mubr.msk.f32.mxu0 %vm538_vm0, %v522_v38  ;;  %v3235_v15 = vld [vmem:[%s3695_s6] ss:$0 sm:$0xff] }
  0x1f   : > { %2629 = vmatmul.mubr.msk.f32.gmra.mrb[6].mxu1 %vm538_vm0, %v505_v40  ;;  %2819 = vmatprep.subr.bf16.mxu0 %v2818_v16 }
  0x20   : > { %2631 = vmatprep.mubr.msk.f32.mxu1 %vm538_vm0, %v506_v42 }
  0x21   : > { %2594 = vmatmul.mubr.msk.f32.gmra.mrb[6].mxu0 %vm538_vm0, %v523_v43 }
  0x22   : > { %2596 = vmatprep.mubr.msk.f32.mxu0 %vm538_vm0, %v524_v44 }
  0x23   : > { %2632 = vmatmul.mubr.msk.f32.gmra.mrb[8].mxu1 %vm538_vm0, %v507_v46 }
  0x24   : > { %2634 = vmatprep.mubr.msk.f32.mxu1 %vm538_vm0, %v508_v48 }
  0x25   : > { %2597 = vmatmul.mubr.msk.f32.gmra.mrb[8].mxu0 %vm538_vm0, %v525_v49 }
  0x26   : > { %2599 = vmatprep.mubr.msk.f32.mxu0 %vm538_vm0, %v526_v50 }
  0x27   : > { %2635 = vmatmul.mubr.msk.f32.gmra.mrb[10].mxu1 %vm538_vm0, %v509_v52 }
  0x28   : > { %2637 = vmatprep.mubr.msk.f32.mxu1 %vm538_vm0, %v510_v54 }
  0x29   : > { %2600 = vmatmul.mubr.msk.f32.gmra.mrb[10].mxu0 %vm538_vm0, %v527_v55 }
  0x2a   : > { %2602 = vmatprep.mubr.msk.f32.mxu0 %vm538_vm0, %v528_v56 }
  0x2b   : > { %2638 = vmatmul.mubr.msk.f32.gmra.mrb[12].mxu1 %vm538_vm0, %v511_v58 }
  0x2c   : > { %2640 = vmatprep.mubr.msk.f32.mxu1 %vm538_vm0, %v512_v60 }
  0x2d   : > { %2603 = vmatmul.mubr.msk.f32.gmra.mrb[12].mxu0 %vm538_vm0, %v529_v61 }
  0x2e   : > { %2605 = vmatprep.mubr.msk.f32.mxu0 %vm538_vm0, %v530_v62 }
  0x2f   : > { %2641 = vmatmul.mubr.msk.f32.gmra.mrb[14].mxu1 %vm538_vm0, %v513_v0 }
  0x30   : > { %2643 = vmatprep.mubr.msk.f32.mxu1 %vm538_vm0, %v514_v2 }
  0x31   : > { %2606 = vmatmul.mubr.msk.f32.gmra.mrb[14].mxu0 %vm538_vm0, %v531_v3 }
  0x32   : > { %2608 = vmatprep.mubr.msk.f32.mxu0 %vm538_vm0, %v532_v4 }
  0x33   : > { %2644 = vmatmul.mubr.msk.f32.gmra.mrb[16].mxu1 %vm538_vm0, %v515_v6 }
  0x35   : > { %2609 = vmatmul.mubr.msk.f32.gmra.mrb[16].mxu0 %vm538_vm0, %v533_v7 }
  0x36   : > { %2654 = vmatprep.mubr.msk.f32.mxu0 %vm538_vm0, %v2979_v17  ;;  %v1529_v17 = vld [vmem:[%s3697_s8 + $0x10] sm:$0xff] }
  0x39   : > { %2655 = vmatmul.mubr.msk.f32.vlgmr.msra.gmra.mrb[18].mxu0 %vm538_vm0, %v2983_v19  ;;  %v2822_v19 = vpack.c.bf16 %v1530_v18, %v1529_v17 }
  0x3a   : > { %2657 = vmatprep.mubr.msk.f32.mxu0 %vm538_vm0, %v2989_v22  ;;  %2821 = vmatpush3.bf16.msra.mxu0 %v2818_v16  ;;  %v3134_v22 = vpack.c.bf16 %v1741_v21, %v1740_v20 }
  0x3b   : > { %2823 = vmatprep.subr.bf16.mxu0 %v2822_v19 }
  0x3c   : > { %2827 = vmatprep.subr.bf16.mxu1 %v3134_v22 }
  0x3d   : > { %2658 = vmatmul.mubr.msk.f32.gmra.mrb[20].mxu0 %vm538_vm0, %v2995_v26 }
  0x3e   : > { %2660 = vmatprep.mubr.msk.f32.mxu0 %vm538_vm0, %v2999_v28  ;;  %2825 = vmatpush3.bf16.msra.mxu0 %v2822_v19 }
  0x41   : > { %2661 = vmatmul.mubr.msk.f32.gmra.mrb[22].mxu0 %vm538_vm0, %v3009_v33 }
  0x42   : > { %2663 = vmatprep.mubr.msk.f32.mxu0 %vm538_vm0, %v3014_v35 }
  0x45   : > { %2664 = vmatmul.mubr.msk.f32.gmra.mrb[24].mxu0 %vm538_vm0, %v3024_v39 }
  0x46   : > { %2666 = vmatprep.mubr.msk.f32.mxu0 %vm538_vm0, %v3028_v41 }
  0x49   : > { %2667 = vmatmul.mubr.msk.f32.gmra.mrb[26].mxu0 %vm538_vm0, %v489_v45 }
  0x4a   : > { %2669 = vmatprep.mubr.msk.f32.mxu0 %vm538_vm0, %v490_v47 }
  0x4d   : > { %2670 = vmatmul.mubr.msk.f32.gmra.mrb[28].mxu0 %vm538_vm0, %v491_v51 }
  0x4e   : > { %2672 = vmatprep.mubr.msk.f32.mxu0 %vm538_vm0, %v492_v53 }
  0x51   : > { %2673 = vmatmul.mubr.msk.f32.gmra.mrb[30].mxu0 %vm538_vm0, %v493_v57 }
  0x52   : > { %2675 = vmatprep.mubr.msk.f32.mxu0 %vm538_vm0, %v494_v59 }
  0x55   : > { %2676 = vmatmul.mubr.msk.f32.gmra.mrb[32].mxu0 %vm538_vm0, %v495_v63 }
  0x56   : > { %2678 = vmatprep.mubr.msk.f32.mxu0 %vm538_vm0, %v496_v1 }
  0x59   : > { %2679 = vmatmul.mubr.msk.f32.gmra.mrb[34].mxu0 %vm538_vm0, %v497_v5 }
  0xe6   : > { %v2621_v24 = vpop.f32.mrb[0].mxu1 }
  0xe7   : > { %v872_v27 = vpop.f32.mrb[1].mxu1 }
  0xe8   : > { %v2586_v23 = vpop.f32.mrb[0].mxu0 }
  0xe9   : > { %v1175_v25 = vsub.f32 %v2586_v23, %v2621_v24  ;;  %v659_v26 = vpop.f32.mrb[1].mxu0 }
  0xea   : > { %v1174_v28 = vsub.f32 %v659_v26, %v872_v27  ;;  %v2624_v30 = vpop.f32.mrb[2].mxu1 }
  0xeb   : > { %v3139_v33 = vpop.f32.mrb[3].mxu1  ;;  %v3238_v16 = vadd.f32 %v3228_v12, %v1175_v25 }
  0xec   : > { %v2589_v29 = vpop.f32.mrb[2].mxu0  ;;  %v3241_v19 = vadd.f32 %v3228_v12, %v1174_v28 }
  0xed   : > { %v1177_v31 = vsub.f32 %v2589_v29, %v2624_v30  ;;  %v3137_v32 = vpop.f32.mrb[3].mxu0  ;;  %v1218_v30 = vmax.f32 %v3238_v16, 0.0 }
  0xee   : > { %v1176_v34 = vsub.f32 %v3137_v32, %v3139_v33  ;;  %v3145_v36 = vpop.f32.mrb[4].mxu1  ;;  %v1217_v28 = vmax.f32 %v3241_v19, 0.0 }
  0xef   : > { %v3151_v39 = vpop.f32.mrb[5].mxu1  ;;  %v3247_v33 = vadd.f32 %v3228_v12, %v1177_v31 }
  0xf0   : > { %v3143_v35 = vpop.f32.mrb[4].mxu0 }
  0xf1   : > { %v1179_v37 = vsub.f32 %v3143_v35, %v3145_v36  ;;  %v3149_v38 = vpop.f32.mrb[5].mxu0 }
  0xf2   : > { %v1178_v40 = vsub.f32 %v3149_v38, %v3151_v39  ;;  %v3157_v42 = vpop.f32.mrb[6].mxu1 }
  0xf3   : > { %v3163_v45 = vpop.f32.mrb[7].mxu1 }
  0xf4   : > { %v3155_v41 = vpop.f32.mrb[6].mxu0 }
  0xf5   : > { %v1181_v43 = vsub.f32 %v3155_v41, %v3157_v42  ;;  %v3161_v44 = vpop.f32.mrb[7].mxu0 }
  0xf6   : > { %v1180_v46 = vsub.f32 %v3161_v44, %v3163_v45  ;;  %v3169_v48 = vpop.f32.mrb[8].mxu1 }
  0xf7   : > { %v3175_v51 = vpop.f32.mrb[9].mxu1 }
  0xf8   : > { %v3167_v47 = vpop.f32.mrb[8].mxu0 }
  0xf9   : > { %v1183_v49 = vsub.f32 %v3167_v47, %v3169_v48  ;;  %v3173_v50 = vpop.f32.mrb[9].mxu0 }
  0xfa   : > { %v1182_v52 = vsub.f32 %v3173_v50, %v3175_v51  ;;  %v3181_v54 = vpop.f32.mrb[10].mxu1 }
  0xfb   : > { %v3187_v57 = vpop.f32.mrb[11].mxu1 }
  0xfc   : > { %v3179_v53 = vpop.f32.mrb[10].mxu0 }
  0xfd   : > { %v1185_v55 = vsub.f32 %v3179_v53, %v3181_v54  ;;  %v3185_v56 = vpop.f32.mrb[11].mxu0 }
  0xfe   : > { %v1184_v58 = vsub.f32 %v3185_v56, %v3187_v57  ;;  %v3193_v60 = vpop.f32.mrb[12].mxu1 }
  0xff   : > { %v3199_v63 = vpop.f32.mrb[13].mxu1 }
 0x100   : > { %v3191_v59 = vpop.f32.mrb[12].mxu0 }
 0x101   : > { %v1187_v61 = vsub.f32 %v3191_v59, %v3193_v60  ;;  %v3197_v62 = vpop.f32.mrb[13].mxu0 }
 0x102   : > { %v1186_v0 = vsub.f32 %v3197_v62, %v3199_v63  ;;  %v3205_v2 = vpop.f32.mrb[14].mxu1 }
 0x103   : > { %v3211_v5 = vpop.f32.mrb[15].mxu1 }
 0x104   : > { %v3203_v1 = vpop.f32.mrb[14].mxu0 }
 0x105   : > { %v1189_v3 = vsub.f32 %v3203_v1, %v3205_v2  ;;  %v3209_v4 = vpop.f32.mrb[15].mxu0 }
 0x106   : > { %v3217_v8 = vpop.f32.mrb[16].mxu1 }
 0x107   : > { %v3223_v11 = vpop.f32.mrb[17].mxu1 }
 0x108   : > { %v3215_v7 = vpop.f32.mrb[16].mxu0 }
 0x109   : > { %v3221_v10 = vpop.f32.mrb[17].mxu0 }
 0x10c   : > { %v2656_v14 = vpop.f32.mrb[18].mxu0 }
 0x10d   : > { %v1236_v17 = vadd.f32 %v2656_v14, %v2586_v23  ;;  %v1085_v18 = vpop.f32.mrb[19].mxu0  ;;  %v1742_v23 = vld [vmem:[%s3698_s9 + $0x10] sm:$0xff]  ;;  %v3257_v14 = vadd.f32 %v3228_v12, %v1176_v34  ;;  %v1220_v34 = vmax.f32 %v3247_v33, 0.0 }
 0x10e   : > { %v1235_v20 = vadd.f32 %v1085_v18, %v659_v26  ;;  %v1743_v26 = vld [vmem:[%s3698_s9 + $0x18] sm:$0xff] }
 0x10f   : > { %v1261_v21 = vadd.f32 %v3235_v15, %v1236_v17  ;;  %v2830_v6 = vpack.c.bf16 %v1743_v26, %v1742_v23  ;;  %v3281_v23 = vadd.f32 %v3228_v12, %v1178_v40 }
 0x110   : > { %v1260_v24 = vadd.f32 %v3235_v15, %v1235_v20  ;;  %v2659_v27 = vpop.f32.mrb[20].mxu0 }
 0x111   : > { %v1279_v13 = vmax.f32 %v1261_v21, 0.0  ;;  %v1238_v9 = vadd.f32 %v2659_v27, %v2589_v29  ;;  %v1095_v25 = vpop.f32.mrb[21].mxu0 }
 0x112   : > { %v1278_v17 = vmax.f32 %v1260_v24, 0.0  ;;  %v1237_v31 = vadd.f32 %v1095_v25, %v3137_v32  ;;  %v3272_v32 = vadd.f32 %v3228_v12, %v1179_v37 }
 0x113   : > { %v1297_v29 = vadd.f32 %v1279_v13, %v1218_v30  ;;  %v1263_v18 = vadd.f32 %v3235_v15, %v1238_v9 }
 0x114   : > { %v1296_v20 = vadd.f32 %v1278_v17, %v1217_v28  ;;  %v1262_v21 = vadd.f32 %v3235_v15, %v1237_v31  ;;  %v2662_v27 = vpop.f32.mrb[22].mxu0  ;;  %2724 = vmatprep.mubr.msk.f32.mxu0 %vm538_vm0, %v1278_v17  ;;  %v1219_v31 = vmax.f32 %v3257_v14, 0.0  ;;  %v3299_v17 = vadd.f32 %v3228_v12, %v1181_v43 }
 0x115   : > { %v1281_v24 = vmax.f32 %v1263_v18, 0.0  ;;  %v1240_v9 = vadd.f32 %v2662_v27, %v3143_v35  ;;  %v1105_v25 = vpop.f32.mrb[23].mxu0  ;;  %2725 = vmatmul.mubr.msk.f32.vlgmr.msra.gmra.mrb[36].mxu0 %vm538_vm0, %v1279_v13 }
 0x116   : > { %v1280_v26 = vmax.f32 %v1262_v21, 0.0  ;;  %v1239_v36 = vadd.f32 %v1105_v25, %v3149_v38  ;;  %2689 = vmatprep.mubr.msk.f32.mxu1 %vm538_vm0, %v1296_v20  ;;  %v1222_v38 = vmax.f32 %v3272_v32, 0.0  ;;  %v3308_v21 = vadd.f32 %v3228_v12, %v1180_v46 }
 0x117   : > { %v1299_v37 = vadd.f32 %v1281_v24, %v1220_v34  ;;  %v1265_v35 = vadd.f32 %v3235_v15, %v1240_v9  ;;  %2690 = vmatmul.mubr.msk.f32.vlgmr.msra.gmra.mrb[18].mxu1 %vm538_vm0, %v1297_v29  ;;  %v3325_v46 = vadd.f32 %v3228_v12, %v1183_v49 }
 0x118   : > { %v1298_v13 = vadd.f32 %v1280_v26, %v1219_v31  ;;  %v1264_v39 = vadd.f32 %v3235_v15, %v1239_v36  ;;  %2829 = vmatpush3.bf16.msra.mxu1 %v3134_v22  ;;  %v2665_v40 = vpop.f32.mrb[24].mxu0  ;;  %2727 = vmatprep.mubr.msk.f32.mxu0 %vm538_vm0, %v1280_v26  ;;  %v1221_v22 = vmax.f32 %v3281_v23, 0.0 }
 0x119   : > { %v1283_v18 = vmax.f32 %v1265_v35, 0.0  ;;  %v1242_v29 = vadd.f32 %v2665_v40, %v3155_v41  ;;  %v1115_v20 = vpop.f32.mrb[25].mxu0  ;;  %2728 = vmatmul.mubr.msk.f32.gmra.mrb[38].mxu0 %vm538_vm0, %v1281_v24  ;;  %2831 = vmatprep.subr.bf16.mxu1 %v2830_v6 }
 0x11a   : > { %v1282_v27 = vmax.f32 %v1264_v39, 0.0  ;;  %v1241_v42 = vadd.f32 %v1115_v20, %v3161_v44  ;;  %2692 = vmatprep.mubr.msk.f32.mxu1 %vm538_vm0, %v1298_v13  ;;  %v1224_v44 = vmax.f32 %v3299_v17, 0.0 }
 0x11b   : > { %v1301_v41 = vadd.f32 %v1283_v18, %v1222_v38  ;;  %v1267_v43 = vadd.f32 %v3235_v15, %v1242_v29  ;;  %2693 = vmatmul.mubr.msk.f32.gmra.mrb[20].mxu1 %vm538_vm0, %v1299_v37  ;;  %v1223_v37 = vmax.f32 %v3308_v21, 0.0 }
 0x11c   : > { %v1300_v24 = vadd.f32 %v1282_v27, %v1221_v22  ;;  %v1266_v45 = vadd.f32 %v3235_v15, %v1241_v42  ;;  %v2668_v9 = vpop.f32.mrb[26].mxu0  ;;  %2730 = vmatprep.mubr.msk.f32.mxu0 %vm538_vm0, %v1282_v27  ;;  %2833 = vmatpush3.bf16.msra.mxu1 %v2830_v6  ;;  %v3334_v6 = vadd.f32 %v3228_v12, %v1182_v52  ;;  %v1226_v52 = vmax.f32 %v3325_v46, 0.0 }
 0x11d   : > { %v1285_v25 = vmax.f32 %v1267_v43, 0.0  ;;  %v1244_v26 = vadd.f32 %v2668_v9, %v3167_v47  ;;  %v1125_v36 = vpop.f32.mrb[27].mxu0  ;;  %2731 = vmatmul.mubr.msk.f32.gmra.mrb[40].mxu0 %vm538_vm0, %v1283_v18  ;;  %v3360_v27 = vadd.f32 %v3228_v12, %v1184_v58 }
 0x11e   : > { %v1284_v35 = vmax.f32 %v1266_v45, 0.0  ;;  %v1243_v48 = vadd.f32 %v1125_v36, %v3173_v50  ;;  %2695 = vmatprep.mubr.msk.f32.mxu1 %vm538_vm0, %v1300_v24  ;;  %v3351_v50 = vadd.f32 %v3228_v12, %v1185_v55  ;;  %v1225_v20 = vmax.f32 %v3334_v6, 0.0 }
 0x11f   : > { %v1303_v49 = vadd.f32 %v1285_v25, %v1224_v44  ;;  %v1269_v47 = vadd.f32 %v3235_v15, %v1244_v26  ;;  %2696 = vmatmul.mubr.msk.f32.gmra.mrb[22].mxu1 %vm538_vm0, %v1301_v41  ;;  %v3386_v26 = vadd.f32 %v3228_v12, %v1186_v0 }
 0x120   : > { %v1302_v13 = vadd.f32 %v1284_v35, %v1223_v37  ;;  %v1268_v51 = vadd.f32 %v3235_v15, %v1243_v48  ;;  %v2671_v39 = vpop.f32.mrb[28].mxu0  ;;  %2733 = vmatprep.mubr.msk.f32.mxu0 %vm538_vm0, %v1284_v35  ;;  %v1228_v58 = vmax.f32 %v3351_v50, 0.0 }
 0x121   : > { %v1287_v40 = vmax.f32 %v1269_v47, 0.0  ;;  %v1246_v18 = vadd.f32 %v2671_v39, %v3179_v53  ;;  %v1135_v29 = vpop.f32.mrb[29].mxu0  ;;  %2734 = vmatmul.mubr.msk.f32.gmra.mrb[42].mxu0 %vm538_vm0, %v1285_v25  ;;  %v1227_v25 = vmax.f32 %v3360_v27, 0.0  ;;  %v3703_v39 = vsub.f32 %v3209_v4, %v3211_v5 }
 0x122   : > { %v1286_v42 = vmax.f32 %v1268_v51, 0.0  ;;  %v1245_v54 = vadd.f32 %v1135_v29, %v3185_v56  ;;  %2698 = vmatprep.mubr.msk.f32.mxu1 %vm538_vm0, %v1302_v13  ;;  %v3377_v56 = vadd.f32 %v3228_v12, %v1187_v61  ;;  %v1229_v51 = vmax.f32 %v3386_v26, 0.0 }
 0x123   : > { %v1305_v55 = vadd.f32 %v1287_v40, %v1226_v52  ;;  %v1271_v53 = vadd.f32 %v3235_v15, %v1246_v18  ;;  %2699 = vmatmul.mubr.msk.f32.gmra.mrb[24].mxu1 %vm538_vm0, %v1303_v49 }
 0x124   : > { %v1304_v41 = vadd.f32 %v1286_v42, %v1225_v20  ;;  %v1270_v57 = vadd.f32 %v3235_v15, %v1245_v54  ;;  %v2674_v43 = vpop.f32.mrb[30].mxu0  ;;  %2736 = vmatprep.mubr.msk.f32.mxu0 %vm538_vm0, %v1286_v42  ;;  %v1230_v0 = vmax.f32 %v3377_v56, 0.0  ;;  %v3705_v56 = vsub.f32 %v3221_v10, %v3223_v11 }
 0x125   : > { %v1289_v24 = vmax.f32 %v1271_v53, 0.0  ;;  %v1248_v45 = vadd.f32 %v2674_v43, %v3191_v59  ;;  %v1145_v9 = vpop.f32.mrb[31].mxu0  ;;  %2737 = vmatmul.mubr.msk.f32.gmra.mrb[44].mxu0 %vm538_vm0, %v1287_v40  ;;  %v1213_v40 = vadd.f32 %v3228_v12, %v3703_v39 }
 0x126   : > { %v1288_v36 = vmax.f32 %v1270_v57, 0.0  ;;  %v1247_v60 = vadd.f32 %v1145_v9, %v3197_v62  ;;  %2701 = vmatprep.mubr.msk.f32.mxu1 %vm538_vm0, %v1304_v41  ;;  %v3403_v62 = vadd.f32 %v3228_v12, %v1189_v3 }
 0x127   : > { %v1307_v61 = vadd.f32 %v1289_v24, %v1228_v58  ;;  %v1273_v59 = vadd.f32 %v3235_v15, %v1248_v45  ;;  %2702 = vmatmul.mubr.msk.f32.gmra.mrb[26].mxu1 %vm538_vm0, %v1305_v55  ;;  %v3704_v55 = vsub.f32 %v3215_v7, %v3217_v8  ;;  %v1231_v43 = vmax.f32 %v1213_v40, 0.0 }
 0x128   : > { %v1306_v35 = vadd.f32 %v1288_v36, %v1227_v25  ;;  %v1272_v63 = vadd.f32 %v3235_v15, %v1247_v60  ;;  %v2677_v48 = vpop.f32.mrb[32].mxu0  ;;  %2739 = vmatprep.mubr.msk.f32.mxu0 %vm538_vm0, %v1288_v36  ;;  %v1232_v5 = vmax.f32 %v3403_v62, 0.0 }
 0x129   : > { %v1291_v49 = vmax.f32 %v1273_v59, 0.0  ;;  %v1250_v47 = vadd.f32 %v2677_v48, %v3203_v1  ;;  %v1155_v13 = vpop.f32.mrb[33].mxu0  ;;  %2740 = vmatmul.mubr.msk.f32.gmra.mrb[46].mxu0 %vm538_vm0, %v1289_v24  ;;  %v1215_v24 = vadd.f32 %v3228_v12, %v3705_v56 }
 0x12a   : > { %v1290_v18 = vmax.f32 %v1272_v63, 0.0  ;;  %v1249_v29 = vadd.f32 %v1155_v13, %v3209_v4  ;;  %2704 = vmatprep.mubr.msk.f32.mxu1 %vm538_vm0, %v1306_v35  ;;  %v1216_v4 = vadd.f32 %v3228_v12, %v3704_v55 }
 0x12b   : > { %v1309_v2 = vadd.f32 %v1291_v49, %v1230_v0  ;;  %v1275_v3 = vadd.f32 %v3235_v15, %v1250_v47  ;;  %2705 = vmatmul.mubr.msk.f32.gmra.mrb[28].mxu1 %vm538_vm0, %v1307_v61  ;;  %v1233_v11 = vmax.f32 %v1215_v24, 0.0 }
 0x12c   : > { %v1308_v1 = vadd.f32 %v1290_v18, %v1229_v51  ;;  %v1274_v42 = vadd.f32 %v3235_v15, %v1249_v29  ;;  %v2680_v54 = vpop.f32.mrb[34].mxu0  ;;  %2742 = vmatprep.mubr.msk.f32.mxu0 %vm538_vm0, %v1290_v18  ;;  %v1234_v60 = vmax.f32 %v1216_v4, 0.0 }
 0x12d   : > { %v1293_v53 = vmax.f32 %v1275_v3, 0.0  ;;  %v1252_v41 = vadd.f32 %v2680_v54, %v3215_v7  ;;  %v1165_v57 = vpop.f32.mrb[35].mxu0  ;;  %2743 = vmatmul.mubr.msk.f32.gmra.mrb[48].mxu0 %vm538_vm0, %v1291_v49 }
 0x12e   : > { %v1292_v45 = vmax.f32 %v1274_v42, 0.0  ;;  %v1251_v9 = vadd.f32 %v1165_v57, %v3221_v10  ;;  %2707 = vmatprep.mubr.msk.f32.mxu1 %vm538_vm0, %v1308_v1 }
 0x12f   : > { %v1311_v8 = vadd.f32 %v1293_v53, %v1232_v5  ;;  %v1277_v26 = vadd.f32 %v3235_v15, %v1252_v41  ;;  %2708 = vmatmul.mubr.msk.f32.gmra.mrb[30].mxu1 %vm538_vm0, %v1309_v2 }
 0x130   : > { %v1310_v7 = vadd.f32 %v1292_v45, %v1231_v43  ;;  %v1276_v36 = vadd.f32 %v3235_v15, %v1251_v9  ;;  %2745 = vmatprep.mubr.msk.f32.mxu0 %vm538_vm0, %v1292_v45 }
 0x131   : > { %v1295_v61 = vmax.f32 %v1277_v26, 0.0  ;;  %2746 = vmatmul.mubr.msk.f32.gmra.mrb[50].mxu0 %vm538_vm0, %v1293_v53 }
 0x132   : > { %v1294_v12 = vmax.f32 %v1276_v36, 0.0  ;;  %2710 = vmatprep.mubr.msk.f32.mxu1 %vm538_vm0, %v1310_v7 }
 0x133   : > { %v1313_v10 = vadd.f32 %v1295_v61, %v1234_v60  ;;  %2711 = vmatmul.mubr.msk.f32.gmra.mrb[32].mxu1 %vm538_vm0, %v1311_v8 }
 0x134   : > { %v1312_v59 = vadd.f32 %v1294_v12, %v1233_v11  ;;  %2748 = vmatprep.mubr.msk.f32.mxu0 %vm538_vm0, %v1294_v12 }
 0x135   : > { %2749 = vmatmul.mubr.msk.f32.gmra.mrb[52].mxu0 %vm538_vm0, %v1295_v61 }
 0x136   : > { %2713 = vmatprep.mubr.msk.f32.mxu1 %vm538_vm0, %v1312_v59 }
 0x137   : > { %2714 = vmatmul.mubr.msk.f32.gmra.mrb[34].mxu1 %vm538_vm0, %v1313_v10 }
 0x138   : > { %2759 = vmatprep.mubr.msk.f32.mxu1 %vm538_vm0, %v1217_v28 }
 0x13b   : > { %2760 = vmatmul.mubr.msk.f32.vlgmr.msra.gmra.mrb[36].mxu1 %vm538_vm0, %v1218_v30  ;;  %v3489_v30 = vld [vmem:[%s3699_s10] ss:$0 sm:$0xff] }
 0x13c   : > { %2762 = vmatprep.mubr.msk.f32.mxu1 %vm538_vm0, %v1219_v31 }
 0x13f   : > { %2763 = vmatmul.mubr.msk.f32.gmra.mrb[38].mxu1 %vm538_vm0, %v1220_v34 }
 0x140   : > { %2765 = vmatprep.mubr.msk.f32.mxu1 %vm538_vm0, %v1221_v22 }
 0x143   : > { %2766 = vmatmul.mubr.msk.f32.gmra.mrb[40].mxu1 %vm538_vm0, %v1222_v38 }
 0x144   : > { %2768 = vmatprep.mubr.msk.f32.mxu1 %vm538_vm0, %v1223_v37 }
 0x147   : > { %2769 = vmatmul.mubr.msk.f32.gmra.mrb[42].mxu1 %vm538_vm0, %v1224_v44 }
 0x148   : > { %2771 = vmatprep.mubr.msk.f32.mxu1 %vm538_vm0, %v1225_v20 }
 0x14b   : > { %2772 = vmatmul.mubr.msk.f32.gmra.mrb[44].mxu1 %vm538_vm0, %v1226_v52 }
 0x14c   : > { %2774 = vmatprep.mubr.msk.f32.mxu1 %vm538_vm0, %v1227_v25 }
 0x14f   : > { %2775 = vmatmul.mubr.msk.f32.gmra.mrb[46].mxu1 %vm538_vm0, %v1228_v58 }
 0x150   : > { %2777 = vmatprep.mubr.msk.f32.mxu1 %vm538_vm0, %v1229_v51 }
 0x153   : > { %2778 = vmatmul.mubr.msk.f32.gmra.mrb[48].mxu1 %vm538_vm0, %v1230_v0 }
 0x154   : > { %2780 = vmatprep.mubr.msk.f32.mxu1 %vm538_vm0, %v1231_v43 }
 0x157   : > { %2781 = vmatmul.mubr.msk.f32.gmra.mrb[50].mxu1 %vm538_vm0, %v1232_v5 }
 0x158   : > { %2783 = vmatprep.mubr.msk.f32.mxu1 %vm538_vm0, %v1233_v11 }
 0x15b   : > { %2784 = vmatmul.mubr.msk.f32.gmra.mrb[52].mxu1 %vm538_vm0, %v1234_v60 }
 0x1e8   : > { %v2726_v15 = vpop.f32.mrb[36].mxu0 }
 0x1e9   : > { %v1651_v16 = vpop.f32.mrb[37].mxu0 }
 0x1ea   : > { %v3484_v19 = vpop.f32.mrb[18].mxu1 }
 0x1eb   : > { %v1954_v33 = vsub.f32 %v3484_v19, %v2726_v15  ;;  %v3492_v28 = vpop.f32.mrb[19].mxu1 }
 0x1ec   : > { %v1953_v14 = vsub.f32 %v3492_v28, %v1651_v16  ;;  %v2729_v34 = vpop.f32.mrb[38].mxu0 }
 0x1ed   : > { %v1979_v32 = vadd.f32 %v3489_v30, %v1954_v33  ;;  %v1661_v31 = vpop.f32.mrb[39].mxu0 }
 0x1ee   : > { %v1978_v23 = vadd.f32 %v3489_v30, %v1953_v14  ;;  %v3497_v38 = vpop.f32.mrb[20].mxu1 }
 0x1ef   : > { %v2407_v17 = vclamps-f32 %v1979_v32, 0.01  ;;  %v1956_v22 = vsub.f32 %v3497_v38, %v2729_v34  ;;  %v3500_v21 = vpop.f32.mrb[21].mxu1 }
 0x1f0   : > { %v2406_v44 = vclamps-f32 %v1978_v23, 0.01  ;;  %v1955_v46 = vsub.f32 %v3500_v21, %v1661_v31  ;;  %v2732_v37 = vpop.f32.mrb[40].mxu0 }
 0x1f1   : > { %v2076_v6 = vsub.f32 %v1979_v32, %v2407_v17  ;;  %v1981_v52 = vadd.f32 %v3489_v30, %v1956_v22  ;;  %v1671_v50 = vpop.f32.mrb[41].mxu0 }
 0x1f2   : > { %v2075_v20 = vsub.f32 %v1978_v23, %v2406_v44  ;;  %v1980_v27 = vadd.f32 %v3489_v30, %v1955_v46  ;;  %v3511_v58 = vpop.f32.mrb[22].mxu1 }
 0x1f3   : > { %2094 = vst.msk [vmem:[%s3506_s29 + $0x8] sm:$0xff] %vm538_vm0, %v2076_v6  ;;  %v2409_v25 = vclamps-f32 %v1981_v52, 0.01  ;;  %v1958_v35 = vsub.f32 %v3511_v58, %v2732_v37  ;;  %v3516_v63 = vpop.f32.mrb[23].mxu1 }
 0x1f4   : > { %2093 = vst.msk [vmem:[%s3506_s29] sm:$0xff] %vm538_vm0, %v2075_v20  ;;  %v2408_v48 = vclamps-f32 %v1980_v27, 0.01  ;;  %v1957_v0 = vsub.f32 %v3516_v63, %v1671_v50  ;;  %v2735_v62 = vpop.f32.mrb[42].mxu0 }
 0x1f5   : > { %v2078_v49 = vsub.f32 %v1981_v52, %v2409_v25  ;;  %v1983_v47 = vadd.f32 %v3489_v30, %v1958_v35  ;;  %v1681_v13 = vpop.f32.mrb[43].mxu0 }
 0x1f6   : > { %v2077_v51 = vsub.f32 %v1980_v27, %v2408_v48  ;;  %v1982_v39 = vadd.f32 %v3489_v30, %v1957_v0  ;;  %v3523_v40 = vpop.f32.mrb[24].mxu1 }
 0x1f7   : > { %2096 = vst.msk [vmem:[%s3506_s29 + $0x18] sm:$0xff] %vm538_vm0, %v2078_v49  ;;  %v2411_v18 = vclamps-f32 %v1983_v47, 0.01  ;;  %v1960_v29 = vsub.f32 %v3523_v40, %v2735_v62  ;;  %v3528_v2 = vpop.f32.mrb[25].mxu1 }
 0x1f8   : > { %2095 = vst.msk [vmem:[%s3506_s29 + $0x10] sm:$0xff] %vm538_vm0, %v2077_v51  ;;  %v2410_v3 = vclamps-f32 %v1982_v39, 0.01  ;;  %v1959_v1 = vsub.f32 %v3528_v2, %v1681_v13  ;;  %v2738_v42 = vpop.f32.mrb[44].mxu0 }
 0x1f9   : > { %v2080_v54 = vsub.f32 %v1983_v47, %v2411_v18  ;;  %v1985_v5 = vadd.f32 %v3489_v30, %v1960_v29  ;;  %v1691_v55 = vpop.f32.mrb[45].mxu0 }
 0x1fa   : > { %v2079_v4 = vsub.f32 %v1982_v39, %v2410_v3  ;;  %v1984_v53 = vadd.f32 %v3489_v30, %v1959_v1  ;;  %v3535_v41 = vpop.f32.mrb[26].mxu1 }
 0x1fb   : > { %2098 = vst.msk [vmem:[%s3506_s29 + $0x28] sm:$0xff] %vm538_vm0, %v2080_v54  ;;  %v2413_v57 = vclamps-f32 %v1985_v5, 0.01  ;;  %v1962_v43 = vsub.f32 %v3535_v41, %v2738_v42  ;;  %v3540_v56 = vpop.f32.mrb[27].mxu1 }
 0x1fc   : > { %2097 = vst.msk [vmem:[%s3506_s29 + $0x20] sm:$0xff] %vm538_vm0, %v2079_v4  ;;  %v2412_v24 = vclamps-f32 %v1984_v53, 0.01  ;;  %v1961_v45 = vsub.f32 %v3540_v56, %v1691_v55  ;;  %v2741_v9 = vpop.f32.mrb[46].mxu0 }
 0x1fd   : > { %v2082_v8 = vsub.f32 %v1985_v5, %v2413_v57  ;;  %v1987_v26 = vadd.f32 %v3489_v30, %v1962_v43  ;;  %v1701_v7 = vpop.f32.mrb[47].mxu0 }
 0x1fe   : > { %v2081_v36 = vsub.f32 %v1984_v53, %v2412_v24  ;;  %v1986_v60 = vadd.f32 %v3489_v30, %v1961_v45  ;;  %v3547_v61 = vpop.f32.mrb[28].mxu1 }
 0x1ff   : > { %2100 = vst.msk [vmem:[%s3506_s29 + $0x38] sm:$0xff] %vm538_vm0, %v2082_v8  ;;  %v2415_v11 = vclamps-f32 %v1987_v26, 0.01  ;;  %v1964_v12 = vsub.f32 %v3547_v61, %v2741_v9  ;;  %v3552_v10 = vpop.f32.mrb[29].mxu1  ;;  %v3598_v9 = vld [vmem:[%s3700_s11] ss:$0 sm:$0xff] }
 0x200   : > { %2099 = vst.msk [vmem:[%s3506_s29 + $0x30] sm:$0xff] %vm538_vm0, %v2081_v36  ;;  %v2414_v59 = vclamps-f32 %v1986_v60, 0.01  ;;  %v1963_v15 = vsub.f32 %v3552_v10, %v1701_v7  ;;  %v2744_v16 = vpop.f32.mrb[48].mxu0 }
 0x201   : > { %v2084_v33 = vsub.f32 %v1987_v26, %v2415_v11  ;;  %v1989_v14 = vadd.f32 %v3489_v30, %v1964_v12  ;;  %v1711_v34 = vpop.f32.mrb[49].mxu0 }
 0x202   : > { %v2083_v32 = vsub.f32 %v1986_v60, %v2414_v59  ;;  %v1988_v31 = vadd.f32 %v3489_v30, %v1963_v15  ;;  %v3559_v23 = vpop.f32.mrb[30].mxu1 }
 0x203   : > { %2102 = vst.msk [vmem:[%s3506_s29 + $0x48] sm:$0xff] %vm538_vm0, %v2084_v33  ;;  %v2417_v17 = vclamps-f32 %v1989_v14, 0.01  ;;  %v1966_v22 = vsub.f32 %v3559_v23, %v2744_v16  ;;  %v3564_v44 = vpop.f32.mrb[31].mxu1 }
 0x204   : > { %2101 = vst.msk [vmem:[%s3506_s29 + $0x40] sm:$0xff] %vm538_vm0, %v2083_v32  ;;  %v2416_v46 = vclamps-f32 %v1988_v31, 0.01  ;;  %v1965_v37 = vsub.f32 %v3564_v44, %v1711_v34  ;;  %v2747_v6 = vpop.f32.mrb[50].mxu0 }
 0x205   : > { %v2086_v52 = vsub.f32 %v1989_v14, %v2417_v17  ;;  %v1991_v50 = vadd.f32 %v3489_v30, %v1966_v22  ;;  %v1721_v20 = vpop.f32.mrb[51].mxu0 }
 0x206   : > { %v2085_v27 = vsub.f32 %v1988_v31, %v2416_v46  ;;  %v1990_v25 = vadd.f32 %v3489_v30, %v1965_v37  ;;  %v3571_v35 = vpop.f32.mrb[32].mxu1 }
 0x207   : > { %2104 = vst.msk [vmem:[%s3506_s29 + $0x58] sm:$0xff] %vm538_vm0, %v2086_v52  ;;  %v2419_v48 = vclamps-f32 %v1991_v50, 0.01  ;;  %v1968_v0 = vsub.f32 %v3571_v35, %v2747_v6  ;;  %v3576_v62 = vpop.f32.mrb[33].mxu1 }
 0x208   : > { %2103 = vst.msk [vmem:[%s3506_s29 + $0x50] sm:$0xff] %vm538_vm0, %v2085_v27  ;;  %v2418_v49 = vclamps-f32 %v1990_v25, 0.01  ;;  %v1967_v47 = vsub.f32 %v3576_v62, %v1721_v20  ;;  %v2750_v13 = vpop.f32.mrb[52].mxu0 }
 0x209   : > { %v2088_v51 = vsub.f32 %v1991_v50, %v2419_v48  ;;  %v1993_v39 = vadd.f32 %v3489_v30, %v1968_v0  ;;  %v1731_v18 = vpop.f32.mrb[53].mxu0 }
 0x20a   : > { %v2087_v29 = vsub.f32 %v1990_v25, %v2418_v49  ;;  %v1992_v3 = vadd.f32 %v3489_v30, %v1967_v47  ;;  %v3583_v1 = vpop.f32.mrb[34].mxu1 }
 0x20b   : > { %2106 = vst.msk [vmem:[%s3506_s29 + $0x68] sm:$0xff] %vm538_vm0, %v2088_v51  ;;  %v2421_v42 = vclamps-f32 %v1993_v39, 0.01  ;;  %v1970_v54 = vsub.f32 %v3583_v1, %v2750_v13  ;;  %v3588_v5 = vpop.f32.mrb[35].mxu1 }
 0x20c   : > { %2105 = vst.msk [vmem:[%s3506_s29 + $0x60] sm:$0xff] %vm538_vm0, %v2087_v29  ;;  %v2420_v55 = vclamps-f32 %v1992_v3, 0.01  ;;  %v1969_v4 = vsub.f32 %v3588_v5, %v1731_v18 }
 0x20d   : > { %v2090_v53 = vsub.f32 %v1993_v39, %v2421_v42  ;;  %v1995_v57 = vadd.f32 %v3489_v30, %v1970_v54 }
 0x20e   : > { %v2089_v43 = vsub.f32 %v1992_v3, %v2420_v55  ;;  %v1994_v24 = vadd.f32 %v3489_v30, %v1969_v4  ;;  %v2761_v45 = vpop.f32.mrb[36].mxu1 }
 0x20f   : > { %2108 = vst.msk [vmem:[%s3506_s29 + $0x78] sm:$0xff] %vm538_vm0, %v2090_v53  ;;  %v2423_v8 = vclamps-f32 %v1995_v57, 0.01  ;;  %v1997_v26 = vadd.f32 %v2761_v45, %v3484_v19  ;;  %v1864_v7 = vpop.f32.mrb[37].mxu1 }
 0x210   : > { %2107 = vst.msk [vmem:[%s3506_s29 + $0x70] sm:$0xff] %vm538_vm0, %v2089_v43  ;;  %v2422_v36 = vclamps-f32 %v1994_v24, 0.01  ;;  %v1996_v60 = vadd.f32 %v1864_v7, %v3492_v28 }
 0x211   : > { %v2092_v30 = vsub.f32 %v1995_v57, %v2423_v8  ;;  %v2022_v11 = vadd.f32 %v3598_v9, %v1997_v26 }
 0x212   : > { %v2091_v12 = vsub.f32 %v1994_v24, %v2422_v36  ;;  %v2021_v59 = vadd.f32 %v3598_v9, %v1996_v60  ;;  %v2764_v15 = vpop.f32.mrb[38].mxu1 }
 0x213   : > { %2110 = vst.msk [vmem:[%s3506_s29 + $0x88] sm:$0xff] %vm538_vm0, %v2092_v30  ;;  %v2425_v16 = vclamps-f32 %v2022_v11, 0.01  ;;  %v1999_v33 = vadd.f32 %v2764_v15, %v3497_v38  ;;  %v1874_v14 = vpop.f32.mrb[39].mxu1 }
 0x214   : > { %2109 = vst.msk [vmem:[%s3506_s29 + $0x80] sm:$0xff] %vm538_vm0, %v2091_v12  ;;  %v2424_v19 = vclamps-f32 %v2021_v59, 0.01  ;;  %v1998_v28 = vadd.f32 %v1874_v14, %v3500_v21 }
 0x215   : > { %v2148_v34 = vsub.f32 %v2022_v11, %v2425_v16  ;;  %v2024_v32 = vadd.f32 %v3598_v9, %v1999_v33 }
 0x216   : > { %v2147_v31 = vsub.f32 %v2021_v59, %v2424_v19  ;;  %v2023_v38 = vadd.f32 %v3598_v9, %v1998_v28  ;;  %v2767_v17 = vpop.f32.mrb[40].mxu1 }
 0x217   : > { %2166 = vst.msk [vmem:[%s3617_s19 + $0x8] sm:$0xff] %vm538_vm0, %v2148_v34  ;;  %v2427_v22 = vclamps-f32 %v2024_v32, 0.01  ;;  %v2001_v46 = vadd.f32 %v2767_v17, %v3511_v58  ;;  %v1884_v37 = vpop.f32.mrb[41].mxu1 }
 0x218   : > { %2165 = vst.msk [vmem:[%s3617_s19] sm:$0xff] %vm538_vm0, %v2147_v31  ;;  %v2426_v6 = vclamps-f32 %v2023_v38, 0.01  ;;  %v2000_v21 = vadd.f32 %v1884_v37, %v3516_v63 }
 0x219   : > { %v2150_v52 = vsub.f32 %v2024_v32, %v2427_v22  ;;  %v2026_v50 = vadd.f32 %v3598_v9, %v2001_v46 }
 0x21a   : > { %v2149_v20 = vsub.f32 %v2023_v38, %v2426_v6  ;;  %v2025_v27 = vadd.f32 %v3598_v9, %v2000_v21  ;;  %v2770_v25 = vpop.f32.mrb[42].mxu1 }
 0x21b   : > { %2168 = vst.msk [vmem:[%s3617_s19 + $0x18] sm:$0xff] %vm538_vm0, %v2150_v52  ;;  %v2429_v48 = vclamps-f32 %v2026_v50, 0.01  ;;  %v2003_v58 = vadd.f32 %v2770_v25, %v3523_v40  ;;  %v1894_v0 = vpop.f32.mrb[43].mxu1 }
 0x21c   : > { %2167 = vst.msk [vmem:[%s3617_s19 + $0x10] sm:$0xff] %vm538_vm0, %v2149_v20  ;;  %v2428_v49 = vclamps-f32 %v2025_v27, 0.01  ;;  %v2002_v63 = vadd.f32 %v1894_v0, %v3528_v2 }
 0x21d   : > { %v2152_v47 = vsub.f32 %v2026_v50, %v2429_v48  ;;  %v2028_v13 = vadd.f32 %v3598_v9, %v2003_v58 }
 0x21e   : > { %v2151_v51 = vsub.f32 %v2025_v27, %v2428_v49  ;;  %v2027_v39 = vadd.f32 %v3598_v9, %v2002_v63  ;;  %v2773_v18 = vpop.f32.mrb[44].mxu1 }
 0x21f   : > { %2170 = vst.msk [vmem:[%s3617_s19 + $0x28] sm:$0xff] %vm538_vm0, %v2152_v47  ;;  %v2431_v29 = vclamps-f32 %v2028_v13, 0.01  ;;  %v2005_v40 = vadd.f32 %v2773_v18, %v3535_v41  ;;  %v1904_v3 = vpop.f32.mrb[45].mxu1 }
 0x220   : > { %2169 = vst.msk [vmem:[%s3617_s19 + $0x20] sm:$0xff] %vm538_vm0, %v2151_v51  ;;  %v2430_v42 = vclamps-f32 %v2027_v39, 0.01  ;;  %v2004_v2 = vadd.f32 %v1904_v3, %v3540_v56 }
 0x221   : > { %v2154_v54 = vsub.f32 %v2028_v13, %v2431_v29  ;;  %v2030_v55 = vadd.f32 %v3598_v9, %v2005_v40 }
 0x222   : > { %v2153_v4 = vsub.f32 %v2027_v39, %v2430_v42  ;;  %v2029_v53 = vadd.f32 %v3598_v9, %v2004_v2  ;;  %v2776_v57 = vpop.f32.mrb[46].mxu1 }
 0x223   : > { %2172 = vst.msk [vmem:[%s3617_s19 + $0x38] sm:$0xff] %vm538_vm0, %v2154_v54  ;;  %v2433_v43 = vclamps-f32 %v2030_v55, 0.01  ;;  %v2007_v41 = vadd.f32 %v2776_v57, %v3547_v61  ;;  %v1914_v24 = vpop.f32.mrb[47].mxu1 }
 0x224   : > { %2171 = vst.msk [vmem:[%s3617_s19 + $0x30] sm:$0xff] %vm538_vm0, %v2153_v4  ;;  %v2432_v45 = vclamps-f32 %v2029_v53, 0.01  ;;  %v2006_v56 = vadd.f32 %v1914_v24, %v3552_v10 }
 0x225   : > { %v2156_v8 = vsub.f32 %v2030_v55, %v2433_v43  ;;  %v2032_v26 = vadd.f32 %v3598_v9, %v2007_v41 }
 0x226   : > { %v2155_v7 = vsub.f32 %v2029_v53, %v2432_v45  ;;  %v2031_v36 = vadd.f32 %v3598_v9, %v2006_v56  ;;  %v2779_v60 = vpop.f32.mrb[48].mxu1 }
 0x227   : > { %2174 = vst.msk [vmem:[%s3617_s19 + $0x48] sm:$0xff] %vm538_vm0, %v2156_v8  ;;  %v2435_v30 = vclamps-f32 %v2032_v26, 0.01  ;;  %v2009_v61 = vadd.f32 %v2779_v60, %v3559_v23  ;;  %v1924_v11 = vpop.f32.mrb[49].mxu1 }
 0x228   : > { %2173 = vst.msk [vmem:[%s3617_s19 + $0x40] sm:$0xff] %vm538_vm0, %v2155_v7  ;;  %v2434_v12 = vclamps-f32 %v2031_v36, 0.01  ;;  %v2008_v10 = vadd.f32 %v1924_v11, %v3564_v44 }
 0x229   : > { %v2158_v59 = vsub.f32 %v2032_v26, %v2435_v30  ;;  %v2034_v15 = vadd.f32 %v3598_v9, %v2009_v61 }
 0x22a   : > { %v2157_v16 = vsub.f32 %v2031_v36, %v2434_v12  ;;  %v2033_v33 = vadd.f32 %v3598_v9, %v2008_v10  ;;  %v2782_v14 = vpop.f32.mrb[50].mxu1 }
 0x22b   : > { %2176 = vst.msk [vmem:[%s3617_s19 + $0x58] sm:$0xff] %vm538_vm0, %v2158_v59  ;;  %v2437_v19 = vclamps-f32 %v2034_v15, 0.01  ;;  %v2011_v23 = vadd.f32 %v2782_v14, %v3571_v35  ;;  %v1934_v28 = vpop.f32.mrb[51].mxu1 }
 0x22c   : > { %2175 = vst.msk [vmem:[%s3617_s19 + $0x50] sm:$0xff] %vm538_vm0, %v2157_v16  ;;  %v2436_v34 = vclamps-f32 %v2033_v33, 0.01  ;;  %v2010_v44 = vadd.f32 %v1934_v28, %v3576_v62 }
 0x22d   : > { %v2160_v32 = vsub.f32 %v2034_v15, %v2437_v19  ;;  %v2036_v31 = vadd.f32 %v3598_v9, %v2011_v23 }
 0x22e   : > { %v2159_v38 = vsub.f32 %v2033_v33, %v2436_v34  ;;  %v2035_v17 = vadd.f32 %v3598_v9, %v2010_v44  ;;  %v2785_v22 = vpop.f32.mrb[52].mxu1 }
 0x22f   : > { %2178 = vst.msk [vmem:[%s3617_s19 + $0x68] sm:$0xff] %vm538_vm0, %v2160_v32  ;;  %v2439_v46 = vclamps-f32 %v2036_v31, 0.01  ;;  %v2013_v35 = vadd.f32 %v2785_v22, %v3583_v1  ;;  %v1944_v37 = vpop.f32.mrb[53].mxu1 }
 0x230   : > { %2177 = vst.msk [vmem:[%s3617_s19 + $0x60] sm:$0xff] %vm538_vm0, %v2159_v38  ;;  %v2438_v62 = vclamps-f32 %v2035_v17, 0.01  ;;  %v2012_v6 = vadd.f32 %v1944_v37, %v3588_v5 }
 0x231   : > { %v2162_v21 = vsub.f32 %v2036_v31, %v2439_v46  ;;  %v2038_v52 = vadd.f32 %v3598_v9, %v2013_v35 }
 0x232   : > { %v2161_v50 = vsub.f32 %v2035_v17, %v2438_v62  ;;  %v2037_v20 = vadd.f32 %v3598_v9, %v2012_v6 }
 0x233   : > { %2180 = vst.msk [vmem:[%s3617_s19 + $0x78] sm:$0xff] %vm538_vm0, %v2162_v21  ;;  %v2441_v27 = vclamps-f32 %v2038_v52, 0.01 }
 0x234   : > { %2179 = vst.msk [vmem:[%s3617_s19 + $0x70] sm:$0xff] %vm538_vm0, %v2161_v50  ;;  %v2440_v25 = vclamps-f32 %v2037_v20, 0.01 }
 0x235   : > { %v2164_v1 = vsub.f32 %v2038_v52, %v2441_v27 }
 0x236   : > { %v2163_v48 = vsub.f32 %v2037_v20, %v2440_v25 }
 0x237   : > { %2182 = vst.msk [vmem:[%s3617_s19 + $0x88] sm:$0xff] %vm538_vm0, %v2164_v1 }
 0x238   : > { %2181 = vst.msk [vmem:[%s3617_s19 + $0x80] sm:$0xff] %vm538_vm0, %v2163_v48 }
 0x239 PF: > { %s24_s25 = sadd.s32 1, %s2848_s25  }
 0x23a   : > { %p21_p4 = scmp.ge.s32.totalorder %s24_s25, 4  }
 0x23c   :  { %23 = sbr.rel (!%p21_p4) target bundleno = 1 (0x1), region = 113 }

// kernel: reverse.4
= control target key start
LH: loop header
LB: loop body
LE: loop exit
PB: predicated region body
PF: predicated region fallthrough
CT: control target
= control target key end

     0   :  { %s344_s0 = inlined_call_operand.vmem [shape: f32[2,32,16,7], index: 0, kind: input, shape index: {}]   ;;  %s345_s1 = inlined_call_operand.vmem [shape: f32[2,32,16,7], index: 1, kind: output, shape index: {}]  }
   0x1   :  { %v112_v0 = vld [vmem:[%s344_s0 + $0x60] sm:$0xff]  ;;  %v113_v1 = vld [vmem:[%s344_s0 + $0xd0] sm:$0xff]  ;;  %v138_v14 = vld [vmem:[%s344_s0 + $0x68] sm:$0xff] }
   0x2   :  { %v115_v2 = vld [vmem:[%s344_s0 + $0x50] sm:$0xff]  ;;  %4 = vst [vmem:[%s345_s1] sm:$0xff] %v112_v0  ;;  %114 = vst [vmem:[%s345_s1 + $0x70] sm:$0xff] %v113_v1  ;;  %v117_v3 = vld [vmem:[%s344_s0 + $0xc0] sm:$0xff] }
   0x3   :  { %116 = vst [vmem:[%s345_s1 + $0x10] sm:$0xff] %v115_v2  ;;  %v119_v4 = vld [vmem:[%s344_s0 + $0x40] sm:$0xff]  ;;  %v121_v5 = vld [vmem:[%s344_s0 + $0xb0] sm:$0xff]  ;;  %118 = vst [vmem:[%s345_s1 + $0x80] sm:$0xff] %v117_v3 }
   0x4   :  { %120 = vst [vmem:[%s345_s1 + $0x20] sm:$0xff] %v119_v4  ;;  %122 = vst [vmem:[%s345_s1 + $0x90] sm:$0xff] %v121_v5  ;;  %v123_v6 = vld [vmem:[%s344_s0 + $0x30] sm:$0xff]  ;;  %v125_v7 = vld [vmem:[%s344_s0 + $0xa0] sm:$0xff] }
   0x5   :  { %v127_v8 = vld [vmem:[%s344_s0 + $0x20] sm:$0xff]  ;;  %124 = vst [vmem:[%s345_s1 + $0x30] sm:$0xff] %v123_v6  ;;  %126 = vst [vmem:[%s345_s1 + $0xa0] sm:$0xff] %v125_v7  ;;  %v129_v9 = vld [vmem:[%s344_s0 + $0x90] sm:$0xff] }
   0x6   :  { %128 = vst [vmem:[%s345_s1 + $0x40] sm:$0xff] %v127_v8  ;;  %v131_v10 = vld [vmem:[%s344_s0 + $0x10] sm:$0xff]  ;;  %v133_v11 = vld [vmem:[%s344_s0 + $0x80] sm:$0xff]  ;;  %130 = vst [vmem:[%s345_s1 + $0xb0] sm:$0xff] %v129_v9 }
   0x7   :  { %132 = vst [vmem:[%s345_s1 + $0x50] sm:$0xff] %v131_v10  ;;  %134 = vst [vmem:[%s345_s1 + $0xc0] sm:$0xff] %v133_v11  ;;  %v49_v12 = vld [vmem:[%s344_s0] sm:$0xff]  ;;  %v136_v13 = vld [vmem:[%s344_s0 + $0x70] sm:$0xff] }
   0x8   :  { %135 = vst [vmem:[%s345_s1 + $0x60] sm:$0xff] %v49_v12  ;;  %137 = vst [vmem:[%s345_s1 + $0xd0] sm:$0xff] %v136_v13  ;;  %v140_v15 = vld [vmem:[%s344_s0 + $0xd8] sm:$0xff]  ;;  %v144_v17 = vld [vmem:[%s344_s0 + $0xc8] sm:$0xff] }
   0x9   :  { %139 = vst [vmem:[%s345_s1 + $0x8] sm:$0xff] %v138_v14  ;;  %v142_v16 = vld [vmem:[%s344_s0 + $0x58] sm:$0xff]  ;;  %141 = vst [vmem:[%s345_s1 + $0x78] sm:$0xff] %v140_v15  ;;  %v146_v18 = vld [vmem:[%s344_s0 + $0x48] sm:$0xff] }
   0xa   :  { %143 = vst [vmem:[%s345_s1 + $0x18] sm:$0xff] %v142_v16  ;;  %145 = vst [vmem:[%s345_s1 + $0x88] sm:$0xff] %v144_v17  ;;  %v148_v19 = vld [vmem:[%s344_s0 + $0xb8] sm:$0xff]  ;;  %v152_v21 = vld [vmem:[%s344_s0 + $0xa8] sm:$0xff] }
   0xb   :  { %v150_v20 = vld [vmem:[%s344_s0 + $0x38] sm:$0xff]  ;;  %147 = vst [vmem:[%s345_s1 + $0x28] sm:$0xff] %v146_v18  ;;  %149 = vst [vmem:[%s345_s1 + $0x98] sm:$0xff] %v148_v19  ;;  %v154_v22 = vld [vmem:[%s344_s0 + $0x28] sm:$0xff] }
   0xc   :  { %151 = vst [vmem:[%s345_s1 + $0x38] sm:$0xff] %v150_v20  ;;  %v156_v23 = vld [vmem:[%s344_s0 + $0x98] sm:$0xff]  ;;  %153 = vst [vmem:[%s345_s1 + $0xa8] sm:$0xff] %v152_v21  ;;  %v160_v25 = vld [vmem:[%s344_s0 + $0x88] sm:$0xff] }
   0xd   :  { %155 = vst [vmem:[%s345_s1 + $0x48] sm:$0xff] %v154_v22  ;;  %157 = vst [vmem:[%s345_s1 + $0xb8] sm:$0xff] %v156_v23  ;;  %v158_v24 = vld [vmem:[%s344_s0 + $0x18] sm:$0xff]  ;;  %v162_v26 = vld [vmem:[%s344_s0 + $0x8] sm:$0xff] }
   0xe   :  { %159 = vst [vmem:[%s345_s1 + $0x58] sm:$0xff] %v158_v24  ;;  %161 = vst [vmem:[%s345_s1 + $0xc8] sm:$0xff] %v160_v25  ;;  %v164_v27 = vld [vmem:[%s344_s0 + $0x78] sm:$0xff] }
   0xf   :  { %163 = vst [vmem:[%s345_s1 + $0x68] sm:$0xff] %v162_v26  ;;  %165 = vst [vmem:[%s345_s1 + $0xd8] sm:$0xff] %v164_v27 }

// kernel: afno_cast_latent_forward.8
= control target key start
LH: loop header
LB: loop body
LE: loop exit
PB: predicated region body
PF: predicated region fallthrough
CT: control target
= control target key end

     0   :  { %s2501_s27 = smov 0   ;;  %s3523_s0 = inlined_call_operand.vmem [shape: f32[512,32], index: 0, kind: input, shape index: {}]   ;;  %s3524_s1 = inlined_call_operand.vmem [shape: f32[512,32], index: 1, kind: input, shape index: {}]   ;;  %s3525_s2 = inlined_call_operand.vmem [shape: f32[1,32], index: 2, kind: input, shape index: {}]   ;;  %s3526_s3 = inlined_call_operand.vmem [shape: f32[1,32], index: 3, kind: input, shape index: {}]   ;;  %s3527_s4 = inlined_call_operand.vmem [shape: f32[32,128], index: 4, kind: input, shape index: {}]   ;;  %s3528_s5 = inlined_call_operand.vmem [shape: f32[1,128], index: 5, kind: input, shape index: {}]   ;;  %s3529_s6 = inlined_call_operand.vmem [shape: f32[128,32], index: 6, kind: input, shape index: {}]   ;;  %s3530_s7 = inlined_call_operand.vmem [shape: f32[1,32], index: 7, kind: input, shape index: {}]   ;;  %s3531_s8 = inlined_call_operand.vmem [shape: f32[512,32], index: 8, kind: output, shape index: {}]  }
   0x1 LB: > { %s1987_s28 = sadd.s32 4294967295, %s2454_s27   ;;  %p1991_p0 = scmp.ge.s32.totalorder %s2454_s27, 1  ;;  %s2454_s27 = sphi %s2501_s27, %s18_s27  }
   0x2   : > { %p274_p1 = scmp.lt.s32.totalorder %s2454_s27, 3 }
   0x4   : > { %p275_p2 = pnand %p1991_p0, %p274_p1 }
   0x6   : > { %278 = sbr.rel (%p275_p2) target bundleno = 884 (0x374), region = 52 }
   0xd   : > { %s1992_s29 = sshll.u32 %s1987_s28, 5  ;;  %vm459_vm0 = vcmask 261120  }
   0xe   : > { %p314_p3 = scmp.lt.s32.totalorder %s1992_s29, 63 }
  0x10   : > { %s3593_s29 = smov (!%p314_p3, %s1992_s29), 63 }
  0x11   : > { %s2509_s30 = sshll.u32 %s3593_s29, 3 }
  0x12   : > { %s2515_s11 = scalar_lea.vmem %s3523_s0, %s2509_s30  ;;  %s2521_s14 = scalar_lea.vmem %s3524_s1, %s2509_s30 }
  0x13   : > { %v331_v0 = vld [vmem:[%s2515_s11] sm:$0xff]  ;;  %v333_v2 = vld [vmem:[%s2515_s11 + $0x10] sm:$0xff]  ;;  %v332_v5 = vld [vmem:[%s2515_s11 + $0x8] sm:$0xff]  ;;  %s3392_s25 = scalar_lea.vmem %s3531_s8, %s2509_s30 }
  0x14   : > { %v363_v1 = vld [vmem:[%s2521_s14] sm:$0xff]  ;;  %v365_v4 = vld [vmem:[%s2521_s14 + $0x10] sm:$0xff]  ;;  %v364_v6 = vld [vmem:[%s2521_s14 + $0x8] sm:$0xff] }
  0x15   : > { %v395_v3 = vmul.f32 0.25, %v363_v1  ;;  %v397_v7 = vmul.f32 0.25, %v365_v4  ;;  %v396_v8 = vmul.f32 0.25, %v364_v6  ;;  %v334_v9 = vld [vmem:[%s2515_s11 + $0x18] sm:$0xff]  ;;  %v367_v13 = vld [vmem:[%s2521_s14 + $0x20] sm:$0xff]  ;;  %v368_v14 = vld [vmem:[%s2521_s14 + $0x28] sm:$0xff] }
  0x16   : > { %v366_v10 = vld [vmem:[%s2521_s14 + $0x18] sm:$0xff]  ;;  %v335_v17 = vld [vmem:[%s2515_s11 + $0x20] sm:$0xff]  ;;  %v399_v18 = vmul.f32 0.25, %v367_v13  ;;  %v400_v19 = vmul.f32 0.25, %v368_v14  ;;  %v369_v20 = vld [vmem:[%s2521_s14 + $0x30] sm:$0xff] }
  0x17   : > { %v2531_v11 = vadd.f32 %v395_v3, %v331_v0  ;;  %v398_v12 = vmul.f32 0.25, %v366_v10  ;;  %v2535_v15 = vadd.f32 %v397_v7, %v333_v2  ;;  %v2537_v16 = vadd.f32 %v396_v8, %v332_v5  ;;  %v336_v23 = vld [vmem:[%s2515_s11 + $0x28] sm:$0xff]  ;;  %v370_v24 = vld [vmem:[%s2521_s14 + $0x38] sm:$0xff]  ;;  %v337_v31 = vld [vmem:[%s2515_s11 + $0x30] sm:$0xff] }
  0x18   : > { %v2551_v27 = vadd.f32 %v399_v18, %v335_v17  ;;  %v401_v28 = vmul.f32 0.25, %v369_v20  ;;  %v2555_v30 = vadd.f32 %v400_v19, %v336_v23  ;;  %v402_v32 = vmul.f32 0.25, %v370_v24  ;;  %v371_v33 = vld [vmem:[%s2521_s14 + $0x40] sm:$0xff]  ;;  %v338_v34 = vld [vmem:[%s2515_s11 + $0x38] sm:$0xff]  ;;  %v372_v35 = vld [vmem:[%s2521_s14 + $0x48] sm:$0xff] }
  0x19   : > { %v460_v21 = vsel %vm459_vm0, %v2531_v11, 0.0  ;;  %v2543_v22 = vadd.f32 %v398_v12, %v334_v9  ;;  %v466_v25 = vsel %vm459_vm0, %v2535_v15, 0.0  ;;  %v463_v26 = vsel %vm459_vm0, %v2537_v16, 0.0  ;;  %v339_v41 = vld [vmem:[%s2515_s11 + $0x40] sm:$0xff]  ;;  %v373_v43 = vld [vmem:[%s2521_s14 + $0x50] sm:$0xff]  ;;  %v340_v44 = vld [vmem:[%s2515_s11 + $0x48] sm:$0xff] }
  0x1a   : > { %461 = vadd.xlane.f32.xlu0 %v460_v21  ;;  %467 = vadd.xlane.f32.xlu1 %v466_v25  ;;  %v472_v36 = vsel %vm459_vm0, %v2551_v27, 0.0  ;;  %v2563_v37 = vadd.f32 %v401_v28, %v337_v31  ;;  %v403_v38 = vmul.f32 0.25, %v371_v33  ;;  %v475_v39 = vsel %vm459_vm0, %v2555_v30, 0.0  ;;  %v374_v45 = vld [vmem:[%s2521_s14 + $0x58] sm:$0xff]  ;;  %v341_v51 = vld [vmem:[%s2515_s11 + $0x50] sm:$0xff]  ;;  %v375_v53 = vld [vmem:[%s2521_s14 + $0x60] sm:$0xff] }
  0x1b   : > { %v469_v29 = vsel %vm459_vm0, %v2543_v22, 0.0  ;;  %v2567_v40 = vadd.f32 %v402_v32, %v338_v34  ;;  %v404_v42 = vmul.f32 0.25, %v372_v35  ;;  %v405_v48 = vmul.f32 0.25, %v373_v43  ;;  %v342_v54 = vld [vmem:[%s2515_s11 + $0x58] sm:$0xff]  ;;  %v376_v55 = vld [vmem:[%s2521_s14 + $0x68] sm:$0xff]  ;;  %v343_v61 = vld [vmem:[%s2515_s11 + $0x60] sm:$0xff] }
  0x1c   : > { %v478_v46 = vsel %vm459_vm0, %v2563_v37, 0.0  ;;  %v2575_v47 = vadd.f32 %v403_v38, %v339_v41  ;;  %v406_v52 = vmul.f32 0.25, %v374_v45  ;;  %v407_v58 = vmul.f32 0.25, %v375_v53  ;;  %v377_v63 = vld [vmem:[%s2521_s14 + $0x70] sm:$0xff]  ;;  %v344_v0 = vld [vmem:[%s2515_s11 + $0x68] sm:$0xff]  ;;  %v378_v1 = vld [vmem:[%s2521_s14 + $0x78] sm:$0xff] }
  0x1d   : > { %v481_v49 = vsel %vm459_vm0, %v2567_v40, 0.0  ;;  %v2579_v50 = vadd.f32 %v404_v42, %v340_v44  ;;  %v2587_v57 = vadd.f32 %v405_v48, %v341_v51  ;;  %v408_v62 = vmul.f32 0.25, %v376_v55  ;;  %v345_v7 = vld [vmem:[%s2515_s11 + $0x70] sm:$0xff]  ;;  %v379_v9 = vld [vmem:[%s2521_s14 + $0x80] sm:$0xff]  ;;  %v346_v10 = vld [vmem:[%s2515_s11 + $0x78] sm:$0xff] }
  0x1e   : > { %464 = vadd.xlane.f32.xlu0 %v463_v26  ;;  %470 = vadd.xlane.f32.xlu1 %v469_v29  ;;  %v484_v56 = vsel %vm459_vm0, %v2575_v47, 0.0  ;;  %v2591_v60 = vadd.f32 %v406_v52, %v342_v54  ;;  %v2599_v3 = vadd.f32 %v407_v58, %v343_v61  ;;  %v409_v4 = vmul.f32 0.25, %v377_v63  ;;  %v380_v12 = vld [vmem:[%s2521_s14 + $0x88] sm:$0xff]  ;;  %v347_v20 = vld [vmem:[%s2515_s11 + $0x80] sm:$0xff]  ;;  %v381_v23 = vld [vmem:[%s2521_s14 + $0x90] sm:$0xff] }
  0x1f   : > { %v487_v59 = vsel %vm459_vm0, %v2579_v50, 0.0  ;;  %v490_v2 = vsel %vm459_vm0, %v2587_v57, 0.0  ;;  %v2603_v6 = vadd.f32 %v408_v62, %v344_v0  ;;  %v410_v8 = vmul.f32 0.25, %v378_v1  ;;  %v348_v24 = vld [vmem:[%s2515_s11 + $0x88] sm:$0xff]  ;;  %v382_v25 = vld [vmem:[%s2521_s14 + $0x98] sm:$0xff]  ;;  %v349_v33 = vld [vmem:[%s2515_s11 + $0x90] sm:$0xff] }
  0x20   : > { %3552 = vst [vmem:[#allocation2_spill] sm:$0xff] %v2599_v3  ;;  %v493_v5 = vsel %vm459_vm0, %v2591_v60, 0.0  ;;  %v496_v13 = vsel %vm459_vm0, %v2599_v3, 0.0  ;;  %v2611_v14 = vadd.f32 %v409_v4, %v345_v7  ;;  %v411_v17 = vmul.f32 0.25, %v379_v9  ;;  %v383_v35 = vld [vmem:[%s2521_s14 + $0xa0] sm:$0xff]  ;;  %v384_v38 = vld [vmem:[%s2521_s14 + $0xa8] sm:$0xff] }
  0x21   : > { %3553 = vst [vmem:[#allocation3_spill] sm:$0xff] %v2603_v6  ;;  %v499_v18 = vsel %vm459_vm0, %v2603_v6, 0.0  ;;  %v2615_v19 = vadd.f32 %v410_v8, %v346_v10  ;;  %v412_v21 = vmul.f32 0.25, %v380_v12  ;;  %v413_v29 = vmul.f32 0.25, %v381_v23  ;;  %v351_v45 = vld [vmem:[%s2515_s11 + $0xa0] sm:$0xff]  ;;  %v385_v48 = vld [vmem:[%s2521_s14 + $0xb0] sm:$0xff] }
  0x22   : > { %473 = vadd.xlane.f32.xlu0 %v472_v36  ;;  %476 = vadd.xlane.f32.xlu1 %v475_v39  ;;  %3554 = vst [vmem:[#allocation4_spill] sm:$0xff] %v2611_v14  ;;  %v502_v26 = vsel %vm459_vm0, %v2611_v14, 0.0  ;;  %v2623_v28 = vadd.f32 %v411_v17, %v347_v20  ;;  %v414_v34 = vmul.f32 0.25, %v382_v25  ;;  %v350_v36 = vld [vmem:[%s2515_s11 + $0x98] sm:$0xff]  ;;  %v415_v42 = vmul.f32 0.25, %v383_v35  ;;  %v353_v58 = vld [vmem:[%s2515_s11 + $0xb0] sm:$0xff] }
  0x23   : > { %3555 = vst [vmem:[#allocation5_spill] sm:$0xff] %v2615_v19  ;;  %v505_v31 = vsel %vm459_vm0, %v2615_v19, 0.0  ;;  %v2627_v32 = vadd.f32 %v412_v21, %v348_v24  ;;  %v2635_v41 = vadd.f32 %v413_v29, %v349_v33  ;;  %v386_v51 = vld [vmem:[%s2521_s14 + $0xb8] sm:$0xff]  ;;  %v417_v54 = vmul.f32 0.25, %v385_v48  ;;  %v387_v61 = vld [vmem:[%s2521_s14 + $0xc0] sm:$0xff]  ;;  %v388_v63 = vld [vmem:[%s2521_s14 + $0xc8] sm:$0xff] }
  0x24   : > { %3556 = vst [vmem:[#allocation6_spill] sm:$0xff] %v2623_v28  ;;  %v508_v39 = vsel %vm459_vm0, %v2623_v28, 0.0  ;;  %v2639_v44 = vadd.f32 %v414_v34, %v350_v36  ;;  %v2647_v53 = vadd.f32 %v415_v42, %v351_v45  ;;  %v354_v62 = vld [vmem:[%s2515_s11 + $0xb8] sm:$0xff]  ;;  %v355_v7 = vld [vmem:[%s2515_s11 + $0xc0] sm:$0xff]  ;;  %v420_v8 = vmul.f32 0.25, %v388_v63  ;;  %v389_v9 = vld [vmem:[%s2521_s14 + $0xd0] sm:$0xff] }
  0x25   : > { %3557 = vst [vmem:[#allocation7_spill] sm:$0xff] %v2627_v32  ;;  %3558 = vst [vmem:[#allocation8_spill] sm:$0xff] %v2635_v41  ;;  %v511_v43 = vsel %vm459_vm0, %v2627_v32, 0.0  ;;  %v514_v52 = vsel %vm459_vm0, %v2635_v41, 0.0  ;;  %v2659_v1 = vadd.f32 %v417_v54, %v353_v58  ;;  %v356_v10 = vld [vmem:[%s2515_s11 + $0xc8] sm:$0xff]  ;;  %v390_v12 = vld [vmem:[%s2521_s14 + $0xd8] sm:$0xff] }
  0x26   : > { %479 = vadd.xlane.f32.xlu0 %v478_v46  ;;  %482 = vadd.xlane.f32.xlu1 %v481_v49  ;;  %3559 = vst [vmem:[#allocation9_spill] sm:$0xff] %v2639_v44  ;;  %v416_v46 = vmul.f32 0.25, %v384_v38  ;;  %v352_v49 = vld [vmem:[%s2515_s11 + $0xa8] sm:$0xff]  ;;  %3560 = vst [vmem:[#allocation10_spill] sm:$0xff] %v2647_v53  ;;  %v517_v55 = vsel %vm459_vm0, %v2639_v44, 0.0  ;;  %v520_v0 = vsel %vm459_vm0, %v2647_v53, 0.0  ;;  %v2675_v21 = vadd.f32 %v420_v8, %v356_v10 }
  0x27   : > { %3562 = vst [vmem:[#allocation12_spill] sm:$0xff] %v2659_v1  ;;  %v357_v23 = vld [vmem:[%s2515_s11 + $0xd0] sm:$0xff]  ;;  %v422_v24 = vmul.f32 0.25, %v390_v12  ;;  %v391_v25 = vld [vmem:[%s2521_s14 + $0xe0] sm:$0xff]  ;;  %v392_v29 = vld [vmem:[%s2521_s14 + $0xe8] sm:$0xff] }
  0x28   : > { %3565 = vst [vmem:[#allocation15_spill] sm:$0xff] %v2675_v21  ;;  %v423_v34 = vmul.f32 0.25, %v391_v25  ;;  %v535_v35 = vsel %vm459_vm0, %v2675_v21, 0.0  ;;  %v359_v38 = vld [vmem:[%s2515_s11 + $0xe0] sm:$0xff]  ;;  %v393_v42 = vld [vmem:[%s2521_s14 + $0xf0] sm:$0xff]  ;;  %v394_v45 = vld [vmem:[%s2521_s14 + $0xf8] sm:$0xff] }
  0x29   : > { %v361_v54 = vld [vmem:[%s2515_s11 + $0xf0] sm:$0xff]  ;;  %v362_v58 = vld [vmem:[%s2515_s11 + $0xf8] sm:$0xff] }
  0x2a   : > { %485 = vadd.xlane.f32.xlu0 %v484_v56  ;;  %488 = vadd.xlane.f32.xlu1 %v487_v59  ;;  %v2651_v56 = vadd.f32 %v416_v46, %v352_v49  ;;  %v418_v59 = vmul.f32 0.25, %v386_v51  ;;  %v2695_v48 = vadd.f32 %v423_v34, %v359_v38  ;;  %v425_v49 = vmul.f32 0.25, %v393_v42 }
  0x2c   : > { %3561 = vst [vmem:[#allocation11_spill] sm:$0xff] %v2651_v56  ;;  %v523_v4 = vsel %vm459_vm0, %v2651_v56, 0.0  ;;  %3568 = vst [vmem:[#allocation18_spill] sm:$0xff] %v2695_v48 }
  0x2e   : > { %491 = vadd.xlane.f32.xlu0 %v490_v2  ;;  %494 = vadd.xlane.f32.xlu1 %v493_v5  ;;  %v419_v2 = vmul.f32 0.25, %v387_v61  ;;  %v2663_v5 = vadd.f32 %v418_v59, %v354_v62  ;;  %v544_v59 = vsel %vm459_vm0, %v2695_v48, 0.0  ;;  %v2705_v61 = vadd.f32 %v425_v49, %v361_v54 }
  0x30   : > { %3563 = vst [vmem:[#allocation13_spill] sm:$0xff] %v2663_v5  ;;  %v2671_v17 = vadd.f32 %v419_v2, %v355_v7  ;;  %v529_v20 = vsel %vm459_vm0, %v2663_v5, 0.0  ;;  %3570 = vst [vmem:[#allocation20_spill] sm:$0xff] %v2705_v61 }
  0x32   : > { %497 = vadd.xlane.f32.xlu0 %v496_v13  ;;  %500 = vadd.xlane.f32.xlu1 %v499_v18  ;;  %v526_v13 = vsel %vm459_vm0, %v2659_v1, 0.0  ;;  %3564 = vst [vmem:[#allocation14_spill] sm:$0xff] %v2671_v17  ;;  %v421_v18 = vmul.f32 0.25, %v389_v9 }
  0x34   : > { %v2683_v33 = vadd.f32 %v421_v18, %v357_v23 }
  0x36   : > { %503 = vadd.xlane.f32.xlu0 %v502_v26  ;;  %506 = vadd.xlane.f32.xlu1 %v505_v31  ;;  %v358_v26 = vld [vmem:[%s2515_s11 + $0xd8] sm:$0xff]  ;;  %v532_v31 = vsel %vm459_vm0, %v2671_v17, 0.0  ;;  %3566 = vst [vmem:[#allocation16_spill] sm:$0xff] %v2683_v33  ;;  %v538_v46 = vsel %vm459_vm0, %v2683_v33, 0.0 }
  0x37   : > { %v2687_v36 = vadd.f32 %v422_v24, %v358_v26 }
  0x39   : > { %3567 = vst [vmem:[#allocation17_spill] sm:$0xff] %v2687_v36  ;;  %v541_v51 = vsel %vm459_vm0, %v2687_v36, 0.0 }
  0x3a   : > { %509 = vadd.xlane.f32.xlu0 %v508_v39  ;;  %512 = vadd.xlane.f32.xlu1 %v511_v43  ;;  %v424_v39 = vmul.f32 0.25, %v392_v29  ;;  %v360_v43 = vld [vmem:[%s2515_s11 + $0xe8] sm:$0xff] }
  0x3e   : > { %515 = vadd.xlane.f32.xlu0 %v514_v52  ;;  %518 = vadd.xlane.f32.xlu1 %v517_v55  ;;  %v2699_v52 = vadd.f32 %v424_v39, %v360_v43  ;;  %v426_v55 = vmul.f32 0.25, %v394_v45 }
  0x40   : > { %3569 = vst [vmem:[#allocation19_spill] sm:$0xff] %v2699_v52  ;;  %v547_v62 = vsel %vm459_vm0, %v2699_v52, 0.0  ;;  %v2709_v63 = vadd.f32 %v426_v55, %v362_v58 }
  0x42   : > { %521 = vadd.xlane.f32.xlu0 %v520_v0  ;;  %524 = vadd.xlane.f32.xlu1 %v523_v4  ;;  %3571 = vst [vmem:[#allocation21_spill] sm:$0xff] %v2709_v63  ;;  %v550_v0 = vsel %vm459_vm0, %v2705_v61, 0.0  ;;  %v553_v2 = vsel %vm459_vm0, %v2709_v63, 0.0 }
  0x46   : > { %527 = vadd.xlane.f32.xlu0 %v526_v13  ;;  %530 = vadd.xlane.f32.xlu1 %v529_v20 }
  0x4a   : > { %533 = vadd.xlane.f32.xlu0 %v532_v31  ;;  %536 = vadd.xlane.f32.xlu1 %v535_v35 }
  0x4e   : > { %539 = vadd.xlane.f32.xlu0 %v538_v46  ;;  %542 = vadd.xlane.f32.xlu1 %v541_v51 }
  0x52   : > { %545 = vadd.xlane.f32.xlu0 %v544_v59  ;;  %548 = vadd.xlane.f32.xlu1 %v547_v62 }
  0x56   : > { %551 = vadd.xlane.f32.xlu0 %v550_v0  ;;  %554 = vadd.xlane.f32.xlu1 %v553_v2 }
  0xa7   : > { %v462_v4 = vpop.xlane.xlu0 %461  ;;  %v468_v8 = vpop.xlane.xlu1 %467 }
  0xa8   : > { %v557_v7 = vmul.f32 0.03125, %v462_v4  ;;  %v559_v9 = vmul.f32 0.03125, %v468_v8 }
  0xaa   : > { %v2716_v10 = vsub.f32 %v2531_v11, %v557_v7  ;;  %v2719_v12 = vsub.f32 %v2535_v15, %v559_v9 }
  0xab   : > { %v465_v13 = vpop.xlane.xlu0 %464  ;;  %v471_v20 = vpop.xlane.xlu1 %470 }
  0xac   : > { %v558_v18 = vmul.f32 0.03125, %v465_v13  ;;  %v621_v23 = vmul.f32 %v2716_v10, %v2716_v10  ;;  %v560_v24 = vmul.f32 0.03125, %v471_v20  ;;  %v623_v25 = vmul.f32 %v2719_v12, %v2719_v12 }
  0xae   : > { %v2726_v26 = vsub.f32 %v2537_v16, %v558_v18  ;;  %v653_v29 = vsel %vm459_vm0, %v621_v23, 0.0  ;;  %v2730_v31 = vsub.f32 %v2543_v22, %v560_v24  ;;  %v659_v39 = vsel %vm459_vm0, %v623_v25, 0.0 }
  0xaf   : > { %654 = vadd.xlane.f32.xlu0 %v653_v29  ;;  %v474_v34 = vpop.xlane.xlu0 %473  ;;  %v477_v38 = vpop.xlane.xlu1 %476 }
  0xb0   : > { %v561_v35 = vmul.f32 0.03125, %v474_v34  ;;  %v622_v42 = vmul.f32 %v2726_v26, %v2726_v26  ;;  %v562_v43 = vmul.f32 0.03125, %v477_v38  ;;  %v624_v45 = vmul.f32 %v2730_v31, %v2730_v31 }
  0xb2   : > { %v2738_v46 = vsub.f32 %v2551_v27, %v561_v35  ;;  %v656_v49 = vsel %vm459_vm0, %v622_v42, 0.0  ;;  %v2742_v51 = vsub.f32 %v2555_v30, %v562_v43  ;;  %v662_v59 = vsel %vm459_vm0, %v624_v45, 0.0 }
  0xb3   : > { %660 = vadd.xlane.f32.xlu0 %v659_v39  ;;  %657 = vadd.xlane.f32.xlu1 %v656_v49  ;;  %v480_v54 = vpop.xlane.xlu0 %479  ;;  %v483_v58 = vpop.xlane.xlu1 %482 }
  0xb4   : > { %v563_v55 = vmul.f32 0.03125, %v480_v54  ;;  %v625_v62 = vmul.f32 %v2738_v46, %v2738_v46  ;;  %v564_v0 = vmul.f32 0.03125, %v483_v58  ;;  %v626_v2 = vmul.f32 %v2742_v51, %v2742_v51 }
  0xb6   : > { %v2750_v4 = vsub.f32 %v2563_v37, %v563_v55  ;;  %v665_v7 = vsel %vm459_vm0, %v625_v62, 0.0  ;;  %v2754_v8 = vsub.f32 %v2567_v40, %v564_v0  ;;  %v668_v20 = vsel %vm459_vm0, %v626_v2, 0.0 }
  0xb7   : > { %663 = vadd.xlane.f32.xlu1 %v662_v59  ;;  %666 = vadd.xlane.f32.xlu0 %v665_v7  ;;  %v486_v9 = vpop.xlane.xlu0 %485  ;;  %v489_v18 = vpop.xlane.xlu1 %488 }
  0xb8   : > { %v565_v13 = vmul.f32 0.03125, %v486_v9  ;;  %v627_v23 = vmul.f32 %v2750_v4, %v2750_v4  ;;  %v566_v24 = vmul.f32 0.03125, %v489_v18  ;;  %v628_v25 = vmul.f32 %v2754_v8, %v2754_v8 }
  0xba   : > { %v2762_v29 = vsub.f32 %v2575_v47, %v565_v13  ;;  %v671_v34 = vsel %vm459_vm0, %v627_v23, 0.0  ;;  %v2766_v35 = vsub.f32 %v2579_v50, %v566_v24  ;;  %v674_v43 = vsel %vm459_vm0, %v628_v25, 0.0 }
  0xbb   : > { %669 = vadd.xlane.f32.xlu1 %v668_v20  ;;  %672 = vadd.xlane.f32.xlu0 %v671_v34  ;;  %v492_v38 = vpop.xlane.xlu0 %491  ;;  %v495_v42 = vpop.xlane.xlu1 %494 }
  0xbc   : > { %v567_v39 = vmul.f32 0.03125, %v492_v38  ;;  %v629_v45 = vmul.f32 %v2762_v29, %v2762_v29  ;;  %v568_v49 = vmul.f32 0.03125, %v495_v42  ;;  %v630_v54 = vmul.f32 %v2766_v35, %v2766_v35 }
  0xbe   : > { %v2774_v55 = vsub.f32 %v2587_v57, %v567_v39  ;;  %v677_v58 = vsel %vm459_vm0, %v629_v45, 0.0  ;;  %v2778_v59 = vsub.f32 %v2591_v60, %v568_v49  ;;  %v680_v7 = vsel %vm459_vm0, %v630_v54, 0.0 }
  0xbf   : > { %675 = vadd.xlane.f32.xlu1 %v674_v43  ;;  %678 = vadd.xlane.f32.xlu0 %v677_v58  ;;  %v498_v62 = vpop.xlane.xlu0 %497  ;;  %v501_v2 = vpop.xlane.xlu1 %500 }
  0xc0   : > { %v569_v0 = vmul.f32 0.03125, %v498_v62  ;;  %v631_v9 = vmul.f32 %v2774_v55, %v2774_v55  ;;  %v570_v13 = vmul.f32 0.03125, %v501_v2  ;;  %v632_v18 = vmul.f32 %v2778_v59, %v2778_v59 }
  0xc2   : > { %v2786_v20 = vsub.f32 %v2599_v3, %v569_v0  ;;  %v683_v23 = vsel %vm459_vm0, %v631_v9, 0.0  ;;  %v2790_v24 = vsub.f32 %v2603_v6, %v570_v13  ;;  %v686_v39 = vsel %vm459_vm0, %v632_v18, 0.0 }
  0xc3   : > { %681 = vadd.xlane.f32.xlu1 %v680_v7  ;;  %684 = vadd.xlane.f32.xlu0 %v683_v23  ;;  %v504_v25 = vpop.xlane.xlu0 %503  ;;  %v507_v38 = vpop.xlane.xlu1 %506 }
  0xc4   : > { %v571_v34 = vmul.f32 0.03125, %v504_v25  ;;  %v633_v42 = vmul.f32 %v2786_v20, %v2786_v20  ;;  %v572_v43 = vmul.f32 0.03125, %v507_v38  ;;  %v634_v45 = vmul.f32 %v2790_v24, %v2790_v24 }
  0xc6   : > { %v2798_v49 = vsub.f32 %v2611_v14, %v571_v34  ;;  %v689_v54 = vsel %vm459_vm0, %v633_v42, 0.0  ;;  %v2802_v58 = vsub.f32 %v2615_v19, %v572_v43  ;;  %v692_v7 = vsel %vm459_vm0, %v634_v45, 0.0 }
  0xc7   : > { %687 = vadd.xlane.f32.xlu1 %v686_v39  ;;  %690 = vadd.xlane.f32.xlu0 %v689_v54  ;;  %v510_v62 = vpop.xlane.xlu0 %509  ;;  %v513_v2 = vpop.xlane.xlu1 %512  ;;  %v955_v54 = vld [vmem:[%s3527_s4] sm:$0xff] }
  0xc8   : > { %v573_v0 = vmul.f32 0.03125, %v510_v62  ;;  %v635_v9 = vmul.f32 %v2798_v49, %v2798_v49  ;;  %v574_v13 = vmul.f32 0.03125, %v513_v2  ;;  %v636_v18 = vmul.f32 %v2802_v58, %v2802_v58  ;;  %v956_v62 = vld [vmem:[%s3527_s4 + $0x8] sm:$0xff] }
  0xca   : > { %v2810_v23 = vsub.f32 %v2623_v28, %v573_v0  ;;  %v695_v25 = vsel %vm459_vm0, %v635_v9, 0.0  ;;  %v2814_v34 = vsub.f32 %v2627_v32, %v574_v13  ;;  %v698_v43 = vsel %vm459_vm0, %v636_v18, 0.0 }
  0xcb   : > { %693 = vadd.xlane.f32.xlu1 %v692_v7  ;;  %696 = vadd.xlane.f32.xlu0 %v695_v25  ;;  %v516_v38 = vpop.xlane.xlu0 %515  ;;  %v519_v42 = vpop.xlane.xlu1 %518  ;;  %v2256_v7 = vpack.c.bf16 %v956_v62, %v955_v54 }
  0xcc   : > { %v575_v39 = vmul.f32 0.03125, %v516_v38  ;;  %v637_v45 = vmul.f32 %v2810_v23, %v2810_v23  ;;  %v576_v0 = vmul.f32 0.03125, %v519_v42  ;;  %v638_v2 = vmul.f32 %v2814_v34, %v2814_v34 }
  0xcd   : > { %2257 = vmatprep.subr.bf16.mxu0 %v2256_v7 }
  0xce   : > { %v2828_v9 = vsub.f32 %v2635_v41, %v575_v39  ;;  %v701_v13 = vsel %vm459_vm0, %v637_v45, 0.0  ;;  %v2832_v18 = vsub.f32 %v2639_v44, %v576_v0  ;;  %v704_v32 = vsel %vm459_vm0, %v638_v2, 0.0  ;;  %v957_v39 = vld [vmem:[%s3527_s4 + $0x10] sm:$0xff]  ;;  %v958_v45 = vld [vmem:[%s3527_s4 + $0x18] sm:$0xff]  ;;  %2259 = vmatpush3.bf16.msra.mxu0 %v2256_v7 }
  0xcf   : > { %699 = vadd.xlane.f32.xlu1 %v698_v43  ;;  %702 = vadd.xlane.f32.xlu0 %v701_v13  ;;  %v522_v25 = vpop.xlane.xlu0 %521  ;;  %v525_v28 = vpop.xlane.xlu1 %524  ;;  %v2260_v62 = vpack.c.bf16 %v958_v45, %v957_v39 }
  0xd0   : > { %v577_v38 = vmul.f32 0.03125, %v522_v25  ;;  %v639_v42 = vmul.f32 %v2828_v9, %v2828_v9  ;;  %v578_v54 = vmul.f32 0.03125, %v525_v28  ;;  %v640_v43 = vmul.f32 %v2832_v18, %v2832_v18 }
  0xd1   : > { %2261 = vmatprep.subr.bf16.mxu0 %v2260_v62 }
  0xd2   : > { %v2846_v0 = vsub.f32 %v2647_v53, %v577_v38  ;;  %v707_v2 = vsel %vm459_vm0, %v639_v42, 0.0  ;;  %v2850_v13 = vsub.f32 %v2651_v56, %v578_v54  ;;  %v710_v28 = vsel %vm459_vm0, %v640_v43, 0.0  ;;  %2263 = vmatpush3.bf16.msra.mxu0 %v2260_v62 }
  0xd3   : > { %705 = vadd.xlane.f32.xlu1 %v704_v32  ;;  %708 = vadd.xlane.f32.xlu0 %v707_v2  ;;  %v528_v25 = vpop.xlane.xlu0 %527  ;;  %v531_v44 = vpop.xlane.xlu1 %530 }
  0xd4   : > { %v579_v41 = vmul.f32 0.03125, %v528_v25  ;;  %v641_v14 = vmul.f32 %v2846_v0, %v2846_v0  ;;  %v580_v7 = vmul.f32 0.03125, %v531_v44  ;;  %v642_v38 = vmul.f32 %v2850_v13, %v2850_v13 }
  0xd6   : > { %v2858_v42 = vsub.f32 %v2659_v1, %v579_v41  ;;  %v713_v32 = vsel %vm459_vm0, %v641_v14, 0.0  ;;  %v2862_v39 = vsub.f32 %v2663_v5, %v580_v7  ;;  %v716_v2 = vsel %vm459_vm0, %v642_v38, 0.0 }
  0xd7   : > { %711 = vadd.xlane.f32.xlu1 %v710_v28  ;;  %714 = vadd.xlane.f32.xlu0 %v713_v32  ;;  %v534_v45 = vpop.xlane.xlu0 %533  ;;  %v537_v43 = vpop.xlane.xlu1 %536 }
  0xd8   : > { %v581_v54 = vmul.f32 0.03125, %v534_v45  ;;  %v643_v44 = vmul.f32 %v2858_v42, %v2858_v42  ;;  %v582_v25 = vmul.f32 0.03125, %v537_v43  ;;  %v644_v41 = vmul.f32 %v2862_v39, %v2862_v39 }
  0xda   : > { %v2870_v62 = vsub.f32 %v2671_v17, %v581_v54  ;;  %v719_v14 = vsel %vm459_vm0, %v643_v44, 0.0  ;;  %v2874_v28 = vsub.f32 %v2675_v21, %v582_v25  ;;  %v722_v45 = vsel %vm459_vm0, %v644_v41, 0.0 }
  0xdb   : > { %717 = vadd.xlane.f32.xlu1 %v716_v2  ;;  %720 = vadd.xlane.f32.xlu0 %v719_v14  ;;  %v540_v7 = vpop.xlane.xlu0 %539  ;;  %v543_v38 = vpop.xlane.xlu1 %542 }
  0xdc   : > { %v583_v32 = vmul.f32 0.03125, %v540_v7  ;;  %v645_v43 = vmul.f32 %v2870_v62, %v2870_v62  ;;  %v584_v1 = vmul.f32 0.03125, %v543_v38  ;;  %v646_v54 = vmul.f32 %v2874_v28, %v2874_v28 }
  0xde   : > { %v2882_v17 = vsub.f32 %v2683_v33, %v583_v32  ;;  %v725_v44 = vsel %vm459_vm0, %v645_v43, 0.0  ;;  %v2886_v2 = vsub.f32 %v2687_v36, %v584_v1  ;;  %v728_v7 = vsel %vm459_vm0, %v646_v54, 0.0 }
  0xdf   : > { %723 = vadd.xlane.f32.xlu1 %v722_v45  ;;  %726 = vadd.xlane.f32.xlu0 %v725_v44  ;;  %v546_v25 = vpop.xlane.xlu0 %545  ;;  %v549_v41 = vpop.xlane.xlu1 %548 }
  0xe0   : > { %v585_v14 = vmul.f32 0.03125, %v546_v25  ;;  %v647_v38 = vmul.f32 %v2882_v17, %v2882_v17  ;;  %v586_v21 = vmul.f32 0.03125, %v549_v41  ;;  %v648_v32 = vmul.f32 %v2886_v2, %v2886_v2 }
  0xe2   : > { %v2894_v33 = vsub.f32 %v2695_v48, %v585_v14  ;;  %v731_v1 = vsel %vm459_vm0, %v647_v38, 0.0  ;;  %v2898_v45 = vsub.f32 %v2699_v52, %v586_v21  ;;  %v734_v25 = vsel %vm459_vm0, %v648_v32, 0.0 }
  0xe3   : > { %729 = vadd.xlane.f32.xlu1 %v728_v7  ;;  %732 = vadd.xlane.f32.xlu0 %v731_v1  ;;  %v552_v43 = vpop.xlane.xlu0 %551  ;;  %v555_v54 = vpop.xlane.xlu1 %554 }
  0xe4   : > { %v587_v44 = vmul.f32 0.03125, %v552_v43  ;;  %v649_v41 = vmul.f32 %v2894_v33, %v2894_v33  ;;  %v588_v36 = vmul.f32 0.03125, %v555_v54  ;;  %v650_v14 = vmul.f32 %v2898_v45, %v2898_v45 }
  0xe6   : > { %v2906_v48 = vsub.f32 %v2705_v61, %v587_v44  ;;  %v737_v21 = vsel %vm459_vm0, %v649_v41, 0.0  ;;  %v2910_v7 = vsub.f32 %v2709_v63, %v588_v36  ;;  %v740_v38 = vsel %vm459_vm0, %v650_v14, 0.0 }
  0xe7   : > { %735 = vadd.xlane.f32.xlu1 %v734_v25  ;;  %738 = vadd.xlane.f32.xlu0 %v737_v21 }
  0xe8   : > { %v651_v32 = vmul.f32 %v2906_v48, %v2906_v48  ;;  %v652_v1 = vmul.f32 %v2910_v7, %v2910_v7 }
  0xea   : > { %v743_v43 = vsel %vm459_vm0, %v651_v32, 0.0  ;;  %v746_v44 = vsel %vm459_vm0, %v652_v1, 0.0 }
  0xeb   : > { %741 = vadd.xlane.f32.xlu1 %v740_v38  ;;  %744 = vadd.xlane.f32.xlu0 %v743_v43 }
  0xef   : > { %747 = vadd.xlane.f32.xlu1 %v746_v44 }
 0x13c   : > { %v655_v54 = vpop.xlane.xlu0 %654 }
 0x13d   : > { %v749_v36 = vmul.f32 0.03125, %v655_v54 }
 0x13f   : > { %v781_v41 = vadd.f32 1e-05, %v749_v36 }
 0x140   : > { %v658_v25 = vpop.xlane.xlu1 %657  ;;  %v661_v21 = vpop.xlane.xlu0 %660 }
 0x141   : > { %2320 = vrsqrt.f32 %v781_v41  ;;  %v750_v14 = vmul.f32 0.03125, %v658_v25  ;;  %v751_v61 = vmul.f32 0.03125, %v661_v21  ;;  %v2928_v21 = vld [vmem:[%s3526_s3] ss:$0 sm:$0xff] }
 0x143   : > { %v782_v63 = vadd.f32 1e-05, %v750_v14  ;;  %v783_v52 = vadd.f32 1e-05, %v751_v61  ;;  %v2922_v61 = vld [vmem:[%s3525_s2] ss:$0 sm:$0xff] }
 0x144   : > { %v664_v5 = vpop.xlane.xlu1 %663  ;;  %v667_v53 = vpop.xlane.xlu0 %666 }
 0x145   : > { %2322 = vrsqrt.f32 %v782_v63  ;;  %v752_v56 = vmul.f32 0.03125, %v664_v5  ;;  %v753_v32 = vmul.f32 0.03125, %v667_v53 }
 0x146   : > { %2324 = vrsqrt.f32 %v783_v52 }
 0x147   : > { %v784_v38 = vadd.f32 1e-05, %v752_v56  ;;  %v785_v43 = vadd.f32 1e-05, %v753_v32 }
 0x148   : > { %v670_v1 = vpop.xlane.xlu1 %669  ;;  %v673_v44 = vpop.xlane.xlu0 %672 }
 0x149   : > { %2326 = vrsqrt.f32 %v784_v38  ;;  %v754_v54 = vmul.f32 0.03125, %v670_v1  ;;  %v755_v36 = vmul.f32 0.03125, %v673_v44 }
 0x14a   : > { %2328 = vrsqrt.f32 %v785_v43 }
 0x14b   : > { %v2321_v19 = vpop.eup %2320  ;;  %v786_v41 = vadd.f32 1e-05, %v754_v54  ;;  %v787_v25 = vadd.f32 1e-05, %v755_v36 }
 0x14c   : > { %v676_v63 = vpop.xlane.xlu1 %675  ;;  %v679_v5 = vpop.xlane.xlu0 %678  ;;  %v845_v53 = vmul.f32 %v2321_v19, %v2716_v10 }
 0x14d   : > { %2330 = vrsqrt.f32 %v786_v41  ;;  %v756_v56 = vmul.f32 0.03125, %v676_v63  ;;  %v757_v52 = vmul.f32 0.03125, %v679_v5 }
 0x14e   : > { %2332 = vrsqrt.f32 %v787_v25  ;;  %v884_v14 = vmul.f32 %v2922_v61, %v845_v53 }
 0x14f   : > { %v2323_v32 = vpop.eup %2322  ;;  %v788_v38 = vadd.f32 1e-05, %v756_v56  ;;  %v789_v43 = vadd.f32 1e-05, %v757_v52 }
 0x150   : > { %v2325_v1 = vpop.eup %2324  ;;  %v682_v44 = vpop.xlane.xlu1 %681  ;;  %v923_v36 = vadd.f32 %v2928_v21, %v884_v14  ;;  %v846_v19 = vmul.f32 %v2323_v32, %v2726_v26 }
 0x151   : > { %v685_v54 = vpop.xlane.xlu0 %684  ;;  %2334 = vrsqrt.f32 %v788_v38  ;;  %v758_v10 = vmul.f32 0.03125, %v682_v44  ;;  %v847_v63 = vmul.f32 %v2325_v1, %v2719_v12 }
 0x152   : > { %v759_v41 = vmul.f32 0.03125, %v685_v54  ;;  %2336 = vrsqrt.f32 %v789_v43  ;;  %2128 = vmatprep.mubr.msk.f32.mxu0 %vm459_vm0, %v923_v36  ;;  %v885_v25 = vmul.f32 %v2922_v61, %v846_v19 }
 0x153   : > { %v2327_v5 = vpop.eup %2326  ;;  %v790_v53 = vadd.f32 1e-05, %v758_v10  ;;  %v886_v52 = vmul.f32 %v2922_v61, %v847_v63 }
 0x154   : > { %v791_v56 = vadd.f32 1e-05, %v759_v41  ;;  %v2329_v3 = vpop.eup %2328  ;;  %v688_v6 = vpop.xlane.xlu1 %687  ;;  %v924_v26 = vadd.f32 %v2928_v21, %v885_v25  ;;  %v848_v32 = vmul.f32 %v2327_v5, %v2730_v31 }
 0x155   : > { %v691_v14 = vpop.xlane.xlu0 %690  ;;  %2338 = vrsqrt.f32 %v790_v53  ;;  %v760_v38 = vmul.f32 0.03125, %v688_v6  ;;  %v925_v43 = vadd.f32 %v2928_v21, %v886_v52  ;;  %v849_v44 = vmul.f32 %v2329_v3, %v2738_v46 }
 0x156   : > { %v761_v12 = vmul.f32 0.03125, %v691_v14  ;;  %2340 = vrsqrt.f32 %v791_v56  ;;  %2129 = vmatmul.mubr.msk.f32.vlgmr.msra.gmra.mrb[0].mxu0 %vm459_vm0, %v924_v26  ;;  %v887_v1 = vmul.f32 %v2922_v61, %v848_v32 }
 0x157   : > { %v2331_v54 = vpop.eup %2330  ;;  %v792_v36 = vadd.f32 1e-05, %v760_v38  ;;  %2131 = vmatprep.mubr.msk.f32.mxu0 %vm459_vm0, %v925_v43  ;;  %v888_v63 = vmul.f32 %v2922_v61, %v849_v44 }
 0x158   : > { %v793_v19 = vadd.f32 1e-05, %v761_v12  ;;  %v2333_v10 = vpop.eup %2332  ;;  %v694_v41 = vpop.xlane.xlu1 %693  ;;  %v926_v6 = vadd.f32 %v2928_v21, %v887_v1  ;;  %v850_v25 = vmul.f32 %v2331_v54, %v2742_v51 }
 0x159   : > { %v697_v31 = vpop.xlane.xlu0 %696  ;;  %2342 = vrsqrt.f32 %v792_v36  ;;  %v762_v5 = vmul.f32 0.03125, %v694_v41  ;;  %v851_v56 = vmul.f32 %v2333_v10, %v2750_v4  ;;  %v927_v3 = vadd.f32 %v2928_v21, %v888_v63 }
 0x15a   : > { %v763_v53 = vmul.f32 0.03125, %v697_v31  ;;  %2344 = vrsqrt.f32 %v793_v19  ;;  %2132 = vmatmul.mubr.msk.f32.gmra.mrb[2].mxu0 %vm459_vm0, %v926_v6  ;;  %v889_v46 = vmul.f32 %v2922_v61, %v850_v25 }
 0x15b   : > { %v2335_v52 = vpop.eup %2334  ;;  %v794_v14 = vadd.f32 1e-05, %v762_v5  ;;  %v890_v32 = vmul.f32 %v2922_v61, %v851_v56  ;;  %2134 = vmatprep.mubr.msk.f32.mxu0 %vm459_vm0, %v927_v3 }
 0x15c   : > { %v795_v26 = vadd.f32 1e-05, %v763_v53  ;;  %v2337_v38 = vpop.eup %2336  ;;  %v700_v51 = vpop.xlane.xlu1 %699  ;;  %v928_v43 = vadd.f32 %v2928_v21, %v889_v46  ;;  %v852_v4 = vmul.f32 %v2335_v52, %v2754_v8 }
 0x15d   : > { %v703_v12 = vpop.xlane.xlu0 %702  ;;  %2346 = vrsqrt.f32 %v794_v14  ;;  %v764_v1 = vmul.f32 0.03125, %v700_v51  ;;  %v929_v54 = vadd.f32 %v2928_v21, %v890_v32  ;;  %v853_v19 = vmul.f32 %v2337_v38, %v2762_v29 }
 0x15e   : > { %v765_v44 = vmul.f32 0.03125, %v703_v12  ;;  %2348 = vrsqrt.f32 %v795_v26  ;;  %2135 = vmatmul.mubr.msk.f32.gmra.mrb[4].mxu0 %vm459_vm0, %v928_v43  ;;  %v891_v36 = vmul.f32 %v2922_v61, %v852_v4 }
 0x15f   : > { %v2339_v10 = vpop.eup %2338  ;;  %v796_v41 = vadd.f32 1e-05, %v764_v1  ;;  %2137 = vmatprep.mubr.msk.f32.mxu0 %vm459_vm0, %v929_v54  ;;  %v892_v5 = vmul.f32 %v2922_v61, %v853_v19 }
 0x160   : > { %v797_v31 = vadd.f32 1e-05, %v765_v44  ;;  %v2341_v6 = vpop.eup %2340  ;;  %v706_v63 = vpop.xlane.xlu1 %705  ;;  %v930_v25 = vadd.f32 %v2928_v21, %v891_v36  ;;  %v854_v53 = vmul.f32 %v2339_v10, %v2766_v35 }
 0x161   : > { %v709_v8 = vpop.xlane.xlu0 %708  ;;  %2350 = vrsqrt.f32 %v796_v41  ;;  %v766_v56 = vmul.f32 0.03125, %v706_v63  ;;  %v855_v46 = vmul.f32 %v2341_v6, %v2774_v55  ;;  %v931_v29 = vadd.f32 %v2928_v21, %v892_v5 }
 0x162   : > { %v767_v3 = vmul.f32 0.03125, %v709_v8  ;;  %2352 = vrsqrt.f32 %v797_v31  ;;  %2138 = vmatmul.mubr.msk.f32.gmra.mrb[6].mxu0 %vm459_vm0, %v930_v25  ;;  %v893_v52 = vmul.f32 %v2922_v61, %v854_v53 }
 0x163   : > { %v2343_v14 = vpop.eup %2342  ;;  %v798_v26 = vadd.f32 1e-05, %v766_v56  ;;  %v894_v38 = vmul.f32 %v2922_v61, %v855_v46  ;;  %2140 = vmatprep.mubr.msk.f32.mxu0 %vm459_vm0, %v931_v29 }
 0x164   : > { %v799_v32 = vadd.f32 1e-05, %v767_v3  ;;  %v2345_v51 = vpop.eup %2344  ;;  %v712_v35 = vpop.xlane.xlu1 %711  ;;  %v932_v43 = vadd.f32 %v2928_v21, %v893_v52  ;;  %v856_v55 = vmul.f32 %v2343_v14, %v2778_v59 }
 0x165   : > { %v715_v12 = vpop.xlane.xlu0 %714  ;;  %2354 = vrsqrt.f32 %v798_v26  ;;  %v768_v4 = vmul.f32 0.03125, %v712_v35  ;;  %v933_v44 = vadd.f32 %v2928_v21, %v894_v38  ;;  %v857_v36 = vmul.f32 %v2345_v51, %v2786_v20 }
 0x166   : > { %v769_v1 = vmul.f32 0.03125, %v715_v12  ;;  %2356 = vrsqrt.f32 %v799_v32  ;;  %2141 = vmatmul.mubr.msk.f32.gmra.mrb[8].mxu0 %vm459_vm0, %v932_v43  ;;  %v895_v54 = vmul.f32 %v2922_v61, %v856_v55 }
 0x167   : > { %v2347_v19 = vpop.eup %2346  ;;  %v800_v10 = vadd.f32 1e-05, %v768_v4  ;;  %2143 = vmatprep.mubr.msk.f32.mxu0 %vm459_vm0, %v933_v44  ;;  %v896_v8 = vmul.f32 %v2922_v61, %v857_v36 }
 0x168   : > { %v801_v41 = vadd.f32 1e-05, %v769_v1  ;;  %v2349_v31 = vpop.eup %2348  ;;  %v718_v6 = vpop.xlane.xlu1 %717  ;;  %v934_v63 = vadd.f32 %v2928_v21, %v895_v54  ;;  %v858_v25 = vmul.f32 %v2347_v19, %v2790_v24 }
 0x169   : > { %v721_v59 = vpop.xlane.xlu0 %720  ;;  %2358 = vrsqrt.f32 %v800_v10  ;;  %v770_v5 = vmul.f32 0.03125, %v718_v6  ;;  %v859_v56 = vmul.f32 %v2349_v31, %v2798_v49  ;;  %v935_v20 = vadd.f32 %v2928_v21, %v896_v8 }
 0x16a   : > { %v771_v53 = vmul.f32 0.03125, %v721_v59  ;;  %2360 = vrsqrt.f32 %v801_v41  ;;  %2144 = vmatmul.mubr.msk.f32.gmra.mrb[10].mxu0 %vm459_vm0, %v934_v63  ;;  %v897_v3 = vmul.f32 %v2922_v61, %v858_v25 }
 0x16b   : > { %v2351_v46 = vpop.eup %2350  ;;  %v802_v29 = vadd.f32 1e-05, %v770_v5  ;;  %v898_v14 = vmul.f32 %v2922_v61, %v859_v56  ;;  %2146 = vmatprep.mubr.msk.f32.mxu0 %vm459_vm0, %v935_v20 }
 0x16c   : > { %v803_v52 = vadd.f32 1e-05, %v771_v53  ;;  %v2353_v26 = vpop.eup %2352  ;;  %v724_v24 = vpop.xlane.xlu1 %723  ;;  %v936_v38 = vadd.f32 %v2928_v21, %v897_v3  ;;  %v860_v49 = vmul.f32 %v2351_v46, %v2802_v58 }
 0x16d   : > { %v727_v32 = vpop.xlane.xlu0 %726  ;;  %2362 = vrsqrt.f32 %v802_v29  ;;  %v772_v51 = vmul.f32 0.03125, %v724_v24  ;;  %v937_v12 = vadd.f32 %v2928_v21, %v898_v14  ;;  %v861_v55 = vmul.f32 %v2353_v26, %v2810_v23 }
 0x16e   : > { %v773_v35 = vmul.f32 0.03125, %v727_v32  ;;  %2364 = vrsqrt.f32 %v803_v52  ;;  %2147 = vmatmul.mubr.msk.f32.gmra.mrb[12].mxu0 %vm459_vm0, %v936_v38  ;;  %v899_v43 = vmul.f32 %v2922_v61, %v860_v49 }
 0x16f   : > { %v2355_v4 = vpop.eup %2354  ;;  %v804_v1 = vadd.f32 1e-05, %v772_v51  ;;  %2149 = vmatprep.mubr.msk.f32.mxu0 %vm459_vm0, %v937_v12  ;;  %v900_v10 = vmul.f32 %v2922_v61, %v861_v55 }
 0x170   : > { %v805_v44 = vadd.f32 1e-05, %v773_v35  ;;  %v2357_v54 = vpop.eup %2356  ;;  %v730_v36 = vpop.xlane.xlu1 %729  ;;  %v938_v19 = vadd.f32 %v2928_v21, %v899_v43  ;;  %v862_v41 = vmul.f32 %v2355_v4, %v2814_v34 }
 0x171   : > { %v733_v58 = vpop.xlane.xlu0 %732  ;;  %2366 = vrsqrt.f32 %v804_v1  ;;  %v774_v31 = vmul.f32 0.03125, %v730_v36  ;;  %v863_v59 = vmul.f32 %v2357_v54, %v2828_v9  ;;  %v939_v23 = vadd.f32 %v2928_v21, %v900_v10 }
 0x172   : > { %v775_v6 = vmul.f32 0.03125, %v733_v58  ;;  %2368 = vrsqrt.f32 %v805_v44  ;;  %2150 = vmatmul.mubr.msk.f32.gmra.mrb[14].mxu0 %vm459_vm0, %v938_v19  ;;  %v901_v63 = vmul.f32 %v2922_v61, %v862_v41 }
 0x173   : > { %v2359_v8 = vpop.eup %2358  ;;  %v806_v25 = vadd.f32 1e-05, %v774_v31  ;;  %v902_v53 = vmul.f32 %v2922_v61, %v863_v59  ;;  %2152 = vmatprep.mubr.msk.f32.mxu0 %vm459_vm0, %v939_v23 }
 0x174   : > { %v807_v5 = vadd.f32 1e-05, %v775_v6  ;;  %v2361_v56 = vpop.eup %2360  ;;  %v736_v34 = vpop.xlane.xlu1 %735  ;;  %v940_v3 = vadd.f32 %v2928_v21, %v901_v63  ;;  %v864_v9 = vmul.f32 %v2359_v8, %v2832_v18 }
 0x175   : > { %v739_v20 = vpop.xlane.xlu0 %738  ;;  %2370 = vrsqrt.f32 %v806_v25  ;;  %v776_v46 = vmul.f32 0.03125, %v736_v34  ;;  %v941_v52 = vadd.f32 %v2928_v21, %v902_v53  ;;  %v865_v26 = vmul.f32 %v2361_v56, %v2846_v0 }
 0x176   : > { %v777_v29 = vmul.f32 0.03125, %v739_v20  ;;  %2372 = vrsqrt.f32 %v807_v5  ;;  %2153 = vmatmul.mubr.msk.f32.gmra.mrb[16].mxu0 %vm459_vm0, %v940_v3  ;;  %v903_v14 = vmul.f32 %v2922_v61, %v864_v9 }
 0x177   : > { %v2363_v24 = vpop.eup %2362  ;;  %v808_v32 = vadd.f32 1e-05, %v776_v46  ;;  %2155 = vmatprep.mubr.msk.f32.mxu0 %vm459_vm0, %v941_v52  ;;  %v904_v12 = vmul.f32 %v2922_v61, %v865_v26 }
 0x178   : > { %v809_v38 = vadd.f32 1e-05, %v777_v29  ;;  %v2365_v49 = vpop.eup %2364  ;;  %v742_v51 = vpop.xlane.xlu1 %741  ;;  %v942_v35 = vadd.f32 %v2928_v21, %v903_v14  ;;  %v866_v43 = vmul.f32 %v2363_v24, %v2850_v13 }
 0x179   : > { %v745_v18 = vpop.xlane.xlu0 %744  ;;  %2374 = vrsqrt.f32 %v808_v32  ;;  %v778_v55 = vmul.f32 0.03125, %v742_v51  ;;  %v867_v1 = vmul.f32 %v2365_v49, %v2858_v42  ;;  %v943_v0 = vadd.f32 %v2928_v21, %v904_v12 }
 0x17a   : > { %v779_v4 = vmul.f32 0.03125, %v745_v18  ;;  %2376 = vrsqrt.f32 %v809_v38  ;;  %2156 = vmatmul.mubr.msk.f32.gmra.mrb[18].mxu0 %vm459_vm0, %v942_v35  ;;  %v905_v44 = vmul.f32 %v2922_v61, %v866_v43 }
 0x17b   : > { %v2367_v54 = vpop.eup %2366  ;;  %v810_v36 = vadd.f32 1e-05, %v778_v55  ;;  %v906_v19 = vmul.f32 %v2922_v61, %v867_v1  ;;  %2158 = vmatprep.mubr.msk.f32.mxu0 %vm459_vm0, %v943_v0  ;;  %v1575_v55 = vld [vmem:[%s3529_s6] sm:$0xff] }
 0x17c   : > { %v811_v58 = vadd.f32 1e-05, %v779_v4  ;;  %v2369_v10 = vpop.eup %2368  ;;  %v748_v13 = vpop.xlane.xlu1 %747  ;;  %v944_v41 = vadd.f32 %v2928_v21, %v905_v44  ;;  %v868_v42 = vmul.f32 %v2367_v54, %v2862_v39  ;;  %v1579_v0 = vld [vmem:[%s3529_s6 + $0x20] sm:$0xff]  ;;  %v1580_v44 = vld [vmem:[%s3529_s6 + $0x28] sm:$0xff] }
 0x17d   : > { %2378 = vrsqrt.f32 %v810_v36  ;;  %v780_v31 = vmul.f32 0.03125, %v748_v13  ;;  %v945_v6 = vadd.f32 %v2928_v21, %v906_v19  ;;  %v869_v59 = vmul.f32 %v2369_v10, %v2870_v62  ;;  %v1581_v36 = vld [vmem:[%s3529_s6 + $0x30] sm:$0xff]  ;;  %v1583_v10 = vld [vmem:[%s3529_s6 + $0x40] sm:$0xff]  ;;  %v1584_v13 = vld [vmem:[%s3529_s6 + $0x48] sm:$0xff] }
 0x17e   : > { %2380 = vrsqrt.f32 %v811_v58  ;;  %2159 = vmatmul.mubr.msk.f32.gmra.mrb[20].mxu0 %vm459_vm0, %v944_v41  ;;  %v907_v23 = vmul.f32 %v2922_v61, %v868_v42  ;;  %v2272_v54 = vpack.c.bf16 %v1580_v44, %v1579_v0  ;;  %v1582_v58 = vld [vmem:[%s3529_s6 + $0x38] sm:$0xff]  ;;  %v2280_v41 = vpack.c.bf16 %v1584_v13, %v1583_v10  ;;  %v1585_v42 = vld [vmem:[%s3529_s6 + $0x50] sm:$0xff] }
 0x17f   : > { %v2371_v63 = vpop.eup %2370  ;;  %v812_v8 = vadd.f32 1e-05, %v780_v31  ;;  %2161 = vmatprep.mubr.msk.f32.mxu0 %vm459_vm0, %v945_v6  ;;  %v908_v25 = vmul.f32 %v2922_v61, %v869_v59  ;;  %v2276_v19 = vpack.c.bf16 %v1582_v58, %v1581_v36  ;;  %v1586_v31 = vld [vmem:[%s3529_s6 + $0x58] sm:$0xff]  ;;  %v1587_v59 = vld [vmem:[%s3529_s6 + $0x60] sm:$0xff] }
 0x180   : > { %v2373_v5 = vpop.eup %2372  ;;  %v946_v39 = vadd.f32 %v2928_v21, %v907_v23  ;;  %v870_v53 = vmul.f32 %v2371_v63, %v2874_v28  ;;  %v2284_v6 = vpack.c.bf16 %v1586_v31, %v1585_v42  ;;  %v1588_v23 = vld [vmem:[%s3529_s6 + $0x68] sm:$0xff] }
 0x181   : > { %2382 = vrsqrt.f32 %v812_v8  ;;  %v947_v56 = vadd.f32 %v2928_v21, %v908_v25  ;;  %v871_v62 = vmul.f32 %v2373_v5, %v2882_v17  ;;  %v2288_v63 = vpack.c.bf16 %v1588_v23, %v1587_v59  ;;  %v1589_v8 = vld [vmem:[%s3529_s6 + $0x70] sm:$0xff]  ;;  %v1590_v25 = vld [vmem:[%s3529_s6 + $0x78] sm:$0xff] }
 0x182   : > { %2162 = vmatmul.mubr.msk.f32.gmra.mrb[22].mxu0 %vm459_vm0, %v946_v39  ;;  %v909_v34 = vmul.f32 %v2922_v61, %v870_v53  ;;  %v2292_v5 = vpack.c.bf16 %v1590_v25, %v1589_v8  ;;  %v3108_v39 = vld [vmem:[%s3528_s5] ss:$0 sm:$0xff] }
 0x183   : > { %v2375_v20 = vpop.eup %2374  ;;  %2164 = vmatprep.mubr.msk.f32.mxu0 %vm459_vm0, %v947_v56  ;;  %v910_v3 = vmul.f32 %v2922_v61, %v871_v62 }
 0x184   : > { %v2377_v9 = vpop.eup %2376  ;;  %v948_v46 = vadd.f32 %v2928_v21, %v909_v34  ;;  %v872_v29 = vmul.f32 %v2375_v20, %v2886_v2 }
 0x185   : > { %v949_v28 = vadd.f32 %v2928_v21, %v910_v3  ;;  %v873_v52 = vmul.f32 %v2377_v9, %v2894_v33 }
 0x186   : > { %2165 = vmatmul.mubr.msk.f32.gmra.mrb[24].mxu0 %vm459_vm0, %v948_v46  ;;  %v911_v17 = vmul.f32 %v2922_v61, %v872_v29 }
 0x187   : > { %v2379_v14 = vpop.eup %2378  ;;  %2167 = vmatprep.mubr.msk.f32.mxu0 %vm459_vm0, %v949_v28  ;;  %v912_v26 = vmul.f32 %v2922_v61, %v873_v52 }
 0x188   : > { %v2381_v24 = vpop.eup %2380  ;;  %v950_v32 = vadd.f32 %v2928_v21, %v911_v17  ;;  %v874_v38 = vmul.f32 %v2379_v14, %v2898_v45 }
 0x189   : > { %v951_v2 = vadd.f32 %v2928_v21, %v912_v26  ;;  %v875_v49 = vmul.f32 %v2381_v24, %v2906_v48 }
 0x18a   : > { %2168 = vmatmul.mubr.msk.f32.gmra.mrb[26].mxu0 %vm459_vm0, %v950_v32  ;;  %v913_v33 = vmul.f32 %v2922_v61, %v874_v38 }
 0x18b   : > { %v2383_v51 = vpop.eup %2382  ;;  %2170 = vmatprep.mubr.msk.f32.mxu0 %vm459_vm0, %v951_v2  ;;  %v914_v18 = vmul.f32 %v2922_v61, %v875_v49 }
 0x18c   : > { %v952_v35 = vadd.f32 %v2928_v21, %v913_v33  ;;  %v876_v12 = vmul.f32 %v2383_v51, %v2910_v7  ;;  %v1576_v7 = vld [vmem:[%s3529_s6 + $0x8] sm:$0xff] }
 0x18d   : > { %v953_v43 = vadd.f32 %v2928_v21, %v914_v18  ;;  %v2264_v4 = vpack.c.bf16 %v1576_v7, %v1575_v55 }
 0x18e   : > { %2171 = vmatmul.mubr.msk.f32.gmra.mrb[28].mxu0 %vm459_vm0, %v952_v35  ;;  %v915_v45 = vmul.f32 %v2922_v61, %v876_v12  ;;  %v1577_v61 = vld [vmem:[%s3529_s6 + $0x10] sm:$0xff] }
 0x18f   : > { %2173 = vmatprep.mubr.msk.f32.mxu0 %vm459_vm0, %v953_v43  ;;  %2265 = vmatprep.subr.bf16.mxu0 %v2264_v4 }
 0x190   : > { %v954_v48 = vadd.f32 %v2928_v21, %v915_v45  ;;  %2296 = vmatprep.subr.bf16.mxu1 %v2264_v4  ;;  %2267 = vmatpush3.bf16.msra.mxu0 %v2264_v4  ;;  %v1578_v21 = vld [vmem:[%s3529_s6 + $0x18] sm:$0xff] }
 0x191   : > { %2304 = vmatpush3.bf16.msra.mxu1 %v2264_v4  ;;  %v2268_v1 = vpack.c.bf16 %v1578_v21, %v1577_v61 }
 0x192   : > { %2174 = vmatmul.mubr.msk.f32.gmra.mrb[30].mxu0 %vm459_vm0, %v954_v48 }
 0x193   : > { %2269 = vmatprep.subr.bf16.mxu0 %v2268_v1  ;;  %2297 = vmatprep.subr.bf16.mxu1 %v2268_v1 }
 0x194   : > { %2271 = vmatpush3.bf16.msra.mxu0 %v2268_v1 }
 0x195   : > { %2305 = vmatpush3.bf16.msra.mxu1 %v2268_v1  ;;  %2273 = vmatprep.subr.bf16.mxu0 %v2272_v54 }
 0x196   : > { %2298 = vmatprep.subr.bf16.mxu1 %v2272_v54 }
 0x198   : > { %2275 = vmatpush3.bf16.msra.mxu0 %v2272_v54 }
 0x199   : > { %2306 = vmatpush3.bf16.msra.mxu1 %v2272_v54  ;;  %2277 = vmatprep.subr.bf16.mxu0 %v2276_v19 }
 0x19a   : > { %2299 = vmatprep.subr.bf16.mxu1 %v2276_v19 }
 0x19c   : > { %2279 = vmatpush3.bf16.msra.mxu0 %v2276_v19 }
 0x19d   : > { %2307 = vmatpush3.bf16.msra.mxu1 %v2276_v19  ;;  %2281 = vmatprep.subr.bf16.mxu0 %v2280_v41 }
 0x19e   : > { %2300 = vmatprep.subr.bf16.mxu1 %v2280_v41 }
 0x1a0   : > { %2283 = vmatpush3.bf16.msra.mxu0 %v2280_v41 }
 0x1a1   : > { %2308 = vmatpush3.bf16.msra.mxu1 %v2280_v41  ;;  %2285 = vmatprep.subr.bf16.mxu0 %v2284_v6 }
 0x1a2   : > { %2301 = vmatprep.subr.bf16.mxu1 %v2284_v6 }
 0x1a4   : > { %2287 = vmatpush3.bf16.msra.mxu0 %v2284_v6 }
 0x1a5   : > { %2309 = vmatpush3.bf16.msra.mxu1 %v2284_v6  ;;  %2289 = vmatprep.subr.bf16.mxu0 %v2288_v63 }
 0x1a6   : > { %2302 = vmatprep.subr.bf16.mxu1 %v2288_v63 }
 0x1a8   : > { %2291 = vmatpush3.bf16.msra.mxu0 %v2288_v63 }
 0x1a9   : > { %2310 = vmatpush3.bf16.msra.mxu1 %v2288_v63  ;;  %2293 = vmatprep.subr.bf16.mxu0 %v2292_v5 }
 0x1aa   : > { %2303 = vmatprep.subr.bf16.mxu1 %v2292_v5 }
 0x1ac   : > { %2295 = vmatpush3.bf16.msra.mxu0 %v2292_v5 }
 0x1ad   : > { %2311 = vmatpush3.bf16.msra.mxu1 %v2292_v5 }
 0x229   : > { %v2130_v53 = vpop.f32.mrb[0].mxu0 }
 0x22a   : > { %v3111_v56 = vadd.f32 %v2130_v53, %v3108_v39  ;;  %v1128_v62 = vpop.f32.mrb[1].mxu0 }
 0x22b   : > { %v3114_v34 = vadd.f32 %v3108_v39, %v1128_v62 }
 0x22c   : > { %v1288_v20 = vmul.f32 %v3111_v56, %v3111_v56 }
 0x22d   : > { %v1287_v3 = vmul.f32 %v3114_v34, %v3114_v34  ;;  %v2133_v9 = vpop.f32.mrb[2].mxu0 }
 0x22e   : > { %v1320_v46 = vmul.f32 %v1288_v20, %v3111_v56  ;;  %v3122_v29 = vadd.f32 %v2133_v9, %v3108_v39  ;;  %v1138_v28 = vpop.f32.mrb[3].mxu0 }
 0x22f   : > { %v1319_v52 = vmul.f32 %v1287_v3, %v3114_v34  ;;  %v3126_v17 = vadd.f32 %v3108_v39, %v1138_v28 }
 0x230   : > { %v1352_v14 = vmul.f32 0.044715, %v1320_v46  ;;  %v1290_v26 = vmul.f32 %v3122_v29, %v3122_v29 }
 0x231   : > { %v1351_v24 = vmul.f32 0.044715, %v1319_v52  ;;  %v1289_v32 = vmul.f32 %v3126_v17, %v3126_v17  ;;  %v2136_v38 = vpop.f32.mrb[4].mxu0 }
 0x232   : > { %v1384_v2 = vadd.f32 %v1352_v14, %v3111_v56  ;;  %v1322_v49 = vmul.f32 %v1290_v26, %v3122_v29  ;;  %v3135_v33 = vadd.f32 %v2136_v38, %v3108_v39  ;;  %v1148_v51 = vpop.f32.mrb[5].mxu0 }
 0x233   : > { %v1383_v18 = vadd.f32 %v1351_v24, %v3114_v34  ;;  %v1321_v35 = vmul.f32 %v1289_v32, %v3126_v17  ;;  %v3140_v12 = vadd.f32 %v3108_v39, %v1148_v51 }
 0x234   : > { %v1416_v43 = vmul.f32 0.7978846, %v1384_v2  ;;  %v1354_v45 = vmul.f32 0.044715, %v1322_v49  ;;  %v1292_v48 = vmul.f32 %v3135_v33, %v3135_v33 }
 0x235   : > { %v1415_v55 = vmul.f32 0.7978846, %v1383_v18  ;;  %v1353_v7 = vmul.f32 0.044715, %v1321_v35  ;;  %v1291_v4 = vmul.f32 %v3140_v12, %v3140_v12  ;;  %v2139_v61 = vpop.f32.mrb[6].mxu0 }
 0x236   : > { %2384 = vtanh.f32 %v1416_v43  ;;  %v1386_v21 = vadd.f32 %v1354_v45, %v3122_v29  ;;  %v1324_v1 = vmul.f32 %v1292_v48, %v3135_v33  ;;  %v3149_v0 = vadd.f32 %v2139_v61, %v3108_v39  ;;  %v1158_v44 = vpop.f32.mrb[7].mxu0 }
 0x237   : > { %v1385_v54 = vadd.f32 %v1353_v7, %v3126_v17  ;;  %v1323_v36 = vmul.f32 %v1291_v4, %v3140_v12  ;;  %v3154_v58 = vadd.f32 %v3108_v39, %v1158_v44  ;;  %2386 = vtanh.f32 %v1415_v55 }
 0x238   : > { %v1418_v19 = vmul.f32 0.7978846, %v1386_v21  ;;  %v1356_v10 = vmul.f32 0.044715, %v1324_v1  ;;  %v1294_v13 = vmul.f32 %v3149_v0, %v3149_v0 }
 0x239   : > { %v1417_v41 = vmul.f32 0.7978846, %v1385_v54  ;;  %v1355_v42 = vmul.f32 0.044715, %v1323_v36  ;;  %v1293_v31 = vmul.f32 %v3154_v58, %v3154_v58  ;;  %v2142_v6 = vpop.f32.mrb[8].mxu0 }
 0x23a   : > { %v1388_v59 = vadd.f32 %v1356_v10, %v3135_v33  ;;  %v1326_v23 = vmul.f32 %v1294_v13, %v3149_v0  ;;  %v3163_v63 = vadd.f32 %v2142_v6, %v3108_v39  ;;  %v1168_v8 = vpop.f32.mrb[9].mxu0  ;;  %2388 = vtanh.f32 %v1418_v19 }
 0x23b   : > { %v1387_v25 = vadd.f32 %v1355_v42, %v3140_v12  ;;  %v1325_v5 = vmul.f32 %v1293_v31, %v3154_v58  ;;  %v3168_v53 = vadd.f32 %v3108_v39, %v1168_v8  ;;  %2390 = vtanh.f32 %v1417_v41 }
 0x23c   : > { %v1420_v62 = vmul.f32 0.7978846, %v1388_v59  ;;  %v1296_v20 = vmul.f32 %v3163_v63, %v3163_v63  ;;  %v1358_v9 = vmul.f32 0.044715, %v1326_v23 }
 0x23d   : > { %v1419_v3 = vmul.f32 0.7978846, %v1387_v25  ;;  %v1295_v46 = vmul.f32 %v3168_v53, %v3168_v53  ;;  %v2145_v28 = vpop.f32.mrb[10].mxu0  ;;  %v1357_v24 = vmul.f32 0.044715, %v1325_v5 }
 0x23e   : > { %v3175_v52 = vadd.f32 %v2145_v28, %v3108_v39  ;;  %v1178_v14 = vpop.f32.mrb[11].mxu0  ;;  %v1328_v38 = vmul.f32 %v1296_v20, %v3163_v63  ;;  %v1390_v35 = vadd.f32 %v1358_v9, %v3149_v0 }
 0x23f   : > { %v3178_v26 = vadd.f32 %v3108_v39, %v1178_v14  ;;  %v1327_v2 = vmul.f32 %v1295_v46, %v3168_v53  ;;  %2392 = vtanh.f32 %v1419_v3  ;;  %v1389_v6 = vadd.f32 %v1357_v24, %v3154_v58 }
 0x240   : > { %v2385_v32 = vpop.eup %2384  ;;  %v1298_v49 = vmul.f32 %v3175_v52, %v3175_v52  ;;  %2394 = vtanh.f32 %v1420_v62  ;;  %v1360_v54 = vmul.f32 0.044715, %v1328_v38  ;;  %v3197_v41 = vmul.f32 0.7978846, %v1390_v35 }
 0x241   : > { %v2387_v51 = vpop.eup %2386  ;;  %v1480_v18 = vadd.f32 1.0, %v2385_v32  ;;  %v1297_v43 = vmul.f32 %v3178_v26, %v3178_v26  ;;  %v2148_v45 = vpop.f32.mrb[12].mxu0  ;;  %v1359_v36 = vmul.f32 0.044715, %v1327_v2  ;;  %v1421_v2 = vmul.f32 0.7978846, %v1389_v6 }
 0x242   : > { %v1330_v48 = vmul.f32 %v1298_v49, %v3175_v52  ;;  %v3189_v55 = vadd.f32 %v2148_v45, %v3108_v39  ;;  %v1188_v7 = vpop.f32.mrb[13].mxu0  ;;  %v1479_v4 = vadd.f32 1.0, %v2387_v51  ;;  %v1392_v46 = vadd.f32 %v1360_v54, %v3163_v63 }
 0x243   : > { %v1512_v61 = vmul.f32 0.5, %v1480_v18  ;;  %v1329_v21 = vmul.f32 %v1297_v43, %v3178_v26  ;;  %v3193_v1 = vadd.f32 %v3108_v39, %v1188_v7  ;;  %v1391_v28 = vadd.f32 %v1359_v36, %v3168_v53 }
 0x244   : > { %v2389_v44 = vpop.eup %2388  ;;  %v1300_v19 = vmul.f32 %v3189_v55, %v3189_v55  ;;  %v1511_v10 = vmul.f32 0.5, %v1479_v4  ;;  %v1362_v59 = vmul.f32 0.044715, %v1330_v48  ;;  %2396 = vtanh.f32 %v1421_v2 }
 0x245   : > { %v2391_v13 = vpop.eup %2390  ;;  %v1299_v42 = vmul.f32 %v3193_v1, %v3193_v1  ;;  %v2151_v31 = vpop.f32.mrb[14].mxu0  ;;  %v1544_v62 = vmul.f32 %v1512_v61, %v3111_v56  ;;  %v1361_v20 = vmul.f32 0.044715, %v1329_v21  ;;  %v1482_v24 = vadd.f32 1.0, %v2389_v44 }
 0x246   : > { %v1332_v23 = vmul.f32 %v1300_v19, %v3189_v55  ;;  %v3204_v8 = vadd.f32 %v2151_v31, %v3108_v39  ;;  %v1198_v25 = vpop.f32.mrb[15].mxu0  ;;  %v1543_v5 = vmul.f32 %v1511_v10, %v3114_v34  ;;  %v1481_v9 = vadd.f32 1.0, %v2391_v13 }
 0x247   : > { %v3209_v3 = vadd.f32 %v3108_v39, %v1198_v25  ;;  %v1331_v14 = vmul.f32 %v1299_v42, %v3193_v1  ;;  %v1394_v51 = vadd.f32 %v1362_v59, %v3175_v52  ;;  %v1514_v45 = vmul.f32 0.5, %v1482_v24 }
 0x248   : > { %2208 = vmatprep.mubr.f32.mxu0 %v1543_v5  ;;  %v1302_v32 = vmul.f32 %v3204_v8, %v3204_v8  ;;  %v1513_v38 = vmul.f32 0.5, %v1481_v9  ;;  %v1364_v18 = vmul.f32 0.044715, %v1332_v23  ;;  %v1393_v7 = vadd.f32 %v1361_v20, %v3178_v26 }
 0x249   : > { %v1301_v34 = vmul.f32 %v3209_v3, %v3209_v3  ;;  %v2154_v56 = vpop.f32.mrb[16].mxu0  ;;  %2209 = vmatmul.mubr.f32.vlgmr.msra.gmra.mrb[32].mxu0 %v1544_v62  ;;  %v2393_v49 = vpop.eup %2392  ;;  %v1424_v44 = vmul.f32 0.7978846, %v1392_v46  ;;  %v1423_v54 = vmul.f32 0.7978846, %v1391_v28  ;;  %v1546_v19 = vmul.f32 %v1514_v45, %v3122_v29 }
 0x24a   : > { %v3220_v35 = vadd.f32 %v2154_v56, %v3108_v39  ;;  %v1208_v43 = vpop.f32.mrb[17].mxu0  ;;  %v2395_v48 = vpop.eup %2394  ;;  %v1545_v21 = vmul.f32 %v1513_v38, %v3126_v17  ;;  %v1363_v36 = vmul.f32 0.044715, %v1331_v14  ;;  %v1334_v10 = vmul.f32 %v1302_v32, %v3204_v8 }
 0x24b   : > { %v1333_v4 = vmul.f32 %v1301_v34, %v3209_v3  ;;  %v3225_v61 = vadd.f32 %v3108_v39, %v1208_v43  ;;  %v1483_v6 = vadd.f32 1.0, %v2393_v49  ;;  %v1426_v59 = vmul.f32 0.7978846, %v1394_v51 }
 0x24c   : > { %v1304_v13 = vmul.f32 %v3220_v35, %v3220_v35  ;;  %2211 = vmatprep.mubr.f32.mxu0 %v1545_v21  ;;  %v1396_v23 = vadd.f32 %v1364_v18, %v3189_v55  ;;  %v1484_v29 = vadd.f32 1.0, %v2395_v48  ;;  %v1425_v5 = vmul.f32 0.7978846, %v1393_v7 }
 0x24d   : > { %v1303_v42 = vmul.f32 %v3225_v61, %v3225_v61  ;;  %v2157_v31 = vpop.f32.mrb[18].mxu0  ;;  %2212 = vmatmul.mubr.f32.gmra.mrb[34].mxu0 %v1546_v19  ;;  %v1365_v62 = vmul.f32 0.044715, %v1333_v4  ;;  %v1515_v9 = vmul.f32 0.5, %v1483_v6  ;;  %v1395_v46 = vadd.f32 %v1363_v36, %v3193_v1 }
 0x24e   : > { %v3236_v17 = vadd.f32 %v2157_v31, %v3108_v39  ;;  %v1218_v25 = vpop.f32.mrb[19].mxu0  ;;  %v1516_v24 = vmul.f32 0.5, %v1484_v29  ;;  %v1366_v32 = vmul.f32 0.044715, %v1334_v10  ;;  %v1336_v34 = vmul.f32 %v1304_v13, %v3220_v35 }
 0x24f   : > { %v3239_v20 = vadd.f32 %v3108_v39, %v1218_v25  ;;  %v1335_v28 = vmul.f32 %v1303_v42, %v3225_v61  ;;  %v1547_v38 = vmul.f32 %v1515_v9, %v3140_v12  ;;  %v1428_v51 = vmul.f32 0.7978846, %v1396_v23 }
 0x250   : > { %v1306_v14 = vmul.f32 %v3236_v17, %v3236_v17  ;;  %v1548_v45 = vmul.f32 %v1516_v24, %v3135_v33  ;;  %v1397_v7 = vadd.f32 %v1365_v62, %v3209_v3  ;;  %v1427_v12 = vmul.f32 0.7978846, %v1395_v46 }
 0x251   : > { %v1305_v56 = vmul.f32 %v3239_v20, %v3239_v20  ;;  %v2160_v49 = vpop.f32.mrb[20].mxu0  ;;  %2214 = vmatprep.mubr.f32.mxu0 %v1547_v38  ;;  %v1367_v36 = vmul.f32 0.044715, %v1335_v28  ;;  %2398 = vtanh.f32 %v3197_v41  ;;  %v1398_v33 = vadd.f32 %v1366_v32, %v3204_v8 }
 0x252   : > { %v1338_v18 = vmul.f32 %v1306_v14, %v3236_v17  ;;  %v3251_v43 = vadd.f32 %v2160_v49, %v3108_v39  ;;  %v1228_v48 = vpop.f32.mrb[21].mxu0  ;;  %2215 = vmatmul.mubr.f32.gmra.mrb[36].mxu0 %v1548_v45  ;;  %v1368_v10 = vmul.f32 0.044715, %v1336_v34  ;;  %2400 = vtanh.f32 %v1423_v54 }
 0x253   : > { %v1337_v4 = vmul.f32 %v1305_v56, %v3239_v20  ;;  %v3257_v21 = vadd.f32 %v3108_v39, %v1228_v48  ;;  %2402 = vtanh.f32 %v1424_v44  ;;  %v1429_v25 = vmul.f32 0.7978846, %v1397_v7 }
 0x254   : > { %v1308_v19 = vmul.f32 %v3251_v43, %v3251_v43  ;;  %v1370_v13 = vmul.f32 0.044715, %v1338_v18  ;;  %2404 = vtanh.f32 %v1425_v5  ;;  %v1399_v62 = vadd.f32 %v1367_v36, %v3225_v61  ;;  %v2397_v18 = vpop.eup %2396 }
 0x255   : > { %v2163_v42 = vpop.f32.mrb[22].mxu0  ;;  %v1369_v31 = vmul.f32 0.044715, %v1337_v4  ;;  %v1307_v6 = vmul.f32 %v3257_v21, %v3257_v21  ;;  %2406 = vtanh.f32 %v1426_v59  ;;  %v1400_v9 = vadd.f32 %v1368_v10, %v3220_v35 }
 0x256   : > { %v3266_v2 = vadd.f32 %v2163_v42, %v3108_v39  ;;  %v1238_v23 = vpop.f32.mrb[23].mxu0  ;;  %v1340_v29 = vmul.f32 %v1308_v19, %v3251_v43  ;;  %v1402_v46 = vadd.f32 %v1370_v13, %v3236_v17  ;;  %2408 = vtanh.f32 %v1427_v12 }
 0x257   : > { %v3270_v41 = vadd.f32 %v3108_v39, %v1238_v23  ;;  %v1430_v14 = vmul.f32 0.7978846, %v1398_v33  ;;  %v1401_v24 = vadd.f32 %v1369_v31, %v3239_v20  ;;  %v1339_v5 = vmul.f32 %v1307_v6, %v3257_v21 }
 0x258   : > { %v1310_v54 = vmul.f32 %v3266_v2, %v3266_v2  ;;  %2410 = vtanh.f32 %v1428_v51  ;;  %v1372_v34 = vmul.f32 0.044715, %v1340_v29  ;;  %v1431_v38 = vmul.f32 0.7978846, %v1399_v62 }
 0x259   : > { %v1309_v44 = vmul.f32 %v3270_v41, %v3270_v41  ;;  %v2166_v28 = vpop.f32.mrb[24].mxu0  ;;  %2412 = vtanh.f32 %v1429_v25  ;;  %v3288_v45 = vmul.f32 0.7978846, %v1400_v9  ;;  %v3290_v48 = vmul.f32 0.7978846, %v1402_v46 }
 0x25a   : > { %v1248_v32 = vpop.f32.mrb[25].mxu0  ;;  %v1342_v56 = vmul.f32 %v1310_v54, %v3266_v2  ;;  %v3286_v49 = vadd.f32 %v2166_v28, %v3108_v39  ;;  %v3293_v12 = vmul.f32 0.7978846, %v1401_v24  ;;  %v1371_v36 = vmul.f32 0.044715, %v1339_v5 }
 0x25b   : > { %v3283_v59 = vadd.f32 %v3108_v39, %v1248_v32  ;;  %v1341_v7 = vmul.f32 %v1309_v44, %v3270_v41  ;;  %v2399_v51 = vpop.eup %2398  ;;  %v1485_v19 = vadd.f32 1.0, %v2397_v18  ;;  %v1404_v42 = vadd.f32 %v1372_v34, %v3251_v43 }
 0x25c   : > { %v2401_v13 = vpop.eup %2400  ;;  %v1374_v31 = vmul.f32 0.044715, %v1342_v56  ;;  %v1486_v6 = vadd.f32 1.0, %v2399_v51  ;;  %2414 = vtanh.f32 %v1430_v14  ;;  %v1312_v62 = vmul.f32 %v3286_v49, %v3286_v49 }
 0x25d   : > { %v2169_v4 = vpop.f32.mrb[26].mxu0  ;;  %v1311_v33 = vmul.f32 %v3283_v59, %v3283_v59  ;;  %v2403_v23 = vpop.eup %2402  ;;  %v1517_v25 = vmul.f32 0.5, %v1485_v19  ;;  %v1487_v29 = vadd.f32 1.0, %v2401_v13  ;;  %2416 = vtanh.f32 %v1431_v38 }
 0x25e   : > { %v1258_v10 = vpop.f32.mrb[27].mxu0  ;;  %v2405_v54 = vpop.eup %2404  ;;  %v1518_v9 = vmul.f32 0.5, %v1486_v6  ;;  %v1373_v46 = vmul.f32 0.044715, %v1341_v7  ;;  %v1488_v44 = vadd.f32 1.0, %v2403_v23  ;;  %v1403_v38 = vadd.f32 %v1371_v36, %v3257_v21 }
 0x25f   : > { %v3301_v28 = vadd.f32 %v3108_v39, %v1258_v10  ;;  %v2407_v24 = vpop.eup %2406  ;;  %v1549_v5 = vmul.f32 %v1517_v25, %v3154_v58  ;;  %v1519_v32 = vmul.f32 0.5, %v1487_v29  ;;  %v1343_v14 = vmul.f32 %v1311_v33, %v3283_v59 }
 0x260   : > { %v1489_v34 = vadd.f32 1.0, %v2405_v54  ;;  %v2409_v18 = vpop.eup %2408  ;;  %v3305_v51 = vmul.f32 0.7978846, %v1404_v42  ;;  %v1550_v19 = vmul.f32 %v1518_v9, %v3149_v0  ;;  %v1520_v7 = vmul.f32 0.5, %v1488_v44 }
 0x261   : > { %v2172_v56 = vpop.f32.mrb[28].mxu0  ;;  %2217 = vmatprep.mubr.f32.mxu1 %v1549_v5  ;;  %v1551_v10 = vmul.f32 %v1519_v32, %v3168_v53  ;;  %v3311_v58 = vadd.f32 %v2169_v4, %v3108_v39  ;;  %v1490_v33 = vadd.f32 1.0, %v2407_v24  ;;  %v1406_v29 = vadd.f32 %v1374_v31, %v3266_v2 }
 0x262   : > { %v1268_v13 = vpop.f32.mrb[29].mxu0  ;;  %v2411_v6 = vpop.eup %2410  ;;  %v1521_v23 = vmul.f32 0.5, %v1489_v34  ;;  %2218 = vmatmul.mubr.f32.vlgmr.msra.gmra.mrb[0].mxu1 %v1550_v19  ;;  %v1405_v42 = vadd.f32 %v1373_v46, %v3270_v41  ;;  %v1344_v36 = vmul.f32 %v1312_v62, %v3286_v49  ;;  %v1313_v0 = vmul.f32 %v3301_v28, %v3301_v28 }
 0x263   : > { %v2413_v25 = vpop.eup %2412  ;;  %2220 = vmatprep.mubr.f32.mxu1 %v1551_v10  ;;  %v1552_v53 = vmul.f32 %v1520_v7, %v3163_v63  ;;  %v1375_v9 = vmul.f32 0.044715, %v1343_v14  ;;  %v1491_v44 = vadd.f32 1.0, %v2409_v18  ;;  %v1522_v5 = vmul.f32 0.5, %v1490_v33 }
 0x264   : > { %v1553_v4 = vmul.f32 %v1521_v23, %v3178_v26  ;;  %v1345_v31 = vmul.f32 %v1313_v0, %v3301_v28  ;;  %v1492_v32 = vadd.f32 1.0, %v2411_v6  ;;  %v3322_v46 = vadd.f32 %v3108_v39, %v1268_v13 }
 0x265   : > { %v2175_v54 = vpop.f32.mrb[30].mxu0  ;;  %v1314_v62 = vmul.f32 %v3311_v58, %v3311_v58  ;;  %v1523_v34 = vmul.f32 0.5, %v1491_v44  ;;  %v3327_v19 = vadd.f32 %v2172_v56, %v3108_v39  ;;  %v1493_v63 = vadd.f32 1.0, %v2413_v25 }
 0x266   : > { %v1278_v24 = vpop.f32.mrb[31].mxu0  ;;  %v2415_v14 = vpop.eup %2414  ;;  %v1435_v7 = vmul.f32 0.7978846, %v1403_v38  ;;  %2221 = vmatmul.mubr.f32.gmra.mrb[2].mxu1 %v1552_v53  ;;  %v1377_v26 = vmul.f32 0.044715, %v1345_v31  ;;  %v1524_v18 = vmul.f32 0.5, %v1492_v32  ;;  %v1315_v10 = vmul.f32 %v3322_v46, %v3322_v46 }
 0x267   : > { %v2417_v6 = vpop.eup %2416  ;;  %v1438_v23 = vmul.f32 0.7978846, %v1406_v29  ;;  %2223 = vmatprep.mubr.f32.mxu1 %v1553_v4  ;;  %v1555_v13 = vmul.f32 %v1523_v34, %v3193_v1  ;;  %v1525_v33 = vmul.f32 0.5, %v1493_v63  ;;  %v3333_v0 = vadd.f32 %v2175_v54, %v3108_v39 }
 0x268   : > { %v1437_v56 = vmul.f32 0.7978846, %v1405_v42  ;;  %v1376_v44 = vmul.f32 0.044715, %v1344_v36  ;;  %v1554_v25 = vmul.f32 %v1522_v5, %v3175_v52  ;;  %v1347_v38 = vmul.f32 %v1315_v10, %v3322_v46 }
 0x269   : > { %v1407_v53 = vadd.f32 %v1375_v9, %v3283_v59  ;;  %v1346_v31 = vmul.f32 %v1314_v62, %v3311_v58  ;;  %v1316_v29 = vmul.f32 %v3327_v19, %v3327_v19  ;;  %v1494_v4 = vadd.f32 1.0, %v2415_v14 }
 0x26a   : > { %2224 = vmatmul.mubr.f32.gmra.mrb[4].mxu1 %v1554_v25  ;;  %v1409_v1 = vadd.f32 %v1377_v26, %v3301_v28  ;;  %v1556_v54 = vmul.f32 %v1524_v18, %v3189_v55  ;;  %v3344_v42 = vadd.f32 %v3108_v39, %v1278_v24  ;;  %v1495_v36 = vadd.f32 1.0, %v2417_v6 }
 0x26b   : > { %2226 = vmatprep.mubr.f32.mxu1 %v1555_v13  ;;  %v1379_v52 = vmul.f32 0.044715, %v1347_v38  ;;  %v1557_v5 = vmul.f32 %v1525_v33, %v3209_v3  ;;  %v1318_v9 = vmul.f32 %v3333_v0, %v3333_v0  ;;  %2418 = vtanh.f32 %v3288_v45 }
 0x26c   : > { %v1526_v32 = vmul.f32 0.5, %v1494_v4  ;;  %v1317_v62 = vmul.f32 %v3344_v42, %v3344_v42  ;;  %v1527_v34 = vmul.f32 0.5, %v1495_v36  ;;  %2420 = vtanh.f32 %v3293_v12 }
 0x26d   : > { %v1408_v39 = vadd.f32 %v1376_v44, %v3286_v49  ;;  %v1378_v55 = vmul.f32 0.044715, %v1346_v31  ;;  %v1348_v24 = vmul.f32 %v1316_v29, %v3327_v19  ;;  %2422 = vtanh.f32 %v3290_v48 }
 0x26e   : > { %v1439_v3 = vmul.f32 0.7978846, %v1407_v53  ;;  %2227 = vmatmul.mubr.f32.gmra.mrb[6].mxu1 %v1556_v54  ;;  %v1349_v63 = vmul.f32 %v1317_v62, %v3344_v42  ;;  %2424 = vtanh.f32 %v1435_v7  ;;  %v1441_v45 = vmul.f32 0.7978846, %v1409_v1 }
 0x26f   : > { %2229 = vmatprep.mubr.f32.mxu1 %v1557_v5  ;;  %v1350_v14 = vmul.f32 %v1318_v9, %v3333_v0  ;;  %v1559_v26 = vmul.f32 %v1527_v34, %v3225_v61  ;;  %2426 = vtanh.f32 %v3305_v51  ;;  %v1411_v12 = vadd.f32 %v1379_v52, %v3322_v46 }
 0x270   : > { %v1558_v18 = vmul.f32 %v1526_v32, %v3204_v8  ;;  %v1381_v10 = vmul.f32 0.044715, %v1349_v63  ;;  %2428 = vtanh.f32 %v1437_v56  ;;  %v1440_v48 = vmul.f32 0.7978846, %v1408_v39 }
 0x271   : > { %v1410_v6 = vadd.f32 %v1378_v55, %v3311_v58  ;;  %v1380_v13 = vmul.f32 0.044715, %v1348_v24  ;;  %2430 = vtanh.f32 %v1438_v23  ;;  %v1382_v7 = vmul.f32 0.044715, %v1350_v14 }
 0x272   : > { %2230 = vmatmul.mubr.f32.gmra.mrb[8].mxu1 %v1558_v18  ;;  %2432 = vtanh.f32 %v1439_v3  ;;  %v1443_v33 = vmul.f32 0.7978846, %v1411_v12  ;;  %v1413_v61 = vadd.f32 %v1381_v10, %v3344_v42 }
 0x273   : > { %2232 = vmatprep.mubr.f32.mxu1 %v1559_v26  ;;  %2434 = vtanh.f32 %v1441_v45  ;;  %v1442_v44 = vmul.f32 0.7978846, %v1410_v6  ;;  %v1412_v25 = vadd.f32 %v1380_v13, %v3327_v19  ;;  %v1414_v53 = vadd.f32 %v1382_v7, %v3333_v0 }
 0x274   : > { %2436 = vtanh.f32 %v1440_v48  ;;  %v1445_v29 = vmul.f32 0.7978846, %v1413_v61 }
 0x275   : > { %v2419_v51 = vpop.eup %2418  ;;  %2438 = vtanh.f32 %v1443_v33  ;;  %v1444_v36 = vmul.f32 0.7978846, %v1412_v25  ;;  %v1446_v45 = vmul.f32 0.7978846, %v1414_v53 }
 0x276   : > { %v2421_v8 = vpop.eup %2420  ;;  %v1496_v56 = vadd.f32 1.0, %v2419_v51  ;;  %2440 = vtanh.f32 %v1442_v44 }
 0x277   : > { %v2423_v38 = vpop.eup %2422  ;;  %v1497_v31 = vadd.f32 1.0, %v2421_v8  ;;  %2442 = vtanh.f32 %v1445_v29 }
 0x278   : > { %v2425_v23 = vpop.eup %2424  ;;  %v1528_v4 = vmul.f32 0.5, %v1496_v56  ;;  %v1498_v1 = vadd.f32 1.0, %v2423_v38  ;;  %2444 = vtanh.f32 %v1444_v36 }
 0x279   : > { %v2427_v54 = vpop.eup %2426  ;;  %v1529_v52 = vmul.f32 0.5, %v1497_v31  ;;  %v1499_v5 = vadd.f32 1.0, %v2425_v23  ;;  %2446 = vtanh.f32 %v1446_v45 }
 0x27a   : > { %v2429_v9 = vpop.eup %2428  ;;  %v1560_v32 = vmul.f32 %v1528_v4, %v3220_v35  ;;  %v1530_v62 = vmul.f32 0.5, %v1498_v1  ;;  %v1500_v34 = vadd.f32 1.0, %v2427_v54 }
 0x27b   : > { %v2431_v39 = vpop.eup %2430  ;;  %v1561_v55 = vmul.f32 %v1529_v52, %v3239_v20  ;;  %v1531_v24 = vmul.f32 0.5, %v1499_v5  ;;  %v1501_v3 = vadd.f32 1.0, %v2429_v9 }
 0x27c   : > { %v2433_v63 = vpop.eup %2432  ;;  %2233 = vmatmul.mubr.f32.gmra.mrb[10].mxu1 %v1560_v32  ;;  %v1562_v35 = vmul.f32 %v1530_v62, %v3236_v17  ;;  %v1532_v10 = vmul.f32 0.5, %v1500_v34  ;;  %v1502_v48 = vadd.f32 1.0, %v2431_v39 }
 0x27d   : > { %2235 = vmatprep.mubr.f32.mxu1 %v1561_v55  ;;  %v1563_v14 = vmul.f32 %v1531_v24, %v3257_v21  ;;  %v1533_v26 = vmul.f32 0.5, %v1501_v3  ;;  %v1503_v12 = vadd.f32 1.0, %v2433_v63  ;;  %v2435_v18 = vpop.eup %2434 }
 0x27e   : > { %v2437_v6 = vpop.eup %2436  ;;  %v1505_v7 = vadd.f32 1.0, %v2435_v18  ;;  %v1564_v61 = vmul.f32 %v1532_v10, %v3251_v43  ;;  %v1534_v21 = vmul.f32 0.5, %v1502_v48 }
 0x27f   : > { %v1565_v20 = vmul.f32 %v1533_v26, %v3270_v41  ;;  %v1535_v13 = vmul.f32 0.5, %v1503_v12  ;;  %v2439_v33 = vpop.eup %2438  ;;  %v1504_v51 = vadd.f32 1.0, %v2437_v6 }
 0x280   : > { %2236 = vmatmul.mubr.f32.gmra.mrb[12].mxu1 %v1562_v35  ;;  %v2441_v44 = vpop.eup %2440  ;;  %v1537_v25 = vmul.f32 0.5, %v1505_v7  ;;  %v1507_v8 = vadd.f32 1.0, %v2439_v33  ;;  %v1566_v38 = vmul.f32 %v1534_v21, %v3266_v2 }
 0x281   : > { %2238 = vmatprep.mubr.f32.mxu1 %v1563_v14  ;;  %v1567_v17 = vmul.f32 %v1535_v13, %v3283_v59  ;;  %v2443_v56 = vpop.eup %2442  ;;  %v1536_v53 = vmul.f32 0.5, %v1504_v51  ;;  %v1506_v41 = vadd.f32 1.0, %v2441_v44 }
 0x282   : > { %v2445_v31 = vpop.eup %2444  ;;  %v1569_v23 = vmul.f32 %v1537_v25, %v3301_v28  ;;  %v1539_v43 = vmul.f32 0.5, %v1507_v8  ;;  %v1509_v29 = vadd.f32 1.0, %v2443_v56 }
 0x283   : > { %v1568_v4 = vmul.f32 %v1536_v53, %v3286_v49  ;;  %v1538_v1 = vmul.f32 0.5, %v1506_v41  ;;  %v1508_v54 = vadd.f32 1.0, %v2445_v31  ;;  %v2447_v36 = vpop.eup %2446 }
 0x284   : > { %2239 = vmatmul.mubr.f32.gmra.mrb[14].mxu1 %v1564_v61  ;;  %v1571_v59 = vmul.f32 %v1539_v43, %v3322_v46  ;;  %v1541_v52 = vmul.f32 0.5, %v1509_v29  ;;  %v1510_v9 = vadd.f32 1.0, %v2447_v36  ;;  %v3384_v46 = vld [vmem:[%s3530_s7] ss:$0 sm:$0xff] }
 0x285   : > { %2241 = vmatprep.mubr.f32.mxu1 %v1565_v20  ;;  %v1570_v2 = vmul.f32 %v1538_v1, %v3311_v58  ;;  %v1540_v5 = vmul.f32 0.5, %v1508_v54 }
 0x286   : > { %v1573_v28 = vmul.f32 %v1541_v52, %v3344_v42  ;;  %v1542_v49 = vmul.f32 0.5, %v1510_v9 }
 0x287   : > { %v1572_v32 = vmul.f32 %v1540_v5, %v3327_v19  ;;  %v3572_v5 = vld [vmem:[#allocation3_spill] sm:$0xff] }
 0x288   : > { %2242 = vmatmul.mubr.f32.gmra.mrb[16].mxu1 %v1566_v38  ;;  %v1574_v62 = vmul.f32 %v1542_v49, %v3333_v0 }
 0x289   : > { %2244 = vmatprep.mubr.f32.mxu1 %v1567_v17 }
 0x28c   : > { %2245 = vmatmul.mubr.f32.gmra.mrb[18].mxu1 %v1568_v4 }
 0x28d   : > { %2247 = vmatprep.mubr.f32.mxu1 %v1569_v23 }
 0x290   : > { %2248 = vmatmul.mubr.f32.gmra.mrb[20].mxu1 %v1570_v2 }
 0x291   : > { %2250 = vmatprep.mubr.f32.mxu1 %v1571_v59 }
 0x294   : > { %2251 = vmatmul.mubr.f32.gmra.mrb[22].mxu1 %v1572_v32  ;;  %v3573_v32 = vld [vmem:[#allocation2_spill] sm:$0xff] }
 0x295   : > { %2253 = vmatprep.mubr.f32.mxu1 %v1573_v28 }
 0x298   : > { %2254 = vmatmul.mubr.f32.gmra.mrb[24].mxu1 %v1574_v62 }
 0x31c   : > { %v2210_v58 = vpop.f32.mrb[32].mxu0 }
 0x31d   : > { %v1670_v34 = vadd.f32 %v2210_v58, %v3384_v46  ;;  %v1664_v39 = vpop.f32.mrb[33].mxu0 }
 0x31e   : > { %v1665_v55 = vadd.f32 %v3384_v46, %v1664_v39 }
 0x31f   : > { %v1824_v42 = vmul.f32 0.25, %v1670_v34  ;;  %v3574_v34 = vld [vmem:[#allocation5_spill] sm:$0xff] }
 0x320   : > { %v1823_v19 = vmul.f32 0.25, %v1665_v55  ;;  %v2213_v24 = vpop.f32.mrb[34].mxu0  ;;  %v3575_v55 = vld [vmem:[#allocation4_spill] sm:$0xff] }
 0x321   : > { %v1856_v0 = vadd.f32 %v1824_v42, %v2537_v16  ;;  %v1680_v63 = vadd.f32 %v2213_v24, %v3384_v46  ;;  %v1674_v45 = vpop.f32.mrb[35].mxu0 }
 0x322   : > { %v1855_v3 = vadd.f32 %v1823_v19, %v2531_v11  ;;  %v1675_v14 = vadd.f32 %v3384_v46, %v1674_v45 }
 0x323   : > { %1888 = vst.msk [vmem:[%s3392_s25 + $0x8] sm:$0xff] %vm459_vm0, %v1856_v0  ;;  %v1826_v26 = vmul.f32 0.25, %v1680_v63 }
 0x324   : > { %1887 = vst.msk [vmem:[%s3392_s25] sm:$0xff] %vm459_vm0, %v1855_v3  ;;  %v1825_v12 = vmul.f32 0.25, %v1675_v14 }
 0x325   : > { %v1858_v18 = vadd.f32 %v1826_v26, %v2543_v22  ;;  %v2216_v35 = vpop.f32.mrb[36].mxu0  ;;  %v3576_v26 = vld [vmem:[#allocation7_spill] sm:$0xff] }
 0x326   : > { %v1857_v16 = vadd.f32 %v1825_v12, %v2535_v15  ;;  %v1690_v11 = vadd.f32 %v2216_v35, %v3384_v46  ;;  %v1684_v10 = vpop.f32.mrb[37].mxu0  ;;  %v3577_v35 = vld [vmem:[#allocation6_spill] sm:$0xff] }
 0x327   : > { %1890 = vst.msk [vmem:[%s3392_s25 + $0x18] sm:$0xff] %vm459_vm0, %v1858_v18  ;;  %v1685_v48 = vadd.f32 %v3384_v46, %v1684_v10 }
 0x328   : > { %1889 = vst.msk [vmem:[%s3392_s25 + $0x10] sm:$0xff] %vm459_vm0, %v1857_v16  ;;  %v1828_v6 = vmul.f32 0.25, %v1690_v11 }
 0x329   : > { %v1827_v20 = vmul.f32 0.25, %v1685_v48 }
 0x32a   : > { %v1860_v13 = vadd.f32 %v1828_v6, %v2555_v30 }
 0x32b   : > { %v1859_v7 = vadd.f32 %v1827_v20, %v2551_v27 }
 0x32c   : > { %1892 = vst.msk [vmem:[%s3392_s25 + $0x28] sm:$0xff] %vm459_vm0, %v1860_v13  ;;  %v3578_v13 = vld [vmem:[#allocation9_spill] sm:$0xff] }
 0x32d   : > { %1891 = vst.msk [vmem:[%s3392_s25 + $0x20] sm:$0xff] %vm459_vm0, %v1859_v7 }
 0x335   : > { %v2219_v15 = vpop.f32.mrb[0].mxu1 }
 0x336   : > { %v1700_v22 = vadd.f32 %v2219_v15, %v3384_v46  ;;  %v1694_v33 = vpop.f32.mrb[1].mxu1 }
 0x337   : > { %v1695_v61 = vadd.f32 %v3384_v46, %v1694_v33  ;;  %v3579_v33 = vld [vmem:[#allocation8_spill] sm:$0xff] }
 0x338   : > { %v1830_v21 = vmul.f32 0.25, %v1700_v22 }
 0x339   : > { %v1829_v51 = vmul.f32 0.25, %v1695_v61  ;;  %v2222_v44 = vpop.f32.mrb[2].mxu1 }
 0x33a   : > { %v1862_v30 = vadd.f32 %v1830_v21, %v2567_v40  ;;  %v1710_v17 = vadd.f32 %v2222_v44, %v3384_v46  ;;  %v1704_v27 = vpop.f32.mrb[3].mxu1 }
 0x33b   : > { %v1861_v25 = vadd.f32 %v1829_v51, %v2563_v37  ;;  %v1705_v8 = vadd.f32 %v3384_v46, %v1704_v27 }
 0x33c   : > { %1894 = vst.msk [vmem:[%s3392_s25 + $0x38] sm:$0xff] %vm459_vm0, %v1862_v30  ;;  %v1832_v56 = vmul.f32 0.25, %v1710_v17  ;;  %v3580_v17 = vld [vmem:[#allocation11_spill] sm:$0xff] }
 0x33d   : > { %1893 = vst.msk [vmem:[%s3392_s25 + $0x30] sm:$0xff] %vm459_vm0, %v1861_v25  ;;  %v1831_v38 = vmul.f32 0.25, %v1705_v8  ;;  %v2225_v53 = vpop.f32.mrb[4].mxu1 }
 0x33e   : > { %v1864_v41 = vadd.f32 %v1832_v56, %v2579_v50  ;;  %v1720_v40 = vadd.f32 %v2225_v53, %v3384_v46  ;;  %v1714_v31 = vpop.f32.mrb[5].mxu1  ;;  %v3581_v56 = vld [vmem:[#allocation10_spill] sm:$0xff] }
 0x33f   : > { %v1863_v23 = vadd.f32 %v1831_v38, %v2575_v47  ;;  %v1715_v37 = vadd.f32 %v3384_v46, %v1714_v31 }
 0x340   : > { %1896 = vst.msk [vmem:[%s3392_s25 + $0x48] sm:$0xff] %vm459_vm0, %v1864_v41  ;;  %v1834_v43 = vmul.f32 0.25, %v1720_v40 }
 0x341   : > { %1895 = vst.msk [vmem:[%s3392_s25 + $0x40] sm:$0xff] %vm459_vm0, %v1863_v23  ;;  %v1833_v29 = vmul.f32 0.25, %v1715_v37  ;;  %v2228_v4 = vpop.f32.mrb[6].mxu1  ;;  %v3582_v23 = vld [vmem:[#allocation13_spill] sm:$0xff] }
 0x342   : > { %v1866_v1 = vadd.f32 %v1834_v43, %v2591_v60  ;;  %v1730_v50 = vadd.f32 %v2228_v4, %v3384_v46  ;;  %v1724_v54 = vpop.f32.mrb[7].mxu1  ;;  %v3583_v4 = vld [vmem:[#allocation12_spill] sm:$0xff] }
 0x343   : > { %v1865_v36 = vadd.f32 %v1833_v29, %v2587_v57  ;;  %v1725_v47 = vadd.f32 %v3384_v46, %v1724_v54 }
 0x344   : > { %1898 = vst.msk [vmem:[%s3392_s25 + $0x58] sm:$0xff] %vm459_vm0, %v1866_v1  ;;  %v1836_v59 = vmul.f32 0.25, %v1730_v50 }
 0x345   : > { %1897 = vst.msk [vmem:[%s3392_s25 + $0x50] sm:$0xff] %vm459_vm0, %v1865_v36  ;;  %v1835_v52 = vmul.f32 0.25, %v1725_v47  ;;  %v2231_v2 = vpop.f32.mrb[8].mxu1 }
 0x346   : > { %v1868_v9 = vadd.f32 %v1836_v59, %v3572_v5  ;;  %v1740_v60 = vadd.f32 %v2231_v2, %v3384_v46  ;;  %v1734_v28 = vpop.f32.mrb[9].mxu1  ;;  %v3584_v59 = vld [vmem:[#allocation15_spill] sm:$0xff] }
 0x347   : > { %v1867_v49 = vadd.f32 %v1835_v52, %v3573_v32  ;;  %v1735_v57 = vadd.f32 %v3384_v46, %v1734_v28 }
 0x348   : > { %1900 = vst.msk [vmem:[%s3392_s25 + $0x68] sm:$0xff] %vm459_vm0, %v1868_v9  ;;  %v1838_v62 = vmul.f32 0.25, %v1740_v60  ;;  %v3585_v9 = vld [vmem:[#allocation14_spill] sm:$0xff] }
 0x349   : > { %1899 = vst.msk [vmem:[%s3392_s25 + $0x60] sm:$0xff] %vm459_vm0, %v1867_v49  ;;  %v1837_v58 = vmul.f32 0.25, %v1735_v57 }
 0x34a   : > { %v1870_v39 = vadd.f32 %v1838_v62, %v3574_v34  ;;  %v3586_v62 = vld [vmem:[#allocation17_spill] sm:$0xff] }
 0x34b   : > { %v1869_v42 = vadd.f32 %v1837_v58, %v3575_v55  ;;  %v3587_v55 = vld [vmem:[#allocation16_spill] sm:$0xff] }
 0x34c   : > { %1902 = vst.msk [vmem:[%s3392_s25 + $0x78] sm:$0xff] %vm459_vm0, %v1870_v39 }
 0x34d   : > { %1901 = vst.msk [vmem:[%s3392_s25 + $0x70] sm:$0xff] %vm459_vm0, %v1869_v42 }
 0x34f   : > { %v2234_v19 = vpop.f32.mrb[10].mxu1 }
 0x350   : > { %v1750_v0 = vadd.f32 %v2234_v19, %v3384_v46  ;;  %v1744_v24 = vpop.f32.mrb[11].mxu1 }
 0x351   : > { %v1745_v3 = vadd.f32 %v3384_v46, %v1744_v24 }
 0x352   : > { %v1840_v63 = vmul.f32 0.25, %v1750_v0 }
 0x353   : > { %v1839_v45 = vmul.f32 0.25, %v1745_v3  ;;  %v2237_v14 = vpop.f32.mrb[12].mxu1 }
 0x354   : > { %v1872_v12 = vadd.f32 %v1840_v63, %v3576_v26  ;;  %v1760_v18 = vadd.f32 %v2237_v14, %v3384_v46  ;;  %v1754_v16 = vpop.f32.mrb[13].mxu1  ;;  %v3588_v63 = vld [vmem:[#allocation19_spill] sm:$0xff] }
 0x355   : > { %v1871_v11 = vadd.f32 %v1839_v45, %v3577_v35  ;;  %v1755_v10 = vadd.f32 %v3384_v46, %v1754_v16 }
 0x356   : > { %1904 = vst.msk [vmem:[%s3392_s25 + $0x88] sm:$0xff] %vm459_vm0, %v1872_v12  ;;  %v1842_v48 = vmul.f32 0.25, %v1760_v18  ;;  %v3589_v12 = vld [vmem:[#allocation18_spill] sm:$0xff] }
 0x357   : > { %1903 = vst.msk [vmem:[%s3392_s25 + $0x80] sm:$0xff] %vm459_vm0, %v1871_v11  ;;  %v1841_v6 = vmul.f32 0.25, %v1755_v10  ;;  %v2240_v20 = vpop.f32.mrb[14].mxu1  ;;  %v3590_v10 = vld [vmem:[#allocation21_spill] sm:$0xff] }
 0x358   : > { %v1874_v7 = vadd.f32 %v1842_v48, %v3578_v13  ;;  %v1770_v15 = vadd.f32 %v2240_v20, %v3384_v46  ;;  %v1764_v22 = vpop.f32.mrb[15].mxu1 }
 0x359   : > { %v1873_v61 = vadd.f32 %v1841_v6, %v3579_v33  ;;  %v1765_v21 = vadd.f32 %v3384_v46, %v1764_v22  ;;  %v3591_v6 = vld [vmem:[#allocation20_spill] sm:$0xff] }
 0x35a   : > { %1906 = vst.msk [vmem:[%s3392_s25 + $0x98] sm:$0xff] %vm459_vm0, %v1874_v7  ;;  %v1844_v51 = vmul.f32 0.25, %v1770_v15 }
 0x35b   : > { %1905 = vst.msk [vmem:[%s3392_s25 + $0x90] sm:$0xff] %vm459_vm0, %v1873_v61  ;;  %v1843_v44 = vmul.f32 0.25, %v1765_v21  ;;  %v2243_v30 = vpop.f32.mrb[16].mxu1 }
 0x35c   : > { %v1876_v27 = vadd.f32 %v1844_v51, %v3580_v17  ;;  %v1780_v25 = vadd.f32 %v2243_v30, %v3384_v46  ;;  %v1774_v8 = vpop.f32.mrb[17].mxu1 }
 0x35d   : > { %v1875_v38 = vadd.f32 %v1843_v44, %v3581_v56  ;;  %v1775_v53 = vadd.f32 %v3384_v46, %v1774_v8 }
 0x35e   : > { %1908 = vst.msk [vmem:[%s3392_s25 + $0xa8] sm:$0xff] %vm459_vm0, %v1876_v27  ;;  %v1846_v41 = vmul.f32 0.25, %v1780_v25 }
 0x35f   : > { %1907 = vst.msk [vmem:[%s3392_s25 + $0xa0] sm:$0xff] %vm459_vm0, %v1875_v38  ;;  %v1845_v40 = vmul.f32 0.25, %v1775_v53  ;;  %v2246_v31 = vpop.f32.mrb[18].mxu1 }
 0x360   : > { %v1878_v37 = vadd.f32 %v1846_v41, %v3582_v23  ;;  %v1790_v43 = vadd.f32 %v2246_v31, %v3384_v46  ;;  %v1784_v29 = vpop.f32.mrb[19].mxu1 }
 0x361   : > { %v1877_v1 = vadd.f32 %v1845_v40, %v3583_v4  ;;  %v1785_v50 = vadd.f32 %v3384_v46, %v1784_v29 }
 0x362   : > { %1910 = vst.msk [vmem:[%s3392_s25 + $0xb8] sm:$0xff] %vm459_vm0, %v1878_v37  ;;  %v1848_v54 = vmul.f32 0.25, %v1790_v43 }
 0x363   : > { %1909 = vst.msk [vmem:[%s3392_s25 + $0xb0] sm:$0xff] %vm459_vm0, %v1877_v1  ;;  %v1847_v36 = vmul.f32 0.25, %v1785_v50  ;;  %v2249_v47 = vpop.f32.mrb[20].mxu1 }
 0x364   : > { %v1880_v52 = vadd.f32 %v1848_v54, %v3584_v59  ;;  %v1800_v2 = vadd.f32 %v2249_v47, %v3384_v46  ;;  %v1794_v5 = vpop.f32.mrb[21].mxu1 }
 0x365   : > { %v1879_v60 = vadd.f32 %v1847_v36, %v3585_v9  ;;  %v1795_v28 = vadd.f32 %v3384_v46, %v1794_v5 }
 0x366   : > { %1912 = vst.msk [vmem:[%s3392_s25 + $0xc8] sm:$0xff] %vm459_vm0, %v1880_v52  ;;  %v1850_v32 = vmul.f32 0.25, %v1800_v2 }
 0x367   : > { %1911 = vst.msk [vmem:[%s3392_s25 + $0xc0] sm:$0xff] %vm459_vm0, %v1879_v60  ;;  %v1849_v49 = vmul.f32 0.25, %v1795_v28  ;;  %v2252_v57 = vpop.f32.mrb[22].mxu1 }
 0x368   : > { %v1882_v58 = vadd.f32 %v1850_v32, %v3586_v62  ;;  %v1810_v34 = vadd.f32 %v2252_v57, %v3384_v46  ;;  %v1804_v39 = vpop.f32.mrb[23].mxu1 }
 0x369   : > { %v1881_v42 = vadd.f32 %v1849_v49, %v3587_v55  ;;  %v1805_v19 = vadd.f32 %v3384_v46, %v1804_v39 }
 0x36a   : > { %1914 = vst.msk [vmem:[%s3392_s25 + $0xd8] sm:$0xff] %vm459_vm0, %v1882_v58  ;;  %v1852_v0 = vmul.f32 0.25, %v1810_v34 }
 0x36b   : > { %1913 = vst.msk [vmem:[%s3392_s25 + $0xd0] sm:$0xff] %vm459_vm0, %v1881_v42  ;;  %v1851_v24 = vmul.f32 0.25, %v1805_v19  ;;  %v2255_v3 = vpop.f32.mrb[24].mxu1 }
 0x36c   : > { %v1884_v45 = vadd.f32 %v1852_v0, %v3588_v63  ;;  %v1820_v14 = vadd.f32 %v2255_v3, %v3384_v46  ;;  %v1814_v26 = vpop.f32.mrb[25].mxu1 }
 0x36d   : > { %v1883_v18 = vadd.f32 %v1851_v24, %v3589_v12  ;;  %v1815_v16 = vadd.f32 %v3384_v46, %v1814_v26 }
 0x36e   : > { %1916 = vst.msk [vmem:[%s3392_s25 + $0xe8] sm:$0xff] %vm459_vm0, %v1884_v45  ;;  %v1854_v35 = vmul.f32 0.25, %v1820_v14 }
 0x36f   : > { %1915 = vst.msk [vmem:[%s3392_s25 + $0xe0] sm:$0xff] %vm459_vm0, %v1883_v18  ;;  %v1853_v11 = vmul.f32 0.25, %v1815_v16 }
 0x370   : > { %v1886_v48 = vadd.f32 %v1854_v35, %v3590_v10 }
 0x371   : > { %v1885_v20 = vadd.f32 %v1853_v11, %v3591_v6 }
 0x372   : > { %1918 = vst.msk [vmem:[%s3392_s25 + $0xf8] sm:$0xff] %vm459_vm0, %v1886_v48 }
 0x373   : > { %1917 = vst.msk [vmem:[%s3392_s25 + $0xf0] sm:$0xff] %vm459_vm0, %v1885_v20 }
 0x374 PF: > { %s18_s27 = sadd.s32 1, %s2454_s27  }
 0x375   : > { %p15_p4 = scmp.ge.s32.totalorder %s18_s27, 4  }
 0x377   :  { %17 = sbr.rel (!%p15_p4) target bundleno = 1 (0x1), region = 85 }

// kernel: afno_cast_latent_forward.9
= control target key start
LH: loop header
LB: loop body
LE: loop exit
PB: predicated region body
PF: predicated region fallthrough
CT: control target
= control target key end

     0   :  { %s903_s12 = smov 0   ;;  %s1453_s0 = inlined_call_operand.vmem [shape: f32[512,32], index: 0, kind: input, shape index: {}]   ;;  %s1454_s1 = inlined_call_operand.vmem [shape: f32[1,32], index: 1, kind: input, shape index: {}]   ;;  %s1455_s2 = inlined_call_operand.vmem [shape: f32[1,32], index: 2, kind: input, shape index: {}]   ;;  %s1456_s3 = inlined_call_operand.vmem [shape: f32[512,32], index: 3, kind: output, shape index: {}]  }
   0x1 LB: > { %s790_s13 = sadd.s32 4294967295, %s881_s12   ;;  %p794_p0 = scmp.ge.s32.totalorder %s881_s12, 1  ;;  %s881_s12 = sphi %s903_s12, %s13_s12  }
   0x2   : > { %p138_p1 = scmp.lt.s32.totalorder %s881_s12, 3 }
   0x4   : > { %p139_p2 = pnand %p794_p0, %p138_p1 }
   0x5   : > { %s795_s14 = sshll.u32 (!%p139_p2), %s790_s13, 5  ;;  %vm206_vm0 = vcmask (!%p139_p2), 261120  }
   0x6   : > { %142 = sbr.rel (%p139_p2) target bundleno = 395 (0x18b), region = 32  ;;  %p163_p3 = scmp.lt.s32.totalorder (!%p139_p2), %s795_s14, 63 }
   0xd   : > { %s1458_s14 = smov (!%p163_p3, %s795_s14), 63 }
   0xe   : > { %s796_s15 = sshll.u32 %s1458_s14, 3 }
   0xf   : > { %s919_s18 = scalar_lea.vmem %s1453_s0, %s796_s15  ;;  %s1290_s25 = scalar_lea.vmem %s1456_s3, %s796_s15 }
  0x10   : > { %v922_v0 = vld [vmem:[%s919_s18] sm:$0xff]  ;;  %v925_v1 = vld [vmem:[%s919_s18 + $0x10] sm:$0xff]  ;;  %v928_v2 = vld [vmem:[%s919_s18 + $0x8] sm:$0xff] }
  0x11   : > { %v207_v3 = vsel %vm206_vm0, %v922_v0, 0.0  ;;  %v213_v4 = vsel %vm206_vm0, %v925_v1, 0.0  ;;  %v935_v5 = vld [vmem:[%s919_s18 + $0x18] sm:$0xff]  ;;  %v210_v6 = vsel %vm206_vm0, %v928_v2, 0.0  ;;  %v942_v8 = vld [vmem:[%s919_s18 + $0x20] sm:$0xff]  ;;  %v945_v9 = vld [vmem:[%s919_s18 + $0x28] sm:$0xff] }
  0x12   : > { %208 = vadd.xlane.f32.xlu0 %v207_v3  ;;  %214 = vadd.xlane.f32.xlu1 %v213_v4  ;;  %v216_v7 = vsel %vm206_vm0, %v935_v5, 0.0  ;;  %v219_v10 = vsel %vm206_vm0, %v942_v8, 0.0  ;;  %v222_v11 = vsel %vm206_vm0, %v945_v9, 0.0  ;;  %v952_v12 = vld [vmem:[%s919_s18 + $0x30] sm:$0xff]  ;;  %v955_v13 = vld [vmem:[%s919_s18 + $0x38] sm:$0xff]  ;;  %v962_v16 = vld [vmem:[%s919_s18 + $0x40] sm:$0xff] }
  0x13   : > { %v225_v14 = vsel %vm206_vm0, %v952_v12, 0.0  ;;  %v228_v15 = vsel %vm206_vm0, %v955_v13, 0.0  ;;  %v965_v17 = vld [vmem:[%s919_s18 + $0x48] sm:$0xff]  ;;  %v231_v18 = vsel %vm206_vm0, %v962_v16, 0.0  ;;  %v972_v20 = vld [vmem:[%s919_s18 + $0x50] sm:$0xff]  ;;  %v975_v21 = vld [vmem:[%s919_s18 + $0x58] sm:$0xff] }
  0x14   : > { %v234_v19 = vsel %vm206_vm0, %v965_v17, 0.0  ;;  %v237_v22 = vsel %vm206_vm0, %v972_v20, 0.0  ;;  %v240_v23 = vsel %vm206_vm0, %v975_v21, 0.0  ;;  %v982_v24 = vld [vmem:[%s919_s18 + $0x60] sm:$0xff]  ;;  %v985_v25 = vld [vmem:[%s919_s18 + $0x68] sm:$0xff]  ;;  %v992_v28 = vld [vmem:[%s919_s18 + $0x70] sm:$0xff] }
  0x15   : > { %v243_v26 = vsel %vm206_vm0, %v982_v24, 0.0  ;;  %v246_v27 = vsel %vm206_vm0, %v985_v25, 0.0  ;;  %v995_v29 = vld [vmem:[%s919_s18 + $0x78] sm:$0xff]  ;;  %v249_v30 = vsel %vm206_vm0, %v992_v28, 0.0  ;;  %v1002_v32 = vld [vmem:[%s919_s18 + $0x80] sm:$0xff]  ;;  %v1005_v33 = vld [vmem:[%s919_s18 + $0x88] sm:$0xff] }
  0x16   : > { %211 = vadd.xlane.f32.xlu0 %v210_v6  ;;  %217 = vadd.xlane.f32.xlu1 %v216_v7  ;;  %v252_v31 = vsel %vm206_vm0, %v995_v29, 0.0  ;;  %v255_v34 = vsel %vm206_vm0, %v1002_v32, 0.0  ;;  %v258_v35 = vsel %vm206_vm0, %v1005_v33, 0.0  ;;  %v1012_v36 = vld [vmem:[%s919_s18 + $0x90] sm:$0xff]  ;;  %v1015_v37 = vld [vmem:[%s919_s18 + $0x98] sm:$0xff]  ;;  %v1022_v40 = vld [vmem:[%s919_s18 + $0xa0] sm:$0xff] }
  0x17   : > { %v261_v38 = vsel %vm206_vm0, %v1012_v36, 0.0  ;;  %v264_v39 = vsel %vm206_vm0, %v1015_v37, 0.0  ;;  %v1025_v41 = vld [vmem:[%s919_s18 + $0xa8] sm:$0xff]  ;;  %v267_v42 = vsel %vm206_vm0, %v1022_v40, 0.0  ;;  %v1032_v44 = vld [vmem:[%s919_s18 + $0xb0] sm:$0xff]  ;;  %v1035_v45 = vld [vmem:[%s919_s18 + $0xb8] sm:$0xff] }
  0x18   : > { %v270_v43 = vsel %vm206_vm0, %v1025_v41, 0.0  ;;  %v273_v46 = vsel %vm206_vm0, %v1032_v44, 0.0  ;;  %v276_v47 = vsel %vm206_vm0, %v1035_v45, 0.0  ;;  %v1042_v48 = vld [vmem:[%s919_s18 + $0xc0] sm:$0xff]  ;;  %v1045_v49 = vld [vmem:[%s919_s18 + $0xc8] sm:$0xff]  ;;  %v1052_v52 = vld [vmem:[%s919_s18 + $0xd0] sm:$0xff] }
  0x19   : > { %v279_v50 = vsel %vm206_vm0, %v1042_v48, 0.0  ;;  %v282_v51 = vsel %vm206_vm0, %v1045_v49, 0.0  ;;  %v1055_v53 = vld [vmem:[%s919_s18 + $0xd8] sm:$0xff]  ;;  %v285_v54 = vsel %vm206_vm0, %v1052_v52, 0.0  ;;  %v1062_v56 = vld [vmem:[%s919_s18 + $0xe0] sm:$0xff]  ;;  %v1065_v57 = vld [vmem:[%s919_s18 + $0xe8] sm:$0xff] }
  0x1a   : > { %220 = vadd.xlane.f32.xlu0 %v219_v10  ;;  %223 = vadd.xlane.f32.xlu1 %v222_v11  ;;  %v288_v55 = vsel %vm206_vm0, %v1055_v53, 0.0  ;;  %v291_v58 = vsel %vm206_vm0, %v1062_v56, 0.0  ;;  %v294_v59 = vsel %vm206_vm0, %v1065_v57, 0.0  ;;  %v1072_v60 = vld [vmem:[%s919_s18 + $0xf0] sm:$0xff]  ;;  %v1075_v61 = vld [vmem:[%s919_s18 + $0xf8] sm:$0xff] }
  0x1b   : > { %v297_v62 = vsel %vm206_vm0, %v1072_v60, 0.0  ;;  %v300_v63 = vsel %vm206_vm0, %v1075_v61, 0.0 }
  0x1e   : > { %226 = vadd.xlane.f32.xlu0 %v225_v14  ;;  %229 = vadd.xlane.f32.xlu1 %v228_v15 }
  0x22   : > { %232 = vadd.xlane.f32.xlu0 %v231_v18  ;;  %235 = vadd.xlane.f32.xlu1 %v234_v19 }
  0x26   : > { %238 = vadd.xlane.f32.xlu0 %v237_v22  ;;  %241 = vadd.xlane.f32.xlu1 %v240_v23 }
  0x2a   : > { %244 = vadd.xlane.f32.xlu0 %v243_v26  ;;  %247 = vadd.xlane.f32.xlu1 %v246_v27 }
  0x2e   : > { %250 = vadd.xlane.f32.xlu0 %v249_v30  ;;  %253 = vadd.xlane.f32.xlu1 %v252_v31 }
  0x32   : > { %256 = vadd.xlane.f32.xlu0 %v255_v34  ;;  %259 = vadd.xlane.f32.xlu1 %v258_v35 }
  0x36   : > { %262 = vadd.xlane.f32.xlu0 %v261_v38  ;;  %265 = vadd.xlane.f32.xlu1 %v264_v39 }
  0x3a   : > { %268 = vadd.xlane.f32.xlu0 %v267_v42  ;;  %271 = vadd.xlane.f32.xlu1 %v270_v43 }
  0x3e   : > { %274 = vadd.xlane.f32.xlu0 %v273_v46  ;;  %277 = vadd.xlane.f32.xlu1 %v276_v47 }
  0x42   : > { %280 = vadd.xlane.f32.xlu0 %v279_v50  ;;  %283 = vadd.xlane.f32.xlu1 %v282_v51 }
  0x46   : > { %286 = vadd.xlane.f32.xlu0 %v285_v54  ;;  %289 = vadd.xlane.f32.xlu1 %v288_v55 }
  0x4a   : > { %292 = vadd.xlane.f32.xlu0 %v291_v58  ;;  %295 = vadd.xlane.f32.xlu1 %v294_v59 }
  0x4e   : > { %298 = vadd.xlane.f32.xlu0 %v297_v62  ;;  %301 = vadd.xlane.f32.xlu1 %v300_v63 }
  0x9f   : > { %v209_v3 = vpop.xlane.xlu0 %208  ;;  %v215_v4 = vpop.xlane.xlu1 %214 }
  0xa0   : > { %v304_v6 = vmul.f32 0.03125, %v209_v3  ;;  %v306_v7 = vmul.f32 0.03125, %v215_v4 }
  0xa2   : > { %v1082_v10 = vsub.f32 %v922_v0, %v304_v6  ;;  %v1085_v11 = vsub.f32 %v925_v1, %v306_v7 }
  0xa3   : > { %v212_v14 = vpop.xlane.xlu0 %211  ;;  %v218_v15 = vpop.xlane.xlu1 %217 }
  0xa4   : > { %v305_v18 = vmul.f32 0.03125, %v212_v14  ;;  %v307_v19 = vmul.f32 0.03125, %v218_v15  ;;  %v368_v22 = vmul.f32 %v1082_v10, %v1082_v10  ;;  %v370_v23 = vmul.f32 %v1085_v11, %v1085_v11 }
  0xa6   : > { %v1092_v26 = vsub.f32 %v928_v2, %v305_v18  ;;  %v1095_v27 = vsub.f32 %v935_v5, %v307_v19  ;;  %v400_v0 = vsel %vm206_vm0, %v368_v22, 0.0  ;;  %v406_v31 = vsel %vm206_vm0, %v370_v23, 0.0 }
  0xa7   : > { %401 = vadd.xlane.f32.xlu0 %v400_v0  ;;  %v221_v1 = vpop.xlane.xlu0 %220  ;;  %v224_v30 = vpop.xlane.xlu1 %223 }
  0xa8   : > { %v308_v34 = vmul.f32 0.03125, %v221_v1  ;;  %v309_v35 = vmul.f32 0.03125, %v224_v30  ;;  %v369_v38 = vmul.f32 %v1092_v26, %v1092_v26  ;;  %v371_v39 = vmul.f32 %v1095_v27, %v1095_v27 }
  0xaa   : > { %v1104_v2 = vsub.f32 %v942_v8, %v308_v34  ;;  %v1107_v5 = vsub.f32 %v945_v9, %v309_v35  ;;  %v403_v42 = vsel %vm206_vm0, %v369_v38, 0.0  ;;  %v409_v47 = vsel %vm206_vm0, %v371_v39, 0.0 }
  0xab   : > { %407 = vadd.xlane.f32.xlu0 %v406_v31  ;;  %404 = vadd.xlane.f32.xlu1 %v403_v42  ;;  %v227_v43 = vpop.xlane.xlu0 %226  ;;  %v230_v46 = vpop.xlane.xlu1 %229 }
  0xac   : > { %v310_v50 = vmul.f32 0.03125, %v227_v43  ;;  %v311_v51 = vmul.f32 0.03125, %v230_v46  ;;  %v372_v54 = vmul.f32 %v1104_v2, %v1104_v2  ;;  %v373_v8 = vmul.f32 %v1107_v5, %v1107_v5 }
  0xae   : > { %v1116_v55 = vsub.f32 %v952_v12, %v310_v50  ;;  %v1119_v9 = vsub.f32 %v955_v13, %v311_v51  ;;  %v412_v58 = vsel %vm206_vm0, %v372_v54, 0.0  ;;  %v415_v63 = vsel %vm206_vm0, %v373_v8, 0.0 }
  0xaf   : > { %410 = vadd.xlane.f32.xlu1 %v409_v47  ;;  %413 = vadd.xlane.f32.xlu0 %v412_v58  ;;  %v233_v59 = vpop.xlane.xlu0 %232  ;;  %v236_v62 = vpop.xlane.xlu1 %235 }
  0xb0   : > { %v312_v3 = vmul.f32 0.03125, %v233_v59  ;;  %v313_v4 = vmul.f32 0.03125, %v236_v62  ;;  %v374_v6 = vmul.f32 %v1116_v55, %v1116_v55  ;;  %v375_v12 = vmul.f32 %v1119_v9, %v1119_v9 }
  0xb2   : > { %v1128_v7 = vsub.f32 %v962_v16, %v312_v3  ;;  %v1131_v13 = vsub.f32 %v965_v17, %v313_v4  ;;  %v418_v14 = vsel %vm206_vm0, %v374_v6, 0.0  ;;  %v421_v19 = vsel %vm206_vm0, %v375_v12, 0.0 }
  0xb3   : > { %416 = vadd.xlane.f32.xlu1 %v415_v63  ;;  %419 = vadd.xlane.f32.xlu0 %v418_v14  ;;  %v239_v15 = vpop.xlane.xlu0 %238  ;;  %v242_v18 = vpop.xlane.xlu1 %241 }
  0xb4   : > { %v314_v22 = vmul.f32 0.03125, %v239_v15  ;;  %v315_v23 = vmul.f32 0.03125, %v242_v18  ;;  %v376_v0 = vmul.f32 %v1128_v7, %v1128_v7  ;;  %v377_v16 = vmul.f32 %v1131_v13, %v1131_v13 }
  0xb6   : > { %v1140_v1 = vsub.f32 %v972_v20, %v314_v22  ;;  %v1143_v17 = vsub.f32 %v975_v21, %v315_v23  ;;  %v424_v30 = vsel %vm206_vm0, %v376_v0, 0.0  ;;  %v427_v35 = vsel %vm206_vm0, %v377_v16, 0.0 }
  0xb7   : > { %422 = vadd.xlane.f32.xlu1 %v421_v19  ;;  %425 = vadd.xlane.f32.xlu0 %v424_v30  ;;  %v245_v31 = vpop.xlane.xlu0 %244  ;;  %v248_v34 = vpop.xlane.xlu1 %247 }
  0xb8   : > { %v316_v38 = vmul.f32 0.03125, %v245_v31  ;;  %v317_v39 = vmul.f32 0.03125, %v248_v34  ;;  %v378_v42 = vmul.f32 %v1140_v1, %v1140_v1  ;;  %v379_v20 = vmul.f32 %v1143_v17, %v1143_v17 }
  0xba   : > { %v1152_v43 = vsub.f32 %v982_v24, %v316_v38  ;;  %v1155_v21 = vsub.f32 %v985_v25, %v317_v39  ;;  %v430_v46 = vsel %vm206_vm0, %v378_v42, 0.0  ;;  %v433_v51 = vsel %vm206_vm0, %v379_v20, 0.0 }
  0xbb   : > { %428 = vadd.xlane.f32.xlu1 %v427_v35  ;;  %431 = vadd.xlane.f32.xlu0 %v430_v46  ;;  %v251_v47 = vpop.xlane.xlu0 %250  ;;  %v254_v50 = vpop.xlane.xlu1 %253 }
  0xbc   : > { %v318_v54 = vmul.f32 0.03125, %v251_v47  ;;  %v319_v8 = vmul.f32 0.03125, %v254_v50  ;;  %v380_v58 = vmul.f32 %v1152_v43, %v1152_v43  ;;  %v381_v24 = vmul.f32 %v1155_v21, %v1155_v21 }
  0xbe   : > { %v1164_v59 = vsub.f32 %v992_v28, %v318_v54  ;;  %v1167_v25 = vsub.f32 %v995_v29, %v319_v8  ;;  %v436_v62 = vsel %vm206_vm0, %v380_v58, 0.0  ;;  %v439_v4 = vsel %vm206_vm0, %v381_v24, 0.0 }
  0xbf   : > { %434 = vadd.xlane.f32.xlu1 %v433_v51  ;;  %437 = vadd.xlane.f32.xlu0 %v436_v62  ;;  %v257_v63 = vpop.xlane.xlu0 %256  ;;  %v260_v3 = vpop.xlane.xlu1 %259 }
  0xc0   : > { %v320_v6 = vmul.f32 0.03125, %v257_v63  ;;  %v321_v12 = vmul.f32 0.03125, %v260_v3  ;;  %v382_v14 = vmul.f32 %v1164_v59, %v1164_v59  ;;  %v383_v28 = vmul.f32 %v1167_v25, %v1167_v25 }
  0xc2   : > { %v1176_v15 = vsub.f32 %v1002_v32, %v320_v6  ;;  %v1179_v29 = vsub.f32 %v1005_v33, %v321_v12  ;;  %v442_v18 = vsel %vm206_vm0, %v382_v14, 0.0  ;;  %v445_v23 = vsel %vm206_vm0, %v383_v28, 0.0 }
  0xc3   : > { %440 = vadd.xlane.f32.xlu1 %v439_v4  ;;  %443 = vadd.xlane.f32.xlu0 %v442_v18  ;;  %v263_v19 = vpop.xlane.xlu0 %262  ;;  %v266_v22 = vpop.xlane.xlu1 %265 }
  0xc4   : > { %v322_v0 = vmul.f32 0.03125, %v263_v19  ;;  %v323_v16 = vmul.f32 0.03125, %v266_v22  ;;  %v384_v30 = vmul.f32 %v1176_v15, %v1176_v15  ;;  %v385_v32 = vmul.f32 %v1179_v29, %v1179_v29 }
  0xc6   : > { %v1188_v31 = vsub.f32 %v1012_v36, %v322_v0  ;;  %v1191_v33 = vsub.f32 %v1015_v37, %v323_v16  ;;  %v448_v34 = vsel %vm206_vm0, %v384_v30, 0.0  ;;  %v451_v39 = vsel %vm206_vm0, %v385_v32, 0.0 }
  0xc7   : > { %446 = vadd.xlane.f32.xlu1 %v445_v23  ;;  %449 = vadd.xlane.f32.xlu0 %v448_v34  ;;  %v269_v35 = vpop.xlane.xlu0 %268  ;;  %v272_v38 = vpop.xlane.xlu1 %271 }
  0xc8   : > { %v324_v42 = vmul.f32 0.03125, %v269_v35  ;;  %v325_v20 = vmul.f32 0.03125, %v272_v38  ;;  %v386_v46 = vmul.f32 %v1188_v31, %v1188_v31  ;;  %v387_v36 = vmul.f32 %v1191_v33, %v1191_v33 }
  0xca   : > { %v1200_v47 = vsub.f32 %v1022_v40, %v324_v42  ;;  %v1203_v37 = vsub.f32 %v1025_v41, %v325_v20  ;;  %v454_v50 = vsel %vm206_vm0, %v386_v46, 0.0  ;;  %v457_v8 = vsel %vm206_vm0, %v387_v36, 0.0 }
  0xcb   : > { %452 = vadd.xlane.f32.xlu1 %v451_v39  ;;  %455 = vadd.xlane.f32.xlu0 %v454_v50  ;;  %v275_v51 = vpop.xlane.xlu0 %274  ;;  %v278_v54 = vpop.xlane.xlu1 %277 }
  0xcc   : > { %v326_v58 = vmul.f32 0.03125, %v275_v51  ;;  %v327_v24 = vmul.f32 0.03125, %v278_v54  ;;  %v388_v62 = vmul.f32 %v1200_v47, %v1200_v47  ;;  %v389_v40 = vmul.f32 %v1203_v37, %v1203_v37 }
  0xce   : > { %v1212_v63 = vsub.f32 %v1032_v44, %v326_v58  ;;  %v1215_v41 = vsub.f32 %v1035_v45, %v327_v24  ;;  %v460_v3 = vsel %vm206_vm0, %v388_v62, 0.0  ;;  %v463_v12 = vsel %vm206_vm0, %v389_v40, 0.0 }
  0xcf   : > { %458 = vadd.xlane.f32.xlu1 %v457_v8  ;;  %461 = vadd.xlane.f32.xlu0 %v460_v3  ;;  %v281_v4 = vpop.xlane.xlu0 %280  ;;  %v284_v6 = vpop.xlane.xlu1 %283 }
  0xd0   : > { %v328_v14 = vmul.f32 0.03125, %v281_v4  ;;  %v329_v28 = vmul.f32 0.03125, %v284_v6  ;;  %v390_v18 = vmul.f32 %v1212_v63, %v1212_v63  ;;  %v391_v44 = vmul.f32 %v1215_v41, %v1215_v41 }
  0xd2   : > { %v1224_v19 = vsub.f32 %v1042_v48, %v328_v14  ;;  %v1227_v45 = vsub.f32 %v1045_v49, %v329_v28  ;;  %v466_v22 = vsel %vm206_vm0, %v390_v18, 0.0  ;;  %v469_v16 = vsel %vm206_vm0, %v391_v44, 0.0 }
  0xd3   : > { %464 = vadd.xlane.f32.xlu1 %v463_v12  ;;  %467 = vadd.xlane.f32.xlu0 %v466_v22  ;;  %v287_v23 = vpop.xlane.xlu0 %286  ;;  %v290_v0 = vpop.xlane.xlu1 %289 }
  0xd4   : > { %v330_v30 = vmul.f32 0.03125, %v287_v23  ;;  %v331_v32 = vmul.f32 0.03125, %v290_v0  ;;  %v392_v34 = vmul.f32 %v1224_v19, %v1224_v19  ;;  %v393_v48 = vmul.f32 %v1227_v45, %v1227_v45 }
  0xd6   : > { %v1236_v35 = vsub.f32 %v1052_v52, %v330_v30  ;;  %v1239_v49 = vsub.f32 %v1055_v53, %v331_v32  ;;  %v472_v38 = vsel %vm206_vm0, %v392_v34, 0.0  ;;  %v475_v20 = vsel %vm206_vm0, %v393_v48, 0.0 }
  0xd7   : > { %470 = vadd.xlane.f32.xlu1 %v469_v16  ;;  %473 = vadd.xlane.f32.xlu0 %v472_v38  ;;  %v293_v39 = vpop.xlane.xlu0 %292  ;;  %v296_v42 = vpop.xlane.xlu1 %295 }
  0xd8   : > { %v332_v46 = vmul.f32 0.03125, %v293_v39  ;;  %v333_v36 = vmul.f32 0.03125, %v296_v42  ;;  %v394_v50 = vmul.f32 %v1236_v35, %v1236_v35  ;;  %v395_v52 = vmul.f32 %v1239_v49, %v1239_v49 }
  0xda   : > { %v1248_v51 = vsub.f32 %v1062_v56, %v332_v46  ;;  %v1251_v53 = vsub.f32 %v1065_v57, %v333_v36  ;;  %v478_v54 = vsel %vm206_vm0, %v394_v50, 0.0  ;;  %v481_v24 = vsel %vm206_vm0, %v395_v52, 0.0 }
  0xdb   : > { %476 = vadd.xlane.f32.xlu1 %v475_v20  ;;  %479 = vadd.xlane.f32.xlu0 %v478_v54  ;;  %v299_v8 = vpop.xlane.xlu0 %298  ;;  %v302_v58 = vpop.xlane.xlu1 %301 }
  0xdc   : > { %v334_v62 = vmul.f32 0.03125, %v299_v8  ;;  %v335_v40 = vmul.f32 0.03125, %v302_v58  ;;  %v396_v3 = vmul.f32 %v1248_v51, %v1248_v51  ;;  %v397_v56 = vmul.f32 %v1251_v53, %v1251_v53  ;;  %v1276_v58 = vld [vmem:[%s1454_s1] ss:$0 sm:$0xff] }
  0xde   : > { %v1260_v4 = vsub.f32 %v1072_v60, %v334_v62  ;;  %v1263_v57 = vsub.f32 %v1075_v61, %v335_v40  ;;  %v484_v6 = vsel %vm206_vm0, %v396_v3, 0.0  ;;  %v487_v12 = vsel %vm206_vm0, %v397_v56, 0.0 }
  0xdf   : > { %482 = vadd.xlane.f32.xlu1 %v481_v24  ;;  %485 = vadd.xlane.f32.xlu0 %v484_v6  ;;  %v1282_v6 = vld [vmem:[%s1455_s2] ss:$0 sm:$0xff] }
  0xe0   : > { %v398_v14 = vmul.f32 %v1260_v4, %v1260_v4  ;;  %v399_v28 = vmul.f32 %v1263_v57, %v1263_v57 }
  0xe2   : > { %v490_v18 = vsel %vm206_vm0, %v398_v14, 0.0  ;;  %v493_v60 = vsel %vm206_vm0, %v399_v28, 0.0 }
  0xe3   : > { %488 = vadd.xlane.f32.xlu1 %v487_v12  ;;  %491 = vadd.xlane.f32.xlu0 %v490_v18 }
  0xe7   : > { %494 = vadd.xlane.f32.xlu1 %v493_v60 }
 0x134   : > { %v402_v61 = vpop.xlane.xlu0 %401 }
 0x135   : > { %v496_v44 = vmul.f32 0.03125, %v402_v61 }
 0x137   : > { %v528_v22 = vadd.f32 1e-05, %v496_v44 }
 0x138   : > { %v405_v23 = vpop.xlane.xlu1 %404  ;;  %v408_v0 = vpop.xlane.xlu0 %407 }
 0x139   : > { %811 = vrsqrt.f32 %v528_v22  ;;  %v497_v16 = vmul.f32 0.03125, %v405_v23  ;;  %v498_v30 = vmul.f32 0.03125, %v408_v0 }
 0x13b   : > { %v529_v32 = vadd.f32 1e-05, %v497_v16  ;;  %v530_v34 = vadd.f32 1e-05, %v498_v30 }
 0x13c   : > { %v411_v48 = vpop.xlane.xlu1 %410  ;;  %v414_v38 = vpop.xlane.xlu0 %413 }
 0x13d   : > { %813 = vrsqrt.f32 %v529_v32  ;;  %v499_v39 = vmul.f32 0.03125, %v411_v48  ;;  %v500_v42 = vmul.f32 0.03125, %v414_v38 }
 0x13e   : > { %815 = vrsqrt.f32 %v530_v34 }
 0x13f   : > { %v531_v20 = vadd.f32 1e-05, %v499_v39  ;;  %v532_v46 = vadd.f32 1e-05, %v500_v42 }
 0x140   : > { %v417_v36 = vpop.xlane.xlu1 %416  ;;  %v420_v50 = vpop.xlane.xlu0 %419 }
 0x141   : > { %817 = vrsqrt.f32 %v531_v20  ;;  %v501_v52 = vmul.f32 0.03125, %v417_v36  ;;  %v502_v54 = vmul.f32 0.03125, %v420_v50 }
 0x142   : > { %819 = vrsqrt.f32 %v532_v46 }
 0x143   : > { %v812_v8 = vpop.eup %811  ;;  %v533_v24 = vadd.f32 1e-05, %v501_v52  ;;  %v534_v62 = vadd.f32 1e-05, %v502_v54 }
 0x144   : > { %v592_v40 = vmul.f32 %v812_v8, %v1082_v10  ;;  %v423_v3 = vpop.xlane.xlu1 %422  ;;  %v426_v56 = vpop.xlane.xlu0 %425 }
 0x145   : > { %821 = vrsqrt.f32 %v533_v24  ;;  %v503_v12 = vmul.f32 0.03125, %v423_v3  ;;  %v504_v14 = vmul.f32 0.03125, %v426_v56 }
 0x146   : > { %v631_v28 = vmul.f32 %v1276_v58, %v592_v40  ;;  %823 = vrsqrt.f32 %v534_v62 }
 0x147   : > { %v814_v18 = vpop.eup %813  ;;  %v535_v10 = vadd.f32 1e-05, %v503_v12  ;;  %v536_v60 = vadd.f32 1e-05, %v504_v14 }
 0x148   : > { %v816_v61 = vpop.eup %815  ;;  %v670_v44 = vadd.f32 %v1282_v6, %v631_v28  ;;  %v593_v22 = vmul.f32 %v814_v18, %v1092_v26  ;;  %v429_v23 = vpop.xlane.xlu1 %428 }
 0x149   : > { %v432_v0 = vpop.xlane.xlu0 %431  ;;  %v594_v16 = vmul.f32 %v816_v61, %v1085_v11  ;;  %825 = vrsqrt.f32 %v535_v10  ;;  %v505_v30 = vmul.f32 0.03125, %v429_v23 }
 0x14a   : > { %v506_v32 = vmul.f32 0.03125, %v432_v0  ;;  %702 = vst.msk [vmem:[%s1290_s25] sm:$0xff] %vm206_vm0, %v670_v44  ;;  %v632_v34 = vmul.f32 %v1276_v58, %v593_v22  ;;  %827 = vrsqrt.f32 %v536_v60 }
 0x14b   : > { %v818_v48 = vpop.eup %817  ;;  %v633_v38 = vmul.f32 %v1276_v58, %v594_v16  ;;  %v537_v39 = vadd.f32 1e-05, %v505_v30 }
 0x14c   : > { %v538_v42 = vadd.f32 1e-05, %v506_v32  ;;  %v820_v26 = vpop.eup %819  ;;  %v671_v20 = vadd.f32 %v1282_v6, %v632_v34  ;;  %v595_v11 = vmul.f32 %v818_v48, %v1095_v27  ;;  %v435_v46 = vpop.xlane.xlu1 %434 }
 0x14d   : > { %v438_v36 = vpop.xlane.xlu0 %437  ;;  %v672_v50 = vadd.f32 %v1282_v6, %v633_v38  ;;  %v596_v52 = vmul.f32 %v820_v26, %v1104_v2  ;;  %829 = vrsqrt.f32 %v537_v39  ;;  %v507_v54 = vmul.f32 0.03125, %v435_v46 }
 0x14e   : > { %703 = vst.msk [vmem:[%s1290_s25 + $0x8] sm:$0xff] %vm206_vm0, %v671_v20  ;;  %v634_v8 = vmul.f32 %v1276_v58, %v595_v11  ;;  %831 = vrsqrt.f32 %v538_v42  ;;  %v508_v24 = vmul.f32 0.03125, %v438_v36 }
 0x14f   : > { %v822_v62 = vpop.eup %821  ;;  %704 = vst.msk [vmem:[%s1290_s25 + $0x10] sm:$0xff] %vm206_vm0, %v672_v50  ;;  %v635_v27 = vmul.f32 %v1276_v58, %v596_v52  ;;  %v539_v40 = vadd.f32 1e-05, %v507_v54 }
 0x150   : > { %v824_v3 = vpop.eup %823  ;;  %v673_v56 = vadd.f32 %v1282_v6, %v634_v8  ;;  %v597_v2 = vmul.f32 %v822_v62, %v1107_v5  ;;  %v540_v12 = vadd.f32 1e-05, %v508_v24  ;;  %v441_v14 = vpop.xlane.xlu1 %440 }
 0x151   : > { %v444_v28 = vpop.xlane.xlu0 %443  ;;  %v674_v18 = vadd.f32 %v1282_v6, %v635_v27  ;;  %v598_v10 = vmul.f32 %v824_v3, %v1116_v55  ;;  %833 = vrsqrt.f32 %v539_v40  ;;  %v509_v60 = vmul.f32 0.03125, %v441_v14 }
 0x152   : > { %705 = vst.msk [vmem:[%s1290_s25 + $0x18] sm:$0xff] %vm206_vm0, %v673_v56  ;;  %v636_v61 = vmul.f32 %v1276_v58, %v597_v2  ;;  %835 = vrsqrt.f32 %v540_v12  ;;  %v510_v44 = vmul.f32 0.03125, %v444_v28 }
 0x153   : > { %v826_v22 = vpop.eup %825  ;;  %706 = vst.msk [vmem:[%s1290_s25 + $0x20] sm:$0xff] %vm206_vm0, %v674_v18  ;;  %v637_v5 = vmul.f32 %v1276_v58, %v598_v10  ;;  %v541_v23 = vadd.f32 1e-05, %v509_v60 }
 0x154   : > { %v828_v0 = vpop.eup %827  ;;  %v675_v16 = vadd.f32 %v1282_v6, %v636_v61  ;;  %v599_v55 = vmul.f32 %v826_v22, %v1119_v9  ;;  %v542_v30 = vadd.f32 1e-05, %v510_v44  ;;  %v447_v32 = vpop.xlane.xlu1 %446 }
 0x155   : > { %v450_v34 = vpop.xlane.xlu0 %449  ;;  %v676_v48 = vadd.f32 %v1282_v6, %v637_v5  ;;  %v600_v38 = vmul.f32 %v828_v0, %v1128_v7  ;;  %837 = vrsqrt.f32 %v541_v23  ;;  %v511_v39 = vmul.f32 0.03125, %v447_v32 }
 0x156   : > { %707 = vst.msk [vmem:[%s1290_s25 + $0x28] sm:$0xff] %vm206_vm0, %v675_v16  ;;  %v638_v42 = vmul.f32 %v1276_v58, %v599_v55  ;;  %839 = vrsqrt.f32 %v542_v30  ;;  %v512_v26 = vmul.f32 0.03125, %v450_v34 }
 0x157   : > { %v830_v20 = vpop.eup %829  ;;  %708 = vst.msk [vmem:[%s1290_s25 + $0x30] sm:$0xff] %vm206_vm0, %v676_v48  ;;  %v639_v9 = vmul.f32 %v1276_v58, %v600_v38  ;;  %v543_v11 = vadd.f32 1e-05, %v511_v39 }
 0x158   : > { %v832_v46 = vpop.eup %831  ;;  %v677_v36 = vadd.f32 %v1282_v6, %v638_v42  ;;  %v601_v7 = vmul.f32 %v830_v20, %v1131_v13  ;;  %v544_v50 = vadd.f32 1e-05, %v512_v26  ;;  %v453_v52 = vpop.xlane.xlu1 %452 }
 0x159   : > { %v456_v54 = vpop.xlane.xlu0 %455  ;;  %v678_v8 = vadd.f32 %v1282_v6, %v639_v9  ;;  %v602_v24 = vmul.f32 %v832_v46, %v1140_v1  ;;  %841 = vrsqrt.f32 %v543_v11  ;;  %v513_v62 = vmul.f32 0.03125, %v453_v52 }
 0x15a   : > { %709 = vst.msk [vmem:[%s1290_s25 + $0x38] sm:$0xff] %vm206_vm0, %v677_v36  ;;  %v640_v27 = vmul.f32 %v1276_v58, %v601_v7  ;;  %843 = vrsqrt.f32 %v544_v50  ;;  %v514_v40 = vmul.f32 0.03125, %v456_v54 }
 0x15b   : > { %v834_v3 = vpop.eup %833  ;;  %710 = vst.msk [vmem:[%s1290_s25 + $0x40] sm:$0xff] %vm206_vm0, %v678_v8  ;;  %v641_v13 = vmul.f32 %v1276_v58, %v602_v24  ;;  %v545_v56 = vadd.f32 1e-05, %v513_v62 }
 0x15c   : > { %v836_v2 = vpop.eup %835  ;;  %v679_v12 = vadd.f32 %v1282_v6, %v640_v27  ;;  %v603_v1 = vmul.f32 %v834_v3, %v1143_v17  ;;  %v546_v14 = vadd.f32 1e-05, %v514_v40  ;;  %v459_v28 = vpop.xlane.xlu1 %458 }
 0x15d   : > { %v462_v18 = vpop.xlane.xlu0 %461  ;;  %v680_v10 = vadd.f32 %v1282_v6, %v641_v13  ;;  %v604_v60 = vmul.f32 %v836_v2, %v1152_v43  ;;  %845 = vrsqrt.f32 %v545_v56  ;;  %v515_v61 = vmul.f32 0.03125, %v459_v28 }
 0x15e   : > { %711 = vst.msk [vmem:[%s1290_s25 + $0x48] sm:$0xff] %vm206_vm0, %v679_v12  ;;  %v642_v44 = vmul.f32 %v1276_v58, %v603_v1  ;;  %847 = vrsqrt.f32 %v546_v14  ;;  %v516_v22 = vmul.f32 0.03125, %v462_v18 }
 0x15f   : > { %v838_v5 = vpop.eup %837  ;;  %712 = vst.msk [vmem:[%s1290_s25 + $0x50] sm:$0xff] %vm206_vm0, %v680_v10  ;;  %v643_v17 = vmul.f32 %v1276_v58, %v604_v60  ;;  %v547_v23 = vadd.f32 1e-05, %v515_v61 }
 0x160   : > { %v840_v0 = vpop.eup %839  ;;  %v681_v16 = vadd.f32 %v1282_v6, %v642_v44  ;;  %v605_v43 = vmul.f32 %v838_v5, %v1155_v21  ;;  %v548_v55 = vadd.f32 1e-05, %v516_v22  ;;  %v465_v30 = vpop.xlane.xlu1 %464 }
 0x161   : > { %v468_v32 = vpop.xlane.xlu0 %467  ;;  %v682_v34 = vadd.f32 %v1282_v6, %v643_v17  ;;  %v606_v48 = vmul.f32 %v840_v0, %v1164_v59  ;;  %849 = vrsqrt.f32 %v547_v23  ;;  %v517_v38 = vmul.f32 0.03125, %v465_v30 }
 0x162   : > { %713 = vst.msk [vmem:[%s1290_s25 + $0x58] sm:$0xff] %vm206_vm0, %v681_v16  ;;  %v644_v39 = vmul.f32 %v1276_v58, %v605_v43  ;;  %851 = vrsqrt.f32 %v548_v55  ;;  %v518_v42 = vmul.f32 0.03125, %v468_v32 }
 0x163   : > { %v842_v26 = vpop.eup %841  ;;  %714 = vst.msk [vmem:[%s1290_s25 + $0x60] sm:$0xff] %vm206_vm0, %v682_v34  ;;  %v645_v21 = vmul.f32 %v1276_v58, %v606_v48  ;;  %v549_v20 = vadd.f32 1e-05, %v517_v38 }
 0x164   : > { %v844_v9 = vpop.eup %843  ;;  %v683_v11 = vadd.f32 %v1282_v6, %v644_v39  ;;  %v607_v59 = vmul.f32 %v842_v26, %v1167_v25  ;;  %v550_v46 = vadd.f32 1e-05, %v518_v42  ;;  %v471_v36 = vpop.xlane.xlu1 %470 }
 0x165   : > { %v474_v7 = vpop.xlane.xlu0 %473  ;;  %v684_v50 = vadd.f32 %v1282_v6, %v645_v21  ;;  %v608_v52 = vmul.f32 %v844_v9, %v1176_v15  ;;  %853 = vrsqrt.f32 %v549_v20  ;;  %v519_v54 = vmul.f32 0.03125, %v471_v36 }
 0x166   : > { %715 = vst.msk [vmem:[%s1290_s25 + $0x68] sm:$0xff] %vm206_vm0, %v683_v11  ;;  %v646_v8 = vmul.f32 %v1276_v58, %v607_v59  ;;  %855 = vrsqrt.f32 %v550_v46  ;;  %v520_v24 = vmul.f32 0.03125, %v474_v7 }
 0x167   : > { %v846_v62 = vpop.eup %845  ;;  %716 = vst.msk [vmem:[%s1290_s25 + $0x70] sm:$0xff] %vm206_vm0, %v684_v50  ;;  %v647_v25 = vmul.f32 %v1276_v58, %v608_v52  ;;  %v551_v27 = vadd.f32 1e-05, %v519_v54 }
 0x168   : > { %v848_v40 = vpop.eup %847  ;;  %v685_v3 = vadd.f32 %v1282_v6, %v646_v8  ;;  %v609_v15 = vmul.f32 %v846_v62, %v1179_v29  ;;  %v552_v13 = vadd.f32 1e-05, %v520_v24  ;;  %v477_v56 = vpop.xlane.xlu1 %476 }
 0x169   : > { %v480_v2 = vpop.xlane.xlu0 %479  ;;  %v686_v12 = vadd.f32 %v1282_v6, %v647_v25  ;;  %v610_v1 = vmul.f32 %v848_v40, %v1188_v31  ;;  %857 = vrsqrt.f32 %v551_v27  ;;  %v521_v14 = vmul.f32 0.03125, %v477_v56 }
 0x16a   : > { %717 = vst.msk [vmem:[%s1290_s25 + $0x78] sm:$0xff] %vm206_vm0, %v685_v3  ;;  %v648_v28 = vmul.f32 %v1276_v58, %v609_v15  ;;  %859 = vrsqrt.f32 %v552_v13  ;;  %v522_v18 = vmul.f32 0.03125, %v480_v2 }
 0x16b   : > { %v850_v10 = vpop.eup %849  ;;  %718 = vst.msk [vmem:[%s1290_s25 + $0x80] sm:$0xff] %vm206_vm0, %v686_v12  ;;  %v649_v29 = vmul.f32 %v1276_v58, %v610_v1  ;;  %v553_v60 = vadd.f32 1e-05, %v521_v14 }
 0x16c   : > { %v852_v61 = vpop.eup %851  ;;  %v687_v44 = vadd.f32 %v1282_v6, %v648_v28  ;;  %v611_v31 = vmul.f32 %v850_v10, %v1191_v33  ;;  %v554_v22 = vadd.f32 1e-05, %v522_v18  ;;  %v483_v5 = vpop.xlane.xlu1 %482 }
 0x16d   : > { %v486_v17 = vpop.xlane.xlu0 %485  ;;  %v688_v23 = vadd.f32 %v1282_v6, %v649_v29  ;;  %v612_v0 = vmul.f32 %v852_v61, %v1200_v47  ;;  %861 = vrsqrt.f32 %v553_v60  ;;  %v523_v16 = vmul.f32 0.03125, %v483_v5 }
 0x16e   : > { %719 = vst.msk [vmem:[%s1290_s25 + $0x88] sm:$0xff] %vm206_vm0, %v687_v44  ;;  %v650_v43 = vmul.f32 %v1276_v58, %v611_v31  ;;  %863 = vrsqrt.f32 %v554_v22  ;;  %v524_v55 = vmul.f32 0.03125, %v486_v17 }
 0x16f   : > { %v854_v30 = vpop.eup %853  ;;  %720 = vst.msk [vmem:[%s1290_s25 + $0x90] sm:$0xff] %vm206_vm0, %v688_v23  ;;  %v651_v33 = vmul.f32 %v1276_v58, %v612_v0  ;;  %v555_v32 = vadd.f32 1e-05, %v523_v16 }
 0x170   : > { %v856_v34 = vpop.eup %855  ;;  %v689_v48 = vadd.f32 %v1282_v6, %v650_v43  ;;  %v613_v47 = vmul.f32 %v854_v30, %v1203_v37  ;;  %v556_v38 = vadd.f32 1e-05, %v524_v55  ;;  %v489_v39 = vpop.xlane.xlu1 %488 }
 0x171   : > { %v492_v42 = vpop.xlane.xlu0 %491  ;;  %v690_v26 = vadd.f32 %v1282_v6, %v651_v33  ;;  %v614_v21 = vmul.f32 %v856_v34, %v1212_v63  ;;  %865 = vrsqrt.f32 %v555_v32  ;;  %v525_v20 = vmul.f32 0.03125, %v489_v39 }
 0x172   : > { %721 = vst.msk [vmem:[%s1290_s25 + $0x98] sm:$0xff] %vm206_vm0, %v689_v48  ;;  %v652_v9 = vmul.f32 %v1276_v58, %v613_v47  ;;  %867 = vrsqrt.f32 %v556_v38  ;;  %v526_v11 = vmul.f32 0.03125, %v492_v42 }
 0x173   : > { %v858_v59 = vpop.eup %857  ;;  %722 = vst.msk [vmem:[%s1290_s25 + $0xa0] sm:$0xff] %vm206_vm0, %v690_v26  ;;  %v653_v37 = vmul.f32 %v1276_v58, %v614_v21  ;;  %v557_v46 = vadd.f32 1e-05, %v525_v20 }
 0x174   : > { %v860_v36 = vpop.eup %859  ;;  %v691_v7 = vadd.f32 %v1282_v6, %v652_v9  ;;  %v615_v63 = vmul.f32 %v858_v59, %v1215_v41  ;;  %v558_v50 = vadd.f32 1e-05, %v526_v11  ;;  %v495_v52 = vpop.xlane.xlu1 %494 }
 0x175   : > { %v692_v54 = vadd.f32 %v1282_v6, %v653_v37  ;;  %v616_v8 = vmul.f32 %v860_v36, %v1224_v19  ;;  %869 = vrsqrt.f32 %v557_v46  ;;  %v527_v24 = vmul.f32 0.03125, %v495_v52 }
 0x176   : > { %723 = vst.msk [vmem:[%s1290_s25 + $0xa8] sm:$0xff] %vm206_vm0, %v691_v7  ;;  %v654_v62 = vmul.f32 %v1276_v58, %v615_v63  ;;  %871 = vrsqrt.f32 %v558_v50 }
 0x177   : > { %v862_v25 = vpop.eup %861  ;;  %724 = vst.msk [vmem:[%s1290_s25 + $0xb0] sm:$0xff] %vm206_vm0, %v692_v54  ;;  %v655_v41 = vmul.f32 %v1276_v58, %v616_v8  ;;  %v559_v27 = vadd.f32 1e-05, %v527_v24 }
 0x178   : > { %v864_v40 = vpop.eup %863  ;;  %v693_v3 = vadd.f32 %v1282_v6, %v654_v62  ;;  %v617_v19 = vmul.f32 %v862_v25, %v1227_v45 }
 0x179   : > { %v694_v15 = vadd.f32 %v1282_v6, %v655_v41  ;;  %v618_v13 = vmul.f32 %v864_v40, %v1236_v35  ;;  %873 = vrsqrt.f32 %v559_v27 }
 0x17a   : > { %725 = vst.msk [vmem:[%s1290_s25 + $0xb8] sm:$0xff] %vm206_vm0, %v693_v3  ;;  %v656_v56 = vmul.f32 %v1276_v58, %v617_v19 }
 0x17b   : > { %v866_v2 = vpop.eup %865  ;;  %726 = vst.msk [vmem:[%s1290_s25 + $0xc0] sm:$0xff] %vm206_vm0, %v694_v15  ;;  %v657_v12 = vmul.f32 %v1276_v58, %v618_v13 }
 0x17c   : > { %v868_v1 = vpop.eup %867  ;;  %v695_v14 = vadd.f32 %v1282_v6, %v656_v56  ;;  %v619_v45 = vmul.f32 %v866_v2, %v1239_v49 }
 0x17d   : > { %v696_v28 = vadd.f32 %v1282_v6, %v657_v12  ;;  %v620_v35 = vmul.f32 %v868_v1, %v1248_v51 }
 0x17e   : > { %727 = vst.msk [vmem:[%s1290_s25 + $0xc8] sm:$0xff] %vm206_vm0, %v695_v14  ;;  %v658_v18 = vmul.f32 %v1276_v58, %v619_v45 }
 0x17f   : > { %v870_v10 = vpop.eup %869  ;;  %728 = vst.msk [vmem:[%s1290_s25 + $0xd0] sm:$0xff] %vm206_vm0, %v696_v28  ;;  %v659_v29 = vmul.f32 %v1276_v58, %v620_v35 }
 0x180   : > { %v872_v60 = vpop.eup %871  ;;  %v697_v61 = vadd.f32 %v1282_v6, %v658_v18  ;;  %v621_v49 = vmul.f32 %v870_v10, %v1251_v53 }
 0x181   : > { %v698_v44 = vadd.f32 %v1282_v6, %v659_v29  ;;  %v622_v51 = vmul.f32 %v872_v60, %v1260_v4 }
 0x182   : > { %729 = vst.msk [vmem:[%s1290_s25 + $0xd8] sm:$0xff] %vm206_vm0, %v697_v61  ;;  %v660_v31 = vmul.f32 %v1276_v58, %v621_v49 }
 0x183   : > { %v874_v22 = vpop.eup %873  ;;  %730 = vst.msk [vmem:[%s1290_s25 + $0xe0] sm:$0xff] %vm206_vm0, %v698_v44  ;;  %v661_v5 = vmul.f32 %v1276_v58, %v622_v51 }
 0x184   : > { %v699_v17 = vadd.f32 %v1282_v6, %v660_v31  ;;  %v623_v23 = vmul.f32 %v874_v22, %v1263_v57 }
 0x185   : > { %v700_v0 = vadd.f32 %v1282_v6, %v661_v5 }
 0x186   : > { %731 = vst.msk [vmem:[%s1290_s25 + $0xe8] sm:$0xff] %vm206_vm0, %v699_v17  ;;  %v662_v53 = vmul.f32 %v1276_v58, %v623_v23 }
 0x187   : > { %732 = vst.msk [vmem:[%s1290_s25 + $0xf0] sm:$0xff] %vm206_vm0, %v700_v0 }
 0x188   : > { %v701_v4 = vadd.f32 %v1282_v6, %v662_v53 }
 0x18a   : > { %733 = vst.msk [vmem:[%s1290_s25 + $0xf8] sm:$0xff] %vm206_vm0, %v701_v4 }
 0x18b PF: > { %s13_s12 = sadd.s32 1, %s881_s12  }
 0x18c   : > { %p10_p4 = scmp.ge.s32.totalorder %s13_s12, 4  }
 0x18e   :  { %12 = sbr.rel (!%p10_p4) target bundleno = 1 (0x1), region = 62 }

// kernel: afno_cast_latent_forward.11
= control target key start
LH: loop header
LB: loop body
LE: loop exit
PB: predicated region body
PF: predicated region fallthrough
CT: control target
= control target key end

     0   :  { %13 = vsyncpa [#allocation3], 0  ;;  %s3720_s0 = inlined_call_operand.vmem [shape: f32[512,32], index: 0, kind: input, shape index: {}]   ;;  %s3721_s1 = inlined_call_operand.vmem [shape: f32[512,32], index: 1, kind: input, shape index: {}]   ;;  %s3722_s2 = inlined_call_operand.vmem [shape: f32[1,32], index: 2, kind: input, shape index: {}]   ;;  %s3723_s3 = inlined_call_operand.vmem [shape: f32[1,32], index: 3, kind: input, shape index: {}]   ;;  %s3724_s4 = inlined_call_operand.vmem [shape: f32[32,128], index: 4, kind: input, shape index: {}]   ;;  %s3725_s5 = inlined_call_operand.vmem [shape: f32[1,128], index: 5, kind: input, shape index: {}]   ;;  %s3726_s6 = inlined_call_operand.vmem [shape: f32[128,32], index: 6, kind: input, shape index: {}]   ;;  %s3727_s7 = inlined_call_operand.vmem [shape: f32[1,32], index: 7, kind: input, shape index: {}]   ;;  %s3728_s8 = inlined_call_operand.hbm [shape: f32[512,32], index: 8, kind: output, shape index: {}]  }
   0x1   :  { %15 = vsyncpa [#allocation3 + $0x1], 0  ;;  %s2613_s27 = smov 0   ;;  %s2615_s28 = smov 0  }
   0x2   :  { %s2617_s29 = smov 0   ;;  %s2619_s30 = smov 0  }
   0x3 LB: > { %s2634_s9 = sadd.s32 4294967295, %s2563_s30   ;;  %s2005_s10 = sadd.s32 4294967294, %s2563_s30   ;;  %s2563_s30 = sphi %s2619_s30, %s3794_s30   ;;  %s2559_s29 = sphi %s2617_s29, %s3793_s29   ;;  %s2555_s28 = sphi %s2615_s28, %s3792_s28   ;;  %s2551_s27 = sphi %s2613_s27, %s3791_s27  }
   0x4   : > { %s2638_s11 = sadd.s32 1, %s2563_s30   ;;  %s206_s12 = sadd.s32 1, %s2559_s29 }
   0x5   : > { %s203_s13 = ssub.s32 %s2563_s30, %s2638_s11  ;;  %p216_p0 = scmp.ne.s32.totalorder %s2559_s29, %s2555_s28 }
   0x6   : > { %p204_p1 = scmp.eq.s32.totalorder %s203_s13, 0  ;;  %p217_p2 = scmp.eq.s32.totalorder %s2634_s9, 1 }
   0x7   : > { %p222_p3 = scmp.ne.s32.totalorder %s2555_s28, %s2551_s27  ;;  %p223_p4 = scmp.eq.s32.totalorder %s2005_s10, 1 }
   0x8   : > { %s2649_s14 = scalar_select %p204_p1, %s2559_s29, %s206_s12  }
   0x9   : > { %p2651_p5 = por %p217_p2, %p216_p0  ;;  %p2655_p6 = por %p223_p4, %p222_p3 }
   0xa   : > { %p2008_p7 = scmp.ge.s32.totalorder %s2563_s30, 1  ;;  %p277_p8 = scmp.lt.s32.totalorder %s2563_s30, 3 }
   0xc   : > { %p278_p9 = pnand %p2008_p7, %p277_p8 }
   0xe   : > { %281 = sbr.rel (%p278_p9) target bundleno = 906 (0x38a), region = 52 }
  0x15   : > { %s2010_s17 = sshll.u32 %s2634_s9, 5  ;;  %vm457_vm0 = vcmask 261120   ;;  %s313_s19 = sand.u32 1, %s2555_s28  }
  0x16   : > { %p317_p10 = scmp.lt.s32.totalorder %s2010_s17, 63  ;;  %s2009_s22 = sshll.u32 %s313_s19, 8 }
  0x17   : > { %s3543_s23 = scalar_lea.vmem [#allocation2], %s2009_s22 }
  0x18   : > { %s3796_s17 = smov (!%p317_p10, %s2010_s17), 63  ;;  %s1931_s25 = sshll.u32 %s3543_s23, 4  ;;  %s3670_s25 = int_to_ptr.vmem [resolvable:$true] %s1931_s25 }
  0x19   : > { %s2011_s18 = sshll.u32 %s3796_s17, 3  ;;  %s2501_s13 = scalar_lea.vmem %s3670_s25, 4096 }
  0x1a   : > { %s2665_s21 = scalar_lea.vmem %s3720_s0, %s2011_s18  ;;  %s2670_s24 = scalar_lea.vmem %s3721_s1, %s2011_s18 }
  0x1b   : > { %v329_v0 = vld [vmem:[%s2665_s21] sm:$0xff]  ;;  %v331_v2 = vld [vmem:[%s2665_s21 + $0x10] sm:$0xff]  ;;  %v330_v5 = vld [vmem:[%s2665_s21 + $0x8] sm:$0xff]  ;;  %p2502_p11 = scmp.ne.s32.totalorder %s3670_s25, %s2501_s13  ;;  %s2565_s17 = smov [#allocation2]  }
  0x1c   : > { %v361_v1 = vld [vmem:[%s2670_s24] sm:$0xff]  ;;  %v363_v4 = vld [vmem:[%s2670_s24 + $0x10] sm:$0xff]  ;;  %v362_v6 = vld [vmem:[%s2670_s24 + $0x8] sm:$0xff]  ;;  %s2505_s18 = sshll.u32 %s2565_s17, 4  ;;  %s2506_s18 = int_to_ptr.vmem [resolvable:$false] %s2505_s18 }
  0x1d   : > { %v393_v3 = vmul.f32 0.25, %v361_v1  ;;  %v395_v7 = vmul.f32 0.25, %v363_v4  ;;  %v394_v8 = vmul.f32 0.25, %v362_v6  ;;  %v332_v9 = vld [vmem:[%s2665_s21 + $0x18] sm:$0xff]  ;;  %v365_v13 = vld [vmem:[%s2670_s24 + $0x20] sm:$0xff]  ;;  %v366_v14 = vld [vmem:[%s2670_s24 + $0x28] sm:$0xff]  ;;  %p2503_p12 = pnand %p2502_p11, %p2651_p5  ;;  %p2508_p0 = scmp.lt.s32.totalorder %s3670_s25, %s2506_s18 }
  0x1e   : > { %v364_v10 = vld [vmem:[%s2670_s24 + $0x18] sm:$0xff]  ;;  %v333_v17 = vld [vmem:[%s2665_s21 + $0x20] sm:$0xff]  ;;  %v397_v18 = vmul.f32 0.25, %v365_v13  ;;  %v398_v19 = vmul.f32 0.25, %v366_v14  ;;  %v367_v20 = vld [vmem:[%s2670_s24 + $0x30] sm:$0xff]  ;;  %s2507_s20 = scalar_lea.vmem %s2506_s18, 8192 }
  0x1f   : > { %v2680_v11 = vadd.f32 %v393_v3, %v329_v0  ;;  %v396_v12 = vmul.f32 0.25, %v364_v10  ;;  %v2684_v15 = vadd.f32 %v395_v7, %v331_v2  ;;  %v2686_v16 = vadd.f32 %v394_v8, %v330_v5  ;;  %v334_v23 = vld [vmem:[%s2665_s21 + $0x28] sm:$0xff]  ;;  %v368_v24 = vld [vmem:[%s2670_s24 + $0x38] sm:$0xff]  ;;  %v335_v31 = vld [vmem:[%s2665_s21 + $0x30] sm:$0xff]  ;;  %p2504_p13 = pneg %p2503_p12  ;;  %p2509_p1 = scmp.lt.s32.totalorder %s2507_s20, %s2501_s13 }
  0x20   : > { %v2700_v27 = vadd.f32 %v397_v18, %v333_v17  ;;  %v399_v28 = vmul.f32 0.25, %v367_v20  ;;  %v2704_v30 = vadd.f32 %v398_v19, %v334_v23  ;;  %v400_v32 = vmul.f32 0.25, %v368_v24  ;;  %v369_v33 = vld [vmem:[%s2670_s24 + $0x40] sm:$0xff]  ;;  %v336_v34 = vld [vmem:[%s2665_s21 + $0x38] sm:$0xff]  ;;  %v370_v35 = vld [vmem:[%s2670_s24 + $0x48] sm:$0xff] }
  0x21   : > { %v458_v21 = vsel %vm457_vm0, %v2680_v11, 0.0  ;;  %v2692_v22 = vadd.f32 %v396_v12, %v332_v9  ;;  %v464_v25 = vsel %vm457_vm0, %v2684_v15, 0.0  ;;  %v461_v26 = vsel %vm457_vm0, %v2686_v16, 0.0  ;;  %v337_v41 = vld [vmem:[%s2665_s21 + $0x40] sm:$0xff]  ;;  %v371_v43 = vld [vmem:[%s2670_s24 + $0x50] sm:$0xff]  ;;  %v338_v44 = vld [vmem:[%s2665_s21 + $0x48] sm:$0xff]  ;;  %p2510_p2 = por %p2509_p1, %p2508_p0 }
  0x22   : > { %459 = vadd.xlane.f32.xlu0 %v458_v21  ;;  %465 = vadd.xlane.f32.xlu1 %v464_v25  ;;  %v470_v36 = vsel %vm457_vm0, %v2700_v27, 0.0  ;;  %v2712_v37 = vadd.f32 %v399_v28, %v335_v31  ;;  %v401_v38 = vmul.f32 0.25, %v369_v33  ;;  %v473_v39 = vsel %vm457_vm0, %v2704_v30, 0.0  ;;  %v372_v45 = vld [vmem:[%s2670_s24 + $0x58] sm:$0xff]  ;;  %v339_v51 = vld [vmem:[%s2665_s21 + $0x50] sm:$0xff]  ;;  %v373_v53 = vld [vmem:[%s2670_s24 + $0x60] sm:$0xff] }
  0x23   : > { %v467_v29 = vsel %vm457_vm0, %v2692_v22, 0.0  ;;  %v2716_v40 = vadd.f32 %v400_v32, %v336_v34  ;;  %v402_v42 = vmul.f32 0.25, %v370_v35  ;;  %v403_v48 = vmul.f32 0.25, %v371_v43  ;;  %v340_v54 = vld [vmem:[%s2665_s21 + $0x58] sm:$0xff]  ;;  %v374_v55 = vld [vmem:[%s2670_s24 + $0x68] sm:$0xff]  ;;  %v341_v61 = vld [vmem:[%s2665_s21 + $0x60] sm:$0xff]  ;;  %p2511_p3 = pnand %p2510_p2, %p2504_p13 }
  0x24   : > { %v476_v46 = vsel %vm457_vm0, %v2712_v37, 0.0  ;;  %v2724_v47 = vadd.f32 %v401_v38, %v337_v41  ;;  %v404_v52 = vmul.f32 0.25, %v372_v45  ;;  %v405_v58 = vmul.f32 0.25, %v373_v53  ;;  %v375_v63 = vld [vmem:[%s2670_s24 + $0x70] sm:$0xff]  ;;  %v342_v0 = vld [vmem:[%s2665_s21 + $0x68] sm:$0xff]  ;;  %v376_v1 = vld [vmem:[%s2670_s24 + $0x78] sm:$0xff] }
  0x25   : > { %v479_v49 = vsel %vm457_vm0, %v2716_v40, 0.0  ;;  %v2728_v50 = vadd.f32 %v402_v42, %v338_v44  ;;  %v2736_v57 = vadd.f32 %v403_v48, %v339_v51  ;;  %v406_v62 = vmul.f32 0.25, %v374_v55  ;;  %v343_v7 = vld [vmem:[%s2665_s21 + $0x70] sm:$0xff]  ;;  %v377_v9 = vld [vmem:[%s2670_s24 + $0x80] sm:$0xff]  ;;  %v344_v10 = vld [vmem:[%s2665_s21 + $0x78] sm:$0xff] }
  0x26   : > { %462 = vadd.xlane.f32.xlu0 %v461_v26  ;;  %468 = vadd.xlane.f32.xlu1 %v467_v29  ;;  %v482_v56 = vsel %vm457_vm0, %v2724_v47, 0.0  ;;  %v2740_v60 = vadd.f32 %v404_v52, %v340_v54  ;;  %v2748_v3 = vadd.f32 %v405_v58, %v341_v61  ;;  %v407_v4 = vmul.f32 0.25, %v375_v63  ;;  %v378_v12 = vld [vmem:[%s2670_s24 + $0x88] sm:$0xff]  ;;  %v345_v20 = vld [vmem:[%s2665_s21 + $0x80] sm:$0xff]  ;;  %v379_v23 = vld [vmem:[%s2670_s24 + $0x90] sm:$0xff] }
  0x27   : > { %v485_v59 = vsel %vm457_vm0, %v2728_v50, 0.0  ;;  %v488_v2 = vsel %vm457_vm0, %v2736_v57, 0.0  ;;  %v2752_v6 = vadd.f32 %v406_v62, %v342_v0  ;;  %v408_v8 = vmul.f32 0.25, %v376_v1  ;;  %v346_v24 = vld [vmem:[%s2665_s21 + $0x88] sm:$0xff]  ;;  %v380_v25 = vld [vmem:[%s2670_s24 + $0x98] sm:$0xff]  ;;  %v347_v33 = vld [vmem:[%s2665_s21 + $0x90] sm:$0xff] }
  0x28   : > { %3751 = vst [vmem:[#allocation5_spill] sm:$0xff] %v2748_v3  ;;  %v491_v5 = vsel %vm457_vm0, %v2740_v60, 0.0  ;;  %v494_v13 = vsel %vm457_vm0, %v2748_v3, 0.0  ;;  %v2760_v14 = vadd.f32 %v407_v4, %v343_v7  ;;  %v409_v17 = vmul.f32 0.25, %v377_v9  ;;  %v381_v35 = vld [vmem:[%s2670_s24 + $0xa0] sm:$0xff]  ;;  %v382_v38 = vld [vmem:[%s2670_s24 + $0xa8] sm:$0xff] }
  0x29   : > { %3752 = vst [vmem:[#allocation6_spill] sm:$0xff] %v2752_v6  ;;  %v497_v18 = vsel %vm457_vm0, %v2752_v6, 0.0  ;;  %v2764_v19 = vadd.f32 %v408_v8, %v344_v10  ;;  %v410_v21 = vmul.f32 0.25, %v378_v12  ;;  %v411_v29 = vmul.f32 0.25, %v379_v23  ;;  %v349_v45 = vld [vmem:[%s2665_s21 + $0xa0] sm:$0xff]  ;;  %v383_v48 = vld [vmem:[%s2670_s24 + $0xb0] sm:$0xff] }
  0x2a   : > { %471 = vadd.xlane.f32.xlu0 %v470_v36  ;;  %474 = vadd.xlane.f32.xlu1 %v473_v39  ;;  %3753 = vst [vmem:[#allocation7_spill] sm:$0xff] %v2760_v14  ;;  %v500_v26 = vsel %vm457_vm0, %v2760_v14, 0.0  ;;  %v2772_v28 = vadd.f32 %v409_v17, %v345_v20  ;;  %v412_v34 = vmul.f32 0.25, %v380_v25  ;;  %v348_v36 = vld [vmem:[%s2665_s21 + $0x98] sm:$0xff]  ;;  %v413_v42 = vmul.f32 0.25, %v381_v35  ;;  %v351_v58 = vld [vmem:[%s2665_s21 + $0xb0] sm:$0xff] }
  0x2b   : > { %3754 = vst [vmem:[#allocation8_spill] sm:$0xff] %v2764_v19  ;;  %v503_v31 = vsel %vm457_vm0, %v2764_v19, 0.0  ;;  %v2776_v32 = vadd.f32 %v410_v21, %v346_v24  ;;  %v2784_v41 = vadd.f32 %v411_v29, %v347_v33  ;;  %v384_v51 = vld [vmem:[%s2670_s24 + $0xb8] sm:$0xff]  ;;  %v415_v54 = vmul.f32 0.25, %v383_v48  ;;  %v385_v61 = vld [vmem:[%s2670_s24 + $0xc0] sm:$0xff]  ;;  %v386_v63 = vld [vmem:[%s2670_s24 + $0xc8] sm:$0xff] }
  0x2c   : > { %3755 = vst [vmem:[#allocation9_spill] sm:$0xff] %v2772_v28  ;;  %v506_v39 = vsel %vm457_vm0, %v2772_v28, 0.0  ;;  %v2788_v44 = vadd.f32 %v412_v34, %v348_v36  ;;  %v2796_v53 = vadd.f32 %v413_v42, %v349_v45  ;;  %v352_v62 = vld [vmem:[%s2665_s21 + $0xb8] sm:$0xff]  ;;  %v353_v7 = vld [vmem:[%s2665_s21 + $0xc0] sm:$0xff]  ;;  %v418_v8 = vmul.f32 0.25, %v386_v63  ;;  %v387_v9 = vld [vmem:[%s2670_s24 + $0xd0] sm:$0xff] }
  0x2d   : > { %3756 = vst [vmem:[#allocation10_spill] sm:$0xff] %v2776_v32  ;;  %3757 = vst [vmem:[#allocation11_spill] sm:$0xff] %v2784_v41  ;;  %v509_v43 = vsel %vm457_vm0, %v2776_v32, 0.0  ;;  %v512_v52 = vsel %vm457_vm0, %v2784_v41, 0.0  ;;  %v2808_v1 = vadd.f32 %v415_v54, %v351_v58  ;;  %v354_v10 = vld [vmem:[%s2665_s21 + $0xc8] sm:$0xff]  ;;  %v388_v12 = vld [vmem:[%s2670_s24 + $0xd8] sm:$0xff] }
  0x2e   : > { %477 = vadd.xlane.f32.xlu0 %v476_v46  ;;  %480 = vadd.xlane.f32.xlu1 %v479_v49  ;;  %3758 = vst [vmem:[#allocation12_spill] sm:$0xff] %v2788_v44  ;;  %v414_v46 = vmul.f32 0.25, %v382_v38  ;;  %v350_v49 = vld [vmem:[%s2665_s21 + $0xa8] sm:$0xff]  ;;  %3759 = vst [vmem:[#allocation13_spill] sm:$0xff] %v2796_v53  ;;  %v515_v55 = vsel %vm457_vm0, %v2788_v44, 0.0  ;;  %v518_v0 = vsel %vm457_vm0, %v2796_v53, 0.0  ;;  %v2824_v21 = vadd.f32 %v418_v8, %v354_v10 }
  0x2f   : > { %3761 = vst [vmem:[#allocation15_spill] sm:$0xff] %v2808_v1  ;;  %v355_v23 = vld [vmem:[%s2665_s21 + $0xd0] sm:$0xff]  ;;  %v420_v24 = vmul.f32 0.25, %v388_v12  ;;  %v389_v25 = vld [vmem:[%s2670_s24 + $0xe0] sm:$0xff]  ;;  %v390_v29 = vld [vmem:[%s2670_s24 + $0xe8] sm:$0xff] }
  0x30   : > { %3764 = vst [vmem:[#allocation18_spill] sm:$0xff] %v2824_v21  ;;  %v421_v34 = vmul.f32 0.25, %v389_v25  ;;  %v533_v35 = vsel %vm457_vm0, %v2824_v21, 0.0  ;;  %v357_v38 = vld [vmem:[%s2665_s21 + $0xe0] sm:$0xff]  ;;  %v391_v42 = vld [vmem:[%s2670_s24 + $0xf0] sm:$0xff]  ;;  %v392_v45 = vld [vmem:[%s2670_s24 + $0xf8] sm:$0xff] }
  0x31   : > { %v359_v54 = vld [vmem:[%s2665_s21 + $0xf0] sm:$0xff]  ;;  %v360_v58 = vld [vmem:[%s2665_s21 + $0xf8] sm:$0xff]  ;;  %s2055_s24 = sshll.u32 %s2634_s9, 12  ;;  %s3679_s9 = scalar_lea.sflag [#allocation3], %s313_s19 }
  0x32   : > { %483 = vadd.xlane.f32.xlu0 %v482_v56  ;;  %486 = vadd.xlane.f32.xlu1 %v485_v59  ;;  %v2800_v56 = vadd.f32 %v414_v46, %v350_v49  ;;  %v416_v59 = vmul.f32 0.25, %v384_v51  ;;  %v2844_v48 = vadd.f32 %v421_v34, %v357_v38  ;;  %v423_v49 = vmul.f32 0.25, %v391_v42  ;;  %s3668_s12 = scalar_lea.hbm %s3728_s8, %s2055_s24 }
  0x34   : > { %3760 = vst [vmem:[#allocation14_spill] sm:$0xff] %v2800_v56  ;;  %v521_v4 = vsel %vm457_vm0, %v2800_v56, 0.0  ;;  %3767 = vst [vmem:[#allocation21_spill] sm:$0xff] %v2844_v48 }
  0x36   : > { %489 = vadd.xlane.f32.xlu0 %v488_v2  ;;  %492 = vadd.xlane.f32.xlu1 %v491_v5  ;;  %v417_v2 = vmul.f32 0.25, %v385_v61  ;;  %v2812_v5 = vadd.f32 %v416_v59, %v352_v62  ;;  %v542_v59 = vsel %vm457_vm0, %v2844_v48, 0.0  ;;  %v2854_v61 = vadd.f32 %v423_v49, %v359_v54 }
  0x38   : > { %3762 = vst [vmem:[#allocation16_spill] sm:$0xff] %v2812_v5  ;;  %v2820_v17 = vadd.f32 %v417_v2, %v353_v7  ;;  %v527_v20 = vsel %vm457_vm0, %v2812_v5, 0.0  ;;  %3769 = vst [vmem:[#allocation23_spill] sm:$0xff] %v2854_v61 }
  0x3a   : > { %495 = vadd.xlane.f32.xlu0 %v494_v13  ;;  %498 = vadd.xlane.f32.xlu1 %v497_v18  ;;  %v524_v13 = vsel %vm457_vm0, %v2808_v1, 0.0  ;;  %3763 = vst [vmem:[#allocation17_spill] sm:$0xff] %v2820_v17  ;;  %v419_v18 = vmul.f32 0.25, %v387_v9 }
  0x3c   : > { %v2832_v33 = vadd.f32 %v419_v18, %v355_v23 }
  0x3e   : > { %501 = vadd.xlane.f32.xlu0 %v500_v26  ;;  %504 = vadd.xlane.f32.xlu1 %v503_v31  ;;  %v356_v26 = vld [vmem:[%s2665_s21 + $0xd8] sm:$0xff]  ;;  %v530_v31 = vsel %vm457_vm0, %v2820_v17, 0.0  ;;  %3765 = vst [vmem:[#allocation19_spill] sm:$0xff] %v2832_v33  ;;  %v536_v46 = vsel %vm457_vm0, %v2832_v33, 0.0 }
  0x3f   : > { %v2836_v36 = vadd.f32 %v420_v24, %v356_v26 }
  0x41   : > { %3766 = vst [vmem:[#allocation20_spill] sm:$0xff] %v2836_v36  ;;  %v539_v51 = vsel %vm457_vm0, %v2836_v36, 0.0 }
  0x42   : > { %507 = vadd.xlane.f32.xlu0 %v506_v39  ;;  %510 = vadd.xlane.f32.xlu1 %v509_v43  ;;  %v422_v39 = vmul.f32 0.25, %v390_v29  ;;  %v358_v43 = vld [vmem:[%s2665_s21 + $0xe8] sm:$0xff] }
  0x46   : > { %513 = vadd.xlane.f32.xlu0 %v512_v52  ;;  %516 = vadd.xlane.f32.xlu1 %v515_v55  ;;  %v2848_v52 = vadd.f32 %v422_v39, %v358_v43  ;;  %v424_v55 = vmul.f32 0.25, %v392_v45 }
  0x48   : > { %3768 = vst [vmem:[#allocation22_spill] sm:$0xff] %v2848_v52  ;;  %v545_v62 = vsel %vm457_vm0, %v2848_v52, 0.0  ;;  %v2858_v63 = vadd.f32 %v424_v55, %v360_v58 }
  0x4a   : > { %519 = vadd.xlane.f32.xlu0 %v518_v0  ;;  %522 = vadd.xlane.f32.xlu1 %v521_v4  ;;  %3770 = vst [vmem:[#allocation24_spill] sm:$0xff] %v2858_v63  ;;  %v548_v0 = vsel %vm457_vm0, %v2854_v61, 0.0  ;;  %v551_v2 = vsel %vm457_vm0, %v2858_v63, 0.0 }
  0x4e   : > { %525 = vadd.xlane.f32.xlu0 %v524_v13  ;;  %528 = vadd.xlane.f32.xlu1 %v527_v20 }
  0x52   : > { %531 = vadd.xlane.f32.xlu0 %v530_v31  ;;  %534 = vadd.xlane.f32.xlu1 %v533_v35 }
  0x56   : > { %537 = vadd.xlane.f32.xlu0 %v536_v46  ;;  %540 = vadd.xlane.f32.xlu1 %v539_v51 }
  0x5a   : > { %543 = vadd.xlane.f32.xlu0 %v542_v59  ;;  %546 = vadd.xlane.f32.xlu1 %v545_v62 }
  0x5e   : > { %549 = vadd.xlane.f32.xlu0 %v548_v0  ;;  %552 = vadd.xlane.f32.xlu1 %v551_v2 }
  0xaf   : > { %v460_v4 = vpop.xlane.xlu0 %459  ;;  %v466_v8 = vpop.xlane.xlu1 %465 }
  0xb0   : > { %v555_v7 = vmul.f32 0.03125, %v460_v4  ;;  %v557_v9 = vmul.f32 0.03125, %v466_v8 }
  0xb2   : > { %v2865_v10 = vsub.f32 %v2680_v11, %v555_v7  ;;  %v2868_v12 = vsub.f32 %v2684_v15, %v557_v9 }
  0xb3   : > { %v463_v13 = vpop.xlane.xlu0 %462  ;;  %v469_v20 = vpop.xlane.xlu1 %468 }
  0xb4   : > { %v556_v18 = vmul.f32 0.03125, %v463_v13  ;;  %v619_v23 = vmul.f32 %v2865_v10, %v2865_v10  ;;  %v558_v24 = vmul.f32 0.03125, %v469_v20  ;;  %v621_v25 = vmul.f32 %v2868_v12, %v2868_v12 }
  0xb6   : > { %v2875_v26 = vsub.f32 %v2686_v16, %v556_v18  ;;  %v651_v29 = vsel %vm457_vm0, %v619_v23, 0.0  ;;  %v2879_v31 = vsub.f32 %v2692_v22, %v558_v24  ;;  %v657_v39 = vsel %vm457_vm0, %v621_v25, 0.0 }
  0xb7   : > { %652 = vadd.xlane.f32.xlu0 %v651_v29  ;;  %v472_v34 = vpop.xlane.xlu0 %471  ;;  %v475_v38 = vpop.xlane.xlu1 %474 }
  0xb8   : > { %v559_v35 = vmul.f32 0.03125, %v472_v34  ;;  %v620_v42 = vmul.f32 %v2875_v26, %v2875_v26  ;;  %v560_v43 = vmul.f32 0.03125, %v475_v38  ;;  %v622_v45 = vmul.f32 %v2879_v31, %v2879_v31 }
  0xba   : > { %v2887_v46 = vsub.f32 %v2700_v27, %v559_v35  ;;  %v654_v49 = vsel %vm457_vm0, %v620_v42, 0.0  ;;  %v2891_v51 = vsub.f32 %v2704_v30, %v560_v43  ;;  %v660_v59 = vsel %vm457_vm0, %v622_v45, 0.0 }
  0xbb   : > { %658 = vadd.xlane.f32.xlu0 %v657_v39  ;;  %655 = vadd.xlane.f32.xlu1 %v654_v49  ;;  %v478_v54 = vpop.xlane.xlu0 %477  ;;  %v481_v58 = vpop.xlane.xlu1 %480 }
  0xbc   : > { %v561_v55 = vmul.f32 0.03125, %v478_v54  ;;  %v623_v62 = vmul.f32 %v2887_v46, %v2887_v46  ;;  %v562_v0 = vmul.f32 0.03125, %v481_v58  ;;  %v624_v2 = vmul.f32 %v2891_v51, %v2891_v51 }
  0xbe   : > { %v2899_v4 = vsub.f32 %v2712_v37, %v561_v55  ;;  %v663_v7 = vsel %vm457_vm0, %v623_v62, 0.0  ;;  %v2903_v8 = vsub.f32 %v2716_v40, %v562_v0  ;;  %v666_v20 = vsel %vm457_vm0, %v624_v2, 0.0 }
  0xbf   : > { %661 = vadd.xlane.f32.xlu1 %v660_v59  ;;  %664 = vadd.xlane.f32.xlu0 %v663_v7  ;;  %v484_v9 = vpop.xlane.xlu0 %483  ;;  %v487_v18 = vpop.xlane.xlu1 %486 }
  0xc0   : > { %v563_v13 = vmul.f32 0.03125, %v484_v9  ;;  %v625_v23 = vmul.f32 %v2899_v4, %v2899_v4  ;;  %v564_v24 = vmul.f32 0.03125, %v487_v18  ;;  %v626_v25 = vmul.f32 %v2903_v8, %v2903_v8 }
  0xc2   : > { %v2911_v29 = vsub.f32 %v2724_v47, %v563_v13  ;;  %v669_v34 = vsel %vm457_vm0, %v625_v23, 0.0  ;;  %v2915_v35 = vsub.f32 %v2728_v50, %v564_v24  ;;  %v672_v43 = vsel %vm457_vm0, %v626_v25, 0.0 }
  0xc3   : > { %667 = vadd.xlane.f32.xlu1 %v666_v20  ;;  %670 = vadd.xlane.f32.xlu0 %v669_v34  ;;  %v490_v38 = vpop.xlane.xlu0 %489  ;;  %v493_v42 = vpop.xlane.xlu1 %492 }
  0xc4   : > { %v565_v39 = vmul.f32 0.03125, %v490_v38  ;;  %v627_v45 = vmul.f32 %v2911_v29, %v2911_v29  ;;  %v566_v49 = vmul.f32 0.03125, %v493_v42  ;;  %v628_v54 = vmul.f32 %v2915_v35, %v2915_v35 }
  0xc6   : > { %v2923_v55 = vsub.f32 %v2736_v57, %v565_v39  ;;  %v675_v58 = vsel %vm457_vm0, %v627_v45, 0.0  ;;  %v2927_v59 = vsub.f32 %v2740_v60, %v566_v49  ;;  %v678_v7 = vsel %vm457_vm0, %v628_v54, 0.0 }
  0xc7   : > { %673 = vadd.xlane.f32.xlu1 %v672_v43  ;;  %676 = vadd.xlane.f32.xlu0 %v675_v58  ;;  %v496_v62 = vpop.xlane.xlu0 %495  ;;  %v499_v2 = vpop.xlane.xlu1 %498 }
  0xc8   : > { %v567_v0 = vmul.f32 0.03125, %v496_v62  ;;  %v629_v9 = vmul.f32 %v2923_v55, %v2923_v55  ;;  %v568_v13 = vmul.f32 0.03125, %v499_v2  ;;  %v630_v18 = vmul.f32 %v2927_v59, %v2927_v59 }
  0xca   : > { %v2935_v20 = vsub.f32 %v2748_v3, %v567_v0  ;;  %v681_v23 = vsel %vm457_vm0, %v629_v9, 0.0  ;;  %v2939_v24 = vsub.f32 %v2752_v6, %v568_v13  ;;  %v684_v39 = vsel %vm457_vm0, %v630_v18, 0.0 }
  0xcb   : > { %679 = vadd.xlane.f32.xlu1 %v678_v7  ;;  %682 = vadd.xlane.f32.xlu0 %v681_v23  ;;  %v502_v25 = vpop.xlane.xlu0 %501  ;;  %v505_v38 = vpop.xlane.xlu1 %504 }
  0xcc   : > { %v569_v34 = vmul.f32 0.03125, %v502_v25  ;;  %v631_v42 = vmul.f32 %v2935_v20, %v2935_v20  ;;  %v570_v43 = vmul.f32 0.03125, %v505_v38  ;;  %v632_v45 = vmul.f32 %v2939_v24, %v2939_v24 }
  0xce   : > { %v2947_v49 = vsub.f32 %v2760_v14, %v569_v34  ;;  %v687_v54 = vsel %vm457_vm0, %v631_v42, 0.0  ;;  %v2951_v58 = vsub.f32 %v2764_v19, %v570_v43  ;;  %v690_v7 = vsel %vm457_vm0, %v632_v45, 0.0 }
  0xcf   : > { %685 = vadd.xlane.f32.xlu1 %v684_v39  ;;  %688 = vadd.xlane.f32.xlu0 %v687_v54  ;;  %v508_v62 = vpop.xlane.xlu0 %507  ;;  %v511_v2 = vpop.xlane.xlu1 %510  ;;  %v953_v54 = vld [vmem:[%s3724_s4] sm:$0xff] }
  0xd0   : > { %v571_v0 = vmul.f32 0.03125, %v508_v62  ;;  %v633_v9 = vmul.f32 %v2947_v49, %v2947_v49  ;;  %v572_v13 = vmul.f32 0.03125, %v511_v2  ;;  %v634_v18 = vmul.f32 %v2951_v58, %v2951_v58  ;;  %v954_v62 = vld [vmem:[%s3724_s4 + $0x8] sm:$0xff] }
  0xd2   : > { %v2959_v23 = vsub.f32 %v2772_v28, %v571_v0  ;;  %v693_v25 = vsel %vm457_vm0, %v633_v9, 0.0  ;;  %v2963_v34 = vsub.f32 %v2776_v32, %v572_v13  ;;  %v696_v43 = vsel %vm457_vm0, %v634_v18, 0.0 }
  0xd3   : > { %691 = vadd.xlane.f32.xlu1 %v690_v7  ;;  %694 = vadd.xlane.f32.xlu0 %v693_v25  ;;  %v514_v38 = vpop.xlane.xlu0 %513  ;;  %v517_v42 = vpop.xlane.xlu1 %516  ;;  %v2276_v7 = vpack.c.bf16 %v954_v62, %v953_v54 }
  0xd4   : > { %v573_v39 = vmul.f32 0.03125, %v514_v38  ;;  %v635_v45 = vmul.f32 %v2959_v23, %v2959_v23  ;;  %v574_v0 = vmul.f32 0.03125, %v517_v42  ;;  %v636_v2 = vmul.f32 %v2963_v34, %v2963_v34 }
  0xd5   : > { %2277 = vmatprep.subr.bf16.mxu0 %v2276_v7 }
  0xd6   : > { %v2977_v9 = vsub.f32 %v2784_v41, %v573_v39  ;;  %v699_v13 = vsel %vm457_vm0, %v635_v45, 0.0  ;;  %v2981_v18 = vsub.f32 %v2788_v44, %v574_v0  ;;  %v702_v32 = vsel %vm457_vm0, %v636_v2, 0.0  ;;  %v955_v39 = vld [vmem:[%s3724_s4 + $0x10] sm:$0xff]  ;;  %v956_v45 = vld [vmem:[%s3724_s4 + $0x18] sm:$0xff]  ;;  %2279 = vmatpush3.bf16.msra.mxu0 %v2276_v7 }
  0xd7   : > { %697 = vadd.xlane.f32.xlu1 %v696_v43  ;;  %700 = vadd.xlane.f32.xlu0 %v699_v13  ;;  %v520_v25 = vpop.xlane.xlu0 %519  ;;  %v523_v28 = vpop.xlane.xlu1 %522  ;;  %v2280_v62 = vpack.c.bf16 %v956_v45, %v955_v39 }
  0xd8   : > { %v575_v38 = vmul.f32 0.03125, %v520_v25  ;;  %v637_v42 = vmul.f32 %v2977_v9, %v2977_v9  ;;  %v576_v54 = vmul.f32 0.03125, %v523_v28  ;;  %v638_v43 = vmul.f32 %v2981_v18, %v2981_v18 }
  0xd9   : > { %2281 = vmatprep.subr.bf16.mxu0 %v2280_v62 }
  0xda   : > { %v2995_v0 = vsub.f32 %v2796_v53, %v575_v38  ;;  %v705_v2 = vsel %vm457_vm0, %v637_v42, 0.0  ;;  %v2999_v13 = vsub.f32 %v2800_v56, %v576_v54  ;;  %v708_v28 = vsel %vm457_vm0, %v638_v43, 0.0  ;;  %2283 = vmatpush3.bf16.msra.mxu0 %v2280_v62 }
  0xdb   : > { %703 = vadd.xlane.f32.xlu1 %v702_v32  ;;  %706 = vadd.xlane.f32.xlu0 %v705_v2  ;;  %v526_v25 = vpop.xlane.xlu0 %525  ;;  %v529_v44 = vpop.xlane.xlu1 %528 }
  0xdc   : > { %v577_v41 = vmul.f32 0.03125, %v526_v25  ;;  %v639_v14 = vmul.f32 %v2995_v0, %v2995_v0  ;;  %v578_v7 = vmul.f32 0.03125, %v529_v44  ;;  %v640_v38 = vmul.f32 %v2999_v13, %v2999_v13 }
  0xde   : > { %v3007_v42 = vsub.f32 %v2808_v1, %v577_v41  ;;  %v711_v32 = vsel %vm457_vm0, %v639_v14, 0.0  ;;  %v3011_v39 = vsub.f32 %v2812_v5, %v578_v7  ;;  %v714_v2 = vsel %vm457_vm0, %v640_v38, 0.0 }
  0xdf   : > { %709 = vadd.xlane.f32.xlu1 %v708_v28  ;;  %712 = vadd.xlane.f32.xlu0 %v711_v32  ;;  %v532_v45 = vpop.xlane.xlu0 %531  ;;  %v535_v43 = vpop.xlane.xlu1 %534 }
  0xe0   : > { %v579_v54 = vmul.f32 0.03125, %v532_v45  ;;  %v641_v44 = vmul.f32 %v3007_v42, %v3007_v42  ;;  %v580_v25 = vmul.f32 0.03125, %v535_v43  ;;  %v642_v41 = vmul.f32 %v3011_v39, %v3011_v39 }
  0xe2   : > { %v3019_v62 = vsub.f32 %v2820_v17, %v579_v54  ;;  %v717_v14 = vsel %vm457_vm0, %v641_v44, 0.0  ;;  %v3023_v28 = vsub.f32 %v2824_v21, %v580_v25  ;;  %v720_v45 = vsel %vm457_vm0, %v642_v41, 0.0 }
  0xe3   : > { %715 = vadd.xlane.f32.xlu1 %v714_v2  ;;  %718 = vadd.xlane.f32.xlu0 %v717_v14  ;;  %v538_v7 = vpop.xlane.xlu0 %537  ;;  %v541_v38 = vpop.xlane.xlu1 %540 }
  0xe4   : > { %v581_v32 = vmul.f32 0.03125, %v538_v7  ;;  %v643_v43 = vmul.f32 %v3019_v62, %v3019_v62  ;;  %v582_v1 = vmul.f32 0.03125, %v541_v38  ;;  %v644_v54 = vmul.f32 %v3023_v28, %v3023_v28 }
  0xe6   : > { %v3031_v17 = vsub.f32 %v2832_v33, %v581_v32  ;;  %v723_v44 = vsel %vm457_vm0, %v643_v43, 0.0  ;;  %v3035_v2 = vsub.f32 %v2836_v36, %v582_v1  ;;  %v726_v7 = vsel %vm457_vm0, %v644_v54, 0.0 }
  0xe7   : > { %721 = vadd.xlane.f32.xlu1 %v720_v45  ;;  %724 = vadd.xlane.f32.xlu0 %v723_v44  ;;  %v544_v25 = vpop.xlane.xlu0 %543  ;;  %v547_v41 = vpop.xlane.xlu1 %546 }
  0xe8   : > { %v583_v14 = vmul.f32 0.03125, %v544_v25  ;;  %v645_v38 = vmul.f32 %v3031_v17, %v3031_v17  ;;  %v584_v21 = vmul.f32 0.03125, %v547_v41  ;;  %v646_v32 = vmul.f32 %v3035_v2, %v3035_v2 }
  0xea   : > { %v3043_v33 = vsub.f32 %v2844_v48, %v583_v14  ;;  %v729_v1 = vsel %vm457_vm0, %v645_v38, 0.0  ;;  %v3047_v45 = vsub.f32 %v2848_v52, %v584_v21  ;;  %v732_v25 = vsel %vm457_vm0, %v646_v32, 0.0 }
  0xeb   : > { %727 = vadd.xlane.f32.xlu1 %v726_v7  ;;  %730 = vadd.xlane.f32.xlu0 %v729_v1  ;;  %v550_v43 = vpop.xlane.xlu0 %549  ;;  %v553_v54 = vpop.xlane.xlu1 %552 }
  0xec   : > { %v585_v44 = vmul.f32 0.03125, %v550_v43  ;;  %v647_v41 = vmul.f32 %v3043_v33, %v3043_v33  ;;  %v586_v36 = vmul.f32 0.03125, %v553_v54  ;;  %v648_v14 = vmul.f32 %v3047_v45, %v3047_v45 }
  0xee   : > { %v3055_v48 = vsub.f32 %v2854_v61, %v585_v44  ;;  %v735_v21 = vsel %vm457_vm0, %v647_v41, 0.0  ;;  %v3059_v7 = vsub.f32 %v2858_v63, %v586_v36  ;;  %v738_v38 = vsel %vm457_vm0, %v648_v14, 0.0 }
  0xef   : > { %733 = vadd.xlane.f32.xlu1 %v732_v25  ;;  %736 = vadd.xlane.f32.xlu0 %v735_v21 }
  0xf0   : > { %v649_v32 = vmul.f32 %v3055_v48, %v3055_v48  ;;  %v650_v1 = vmul.f32 %v3059_v7, %v3059_v7 }
  0xf2   : > { %v741_v43 = vsel %vm457_vm0, %v649_v32, 0.0  ;;  %v744_v44 = vsel %vm457_vm0, %v650_v1, 0.0 }
  0xf3   : > { %739 = vadd.xlane.f32.xlu1 %v738_v38  ;;  %742 = vadd.xlane.f32.xlu0 %v741_v43 }
  0xf7   : > { %745 = vadd.xlane.f32.xlu1 %v744_v44 }
 0x144   : > { %v653_v54 = vpop.xlane.xlu0 %652 }
 0x145   : > { %v747_v36 = vmul.f32 0.03125, %v653_v54 }
 0x147   : > { %v779_v41 = vadd.f32 1e-05, %v747_v36 }
 0x148   : > { %v656_v25 = vpop.xlane.xlu1 %655  ;;  %v659_v21 = vpop.xlane.xlu0 %658 }
 0x149   : > { %2373 = vrsqrt.f32 %v779_v41  ;;  %v748_v14 = vmul.f32 0.03125, %v656_v25  ;;  %v749_v61 = vmul.f32 0.03125, %v659_v21  ;;  %v3077_v21 = vld [vmem:[%s3723_s3] ss:$0 sm:$0xff] }
 0x14b   : > { %v780_v63 = vadd.f32 1e-05, %v748_v14  ;;  %v781_v52 = vadd.f32 1e-05, %v749_v61  ;;  %v3071_v61 = vld [vmem:[%s3722_s2] ss:$0 sm:$0xff] }
 0x14c   : > { %v662_v5 = vpop.xlane.xlu1 %661  ;;  %v665_v53 = vpop.xlane.xlu0 %664 }
 0x14d   : > { %2375 = vrsqrt.f32 %v780_v63  ;;  %v750_v56 = vmul.f32 0.03125, %v662_v5  ;;  %v751_v32 = vmul.f32 0.03125, %v665_v53 }
 0x14e   : > { %2377 = vrsqrt.f32 %v781_v52 }
 0x14f   : > { %v782_v38 = vadd.f32 1e-05, %v750_v56  ;;  %v783_v43 = vadd.f32 1e-05, %v751_v32 }
 0x150   : > { %v668_v1 = vpop.xlane.xlu1 %667  ;;  %v671_v44 = vpop.xlane.xlu0 %670 }
 0x151   : > { %2379 = vrsqrt.f32 %v782_v38  ;;  %v752_v54 = vmul.f32 0.03125, %v668_v1  ;;  %v753_v36 = vmul.f32 0.03125, %v671_v44 }
 0x152   : > { %2381 = vrsqrt.f32 %v783_v43 }
 0x153   : > { %v2374_v19 = vpop.eup %2373  ;;  %v784_v41 = vadd.f32 1e-05, %v752_v54  ;;  %v785_v25 = vadd.f32 1e-05, %v753_v36 }
 0x154   : > { %v674_v63 = vpop.xlane.xlu1 %673  ;;  %v677_v5 = vpop.xlane.xlu0 %676  ;;  %v843_v53 = vmul.f32 %v2374_v19, %v2865_v10 }
 0x155   : > { %2383 = vrsqrt.f32 %v784_v41  ;;  %v754_v56 = vmul.f32 0.03125, %v674_v63  ;;  %v755_v52 = vmul.f32 0.03125, %v677_v5 }
 0x156   : > { %2385 = vrsqrt.f32 %v785_v25  ;;  %v882_v14 = vmul.f32 %v3071_v61, %v843_v53 }
 0x157   : > { %v2376_v32 = vpop.eup %2375  ;;  %v786_v38 = vadd.f32 1e-05, %v754_v56  ;;  %v787_v43 = vadd.f32 1e-05, %v755_v52 }
 0x158   : > { %v2378_v1 = vpop.eup %2377  ;;  %v680_v44 = vpop.xlane.xlu1 %679  ;;  %v921_v36 = vadd.f32 %v3077_v21, %v882_v14  ;;  %v844_v19 = vmul.f32 %v2376_v32, %v2875_v26 }
 0x159   : > { %v683_v54 = vpop.xlane.xlu0 %682  ;;  %2387 = vrsqrt.f32 %v786_v38  ;;  %v756_v10 = vmul.f32 0.03125, %v680_v44  ;;  %v845_v63 = vmul.f32 %v2378_v1, %v2868_v12 }
 0x15a   : > { %v757_v41 = vmul.f32 0.03125, %v683_v54  ;;  %2389 = vrsqrt.f32 %v787_v43  ;;  %2148 = vmatprep.mubr.msk.f32.mxu0 %vm457_vm0, %v921_v36  ;;  %v883_v25 = vmul.f32 %v3071_v61, %v844_v19 }
 0x15b   : > { %v2380_v5 = vpop.eup %2379  ;;  %v788_v53 = vadd.f32 1e-05, %v756_v10  ;;  %v884_v52 = vmul.f32 %v3071_v61, %v845_v63 }
 0x15c   : > { %v789_v56 = vadd.f32 1e-05, %v757_v41  ;;  %v2382_v3 = vpop.eup %2381  ;;  %v686_v6 = vpop.xlane.xlu1 %685  ;;  %v922_v26 = vadd.f32 %v3077_v21, %v883_v25  ;;  %v846_v32 = vmul.f32 %v2380_v5, %v2879_v31 }
 0x15d   : > { %v689_v14 = vpop.xlane.xlu0 %688  ;;  %2391 = vrsqrt.f32 %v788_v53  ;;  %v758_v38 = vmul.f32 0.03125, %v686_v6  ;;  %v923_v43 = vadd.f32 %v3077_v21, %v884_v52  ;;  %v847_v44 = vmul.f32 %v2382_v3, %v2887_v46 }
 0x15e   : > { %v759_v12 = vmul.f32 0.03125, %v689_v14  ;;  %2393 = vrsqrt.f32 %v789_v56  ;;  %2149 = vmatmul.mubr.msk.f32.vlgmr.msra.gmra.mrb[0].mxu0 %vm457_vm0, %v922_v26  ;;  %v885_v1 = vmul.f32 %v3071_v61, %v846_v32 }
 0x15f   : > { %v2384_v54 = vpop.eup %2383  ;;  %v790_v36 = vadd.f32 1e-05, %v758_v38  ;;  %2151 = vmatprep.mubr.msk.f32.mxu0 %vm457_vm0, %v923_v43  ;;  %v886_v63 = vmul.f32 %v3071_v61, %v847_v44 }
 0x160   : > { %v791_v19 = vadd.f32 1e-05, %v759_v12  ;;  %v2386_v10 = vpop.eup %2385  ;;  %v692_v41 = vpop.xlane.xlu1 %691  ;;  %v924_v6 = vadd.f32 %v3077_v21, %v885_v1  ;;  %v848_v25 = vmul.f32 %v2384_v54, %v2891_v51 }
 0x161   : > { %v695_v31 = vpop.xlane.xlu0 %694  ;;  %2395 = vrsqrt.f32 %v790_v36  ;;  %v760_v5 = vmul.f32 0.03125, %v692_v41  ;;  %v849_v56 = vmul.f32 %v2386_v10, %v2899_v4  ;;  %v925_v3 = vadd.f32 %v3077_v21, %v886_v63 }
 0x162   : > { %v761_v53 = vmul.f32 0.03125, %v695_v31  ;;  %2397 = vrsqrt.f32 %v791_v19  ;;  %2152 = vmatmul.mubr.msk.f32.gmra.mrb[2].mxu0 %vm457_vm0, %v924_v6  ;;  %v887_v46 = vmul.f32 %v3071_v61, %v848_v25 }
 0x163   : > { %v2388_v52 = vpop.eup %2387  ;;  %v792_v14 = vadd.f32 1e-05, %v760_v5  ;;  %v888_v32 = vmul.f32 %v3071_v61, %v849_v56  ;;  %2154 = vmatprep.mubr.msk.f32.mxu0 %vm457_vm0, %v925_v3 }
 0x164   : > { %v793_v26 = vadd.f32 1e-05, %v761_v53  ;;  %v2390_v38 = vpop.eup %2389  ;;  %v698_v51 = vpop.xlane.xlu1 %697  ;;  %v926_v43 = vadd.f32 %v3077_v21, %v887_v46  ;;  %v850_v4 = vmul.f32 %v2388_v52, %v2903_v8 }
 0x165   : > { %v701_v12 = vpop.xlane.xlu0 %700  ;;  %2399 = vrsqrt.f32 %v792_v14  ;;  %v762_v1 = vmul.f32 0.03125, %v698_v51  ;;  %v927_v54 = vadd.f32 %v3077_v21, %v888_v32  ;;  %v851_v19 = vmul.f32 %v2390_v38, %v2911_v29 }
 0x166   : > { %v763_v44 = vmul.f32 0.03125, %v701_v12  ;;  %2401 = vrsqrt.f32 %v793_v26  ;;  %2155 = vmatmul.mubr.msk.f32.gmra.mrb[4].mxu0 %vm457_vm0, %v926_v43  ;;  %v889_v36 = vmul.f32 %v3071_v61, %v850_v4 }
 0x167   : > { %v2392_v10 = vpop.eup %2391  ;;  %v794_v41 = vadd.f32 1e-05, %v762_v1  ;;  %2157 = vmatprep.mubr.msk.f32.mxu0 %vm457_vm0, %v927_v54  ;;  %v890_v5 = vmul.f32 %v3071_v61, %v851_v19 }
 0x168   : > { %v795_v31 = vadd.f32 1e-05, %v763_v44  ;;  %v2394_v6 = vpop.eup %2393  ;;  %v704_v63 = vpop.xlane.xlu1 %703  ;;  %v928_v25 = vadd.f32 %v3077_v21, %v889_v36  ;;  %v852_v53 = vmul.f32 %v2392_v10, %v2915_v35 }
 0x169   : > { %v707_v8 = vpop.xlane.xlu0 %706  ;;  %2403 = vrsqrt.f32 %v794_v41  ;;  %v764_v56 = vmul.f32 0.03125, %v704_v63  ;;  %v853_v46 = vmul.f32 %v2394_v6, %v2923_v55  ;;  %v929_v29 = vadd.f32 %v3077_v21, %v890_v5 }
 0x16a   : > { %v765_v3 = vmul.f32 0.03125, %v707_v8  ;;  %2405 = vrsqrt.f32 %v795_v31  ;;  %2158 = vmatmul.mubr.msk.f32.gmra.mrb[6].mxu0 %vm457_vm0, %v928_v25  ;;  %v891_v52 = vmul.f32 %v3071_v61, %v852_v53 }
 0x16b   : > { %v2396_v14 = vpop.eup %2395  ;;  %v796_v26 = vadd.f32 1e-05, %v764_v56  ;;  %v892_v38 = vmul.f32 %v3071_v61, %v853_v46  ;;  %2160 = vmatprep.mubr.msk.f32.mxu0 %vm457_vm0, %v929_v29 }
 0x16c   : > { %v797_v32 = vadd.f32 1e-05, %v765_v3  ;;  %v2398_v51 = vpop.eup %2397  ;;  %v710_v35 = vpop.xlane.xlu1 %709  ;;  %v930_v43 = vadd.f32 %v3077_v21, %v891_v52  ;;  %v854_v55 = vmul.f32 %v2396_v14, %v2927_v59 }
 0x16d   : > { %v713_v12 = vpop.xlane.xlu0 %712  ;;  %2407 = vrsqrt.f32 %v796_v26  ;;  %v766_v4 = vmul.f32 0.03125, %v710_v35  ;;  %v931_v44 = vadd.f32 %v3077_v21, %v892_v38  ;;  %v855_v36 = vmul.f32 %v2398_v51, %v2935_v20 }
 0x16e   : > { %v767_v1 = vmul.f32 0.03125, %v713_v12  ;;  %2409 = vrsqrt.f32 %v797_v32  ;;  %2161 = vmatmul.mubr.msk.f32.gmra.mrb[8].mxu0 %vm457_vm0, %v930_v43  ;;  %v893_v54 = vmul.f32 %v3071_v61, %v854_v55 }
 0x16f   : > { %v2400_v19 = vpop.eup %2399  ;;  %v798_v10 = vadd.f32 1e-05, %v766_v4  ;;  %2163 = vmatprep.mubr.msk.f32.mxu0 %vm457_vm0, %v931_v44  ;;  %v894_v8 = vmul.f32 %v3071_v61, %v855_v36 }
 0x170   : > { %v799_v41 = vadd.f32 1e-05, %v767_v1  ;;  %v2402_v31 = vpop.eup %2401  ;;  %v716_v6 = vpop.xlane.xlu1 %715  ;;  %v932_v63 = vadd.f32 %v3077_v21, %v893_v54  ;;  %v856_v25 = vmul.f32 %v2400_v19, %v2939_v24 }
 0x171   : > { %v719_v59 = vpop.xlane.xlu0 %718  ;;  %2411 = vrsqrt.f32 %v798_v10  ;;  %v768_v5 = vmul.f32 0.03125, %v716_v6  ;;  %v857_v56 = vmul.f32 %v2402_v31, %v2947_v49  ;;  %v933_v20 = vadd.f32 %v3077_v21, %v894_v8 }
 0x172   : > { %v769_v53 = vmul.f32 0.03125, %v719_v59  ;;  %2413 = vrsqrt.f32 %v799_v41  ;;  %2164 = vmatmul.mubr.msk.f32.gmra.mrb[10].mxu0 %vm457_vm0, %v932_v63  ;;  %v895_v3 = vmul.f32 %v3071_v61, %v856_v25 }
 0x173   : > { %v2404_v46 = vpop.eup %2403  ;;  %v800_v29 = vadd.f32 1e-05, %v768_v5  ;;  %v896_v14 = vmul.f32 %v3071_v61, %v857_v56  ;;  %2166 = vmatprep.mubr.msk.f32.mxu0 %vm457_vm0, %v933_v20 }
 0x174   : > { %v801_v52 = vadd.f32 1e-05, %v769_v53  ;;  %v2406_v26 = vpop.eup %2405  ;;  %v722_v24 = vpop.xlane.xlu1 %721  ;;  %v934_v38 = vadd.f32 %v3077_v21, %v895_v3  ;;  %v858_v49 = vmul.f32 %v2404_v46, %v2951_v58 }
 0x175   : > { %v725_v32 = vpop.xlane.xlu0 %724  ;;  %2415 = vrsqrt.f32 %v800_v29  ;;  %v770_v51 = vmul.f32 0.03125, %v722_v24  ;;  %v935_v12 = vadd.f32 %v3077_v21, %v896_v14  ;;  %v859_v55 = vmul.f32 %v2406_v26, %v2959_v23 }
 0x176   : > { %v771_v35 = vmul.f32 0.03125, %v725_v32  ;;  %2417 = vrsqrt.f32 %v801_v52  ;;  %2167 = vmatmul.mubr.msk.f32.gmra.mrb[12].mxu0 %vm457_vm0, %v934_v38  ;;  %v897_v43 = vmul.f32 %v3071_v61, %v858_v49 }
 0x177   : > { %v2408_v4 = vpop.eup %2407  ;;  %v802_v1 = vadd.f32 1e-05, %v770_v51  ;;  %2169 = vmatprep.mubr.msk.f32.mxu0 %vm457_vm0, %v935_v12  ;;  %v898_v10 = vmul.f32 %v3071_v61, %v859_v55 }
 0x178   : > { %v803_v44 = vadd.f32 1e-05, %v771_v35  ;;  %v2410_v54 = vpop.eup %2409  ;;  %v728_v36 = vpop.xlane.xlu1 %727  ;;  %v936_v19 = vadd.f32 %v3077_v21, %v897_v43  ;;  %v860_v41 = vmul.f32 %v2408_v4, %v2963_v34 }
 0x179   : > { %v731_v58 = vpop.xlane.xlu0 %730  ;;  %2419 = vrsqrt.f32 %v802_v1  ;;  %v772_v31 = vmul.f32 0.03125, %v728_v36  ;;  %v861_v59 = vmul.f32 %v2410_v54, %v2977_v9  ;;  %v937_v23 = vadd.f32 %v3077_v21, %v898_v10 }
 0x17a   : > { %v773_v6 = vmul.f32 0.03125, %v731_v58  ;;  %2421 = vrsqrt.f32 %v803_v44  ;;  %2170 = vmatmul.mubr.msk.f32.gmra.mrb[14].mxu0 %vm457_vm0, %v936_v19  ;;  %v899_v63 = vmul.f32 %v3071_v61, %v860_v41 }
 0x17b   : > { %v2412_v8 = vpop.eup %2411  ;;  %v804_v25 = vadd.f32 1e-05, %v772_v31  ;;  %v900_v53 = vmul.f32 %v3071_v61, %v861_v59  ;;  %2172 = vmatprep.mubr.msk.f32.mxu0 %vm457_vm0, %v937_v23 }
 0x17c   : > { %v805_v5 = vadd.f32 1e-05, %v773_v6  ;;  %v2414_v56 = vpop.eup %2413  ;;  %v734_v34 = vpop.xlane.xlu1 %733  ;;  %v938_v3 = vadd.f32 %v3077_v21, %v899_v63  ;;  %v862_v9 = vmul.f32 %v2412_v8, %v2981_v18 }
 0x17d   : > { %v737_v20 = vpop.xlane.xlu0 %736  ;;  %2423 = vrsqrt.f32 %v804_v25  ;;  %v774_v46 = vmul.f32 0.03125, %v734_v34  ;;  %v939_v52 = vadd.f32 %v3077_v21, %v900_v53  ;;  %v863_v26 = vmul.f32 %v2414_v56, %v2995_v0 }
 0x17e   : > { %v775_v29 = vmul.f32 0.03125, %v737_v20  ;;  %2425 = vrsqrt.f32 %v805_v5  ;;  %2173 = vmatmul.mubr.msk.f32.gmra.mrb[16].mxu0 %vm457_vm0, %v938_v3  ;;  %v901_v14 = vmul.f32 %v3071_v61, %v862_v9 }
 0x17f   : > { %v2416_v24 = vpop.eup %2415  ;;  %v806_v32 = vadd.f32 1e-05, %v774_v46  ;;  %2175 = vmatprep.mubr.msk.f32.mxu0 %vm457_vm0, %v939_v52  ;;  %v902_v12 = vmul.f32 %v3071_v61, %v863_v26 }
 0x180   : > { %v807_v38 = vadd.f32 1e-05, %v775_v29  ;;  %v2418_v49 = vpop.eup %2417  ;;  %v740_v51 = vpop.xlane.xlu1 %739  ;;  %v940_v35 = vadd.f32 %v3077_v21, %v901_v14  ;;  %v864_v43 = vmul.f32 %v2416_v24, %v2999_v13 }
 0x181   : > { %v743_v18 = vpop.xlane.xlu0 %742  ;;  %2427 = vrsqrt.f32 %v806_v32  ;;  %v776_v55 = vmul.f32 0.03125, %v740_v51  ;;  %v865_v1 = vmul.f32 %v2418_v49, %v3007_v42  ;;  %v941_v0 = vadd.f32 %v3077_v21, %v902_v12 }
 0x182   : > { %v777_v4 = vmul.f32 0.03125, %v743_v18  ;;  %2429 = vrsqrt.f32 %v807_v38  ;;  %2176 = vmatmul.mubr.msk.f32.gmra.mrb[18].mxu0 %vm457_vm0, %v940_v35  ;;  %v903_v44 = vmul.f32 %v3071_v61, %v864_v43 }
 0x183   : > { %v2420_v54 = vpop.eup %2419  ;;  %v808_v36 = vadd.f32 1e-05, %v776_v55  ;;  %v904_v19 = vmul.f32 %v3071_v61, %v865_v1  ;;  %2178 = vmatprep.mubr.msk.f32.mxu0 %vm457_vm0, %v941_v0  ;;  %v1573_v55 = vld [vmem:[%s3726_s6] sm:$0xff] }
 0x184   : > { %v809_v58 = vadd.f32 1e-05, %v777_v4  ;;  %v2422_v10 = vpop.eup %2421  ;;  %v746_v13 = vpop.xlane.xlu1 %745  ;;  %v942_v41 = vadd.f32 %v3077_v21, %v903_v44  ;;  %v866_v42 = vmul.f32 %v2420_v54, %v3011_v39  ;;  %v1577_v0 = vld [vmem:[%s3726_s6 + $0x20] sm:$0xff]  ;;  %v1578_v44 = vld [vmem:[%s3726_s6 + $0x28] sm:$0xff] }
 0x185   : > { %2431 = vrsqrt.f32 %v808_v36  ;;  %v778_v31 = vmul.f32 0.03125, %v746_v13  ;;  %v943_v6 = vadd.f32 %v3077_v21, %v904_v19  ;;  %v867_v59 = vmul.f32 %v2422_v10, %v3019_v62  ;;  %v1579_v36 = vld [vmem:[%s3726_s6 + $0x30] sm:$0xff]  ;;  %v1581_v10 = vld [vmem:[%s3726_s6 + $0x40] sm:$0xff]  ;;  %v1582_v13 = vld [vmem:[%s3726_s6 + $0x48] sm:$0xff] }
 0x186   : > { %2433 = vrsqrt.f32 %v809_v58  ;;  %2179 = vmatmul.mubr.msk.f32.gmra.mrb[20].mxu0 %vm457_vm0, %v942_v41  ;;  %v905_v23 = vmul.f32 %v3071_v61, %v866_v42  ;;  %v2292_v54 = vpack.c.bf16 %v1578_v44, %v1577_v0  ;;  %v1580_v58 = vld [vmem:[%s3726_s6 + $0x38] sm:$0xff]  ;;  %v2300_v41 = vpack.c.bf16 %v1582_v13, %v1581_v10  ;;  %v1583_v42 = vld [vmem:[%s3726_s6 + $0x50] sm:$0xff] }
 0x187   : > { %v2424_v63 = vpop.eup %2423  ;;  %v810_v8 = vadd.f32 1e-05, %v778_v31  ;;  %2181 = vmatprep.mubr.msk.f32.mxu0 %vm457_vm0, %v943_v6  ;;  %v906_v25 = vmul.f32 %v3071_v61, %v867_v59  ;;  %v2296_v19 = vpack.c.bf16 %v1580_v58, %v1579_v36  ;;  %v1584_v31 = vld [vmem:[%s3726_s6 + $0x58] sm:$0xff]  ;;  %v1585_v59 = vld [vmem:[%s3726_s6 + $0x60] sm:$0xff] }
 0x188   : > { %v2426_v5 = vpop.eup %2425  ;;  %v944_v39 = vadd.f32 %v3077_v21, %v905_v23  ;;  %v868_v53 = vmul.f32 %v2424_v63, %v3023_v28  ;;  %v2304_v6 = vpack.c.bf16 %v1584_v31, %v1583_v42  ;;  %v1586_v23 = vld [vmem:[%s3726_s6 + $0x68] sm:$0xff] }
 0x189   : > { %2435 = vrsqrt.f32 %v810_v8  ;;  %v945_v56 = vadd.f32 %v3077_v21, %v906_v25  ;;  %v869_v62 = vmul.f32 %v2426_v5, %v3031_v17  ;;  %v2308_v63 = vpack.c.bf16 %v1586_v23, %v1585_v59  ;;  %v1587_v8 = vld [vmem:[%s3726_s6 + $0x70] sm:$0xff]  ;;  %v1588_v25 = vld [vmem:[%s3726_s6 + $0x78] sm:$0xff] }
 0x18a   : > { %2182 = vmatmul.mubr.msk.f32.gmra.mrb[22].mxu0 %vm457_vm0, %v944_v39  ;;  %v907_v34 = vmul.f32 %v3071_v61, %v868_v53  ;;  %v2312_v5 = vpack.c.bf16 %v1588_v25, %v1587_v8  ;;  %v3257_v39 = vld [vmem:[%s3725_s5] ss:$0 sm:$0xff] }
 0x18b   : > { %v2428_v20 = vpop.eup %2427  ;;  %2184 = vmatprep.mubr.msk.f32.mxu0 %vm457_vm0, %v945_v56  ;;  %v908_v3 = vmul.f32 %v3071_v61, %v869_v62 }
 0x18c   : > { %v2430_v9 = vpop.eup %2429  ;;  %v946_v46 = vadd.f32 %v3077_v21, %v907_v34  ;;  %v870_v29 = vmul.f32 %v2428_v20, %v3035_v2 }
 0x18d   : > { %v947_v28 = vadd.f32 %v3077_v21, %v908_v3  ;;  %v871_v52 = vmul.f32 %v2430_v9, %v3043_v33 }
 0x18e   : > { %2185 = vmatmul.mubr.msk.f32.gmra.mrb[24].mxu0 %vm457_vm0, %v946_v46  ;;  %v909_v17 = vmul.f32 %v3071_v61, %v870_v29 }
 0x18f   : > { %v2432_v14 = vpop.eup %2431  ;;  %2187 = vmatprep.mubr.msk.f32.mxu0 %vm457_vm0, %v947_v28  ;;  %v910_v26 = vmul.f32 %v3071_v61, %v871_v52 }
 0x190   : > { %v2434_v24 = vpop.eup %2433  ;;  %v948_v32 = vadd.f32 %v3077_v21, %v909_v17  ;;  %v872_v38 = vmul.f32 %v2432_v14, %v3047_v45 }
 0x191   : > { %v949_v2 = vadd.f32 %v3077_v21, %v910_v26  ;;  %v873_v49 = vmul.f32 %v2434_v24, %v3055_v48 }
 0x192   : > { %2188 = vmatmul.mubr.msk.f32.gmra.mrb[26].mxu0 %vm457_vm0, %v948_v32  ;;  %v911_v33 = vmul.f32 %v3071_v61, %v872_v38 }
 0x193   : > { %v2436_v51 = vpop.eup %2435  ;;  %2190 = vmatprep.mubr.msk.f32.mxu0 %vm457_vm0, %v949_v2  ;;  %v912_v18 = vmul.f32 %v3071_v61, %v873_v49 }
 0x194   : > { %v950_v35 = vadd.f32 %v3077_v21, %v911_v33  ;;  %v874_v12 = vmul.f32 %v2436_v51, %v3059_v7  ;;  %v1574_v7 = vld [vmem:[%s3726_s6 + $0x8] sm:$0xff] }
 0x195   : > { %v951_v43 = vadd.f32 %v3077_v21, %v912_v18  ;;  %v2284_v4 = vpack.c.bf16 %v1574_v7, %v1573_v55 }
 0x196   : > { %2191 = vmatmul.mubr.msk.f32.gmra.mrb[28].mxu0 %vm457_vm0, %v950_v35  ;;  %v913_v45 = vmul.f32 %v3071_v61, %v874_v12  ;;  %v1575_v61 = vld [vmem:[%s3726_s6 + $0x10] sm:$0xff] }
 0x197   : > { %2193 = vmatprep.mubr.msk.f32.mxu0 %vm457_vm0, %v951_v43  ;;  %2285 = vmatprep.subr.bf16.mxu0 %v2284_v4 }
 0x198   : > { %v952_v48 = vadd.f32 %v3077_v21, %v913_v45  ;;  %2316 = vmatprep.subr.bf16.mxu1 %v2284_v4  ;;  %2287 = vmatpush3.bf16.msra.mxu0 %v2284_v4  ;;  %v1576_v21 = vld [vmem:[%s3726_s6 + $0x18] sm:$0xff] }
 0x199   : > { %2324 = vmatpush3.bf16.msra.mxu1 %v2284_v4  ;;  %v2288_v1 = vpack.c.bf16 %v1576_v21, %v1575_v61 }
 0x19a   : > { %2194 = vmatmul.mubr.msk.f32.gmra.mrb[30].mxu0 %vm457_vm0, %v952_v48 }
 0x19b   : > { %2289 = vmatprep.subr.bf16.mxu0 %v2288_v1  ;;  %2317 = vmatprep.subr.bf16.mxu1 %v2288_v1 }
 0x19c   : > { %2291 = vmatpush3.bf16.msra.mxu0 %v2288_v1 }
 0x19d   : > { %2325 = vmatpush3.bf16.msra.mxu1 %v2288_v1  ;;  %2293 = vmatprep.subr.bf16.mxu0 %v2292_v54 }
 0x19e   : > { %2318 = vmatprep.subr.bf16.mxu1 %v2292_v54 }
 0x1a0   : > { %2295 = vmatpush3.bf16.msra.mxu0 %v2292_v54 }
 0x1a1   : > { %2326 = vmatpush3.bf16.msra.mxu1 %v2292_v54  ;;  %2297 = vmatprep.subr.bf16.mxu0 %v2296_v19 }
 0x1a2   : > { %2319 = vmatprep.subr.bf16.mxu1 %v2296_v19 }
 0x1a4   : > { %2299 = vmatpush3.bf16.msra.mxu0 %v2296_v19 }
 0x1a5   : > { %2327 = vmatpush3.bf16.msra.mxu1 %v2296_v19  ;;  %2301 = vmatprep.subr.bf16.mxu0 %v2300_v41 }
 0x1a6   : > { %2320 = vmatprep.subr.bf16.mxu1 %v2300_v41 }
 0x1a8   : > { %2303 = vmatpush3.bf16.msra.mxu0 %v2300_v41 }
 0x1a9   : > { %2328 = vmatpush3.bf16.msra.mxu1 %v2300_v41  ;;  %2305 = vmatprep.subr.bf16.mxu0 %v2304_v6 }
 0x1aa   : > { %2321 = vmatprep.subr.bf16.mxu1 %v2304_v6 }
 0x1ac   : > { %2307 = vmatpush3.bf16.msra.mxu0 %v2304_v6 }
 0x1ad   : > { %2329 = vmatpush3.bf16.msra.mxu1 %v2304_v6  ;;  %2309 = vmatprep.subr.bf16.mxu0 %v2308_v63 }
 0x1ae   : > { %2322 = vmatprep.subr.bf16.mxu1 %v2308_v63 }
 0x1b0   : > { %2311 = vmatpush3.bf16.msra.mxu0 %v2308_v63 }
 0x1b1   : > { %2330 = vmatpush3.bf16.msra.mxu1 %v2308_v63  ;;  %2313 = vmatprep.subr.bf16.mxu0 %v2312_v5 }
 0x1b2   : > { %2323 = vmatprep.subr.bf16.mxu1 %v2312_v5 }
 0x1b4   : > { %2315 = vmatpush3.bf16.msra.mxu0 %v2312_v5 }
 0x1b5   : > { %2331 = vmatpush3.bf16.msra.mxu1 %v2312_v5 }
 0x231   : > { %v2150_v53 = vpop.f32.mrb[0].mxu0 }
 0x232   : > { %v3260_v56 = vadd.f32 %v2150_v53, %v3257_v39  ;;  %v1126_v62 = vpop.f32.mrb[1].mxu0 }
 0x233   : > { %v3263_v34 = vadd.f32 %v3257_v39, %v1126_v62 }
 0x234   : > { %v1286_v20 = vmul.f32 %v3260_v56, %v3260_v56 }
 0x235   : > { %v1285_v3 = vmul.f32 %v3263_v34, %v3263_v34  ;;  %v2153_v9 = vpop.f32.mrb[2].mxu0 }
 0x236   : > { %v1318_v46 = vmul.f32 %v1286_v20, %v3260_v56  ;;  %v3271_v29 = vadd.f32 %v2153_v9, %v3257_v39  ;;  %v1136_v28 = vpop.f32.mrb[3].mxu0 }
 0x237   : > { %v1317_v52 = vmul.f32 %v1285_v3, %v3263_v34  ;;  %v3275_v17 = vadd.f32 %v3257_v39, %v1136_v28 }
 0x238   : > { %v1350_v14 = vmul.f32 0.044715, %v1318_v46  ;;  %v1288_v26 = vmul.f32 %v3271_v29, %v3271_v29 }
 0x239   : > { %v1349_v24 = vmul.f32 0.044715, %v1317_v52  ;;  %v1287_v32 = vmul.f32 %v3275_v17, %v3275_v17  ;;  %v2156_v38 = vpop.f32.mrb[4].mxu0 }
 0x23a   : > { %v1382_v2 = vadd.f32 %v1350_v14, %v3260_v56  ;;  %v1320_v49 = vmul.f32 %v1288_v26, %v3271_v29  ;;  %v3284_v33 = vadd.f32 %v2156_v38, %v3257_v39  ;;  %v1146_v51 = vpop.f32.mrb[5].mxu0 }
 0x23b   : > { %v1381_v18 = vadd.f32 %v1349_v24, %v3263_v34  ;;  %v1319_v35 = vmul.f32 %v1287_v32, %v3275_v17  ;;  %v3289_v12 = vadd.f32 %v3257_v39, %v1146_v51 }
 0x23c   : > { %v1414_v43 = vmul.f32 0.7978846, %v1382_v2  ;;  %v1352_v45 = vmul.f32 0.044715, %v1320_v49  ;;  %v1290_v48 = vmul.f32 %v3284_v33, %v3284_v33 }
 0x23d   : > { %v1413_v55 = vmul.f32 0.7978846, %v1381_v18  ;;  %v1351_v7 = vmul.f32 0.044715, %v1319_v35  ;;  %v1289_v4 = vmul.f32 %v3289_v12, %v3289_v12  ;;  %v2159_v61 = vpop.f32.mrb[6].mxu0 }
 0x23e   : > { %2437 = vtanh.f32 %v1414_v43  ;;  %v1384_v21 = vadd.f32 %v1352_v45, %v3271_v29  ;;  %v1322_v1 = vmul.f32 %v1290_v48, %v3284_v33  ;;  %v3298_v0 = vadd.f32 %v2159_v61, %v3257_v39  ;;  %v1156_v44 = vpop.f32.mrb[7].mxu0 }
 0x23f   : > { %v1383_v54 = vadd.f32 %v1351_v7, %v3275_v17  ;;  %v1321_v36 = vmul.f32 %v1289_v4, %v3289_v12  ;;  %v3303_v58 = vadd.f32 %v3257_v39, %v1156_v44  ;;  %2439 = vtanh.f32 %v1413_v55 }
 0x240   : > { %v1416_v19 = vmul.f32 0.7978846, %v1384_v21  ;;  %v1354_v10 = vmul.f32 0.044715, %v1322_v1  ;;  %v1292_v13 = vmul.f32 %v3298_v0, %v3298_v0 }
 0x241   : > { %v1415_v41 = vmul.f32 0.7978846, %v1383_v54  ;;  %v1353_v42 = vmul.f32 0.044715, %v1321_v36  ;;  %v1291_v31 = vmul.f32 %v3303_v58, %v3303_v58  ;;  %v2162_v6 = vpop.f32.mrb[8].mxu0 }
 0x242   : > { %v1386_v59 = vadd.f32 %v1354_v10, %v3284_v33  ;;  %v1324_v23 = vmul.f32 %v1292_v13, %v3298_v0  ;;  %v3312_v63 = vadd.f32 %v2162_v6, %v3257_v39  ;;  %v1166_v8 = vpop.f32.mrb[9].mxu0  ;;  %2441 = vtanh.f32 %v1416_v19 }
 0x243   : > { %v1385_v25 = vadd.f32 %v1353_v42, %v3289_v12  ;;  %v1323_v5 = vmul.f32 %v1291_v31, %v3303_v58  ;;  %v3317_v53 = vadd.f32 %v3257_v39, %v1166_v8  ;;  %2443 = vtanh.f32 %v1415_v41 }
 0x244   : > { %v1418_v62 = vmul.f32 0.7978846, %v1386_v59  ;;  %v1294_v20 = vmul.f32 %v3312_v63, %v3312_v63  ;;  %v1356_v9 = vmul.f32 0.044715, %v1324_v23 }
 0x245   : > { %v1417_v3 = vmul.f32 0.7978846, %v1385_v25  ;;  %v1293_v46 = vmul.f32 %v3317_v53, %v3317_v53  ;;  %v2165_v28 = vpop.f32.mrb[10].mxu0  ;;  %v1355_v24 = vmul.f32 0.044715, %v1323_v5 }
 0x246   : > { %v3324_v52 = vadd.f32 %v2165_v28, %v3257_v39  ;;  %v1176_v14 = vpop.f32.mrb[11].mxu0  ;;  %v1326_v38 = vmul.f32 %v1294_v20, %v3312_v63  ;;  %v1388_v35 = vadd.f32 %v1356_v9, %v3298_v0 }
 0x247   : > { %v3327_v26 = vadd.f32 %v3257_v39, %v1176_v14  ;;  %v1325_v2 = vmul.f32 %v1293_v46, %v3317_v53  ;;  %2445 = vtanh.f32 %v1417_v3  ;;  %v1387_v6 = vadd.f32 %v1355_v24, %v3303_v58 }
 0x248   : > { %v2438_v32 = vpop.eup %2437  ;;  %v1296_v49 = vmul.f32 %v3324_v52, %v3324_v52  ;;  %2447 = vtanh.f32 %v1418_v62  ;;  %v1358_v54 = vmul.f32 0.044715, %v1326_v38  ;;  %v3346_v41 = vmul.f32 0.7978846, %v1388_v35 }
 0x249   : > { %v2440_v51 = vpop.eup %2439  ;;  %v1478_v18 = vadd.f32 1.0, %v2438_v32  ;;  %v1295_v43 = vmul.f32 %v3327_v26, %v3327_v26  ;;  %v2168_v45 = vpop.f32.mrb[12].mxu0  ;;  %v1357_v36 = vmul.f32 0.044715, %v1325_v2  ;;  %v1419_v2 = vmul.f32 0.7978846, %v1387_v6 }
 0x24a   : > { %v1328_v48 = vmul.f32 %v1296_v49, %v3324_v52  ;;  %v3338_v55 = vadd.f32 %v2168_v45, %v3257_v39  ;;  %v1186_v7 = vpop.f32.mrb[13].mxu0  ;;  %v1477_v4 = vadd.f32 1.0, %v2440_v51  ;;  %v1390_v46 = vadd.f32 %v1358_v54, %v3312_v63 }
 0x24b   : > { %v1510_v61 = vmul.f32 0.5, %v1478_v18  ;;  %v1327_v21 = vmul.f32 %v1295_v43, %v3327_v26  ;;  %v3342_v1 = vadd.f32 %v3257_v39, %v1186_v7  ;;  %v1389_v28 = vadd.f32 %v1357_v36, %v3317_v53 }
 0x24c   : > { %v2442_v44 = vpop.eup %2441  ;;  %v1298_v19 = vmul.f32 %v3338_v55, %v3338_v55  ;;  %v1509_v10 = vmul.f32 0.5, %v1477_v4  ;;  %v1360_v59 = vmul.f32 0.044715, %v1328_v48  ;;  %2449 = vtanh.f32 %v1419_v2 }
 0x24d   : > { %v2444_v13 = vpop.eup %2443  ;;  %v1297_v42 = vmul.f32 %v3342_v1, %v3342_v1  ;;  %v2171_v31 = vpop.f32.mrb[14].mxu0  ;;  %v1542_v62 = vmul.f32 %v1510_v61, %v3260_v56  ;;  %v1359_v20 = vmul.f32 0.044715, %v1327_v21  ;;  %v1480_v24 = vadd.f32 1.0, %v2442_v44 }
 0x24e   : > { %v1330_v23 = vmul.f32 %v1298_v19, %v3338_v55  ;;  %v3353_v8 = vadd.f32 %v2171_v31, %v3257_v39  ;;  %v1196_v25 = vpop.f32.mrb[15].mxu0  ;;  %v1541_v5 = vmul.f32 %v1509_v10, %v3263_v34  ;;  %v1479_v9 = vadd.f32 1.0, %v2444_v13 }
 0x24f   : > { %v3358_v3 = vadd.f32 %v3257_v39, %v1196_v25  ;;  %v1329_v14 = vmul.f32 %v1297_v42, %v3342_v1  ;;  %v1392_v51 = vadd.f32 %v1360_v59, %v3324_v52  ;;  %v1512_v45 = vmul.f32 0.5, %v1480_v24 }
 0x250   : > { %2228 = vmatprep.mubr.f32.mxu0 %v1541_v5  ;;  %v1300_v32 = vmul.f32 %v3353_v8, %v3353_v8  ;;  %v1511_v38 = vmul.f32 0.5, %v1479_v9  ;;  %v1362_v18 = vmul.f32 0.044715, %v1330_v23  ;;  %v1391_v7 = vadd.f32 %v1359_v20, %v3327_v26 }
 0x251   : > { %v1299_v34 = vmul.f32 %v3358_v3, %v3358_v3  ;;  %v2174_v56 = vpop.f32.mrb[16].mxu0  ;;  %2229 = vmatmul.mubr.f32.vlgmr.msra.gmra.mrb[32].mxu0 %v1542_v62  ;;  %v2446_v49 = vpop.eup %2445  ;;  %v1422_v44 = vmul.f32 0.7978846, %v1390_v46  ;;  %v1421_v54 = vmul.f32 0.7978846, %v1389_v28  ;;  %v1544_v19 = vmul.f32 %v1512_v45, %v3271_v29 }
 0x252   : > { %v3369_v35 = vadd.f32 %v2174_v56, %v3257_v39  ;;  %v1206_v43 = vpop.f32.mrb[17].mxu0  ;;  %v2448_v48 = vpop.eup %2447  ;;  %v1543_v21 = vmul.f32 %v1511_v38, %v3275_v17  ;;  %v1361_v36 = vmul.f32 0.044715, %v1329_v14  ;;  %v1332_v10 = vmul.f32 %v1300_v32, %v3353_v8 }
 0x253   : > { %v1331_v4 = vmul.f32 %v1299_v34, %v3358_v3  ;;  %v3374_v61 = vadd.f32 %v3257_v39, %v1206_v43  ;;  %v1481_v6 = vadd.f32 1.0, %v2446_v49  ;;  %v1424_v59 = vmul.f32 0.7978846, %v1392_v51 }
 0x254   : > { %v1302_v13 = vmul.f32 %v3369_v35, %v3369_v35  ;;  %2231 = vmatprep.mubr.f32.mxu0 %v1543_v21  ;;  %v1394_v23 = vadd.f32 %v1362_v18, %v3338_v55  ;;  %v1482_v29 = vadd.f32 1.0, %v2448_v48  ;;  %v1423_v5 = vmul.f32 0.7978846, %v1391_v7 }
 0x255   : > { %v1301_v42 = vmul.f32 %v3374_v61, %v3374_v61  ;;  %v2177_v31 = vpop.f32.mrb[18].mxu0  ;;  %2232 = vmatmul.mubr.f32.gmra.mrb[34].mxu0 %v1544_v19  ;;  %v1363_v62 = vmul.f32 0.044715, %v1331_v4  ;;  %v1513_v9 = vmul.f32 0.5, %v1481_v6  ;;  %v1393_v46 = vadd.f32 %v1361_v36, %v3342_v1 }
 0x256   : > { %v3385_v17 = vadd.f32 %v2177_v31, %v3257_v39  ;;  %v1216_v25 = vpop.f32.mrb[19].mxu0  ;;  %v1514_v24 = vmul.f32 0.5, %v1482_v29  ;;  %v1364_v32 = vmul.f32 0.044715, %v1332_v10  ;;  %v1334_v34 = vmul.f32 %v1302_v13, %v3369_v35 }
 0x257   : > { %v3388_v20 = vadd.f32 %v3257_v39, %v1216_v25  ;;  %v1333_v28 = vmul.f32 %v1301_v42, %v3374_v61  ;;  %v1545_v38 = vmul.f32 %v1513_v9, %v3289_v12  ;;  %v1426_v51 = vmul.f32 0.7978846, %v1394_v23 }
 0x258   : > { %v1304_v14 = vmul.f32 %v3385_v17, %v3385_v17  ;;  %v1546_v45 = vmul.f32 %v1514_v24, %v3284_v33  ;;  %v1395_v7 = vadd.f32 %v1363_v62, %v3358_v3  ;;  %v1425_v12 = vmul.f32 0.7978846, %v1393_v46 }
 0x259   : > { %v1303_v56 = vmul.f32 %v3388_v20, %v3388_v20  ;;  %v2180_v49 = vpop.f32.mrb[20].mxu0  ;;  %2234 = vmatprep.mubr.f32.mxu0 %v1545_v38  ;;  %v1365_v36 = vmul.f32 0.044715, %v1333_v28  ;;  %2451 = vtanh.f32 %v3346_v41  ;;  %v1396_v33 = vadd.f32 %v1364_v32, %v3353_v8 }
 0x25a   : > { %v1336_v18 = vmul.f32 %v1304_v14, %v3385_v17  ;;  %v3400_v43 = vadd.f32 %v2180_v49, %v3257_v39  ;;  %v1226_v48 = vpop.f32.mrb[21].mxu0  ;;  %2235 = vmatmul.mubr.f32.gmra.mrb[36].mxu0 %v1546_v45  ;;  %v1366_v10 = vmul.f32 0.044715, %v1334_v34  ;;  %2453 = vtanh.f32 %v1421_v54 }
 0x25b   : > { %v1335_v4 = vmul.f32 %v1303_v56, %v3388_v20  ;;  %v3406_v21 = vadd.f32 %v3257_v39, %v1226_v48  ;;  %2455 = vtanh.f32 %v1422_v44  ;;  %v1427_v25 = vmul.f32 0.7978846, %v1395_v7 }
 0x25c   : > { %v1306_v19 = vmul.f32 %v3400_v43, %v3400_v43  ;;  %v1368_v13 = vmul.f32 0.044715, %v1336_v18  ;;  %2457 = vtanh.f32 %v1423_v5  ;;  %v1397_v62 = vadd.f32 %v1365_v36, %v3374_v61  ;;  %v2450_v18 = vpop.eup %2449 }
 0x25d   : > { %v2183_v42 = vpop.f32.mrb[22].mxu0  ;;  %v1367_v31 = vmul.f32 0.044715, %v1335_v4  ;;  %v1305_v6 = vmul.f32 %v3406_v21, %v3406_v21  ;;  %2459 = vtanh.f32 %v1424_v59  ;;  %v1398_v9 = vadd.f32 %v1366_v10, %v3369_v35 }
 0x25e   : > { %v3415_v2 = vadd.f32 %v2183_v42, %v3257_v39  ;;  %v1236_v23 = vpop.f32.mrb[23].mxu0  ;;  %v1338_v29 = vmul.f32 %v1306_v19, %v3400_v43  ;;  %v1400_v46 = vadd.f32 %v1368_v13, %v3385_v17  ;;  %2461 = vtanh.f32 %v1425_v12 }
 0x25f   : > { %v3419_v41 = vadd.f32 %v3257_v39, %v1236_v23  ;;  %v1428_v14 = vmul.f32 0.7978846, %v1396_v33  ;;  %v1399_v24 = vadd.f32 %v1367_v31, %v3388_v20  ;;  %v1337_v5 = vmul.f32 %v1305_v6, %v3406_v21 }
 0x260   : > { %v1308_v54 = vmul.f32 %v3415_v2, %v3415_v2  ;;  %2463 = vtanh.f32 %v1426_v51  ;;  %v1370_v34 = vmul.f32 0.044715, %v1338_v29  ;;  %v1429_v38 = vmul.f32 0.7978846, %v1397_v62 }
 0x261   : > { %v1307_v44 = vmul.f32 %v3419_v41, %v3419_v41  ;;  %v2186_v28 = vpop.f32.mrb[24].mxu0  ;;  %2465 = vtanh.f32 %v1427_v25  ;;  %v3437_v45 = vmul.f32 0.7978846, %v1398_v9  ;;  %v3439_v48 = vmul.f32 0.7978846, %v1400_v46 }
 0x262   : > { %v1246_v32 = vpop.f32.mrb[25].mxu0  ;;  %v1340_v56 = vmul.f32 %v1308_v54, %v3415_v2  ;;  %v3435_v49 = vadd.f32 %v2186_v28, %v3257_v39  ;;  %v3442_v12 = vmul.f32 0.7978846, %v1399_v24  ;;  %v1369_v36 = vmul.f32 0.044715, %v1337_v5 }
 0x263   : > { %v3432_v59 = vadd.f32 %v3257_v39, %v1246_v32  ;;  %v1339_v7 = vmul.f32 %v1307_v44, %v3419_v41  ;;  %v2452_v51 = vpop.eup %2451  ;;  %v1483_v19 = vadd.f32 1.0, %v2450_v18  ;;  %v1402_v42 = vadd.f32 %v1370_v34, %v3400_v43 }
 0x264   : > { %v2454_v13 = vpop.eup %2453  ;;  %v1372_v31 = vmul.f32 0.044715, %v1340_v56  ;;  %v1484_v6 = vadd.f32 1.0, %v2452_v51  ;;  %2467 = vtanh.f32 %v1428_v14  ;;  %v1310_v62 = vmul.f32 %v3435_v49, %v3435_v49 }
 0x265   : > { %v2189_v4 = vpop.f32.mrb[26].mxu0  ;;  %v1309_v33 = vmul.f32 %v3432_v59, %v3432_v59  ;;  %v2456_v23 = vpop.eup %2455  ;;  %v1515_v25 = vmul.f32 0.5, %v1483_v19  ;;  %v1485_v29 = vadd.f32 1.0, %v2454_v13  ;;  %2469 = vtanh.f32 %v1429_v38 }
 0x266   : > { %v1256_v10 = vpop.f32.mrb[27].mxu0  ;;  %v2458_v54 = vpop.eup %2457  ;;  %v1516_v9 = vmul.f32 0.5, %v1484_v6  ;;  %v1371_v46 = vmul.f32 0.044715, %v1339_v7  ;;  %v1486_v44 = vadd.f32 1.0, %v2456_v23  ;;  %v1401_v38 = vadd.f32 %v1369_v36, %v3406_v21 }
 0x267   : > { %v3450_v28 = vadd.f32 %v3257_v39, %v1256_v10  ;;  %v2460_v24 = vpop.eup %2459  ;;  %v1547_v5 = vmul.f32 %v1515_v25, %v3303_v58  ;;  %v1517_v32 = vmul.f32 0.5, %v1485_v29  ;;  %v1341_v14 = vmul.f32 %v1309_v33, %v3432_v59 }
 0x268   : > { %v1487_v34 = vadd.f32 1.0, %v2458_v54  ;;  %v2462_v18 = vpop.eup %2461  ;;  %v3454_v51 = vmul.f32 0.7978846, %v1402_v42  ;;  %v1548_v19 = vmul.f32 %v1516_v9, %v3298_v0  ;;  %v1518_v7 = vmul.f32 0.5, %v1486_v44 }
 0x269   : > { %v2192_v56 = vpop.f32.mrb[28].mxu0  ;;  %2237 = vmatprep.mubr.f32.mxu1 %v1547_v5  ;;  %v1549_v10 = vmul.f32 %v1517_v32, %v3317_v53  ;;  %v3460_v58 = vadd.f32 %v2189_v4, %v3257_v39  ;;  %v1488_v33 = vadd.f32 1.0, %v2460_v24  ;;  %v1404_v29 = vadd.f32 %v1372_v31, %v3415_v2 }
 0x26a   : > { %v1266_v13 = vpop.f32.mrb[29].mxu0  ;;  %v2464_v6 = vpop.eup %2463  ;;  %v1519_v23 = vmul.f32 0.5, %v1487_v34  ;;  %2238 = vmatmul.mubr.f32.vlgmr.msra.gmra.mrb[0].mxu1 %v1548_v19  ;;  %v1403_v42 = vadd.f32 %v1371_v46, %v3419_v41  ;;  %v1342_v36 = vmul.f32 %v1310_v62, %v3435_v49  ;;  %v1311_v0 = vmul.f32 %v3450_v28, %v3450_v28 }
 0x26b   : > { %v2466_v25 = vpop.eup %2465  ;;  %2240 = vmatprep.mubr.f32.mxu1 %v1549_v10  ;;  %v1550_v53 = vmul.f32 %v1518_v7, %v3312_v63  ;;  %v1373_v9 = vmul.f32 0.044715, %v1341_v14  ;;  %v1489_v44 = vadd.f32 1.0, %v2462_v18  ;;  %v1520_v5 = vmul.f32 0.5, %v1488_v33 }
 0x26c   : > { %v1551_v4 = vmul.f32 %v1519_v23, %v3327_v26  ;;  %v1343_v31 = vmul.f32 %v1311_v0, %v3450_v28  ;;  %v1490_v32 = vadd.f32 1.0, %v2464_v6  ;;  %v3471_v46 = vadd.f32 %v3257_v39, %v1266_v13 }
 0x26d   : > { %v2195_v54 = vpop.f32.mrb[30].mxu0  ;;  %v1312_v62 = vmul.f32 %v3460_v58, %v3460_v58  ;;  %v1521_v34 = vmul.f32 0.5, %v1489_v44  ;;  %v3476_v19 = vadd.f32 %v2192_v56, %v3257_v39  ;;  %v1491_v63 = vadd.f32 1.0, %v2466_v25 }
 0x26e   : > { %v1276_v24 = vpop.f32.mrb[31].mxu0  ;;  %v2468_v14 = vpop.eup %2467  ;;  %v1433_v7 = vmul.f32 0.7978846, %v1401_v38  ;;  %2241 = vmatmul.mubr.f32.gmra.mrb[2].mxu1 %v1550_v53  ;;  %v1375_v26 = vmul.f32 0.044715, %v1343_v31  ;;  %v1522_v18 = vmul.f32 0.5, %v1490_v32  ;;  %v1313_v10 = vmul.f32 %v3471_v46, %v3471_v46 }
 0x26f   : > { %v2470_v6 = vpop.eup %2469  ;;  %v1436_v23 = vmul.f32 0.7978846, %v1404_v29  ;;  %2243 = vmatprep.mubr.f32.mxu1 %v1551_v4  ;;  %v1553_v13 = vmul.f32 %v1521_v34, %v3342_v1  ;;  %v1523_v33 = vmul.f32 0.5, %v1491_v63  ;;  %v3482_v0 = vadd.f32 %v2195_v54, %v3257_v39 }
 0x270   : > { %v1435_v56 = vmul.f32 0.7978846, %v1403_v42  ;;  %v1374_v44 = vmul.f32 0.044715, %v1342_v36  ;;  %v1552_v25 = vmul.f32 %v1520_v5, %v3324_v52  ;;  %v1345_v38 = vmul.f32 %v1313_v10, %v3471_v46 }
 0x271   : > { %v1405_v53 = vadd.f32 %v1373_v9, %v3432_v59  ;;  %v1344_v31 = vmul.f32 %v1312_v62, %v3460_v58  ;;  %v1314_v29 = vmul.f32 %v3476_v19, %v3476_v19  ;;  %v1492_v4 = vadd.f32 1.0, %v2468_v14 }
 0x272   : > { %2244 = vmatmul.mubr.f32.gmra.mrb[4].mxu1 %v1552_v25  ;;  %v1407_v1 = vadd.f32 %v1375_v26, %v3450_v28  ;;  %v1554_v54 = vmul.f32 %v1522_v18, %v3338_v55  ;;  %v3493_v42 = vadd.f32 %v3257_v39, %v1276_v24  ;;  %v1493_v36 = vadd.f32 1.0, %v2470_v6 }
 0x273   : > { %2246 = vmatprep.mubr.f32.mxu1 %v1553_v13  ;;  %v1377_v52 = vmul.f32 0.044715, %v1345_v38  ;;  %v1555_v5 = vmul.f32 %v1523_v33, %v3358_v3  ;;  %v1316_v9 = vmul.f32 %v3482_v0, %v3482_v0  ;;  %2471 = vtanh.f32 %v3437_v45 }
 0x274   : > { %v1524_v32 = vmul.f32 0.5, %v1492_v4  ;;  %v1315_v62 = vmul.f32 %v3493_v42, %v3493_v42  ;;  %v1525_v34 = vmul.f32 0.5, %v1493_v36  ;;  %2473 = vtanh.f32 %v3442_v12 }
 0x275   : > { %v1406_v39 = vadd.f32 %v1374_v44, %v3435_v49  ;;  %v1376_v55 = vmul.f32 0.044715, %v1344_v31  ;;  %v1346_v24 = vmul.f32 %v1314_v29, %v3476_v19  ;;  %2475 = vtanh.f32 %v3439_v48 }
 0x276   : > { %v1437_v3 = vmul.f32 0.7978846, %v1405_v53  ;;  %2247 = vmatmul.mubr.f32.gmra.mrb[6].mxu1 %v1554_v54  ;;  %v1347_v63 = vmul.f32 %v1315_v62, %v3493_v42  ;;  %2477 = vtanh.f32 %v1433_v7  ;;  %v1439_v45 = vmul.f32 0.7978846, %v1407_v1 }
 0x277   : > { %2249 = vmatprep.mubr.f32.mxu1 %v1555_v5  ;;  %v1348_v14 = vmul.f32 %v1316_v9, %v3482_v0  ;;  %v1557_v26 = vmul.f32 %v1525_v34, %v3374_v61  ;;  %2479 = vtanh.f32 %v3454_v51  ;;  %v1409_v12 = vadd.f32 %v1377_v52, %v3471_v46 }
 0x278   : > { %v1556_v18 = vmul.f32 %v1524_v32, %v3353_v8  ;;  %v1379_v10 = vmul.f32 0.044715, %v1347_v63  ;;  %2481 = vtanh.f32 %v1435_v56  ;;  %v1438_v48 = vmul.f32 0.7978846, %v1406_v39 }
 0x279   : > { %v1408_v6 = vadd.f32 %v1376_v55, %v3460_v58  ;;  %v1378_v13 = vmul.f32 0.044715, %v1346_v24  ;;  %2483 = vtanh.f32 %v1436_v23  ;;  %v1380_v7 = vmul.f32 0.044715, %v1348_v14 }
 0x27a   : > { %2250 = vmatmul.mubr.f32.gmra.mrb[8].mxu1 %v1556_v18  ;;  %2485 = vtanh.f32 %v1437_v3  ;;  %v1441_v33 = vmul.f32 0.7978846, %v1409_v12  ;;  %v1411_v61 = vadd.f32 %v1379_v10, %v3493_v42 }
 0x27b   : > { %2252 = vmatprep.mubr.f32.mxu1 %v1557_v26  ;;  %2487 = vtanh.f32 %v1439_v45  ;;  %v1440_v44 = vmul.f32 0.7978846, %v1408_v6  ;;  %v1410_v25 = vadd.f32 %v1378_v13, %v3476_v19  ;;  %v1412_v53 = vadd.f32 %v1380_v7, %v3482_v0 }
 0x27c   : > { %2489 = vtanh.f32 %v1438_v48  ;;  %v1443_v29 = vmul.f32 0.7978846, %v1411_v61 }
 0x27d   : > { %v2472_v51 = vpop.eup %2471  ;;  %2491 = vtanh.f32 %v1441_v33  ;;  %v1442_v36 = vmul.f32 0.7978846, %v1410_v25  ;;  %v1444_v45 = vmul.f32 0.7978846, %v1412_v53 }
 0x27e   : > { %v2474_v8 = vpop.eup %2473  ;;  %v1494_v56 = vadd.f32 1.0, %v2472_v51  ;;  %2493 = vtanh.f32 %v1440_v44 }
 0x27f   : > { %v2476_v38 = vpop.eup %2475  ;;  %v1495_v31 = vadd.f32 1.0, %v2474_v8  ;;  %2495 = vtanh.f32 %v1443_v29 }
 0x280   : > { %v2478_v23 = vpop.eup %2477  ;;  %v1526_v4 = vmul.f32 0.5, %v1494_v56  ;;  %v1496_v1 = vadd.f32 1.0, %v2476_v38  ;;  %2497 = vtanh.f32 %v1442_v36 }
 0x281   : > { %v2480_v54 = vpop.eup %2479  ;;  %v1527_v52 = vmul.f32 0.5, %v1495_v31  ;;  %v1497_v5 = vadd.f32 1.0, %v2478_v23  ;;  %2499 = vtanh.f32 %v1444_v45 }
 0x282   : > { %v2482_v9 = vpop.eup %2481  ;;  %v1558_v32 = vmul.f32 %v1526_v4, %v3369_v35  ;;  %v1528_v62 = vmul.f32 0.5, %v1496_v1  ;;  %v1498_v34 = vadd.f32 1.0, %v2480_v54 }
 0x283   : > { %v2484_v39 = vpop.eup %2483  ;;  %v1559_v55 = vmul.f32 %v1527_v52, %v3388_v20  ;;  %v1529_v24 = vmul.f32 0.5, %v1497_v5  ;;  %v1499_v3 = vadd.f32 1.0, %v2482_v9 }
 0x284   : > { %v2486_v63 = vpop.eup %2485  ;;  %2253 = vmatmul.mubr.f32.gmra.mrb[10].mxu1 %v1558_v32  ;;  %v1560_v35 = vmul.f32 %v1528_v62, %v3385_v17  ;;  %v1530_v10 = vmul.f32 0.5, %v1498_v34  ;;  %v1500_v48 = vadd.f32 1.0, %v2484_v39 }
 0x285   : > { %2255 = vmatprep.mubr.f32.mxu1 %v1559_v55  ;;  %v1561_v14 = vmul.f32 %v1529_v24, %v3406_v21  ;;  %v1531_v26 = vmul.f32 0.5, %v1499_v3  ;;  %v1501_v12 = vadd.f32 1.0, %v2486_v63  ;;  %v2488_v18 = vpop.eup %2487 }
 0x286   : > { %v2490_v6 = vpop.eup %2489  ;;  %v1503_v7 = vadd.f32 1.0, %v2488_v18  ;;  %v1562_v61 = vmul.f32 %v1530_v10, %v3400_v43  ;;  %v1532_v21 = vmul.f32 0.5, %v1500_v48 }
 0x287   : > { %v1563_v20 = vmul.f32 %v1531_v26, %v3419_v41  ;;  %v1533_v13 = vmul.f32 0.5, %v1501_v12  ;;  %v2492_v33 = vpop.eup %2491  ;;  %v1502_v51 = vadd.f32 1.0, %v2490_v6 }
 0x288   : > { %2256 = vmatmul.mubr.f32.gmra.mrb[12].mxu1 %v1560_v35  ;;  %v2494_v44 = vpop.eup %2493  ;;  %v1535_v25 = vmul.f32 0.5, %v1503_v7  ;;  %v1505_v8 = vadd.f32 1.0, %v2492_v33  ;;  %v1564_v38 = vmul.f32 %v1532_v21, %v3415_v2 }
 0x289   : > { %2258 = vmatprep.mubr.f32.mxu1 %v1561_v14  ;;  %v1565_v17 = vmul.f32 %v1533_v13, %v3432_v59  ;;  %v2496_v56 = vpop.eup %2495  ;;  %v1534_v53 = vmul.f32 0.5, %v1502_v51  ;;  %v1504_v41 = vadd.f32 1.0, %v2494_v44 }
 0x28a   : > { %v2498_v31 = vpop.eup %2497  ;;  %v1567_v23 = vmul.f32 %v1535_v25, %v3450_v28  ;;  %v1537_v43 = vmul.f32 0.5, %v1505_v8  ;;  %v1507_v29 = vadd.f32 1.0, %v2496_v56 }
 0x28b   : > { %v1566_v4 = vmul.f32 %v1534_v53, %v3435_v49  ;;  %v1536_v1 = vmul.f32 0.5, %v1504_v41  ;;  %v1506_v54 = vadd.f32 1.0, %v2498_v31  ;;  %v2500_v36 = vpop.eup %2499 }
 0x28c   : > { %2259 = vmatmul.mubr.f32.gmra.mrb[14].mxu1 %v1562_v61  ;;  %v1569_v59 = vmul.f32 %v1537_v43, %v3471_v46  ;;  %v1539_v2 = vmul.f32 0.5, %v1507_v29  ;;  %v1508_v9 = vadd.f32 1.0, %v2500_v36  ;;  %v3534_v46 = vld [vmem:[%s3727_s7] ss:$0 sm:$0xff] }
 0x28d   : > { %2261 = vmatprep.mubr.f32.mxu1 %v1563_v20  ;;  %v1568_v52 = vmul.f32 %v1536_v1, %v3460_v58  ;;  %v1538_v5 = vmul.f32 0.5, %v1506_v54 }
 0x28e   : > { %v1571_v28 = vmul.f32 %v1539_v2, %v3493_v42  ;;  %v1540_v32 = vmul.f32 0.5, %v1508_v9 }
 0x28f   : > { %v1570_v49 = vmul.f32 %v1538_v5, %v3476_v19  ;;  %v3771_v5 = vld [vmem:[#allocation6_spill] sm:$0xff] }
 0x290   : > { %2262 = vmatmul.mubr.f32.gmra.mrb[16].mxu1 %v1564_v38  ;;  %v1572_v62 = vmul.f32 %v1540_v32, %v3482_v0 }
 0x291   : > { %2264 = vmatprep.mubr.f32.mxu1 %v1565_v17 }
 0x294   : > { %2265 = vmatmul.mubr.f32.gmra.mrb[18].mxu1 %v1566_v4 }
 0x295   : > { %2267 = vmatprep.mubr.f32.mxu1 %v1567_v23 }
 0x298   : > { %2268 = vmatmul.mubr.f32.gmra.mrb[20].mxu1 %v1568_v52 }
 0x299   : > { %2270 = vmatprep.mubr.f32.mxu1 %v1569_v59 }
 0x29c   : > { %2271 = vmatmul.mubr.f32.gmra.mrb[22].mxu1 %v1570_v49  ;;  %v3772_v49 = vld [vmem:[#allocation5_spill] sm:$0xff] }
 0x29d   : > { %2273 = vmatprep.mubr.f32.mxu1 %v1571_v28 }
 0x2a0   : > { %2274 = vmatmul.mubr.f32.gmra.mrb[24].mxu1 %v1572_v62 }
 0x324   : > { %v2230_v58 = vpop.f32.mrb[32].mxu0 }
 0x325   : > { %v1668_v34 = vadd.f32 %v2230_v58, %v3534_v46  ;;  %v1662_v42 = vpop.f32.mrb[33].mxu0 }
 0x326   : > { %v1663_v19 = vadd.f32 %v3534_v46, %v1662_v42 }
 0x327   : > { %v1822_v39 = vmul.f32 0.25, %v1668_v34  ;;  %v3773_v34 = vld [vmem:[#allocation8_spill] sm:$0xff] }
 0x328   : > { %v1821_v55 = vmul.f32 0.25, %v1663_v19  ;;  %v2233_v0 = vpop.f32.mrb[34].mxu0  ;;  %v3774_v19 = vld [vmem:[#allocation7_spill] sm:$0xff] }
 0x329   : > { %v1854_v24 = vadd.f32 %v1822_v39, %v2686_v16  ;;  %v1678_v63 = vadd.f32 %v2233_v0, %v3534_v46  ;;  %v1672_v45 = vpop.f32.mrb[35].mxu0 }
 0x32a   : > { %v1853_v3 = vadd.f32 %v1821_v55, %v2680_v11  ;;  %v1673_v14 = vadd.f32 %v3534_v46, %v1672_v45 }
 0x32b   : > { %1886 = vst.msk [vmem:[%s3543_s23 + $0x8] sm:$0xff] %vm457_vm0, %v1854_v24  ;;  %v1824_v16 = vmul.f32 0.25, %v1678_v63 }
 0x32c   : > { %1885 = vst.msk [vmem:[%s3543_s23] sm:$0xff] %vm457_vm0, %v1853_v3  ;;  %v1823_v26 = vmul.f32 0.25, %v1673_v14 }
 0x32d   : > { %v1856_v11 = vadd.f32 %v1824_v16, %v2692_v22  ;;  %v2236_v18 = vpop.f32.mrb[36].mxu0  ;;  %v3775_v16 = vld [vmem:[#allocation10_spill] sm:$0xff] }
 0x32e   : > { %v1855_v12 = vadd.f32 %v1823_v26, %v2684_v15  ;;  %v1688_v35 = vadd.f32 %v2236_v18, %v3534_v46  ;;  %v1682_v10 = vpop.f32.mrb[37].mxu0  ;;  %v3776_v18 = vld [vmem:[#allocation9_spill] sm:$0xff] }
 0x32f   : > { %1888 = vst.msk [vmem:[%s3543_s23 + $0x18] sm:$0xff] %vm457_vm0, %v1856_v11  ;;  %v1683_v48 = vadd.f32 %v3534_v46, %v1682_v10 }
 0x330   : > { %1887 = vst.msk [vmem:[%s3543_s23 + $0x10] sm:$0xff] %vm457_vm0, %v1855_v12  ;;  %v1826_v6 = vmul.f32 0.25, %v1688_v35 }
 0x331   : > { %v1825_v20 = vmul.f32 0.25, %v1683_v48 }
 0x332   : > { %v1858_v13 = vadd.f32 %v1826_v6, %v2704_v30 }
 0x333   : > { %v1857_v7 = vadd.f32 %v1825_v20, %v2700_v27 }
 0x334   : > { %1890 = vst.msk [vmem:[%s3543_s23 + $0x28] sm:$0xff] %vm457_vm0, %v1858_v13  ;;  %v3777_v13 = vld [vmem:[#allocation12_spill] sm:$0xff] }
 0x335   : > { %1889 = vst.msk [vmem:[%s3543_s23 + $0x20] sm:$0xff] %vm457_vm0, %v1857_v7 }
 0x33d   : > { %v2239_v15 = vpop.f32.mrb[0].mxu1 }
 0x33e   : > { %v1698_v22 = vadd.f32 %v2239_v15, %v3534_v46  ;;  %v1692_v33 = vpop.f32.mrb[1].mxu1 }
 0x33f   : > { %v1693_v61 = vadd.f32 %v3534_v46, %v1692_v33  ;;  %v3778_v33 = vld [vmem:[#allocation11_spill] sm:$0xff] }
 0x340   : > { %v1828_v21 = vmul.f32 0.25, %v1698_v22 }
 0x341   : > { %v1827_v51 = vmul.f32 0.25, %v1693_v61  ;;  %v2242_v44 = vpop.f32.mrb[2].mxu1 }
 0x342   : > { %v1860_v30 = vadd.f32 %v1828_v21, %v2716_v40  ;;  %v1708_v17 = vadd.f32 %v2242_v44, %v3534_v46  ;;  %v1702_v27 = vpop.f32.mrb[3].mxu1 }
 0x343   : > { %v1859_v25 = vadd.f32 %v1827_v51, %v2712_v37  ;;  %v1703_v8 = vadd.f32 %v3534_v46, %v1702_v27 }
 0x344   : > { %1892 = vst.msk [vmem:[%s3543_s23 + $0x38] sm:$0xff] %vm457_vm0, %v1860_v30  ;;  %v1830_v56 = vmul.f32 0.25, %v1708_v17  ;;  %v3779_v17 = vld [vmem:[#allocation14_spill] sm:$0xff] }
 0x345   : > { %1891 = vst.msk [vmem:[%s3543_s23 + $0x30] sm:$0xff] %vm457_vm0, %v1859_v25  ;;  %v1829_v38 = vmul.f32 0.25, %v1703_v8  ;;  %v2245_v53 = vpop.f32.mrb[4].mxu1 }
 0x346   : > { %v1862_v41 = vadd.f32 %v1830_v56, %v2728_v50  ;;  %v1718_v40 = vadd.f32 %v2245_v53, %v3534_v46  ;;  %v1712_v31 = vpop.f32.mrb[5].mxu1  ;;  %v3780_v56 = vld [vmem:[#allocation13_spill] sm:$0xff] }
 0x347   : > { %v1861_v23 = vadd.f32 %v1829_v38, %v2724_v47  ;;  %v1713_v37 = vadd.f32 %v3534_v46, %v1712_v31 }
 0x348   : > { %1894 = vst.msk [vmem:[%s3543_s23 + $0x48] sm:$0xff] %vm457_vm0, %v1862_v41  ;;  %v1832_v43 = vmul.f32 0.25, %v1718_v40 }
 0x349   : > { %1893 = vst.msk [vmem:[%s3543_s23 + $0x40] sm:$0xff] %vm457_vm0, %v1861_v23  ;;  %v1831_v29 = vmul.f32 0.25, %v1713_v37  ;;  %v2248_v4 = vpop.f32.mrb[6].mxu1  ;;  %v3781_v23 = vld [vmem:[#allocation16_spill] sm:$0xff] }
 0x34a   : > { %v1864_v1 = vadd.f32 %v1832_v43, %v2740_v60  ;;  %v1728_v50 = vadd.f32 %v2248_v4, %v3534_v46  ;;  %v1722_v54 = vpop.f32.mrb[7].mxu1  ;;  %v3782_v4 = vld [vmem:[#allocation15_spill] sm:$0xff] }
 0x34b   : > { %v1863_v36 = vadd.f32 %v1831_v29, %v2736_v57  ;;  %v1723_v47 = vadd.f32 %v3534_v46, %v1722_v54 }
 0x34c   : > { %1896 = vst.msk [vmem:[%s3543_s23 + $0x58] sm:$0xff] %vm457_vm0, %v1864_v1  ;;  %v1834_v59 = vmul.f32 0.25, %v1728_v50 }
 0x34d   : > { %1895 = vst.msk [vmem:[%s3543_s23 + $0x50] sm:$0xff] %vm457_vm0, %v1863_v36  ;;  %v1833_v2 = vmul.f32 0.25, %v1723_v47  ;;  %v2251_v52 = vpop.f32.mrb[8].mxu1 }
 0x34e   : > { %v1866_v9 = vadd.f32 %v1834_v59, %v3771_v5  ;;  %v1738_v60 = vadd.f32 %v2251_v52, %v3534_v46  ;;  %v1732_v28 = vpop.f32.mrb[9].mxu1  ;;  %v3783_v59 = vld [vmem:[#allocation18_spill] sm:$0xff] }
 0x34f   : > { %v1865_v32 = vadd.f32 %v1833_v2, %v3772_v49  ;;  %v1733_v57 = vadd.f32 %v3534_v46, %v1732_v28 }
 0x350   : > { %1898 = vst.msk [vmem:[%s3543_s23 + $0x68] sm:$0xff] %vm457_vm0, %v1866_v9  ;;  %v1836_v62 = vmul.f32 0.25, %v1738_v60  ;;  %v3784_v9 = vld [vmem:[#allocation17_spill] sm:$0xff] }
 0x351   : > { %1897 = vst.msk [vmem:[%s3543_s23 + $0x60] sm:$0xff] %vm457_vm0, %v1865_v32  ;;  %v1835_v58 = vmul.f32 0.25, %v1733_v57 }
 0x352   : > { %v1868_v42 = vadd.f32 %v1836_v62, %v3773_v34  ;;  %v3785_v62 = vld [vmem:[#allocation20_spill] sm:$0xff] }
 0x353   : > { %v1867_v39 = vadd.f32 %v1835_v58, %v3774_v19  ;;  %v3786_v19 = vld [vmem:[#allocation19_spill] sm:$0xff] }
 0x354   : > { %1900 = vst.msk [vmem:[%s3543_s23 + $0x78] sm:$0xff] %vm457_vm0, %v1868_v42 }
 0x355   : > { %1899 = vst.msk [vmem:[%s3543_s23 + $0x70] sm:$0xff] %vm457_vm0, %v1867_v39 }
 0x357   : > { %v2254_v55 = vpop.f32.mrb[10].mxu1 }
 0x358   : > { %v1748_v24 = vadd.f32 %v2254_v55, %v3534_v46  ;;  %v1742_v0 = vpop.f32.mrb[11].mxu1 }
 0x359   : > { %v1743_v3 = vadd.f32 %v3534_v46, %v1742_v0 }
 0x35a   : > { %v1838_v63 = vmul.f32 0.25, %v1748_v24 }
 0x35b   : > { %v1837_v45 = vmul.f32 0.25, %v1743_v3  ;;  %v2257_v14 = vpop.f32.mrb[12].mxu1 }
 0x35c   : > { %v1870_v26 = vadd.f32 %v1838_v63, %v3775_v16  ;;  %v1758_v11 = vadd.f32 %v2257_v14, %v3534_v46  ;;  %v1752_v12 = vpop.f32.mrb[13].mxu1  ;;  %v3787_v63 = vld [vmem:[#allocation22_spill] sm:$0xff] }
 0x35d   : > { %v1869_v35 = vadd.f32 %v1837_v45, %v3776_v18  ;;  %v1753_v10 = vadd.f32 %v3534_v46, %v1752_v12 }
 0x35e   : > { %1902 = vst.msk [vmem:[%s3543_s23 + $0x88] sm:$0xff] %vm457_vm0, %v1870_v26  ;;  %v1840_v48 = vmul.f32 0.25, %v1758_v11  ;;  %v3788_v26 = vld [vmem:[#allocation21_spill] sm:$0xff] }
 0x35f   : > { %1901 = vst.msk [vmem:[%s3543_s23 + $0x80] sm:$0xff] %vm457_vm0, %v1869_v35  ;;  %v1839_v6 = vmul.f32 0.25, %v1753_v10  ;;  %v2260_v20 = vpop.f32.mrb[14].mxu1  ;;  %v3789_v10 = vld [vmem:[#allocation24_spill] sm:$0xff] }
 0x360   : > { %v1872_v7 = vadd.f32 %v1840_v48, %v3777_v13  ;;  %v1768_v15 = vadd.f32 %v2260_v20, %v3534_v46  ;;  %v1762_v22 = vpop.f32.mrb[15].mxu1 }
 0x361   : > { %v1871_v61 = vadd.f32 %v1839_v6, %v3778_v33  ;;  %v1763_v21 = vadd.f32 %v3534_v46, %v1762_v22  ;;  %v3790_v6 = vld [vmem:[#allocation23_spill] sm:$0xff] }
 0x362   : > { %1904 = vst.msk [vmem:[%s3543_s23 + $0x98] sm:$0xff] %vm457_vm0, %v1872_v7  ;;  %v1842_v51 = vmul.f32 0.25, %v1768_v15 }
 0x363   : > { %1903 = vst.msk [vmem:[%s3543_s23 + $0x90] sm:$0xff] %vm457_vm0, %v1871_v61  ;;  %v1841_v44 = vmul.f32 0.25, %v1763_v21  ;;  %v2263_v30 = vpop.f32.mrb[16].mxu1 }
 0x364   : > { %v1874_v27 = vadd.f32 %v1842_v51, %v3779_v17  ;;  %v1778_v25 = vadd.f32 %v2263_v30, %v3534_v46  ;;  %v1772_v8 = vpop.f32.mrb[17].mxu1 }
 0x365   : > { %v1873_v38 = vadd.f32 %v1841_v44, %v3780_v56  ;;  %v1773_v53 = vadd.f32 %v3534_v46, %v1772_v8 }
 0x366   : > { %1906 = vst.msk [vmem:[%s3543_s23 + $0xa8] sm:$0xff] %vm457_vm0, %v1874_v27  ;;  %v1844_v41 = vmul.f32 0.25, %v1778_v25 }
 0x367   : > { %1905 = vst.msk [vmem:[%s3543_s23 + $0xa0] sm:$0xff] %vm457_vm0, %v1873_v38  ;;  %v1843_v40 = vmul.f32 0.25, %v1773_v53  ;;  %v2266_v31 = vpop.f32.mrb[18].mxu1 }
 0x368   : > { %v1876_v37 = vadd.f32 %v1844_v41, %v3781_v23  ;;  %v1788_v43 = vadd.f32 %v2266_v31, %v3534_v46  ;;  %v1782_v29 = vpop.f32.mrb[19].mxu1 }
 0x369   : > { %v1875_v1 = vadd.f32 %v1843_v40, %v3782_v4  ;;  %v1783_v50 = vadd.f32 %v3534_v46, %v1782_v29 }
 0x36a   : > { %1908 = vst.msk [vmem:[%s3543_s23 + $0xb8] sm:$0xff] %vm457_vm0, %v1876_v37  ;;  %v1846_v54 = vmul.f32 0.25, %v1788_v43 }
 0x36b   : > { %1907 = vst.msk [vmem:[%s3543_s23 + $0xb0] sm:$0xff] %vm457_vm0, %v1875_v1  ;;  %v1845_v36 = vmul.f32 0.25, %v1783_v50  ;;  %v2269_v47 = vpop.f32.mrb[20].mxu1 }
 0x36c   : > { %v1878_v2 = vadd.f32 %v1846_v54, %v3783_v59  ;;  %v1798_v52 = vadd.f32 %v2269_v47, %v3534_v46  ;;  %v1792_v5 = vpop.f32.mrb[21].mxu1 }
 0x36d   : > { %v1877_v60 = vadd.f32 %v1845_v36, %v3784_v9  ;;  %v1793_v28 = vadd.f32 %v3534_v46, %v1792_v5 }
 0x36e   : > { %1910 = vst.msk [vmem:[%s3543_s23 + $0xc8] sm:$0xff] %vm457_vm0, %v1878_v2  ;;  %v1848_v49 = vmul.f32 0.25, %v1798_v52 }
 0x36f   : > { %1909 = vst.msk [vmem:[%s3543_s23 + $0xc0] sm:$0xff] %vm457_vm0, %v1877_v60  ;;  %v1847_v32 = vmul.f32 0.25, %v1793_v28  ;;  %v2272_v57 = vpop.f32.mrb[22].mxu1 }
 0x370   : > { %v1880_v58 = vadd.f32 %v1848_v49, %v3785_v62  ;;  %v1808_v34 = vadd.f32 %v2272_v57, %v3534_v46  ;;  %v1802_v42 = vpop.f32.mrb[23].mxu1 }
 0x371   : > { %v1879_v39 = vadd.f32 %v1847_v32, %v3786_v19  ;;  %v1803_v55 = vadd.f32 %v3534_v46, %v1802_v42 }
 0x372   : > { %1912 = vst.msk [vmem:[%s3543_s23 + $0xd8] sm:$0xff] %vm457_vm0, %v1880_v58  ;;  %v1850_v24 = vmul.f32 0.25, %v1808_v34 }
 0x373   : > { %1911 = vst.msk [vmem:[%s3543_s23 + $0xd0] sm:$0xff] %vm457_vm0, %v1879_v39  ;;  %v1849_v0 = vmul.f32 0.25, %v1803_v55  ;;  %v2275_v3 = vpop.f32.mrb[24].mxu1 }
 0x374   : > { %v1882_v45 = vadd.f32 %v1850_v24, %v3787_v63  ;;  %v1818_v14 = vadd.f32 %v2275_v3, %v3534_v46  ;;  %v1812_v16 = vpop.f32.mrb[25].mxu1 }
 0x375   : > { %v1881_v11 = vadd.f32 %v1849_v0, %v3788_v26  ;;  %v1813_v12 = vadd.f32 %v3534_v46, %v1812_v16 }
 0x376   : > { %1914 = vst.msk [vmem:[%s3543_s23 + $0xe8] sm:$0xff] %vm457_vm0, %v1882_v45  ;;  %v1852_v18 = vmul.f32 0.25, %v1818_v14 }
 0x377   : > { %1913 = vst.msk [vmem:[%s3543_s23 + $0xe0] sm:$0xff] %vm457_vm0, %v1881_v11  ;;  %v1851_v35 = vmul.f32 0.25, %v1813_v12 }
 0x378   : > { %v1884_v48 = vadd.f32 %v1852_v18, %v3789_v10 }
 0x379   : > { %v1883_v46 = vadd.f32 %v1851_v35, %v3790_v6 }
 0x37a   : > { %1916 = vst.msk [vmem:[%s3543_s23 + $0xf8] sm:$0xff] %vm457_vm0, %v1884_v48 }
 0x37b   : > { %1915 = vst.msk [vmem:[%s3543_s23 + $0xf0] sm:$0xff] %vm457_vm0, %v1883_v46 }
 0x37c   : > { %2514 = shalt.err (!%p2511_p3)
}
 0x37d   : > { %s2515_s19 = scalar_lea.hbm %s3668_s12, 4096  ;;  %s2519_s23 = scalar_lea.hbm %s3728_s8, 8192 }
 0x37e   : > { %p2516_p4 = scmp.ne.s32.totalorder %s3668_s12, %s2515_s19  ;;  %p2520_p9 = scmp.lt.u32.totalorder %s3668_s12, %s3728_s8 }
 0x37f   : > { %p2521_p10 = scmp.lt.u32.totalorder %s2519_s23, %s2515_s19  ;;  %p2523_p12 = scmp.lt.u32.totalorder %s2515_s19, %s3668_s12 }
 0x380   : > { %p2517_p7 = pnand %p2516_p4, %p2651_p5 }
 0x381   : > { %p2522_p11 = por %p2521_p10, %p2520_p9 }
 0x382   : > { %p2518_p8 = pneg %p2517_p7 }
 0x383   : > { %p2524_p13 = por %p2523_p12, %p2522_p11 }
 0x385   : > { %p2525_p0 = pnand %p2524_p13, %p2518_p8 }
 0x387   : > { %2528 = shalt.err (!%p2525_p0)
}
 0x388   : > { %s2566_s10 = smov 128   ;;  %s2567_s13 = smov 8  }
 0x389   : > { %2332 = dma.vmem_to_hbm [thread:$0]  (%p2651_p5), %s3670_s25, 4096, %s3668_s12, %s3679_s9, %s2566_s10, %s2566_s10, %s2567_s13  }
 0x38a PF: > { %p2338_p1 = scmp.ge.s32.totalorder %s2563_s30, 2  ;;  %s1946_s17 = sand.u32 1, %s2551_s27  }
 0x38b   : > { %s1947_s18 = scalar_lea.sflag [#allocation3], %s1946_s17 }
 0x38c   : > { %p2335_p2 = pnand %p2338_p1, %p2655_p6 }
 0x38e   : > { %2546 = dma.done.wait (!%p2335_p2), %s1947_s18, 4096  }
 0x38f   : > { %2548 = vsyncadd (!%p2335_p2), %s1947_s18, 4294963200  ;;  %p18_p3 = scmp.ge.s32.totalorder %s2638_s11, 4   ;;  %s3791_s27 = smov %s2555_s28 }
 0x390   : > { %s3792_s28 = smov %s2559_s29  ;;  %s3793_s29 = smov %s2649_s14 }
 0x391   : > { %s3794_s30 = smov %s2638_s11  ;;  %20 = sbr.rel (!%p18_p3) target bundleno = 3 (0x3), region = 90 }
 0x398   :  { %1952 = vsyncpa [#allocation3], 1 }
 0x399   :  { %1954 = vsyncpa [#allocation3 + $0x1], 1 }

</bundles_post_ra>
